<compile_context>
chip_gen: v6e
topology: v6e:2x2x1
jax: 0.10.0
libtpu: 0.0.40
codegen_flags: <defaults>
</compile_context>

<pallas_src>
import jax
import jax.numpy as jnp
from jax.experimental import pallas as pl
from jax.experimental.pallas import tpu as pltpu

_BN_EPS = 1e-5
_VMEM_LIMIT = 32 * 1024 * 1024   # safe on v5e/v6e (128 MiB) and v7x (64 MiB/TC)


def _cdiv(a, b):
    return -(-a // b)


# ---------------------------------------------------------------------------
# Conv kernel builder: in-kernel patch assembly (tap accumulation) + fused
# BN affine / ReLU / residual add / 1x1 downsample.
# ---------------------------------------------------------------------------
def _make_conv_kernel(*, kh, kw, stride, ho, wo, has_identity, has_down):
    """Builds a per-image conv kernel.

    Ref blocks (one batch element per grid step, everything resident in VMEM):
      x_ref      : (1, S*S, Hh, Wh, Cin)  bf16  zero-padded, stride-phase-split input
      w_ref      : (kh*kw, Cin, Cout)     bf16  tap-major weights
      sc_ref/b_ref : (1, Cout) f32              folded BatchNorm affine
      [wd_ref    : (1, Cin, Cout) bf16, sd_ref/bd_ref]  fused 1x1/s2 downsample
      [id_ref    : (1, Ho, Wo, Cout) bf16]              residual identity input
      o_ref      : (1, Ho, Wo, Cout) bf16
      [id_out_ref: (1, Ho, Wo, Cout) bf16]              downsample (identity) output
    """

    def kernel(*refs):
        if has_down:
            (x_ref, w_ref, wd_ref, sc_ref, b_ref, sd_ref, bd_ref,
             o_ref, id_out_ref) = refs
        elif has_identity:
            x_ref, w_ref, sc_ref, b_ref, id_ref, o_ref = refs
        else:
            x_ref, w_ref, sc_ref, b_ref, o_ref = refs
        cout = o_ref.shape[-1]

        @pl.loop(0, ho)
        def _(r):
            acc = jnp.zeros((wo, cout), jnp.float32)
            acc_dn = None
            for i in range(kh):
                for j in range(kw):
                    ph = (i % stride) * stride + (j % stride)   # phase plane
                    di, dj = i // stride, j // stride
                    # (Wo, Cin) window of output row r for tap (i, j): a
                    # unit-stride slice of the phase-split input in VMEM.
                    win = x_ref[0, ph, di + r, pl.ds(dj, wo), :]
                    acc = acc + jnp.dot(win, w_ref[i * kw + j],
                                        preferred_element_type=jnp.float32)
                    if has_down and i == kh // 2 and j == kw // 2:
                        # 1x1 stride-2 downsample == centre tap of the 3x3/s2
                        # conv1 window; reuse the already-loaded window.
                        acc_dn = jnp.dot(win, wd_ref[0],
                                         preferred_element_type=jnp.float32)
            y = jnp.maximum(acc * sc_ref[...] + b_ref[...], 0.0)       # BN + ReLU
            if has_identity:
                y = y + id_ref[0, r].astype(jnp.float32)               # residual add
            o_ref[0, r] = y.astype(o_ref.dtype)
            if has_down:
                yd = acc_dn * sd_ref[...] + bd_ref[...]                # BN, no ReLU
                id_out_ref[0, r] = yd.astype(id_out_ref.dtype)

    return kernel


# ---------------------------------------------------------------------------
# Wrapper-side layout prep (cheap: ~1x activation bytes) + pallas_call launch
# ---------------------------------------------------------------------------
def _pad_phase_split(x, pad, stride):
    """(N,H,W,C) -> (N, S*S, Hh, Wh, C): zero-pad spatially, split H/W into the
    `stride` phases so every conv tap becomes a unit-stride in-kernel slice."""
    n, h, w, c = x.shape
    s = stride
    xp = jnp.pad(x, ((0, 0), (pad, pad), (pad, pad), (0, 0)))
    hp, wp = h + 2 * pad, w + 2 * pad
    hh, wh = _cdiv(hp, s), _cdiv(wp, s)
    xp = jnp.pad(xp, ((0, 0), (0, hh * s - hp), (0, wh * s - wp), (0, 0)))
    xp = xp.reshape(n, hh, s, wh, s, c)
    xp = jnp.transpose(xp, (0, 2, 4, 1, 3, 5))          # (N, S, S, Hh, Wh, C)
    return xp.reshape(n, s * s, hh, wh, c)


def _conv_layer(x, p, *, kh, stride, pad, identity=None, down=None):
    """One conv + folded-BN (+ReLU) layer, NHWC bf16 in/out.

    identity : fuse `+ identity` into the epilogue (conv2 of a residual block).
    down     : also emit the 1x1/stride-2 downsample branch as a second output.
    """
    n, h, w, c = x.shape
    cout = p["w"].shape[-1]
    ho = (h + 2 * pad - kh) // stride + 1
    wo = (w + 2 * pad - kh) // stride + 1
    xph = _pad_phase_split(x, pad, stride)
    _, ss, hh, wh, _ = xph.shape

    kernel = _make_conv_kernel(kh=kh, kw=kh, stride=stride, ho=ho, wo=wo,
                               has_identity=identity is not None,
                               has_down=down is not None)

    x_spec = pl.BlockSpec((1, ss, hh, wh, c), lambda i: (i, 0, 0, 0, 0))
    row_spec = pl.BlockSpec((1, ho, wo, cout), lambda i: (i, 0, 0, 0))

    def rep(shape):
        return pl.BlockSpec(shape, lambda i: (0,) * len(shape))

    out_bytes = n * ho * wo * cout * 2
    flops = 2 * n * ho * wo * kh * kh * c * cout
    bytes_accessed = xph.size * xph.dtype.itemsize + p["w"].size * 2 + out_bytes

    cparams = pltpu.CompilerParams(
        dimension_semantics=("parallel",),          # batch grid; megacore-splittable
        vmem_limit_bytes=_VMEM_LIMIT,
    )
    out_sds = jax.ShapeDtypeStruct((n, ho, wo, cout), jnp.bfloat16)

    if down is not None:
        flops += 2 * n * ho * wo * c * cout
        bytes_accessed += down["w"].size * 2 + out_bytes
        return pl.pallas_call(
            kernel,
            out_shape=(out_sds, out_sds),
            grid=(n,),
            in_specs=[x_spec, rep(p["w"].shape), rep(down["w"].shape),
                      rep((1, cout)), rep((1, cout)),
                      rep((1, cout)), rep((1, cout))],
            out_specs=(row_spec, row_spec),
            compiler_params=cparams,
            cost_estimate=pl.CostEstimate(flops=int(flops), transcendentals=0,
                                          bytes_accessed=int(bytes_accessed)),
        )(xph, p["w"], down["w"], p["scale"], p["bias"],
          down["scale"], down["bias"])

    if identity is not None:
        bytes_accessed += identity.size * identity.dtype.itemsize
        return pl.pallas_call(
            kernel,
            out_shape=out_sds,
            grid=(n,),
            in_specs=[x_spec, rep(p["w"].shape), rep((1, cout)), rep((1, cout)),
                      row_spec],
            out_specs=row_spec,
            compiler_params=cparams,
            cost_estimate=pl.CostEstimate(flops=int(flops), transcendentals=0,
                                          bytes_accessed=int(bytes_accessed)),
        )(xph, p["w"], p["scale"], p["bias"], identity)

    return pl.pallas_call(
        kernel,
        out_shape=out_sds,
        grid=(n,),
        in_specs=[x_spec, rep(p["w"].shape), rep((1, cout)), rep((1, cout))],
        out_specs=row_spec,
        compiler_params=cparams,
        cost_estimate=pl.CostEstimate(flops=int(flops), transcendentals=0,
                                      bytes_accessed=int(bytes_accessed)),
    )(xph, p["w"], p["scale"], p["bias"])


# ---------------------------------------------------------------------------
# Head: global average pool + Linear(c, 6), batch-tiled, bf16 input
# ---------------------------------------------------------------------------
def _head_kernel(z_ref, w_ref, b_ref, o_ref):
    zm = jnp.mean(z_ref[...].astype(jnp.float32), axis=1)          # (TB, C)
    o_ref[...] = (jnp.dot(zm, w_ref[...], preferred_element_type=jnp.float32)
                  + b_ref[...])


def _head(x, cls_w, cls_b, *, tb=8):
    n, ho, wo, c = x.shape
    nc = cls_w.shape[1]
    z = x.reshape(n, ho * wo, c)                                    # bf16
    tb = min(tb, n)
    n_pad = _cdiv(n, tb) * tb
    if n_pad != n:
        z = jnp.pad(z, ((0, n_pad - n), (0, 0), (0, 0)))
    out = pl.pallas_call(
        _head_kernel,
        out_shape=jax.ShapeDtypeStruct((n_pad, nc), jnp.float32),
        grid=(n_pad // tb,),
        in_specs=[pl.BlockSpec((tb, ho * wo, c), lambda i: (i, 0, 0)),
                  pl.BlockSpec((c, nc), lambda i: (0, 0)),
                  pl.BlockSpec((1, nc), lambda i: (0, 0))],
        out_specs=pl.BlockSpec((tb, nc), lambda i: (i, 0)),
        compiler_params=pltpu.CompilerParams(
            dimension_semantics=("parallel",), vmem_limit_bytes=_VMEM_LIMIT),
    )(z, cls_w, cls_b)
    return out[:n]


# ---------------------------------------------------------------------------
# Parameter preparation (BN / normalization folding, tap-major bf16 weights)
# ---------------------------------------------------------------------------
def _fold_bn(conv_bias, gamma, beta, rmean, rvar):
    scale = gamma / jnp.sqrt(rvar + _BN_EPS)
    bias = beta + (conv_bias - rmean) * scale
    return (scale.reshape(1, -1).astype(jnp.float32),
            bias.reshape(1, -1).astype(jnp.float32))


def _prep_conv(raw, w_override=None):
    w = raw["w"] if w_override is None else w_override
    cout, cin, kh, kw = w.shape
    scale, bias = _fold_bn(raw["b"], raw["gamma"], raw["beta"],
                           raw["rmean"], raw["rvar"])
    w_taps = jnp.transpose(w, (2, 3, 1, 0)).reshape(kh * kw, cin, cout)
    return {"w": w_taps.astype(jnp.bfloat16), "scale": scale, "bias": bias}


def prepare_params(raw):
    prep = {"norm_mean": raw["norm_mean"].reshape(1, 1, 1, -1)}
    # Stem: fold 1/std into the weights (exact even with zero padding, since the
    # mean-subtract stays on the input and the reference pads in normalized
    # space where padded pixels are also zero).
    stem_w = raw["stem"]["w"] / raw["norm_std"][None, :, None, None]
    prep["stem"] = _prep_conv(raw["stem"], stem_w)
    prep["blocks"] = [{
        "conv1": _prep_conv(blk["conv1"]),
        "conv2": _prep_conv(blk["conv2"]),
        "down": _prep_conv(blk["down"]),
    } for blk in raw["blocks"]]
    prep["cls_w"] = raw["cls_w"].astype(jnp.float32)
    prep["cls_b"] = raw["cls_b"].astype(jnp.float32)
    return prep


# ---------------------------------------------------------------------------
# Parameter init (mimics the PyTorch module's structure, inference-mode BN)
# ---------------------------------------------------------------------------
def _init_conv_bn_raw(key, cin, cout, k):
    k1, k2, k3, k4, k5, k6 = jax.random.split(key, 6)
    return {
        "w": 0.05 * jax.random.normal(k1, (cout, cin, k, k), jnp.float32),
        "b": 0.05 * jax.random.normal(k2, (cout,), jnp.float32),
        "gamma": 1.0 + 0.1 * jax.random.normal(k3, (cout,), jnp.float32),
        "beta": 0.1 * jax.random.normal(k4, (cout,), jnp.float32),
        "rmean": 0.1 * jax.random.normal(k5, (cout,), jnp.float32),
        "rvar": jnp.abs(1.0 + 0.1 * jax.random.normal(k6, (cout,), jnp.float32)),
    }


def init_params(key, layers=(32, 64, 128), n_input_channels=3, n_classes=6):
    keys = jax.random.split(key, 2 + 3 * len(layers))
    params = {
        "norm_mean": jnp.array([0.3234, 0.331, 0.3444], jnp.float32),
        "norm_std": jnp.array([0.2524, 0.2219, 0.247], jnp.float32),
        "stem": _init_conv_bn_raw(keys[0], n_input_channels, 32, 7),
        "blocks": [],
    }
    c, ki = 32, 1
    for l in layers:
        params["blocks"].append({
            # stride=2 always != 1 => the downsample branch is always present
            "conv1": _init_conv_bn_raw(keys[ki], c, l, 3),
            "conv2": _init_conv_bn_raw(keys[ki + 1], l, l, 3),
            "down": _init_conv_bn_raw(keys[ki + 2], c, l, 1),
        })
        c, ki = l, ki + 3
    kw_, kb_ = jax.random.split(keys[-1])
    params["cls_w"] = 0.05 * jax.random.normal(kw_, (c, n_classes), jnp.float32)
    params["cls_b"] = 0.05 * jax.random.normal(kb_, (1, n_classes), jnp.float32)
    return params


# ---------------------------------------------------------------------------
# Forward pass
# ---------------------------------------------------------------------------
def cnn_classifier_forward(params, x_nchw):
    # NCHW (PyTorch convention) -> NHWC (channels on lanes).
    x = jnp.transpose(x_nchw.astype(jnp.float32), (0, 2, 3, 1))
    # Normalization: mean-subtract here (fuses into the pad/phase-split XLA ops);
    # 1/std is folded into the stem weights in prepare_params.
    x = (x - params["norm_mean"]).astype(jnp.bfloat16)

    # Stem: Conv2d(3, 32, k=7, pad=3, stride=2) + BN + ReLU.
    x = _conv_layer(x, params["stem"], kh=7, stride=2, pad=3)

    # Residual blocks: conv1 (3x3, s=2) and the 1x1/s=2 downsample run in ONE
    # kernel with two outputs (h1 and identity); conv2 fuses the residual add.
    for blk in params["blocks"]:
        h1, idn = _conv_layer(x, blk["conv1"], kh=3, stride=2, pad=1,
                              down=blk["down"])
        x = _conv_layer(h1, blk["conv2"], kh=3, stride=1, pad=1, identity=idn)

    # Head: global average pool over H,W then Linear(c, 6).
    return _head(x, params["cls_w"], params["cls_b"])


if __name__ == "__main__":
    key = jax.random.PRNGKey(0)
    kparam, kx = jax.random.split(key)
    raw_params = init_params(kparam)
    params = prepare_params(raw_params)
    # small NCHW input consistent with the module (3 input channels)
    x = jax.random.uniform(kx, (2, 3, 16, 16), jnp.float32)
    fwd = jax.jit(cnn_classifier_forward)
    out = jax.block_until_ready(fwd(params, x))
    assert out.shape == (2, 6)
    assert bool(jnp.all(jnp.isfinite(out)))
    print("KERNEL_OK")
</pallas_src>

<mosaic_0001>
module attributes {stable_mosaic.version = 11 : i64} {
  func.func @kernel(%arg0: i32, %arg1: memref<1x4x11x11x3xbf16, #tpu.memory_space<vmem>>, %arg2: memref<49x3x32xbf16, #tpu.memory_space<vmem>>, %arg3: memref<1x32xf32, #tpu.memory_space<vmem>>, %arg4: memref<1x32xf32, #tpu.memory_space<vmem>>, %arg5: memref<1x8x8x32xbf16, #tpu.memory_space<vmem>>) attributes {dimension_semantics = [#tpu.dimension_semantics<parallel>], iteration_bounds = array<i64: 2>, scalar_prefetch = 0 : i64, scratch_operands = 0 : i64, tpu.core_type = #tpu.core_type<tc>, window_params = [{transform_indices = @transform_0, window_bounds = array<i64: 1, 4, 11, 11, 3>}, {pipeline_mode = #tpu.pipeline_mode<synchronous>, transform_indices = @transform_1, window_bounds = array<i64: 49, 3, 32>}, {pipeline_mode = #tpu.pipeline_mode<synchronous>, transform_indices = @transform_2, window_bounds = array<i64: 1, 32>}, {pipeline_mode = #tpu.pipeline_mode<synchronous>, transform_indices = @transform_3, window_bounds = array<i64: 1, 32>}, {transform_indices = @transform_4, window_bounds = array<i64: 1, 8, 8, 32>}]} {
    %c0_i32 = arith.constant 0 : i32
    %c8_i32 = arith.constant 8 : i32
    %0 = arith.addi %c0_i32, %c8_i32 : i32
    %c1_i32 = arith.constant 1 : i32
    scf.for %arg6 = %c0_i32 to %0 step %c1_i32  : i32 {
      %c1_i32_1 = arith.constant 1 : i32
      %1 = arith.muli %arg6, %c1_i32_1 : i32
      %c0_i32_2 = arith.constant 0 : i32
      %2 = arith.addi %c0_i32_2, %1 : i32
      %cst = arith.constant 0.000000e+00 : f32
      %3 = vector.broadcast %cst : f32 to vector<8x32xf32>
      %c0_i32_3 = arith.constant 0 : i32
      %4 = arith.addi %c0_i32_3, %2 : i32
      %c0 = arith.constant 0 : index
      %c0_4 = arith.constant 0 : index
      %5 = arith.index_cast %4 : i32 to index
      %c0_5 = arith.constant 0 : index
      %c0_6 = arith.constant 0 : index
      %6 = vector.load %arg1[%c0, %c0_4, %5, %c0_5, %c0_6] : memref<1x4x11x11x3xbf16, #tpu.memory_space<vmem>>, vector<1x1x1x8x3xbf16>
      %7 = vector.shape_cast %6 : vector<1x1x1x8x3xbf16> to vector<8x3xbf16>
      %c0_7 = arith.constant 0 : index
      %c0_8 = arith.constant 0 : index
      %c0_9 = arith.constant 0 : index
      %8 = vector.load %arg2[%c0_7, %c0_8, %c0_9] : memref<49x3x32xbf16, #tpu.memory_space<vmem>>, vector<1x3x32xbf16>
      %9 = vector.shape_cast %8 : vector<1x3x32xbf16> to vector<3x32xbf16>
      %cst_10 = arith.constant dense<0.000000e+00> : vector<8x32xf32>
      %10 = tpu.matmul %7, %9, %cst_10 {dimension_numbers = #tpu.dot_dimension_numbers<[1], [0], [0], [1], [0, 0, 1, 1], [], []>} : vector<8x3xbf16>, vector<3x32xbf16>, vector<8x32xf32> -> vector<8x32xf32>
      %11 = arith.addf %3, %10 : vector<8x32xf32>
      %c0_i32_11 = arith.constant 0 : i32
      %12 = arith.addi %c0_i32_11, %2 : i32
      %c0_12 = arith.constant 0 : index
      %c1 = arith.constant 1 : index
      %13 = arith.index_cast %12 : i32 to index
      %c0_13 = arith.constant 0 : index
      %c0_14 = arith.constant 0 : index
      %14 = vector.load %arg1[%c0_12, %c1, %13, %c0_13, %c0_14] : memref<1x4x11x11x3xbf16, #tpu.memory_space<vmem>>, vector<1x1x1x8x3xbf16>
      %15 = vector.shape_cast %14 : vector<1x1x1x8x3xbf16> to vector<8x3xbf16>
      %c1_15 = arith.constant 1 : index
      %c0_16 = arith.constant 0 : index
      %c0_17 = arith.constant 0 : index
      %16 = vector.load %arg2[%c1_15, %c0_16, %c0_17] : memref<49x3x32xbf16, #tpu.memory_space<vmem>>, vector<1x3x32xbf16>
      %17 = vector.shape_cast %16 : vector<1x3x32xbf16> to vector<3x32xbf16>
      %cst_18 = arith.constant dense<0.000000e+00> : vector<8x32xf32>
      %18 = tpu.matmul %15, %17, %cst_18 {dimension_numbers = #tpu.dot_dimension_numbers<[1], [0], [0], [1], [0, 0, 1, 1], [], []>} : vector<8x3xbf16>, vector<3x32xbf16>, vector<8x32xf32> -> vector<8x32xf32>
      %19 = arith.addf %11, %18 : vector<8x32xf32>
      %c0_i32_19 = arith.constant 0 : i32
      %20 = arith.addi %c0_i32_19, %2 : i32
      %c0_20 = arith.constant 0 : index
      %c0_21 = arith.constant 0 : index
      %21 = arith.index_cast %20 : i32 to index
      %c1_22 = arith.constant 1 : index
      %c0_23 = arith.constant 0 : index
      %22 = vector.load %arg1[%c0_20, %c0_21, %21, %c1_22, %c0_23] : memref<1x4x11x11x3xbf16, #tpu.memory_space<vmem>>, vector<1x1x1x8x3xbf16>
      %23 = vector.shape_cast %22 : vector<1x1x1x8x3xbf16> to vector<8x3xbf16>
      %c2 = arith.constant 2 : index
      %c0_24 = arith.constant 0 : index
      %c0_25 = arith.constant 0 : index
      %24 = vector.load %arg2[%c2, %c0_24, %c0_25] : memref<49x3x32xbf16, #tpu.memory_space<vmem>>, vector<1x3x32xbf16>
      %25 = vector.shape_cast %24 : vector<1x3x32xbf16> to vector<3x32xbf16>
      %cst_26 = arith.constant dense<0.000000e+00> : vector<8x32xf32>
      %26 = tpu.matmul %23, %25, %cst_26 {dimension_numbers = #tpu.dot_dimension_numbers<[1], [0], [0], [1], [0, 0, 1, 1], [], []>} : vector<8x3xbf16>, vector<3x32xbf16>, vector<8x32xf32> -> vector<8x32xf32>
      %27 = arith.addf %19, %26 : vector<8x32xf32>
      %c0_i32_27 = arith.constant 0 : i32
      %28 = arith.addi %c0_i32_27, %2 : i32
      %c0_28 = arith.constant 0 : index
      %c1_29 = arith.constant 1 : index
      %29 = arith.index_cast %28 : i32 to index
      %c1_30 = arith.constant 1 : index
      %c0_31 = arith.constant 0 : index
      %30 = vector.load %arg1[%c0_28, %c1_29, %29, %c1_30, %c0_31] : memref<1x4x11x11x3xbf16, #tpu.memory_space<vmem>>, vector<1x1x1x8x3xbf16>
      %31 = vector.shape_cast %30 : vector<1x1x1x8x3xbf16> to vector<8x3xbf16>
      %c3 = arith.constant 3 : index
      %c0_32 = arith.constant 0 : index
      %c0_33 = arith.constant 0 : index
      %32 = vector.load %arg2[%c3, %c0_32, %c0_33] : memref<49x3x32xbf16, #tpu.memory_space<vmem>>, vector<1x3x32xbf16>
      %33 = vector.shape_cast %32 : vector<1x3x32xbf16> to vector<3x32xbf16>
      %cst_34 = arith.constant dense<0.000000e+00> : vector<8x32xf32>
      %34 = tpu.matmul %31, %33, %cst_34 {dimension_numbers = #tpu.dot_dimension_numbers<[1], [0], [0], [1], [0, 0, 1, 1], [], []>} : vector<8x3xbf16>, vector<3x32xbf16>, vector<8x32xf32> -> vector<8x32xf32>
      %35 = arith.addf %27, %34 : vector<8x32xf32>
      %c0_i32_35 = arith.constant 0 : i32
      %36 = arith.addi %c0_i32_35, %2 : i32
      %c0_36 = arith.constant 0 : index
      %c0_37 = arith.constant 0 : index
      %37 = arith.index_cast %36 : i32 to index
      %c2_38 = arith.constant 2 : index
      %c0_39 = arith.constant 0 : index
      %38 = vector.load %arg1[%c0_36, %c0_37, %37, %c2_38, %c0_39] : memref<1x4x11x11x3xbf16, #tpu.memory_space<vmem>>, vector<1x1x1x8x3xbf16>
      %39 = vector.shape_cast %38 : vector<1x1x1x8x3xbf16> to vector<8x3xbf16>
      %c4 = arith.constant 4 : index
      %c0_40 = arith.constant 0 : index
      %c0_41 = arith.constant 0 : index
      %40 = vector.load %arg2[%c4, %c0_40, %c0_41] : memref<49x3x32xbf16, #tpu.memory_space<vmem>>, vector<1x3x32xbf16>
      %41 = vector.shape_cast %40 : vector<1x3x32xbf16> to vector<3x32xbf16>
      %cst_42 = arith.constant dense<0.000000e+00> : vector<8x32xf32>
      %42 = tpu.matmul %39, %41, %cst_42 {dimension_numbers = #tpu.dot_dimension_numbers<[1], [0], [0], [1], [0, 0, 1, 1], [], []>} : vector<8x3xbf16>, vector<3x32xbf16>, vector<8x32xf32> -> vector<8x32xf32>
      %43 = arith.addf %35, %42 : vector<8x32xf32>
      %c0_i32_43 = arith.constant 0 : i32
      %44 = arith.addi %c0_i32_43, %2 : i32
      %c0_44 = arith.constant 0 : index
      %c1_45 = arith.constant 1 : index
      %45 = arith.index_cast %44 : i32 to index
      %c2_46 = arith.constant 2 : index
      %c0_47 = arith.constant 0 : index
      %46 = vector.load %arg1[%c0_44, %c1_45, %45, %c2_46, %c0_47] : memref<1x4x11x11x3xbf16, #tpu.memory_space<vmem>>, vector<1x1x1x8x3xbf16>
      %47 = vector.shape_cast %46 : vector<1x1x1x8x3xbf16> to vector<8x3xbf16>
      %c5 = arith.constant 5 : index
      %c0_48 = arith.constant 0 : index
      %c0_49 = arith.constant 0 : index
      %48 = vector.load %arg2[%c5, %c0_48, %c0_49] : memref<49x3x32xbf16, #tpu.memory_space<vmem>>, vector<1x3x32xbf16>
      %49 = vector.shape_cast %48 : vector<1x3x32xbf16> to vector<3x32xbf16>
      %cst_50 = arith.constant dense<0.000000e+00> : vector<8x32xf32>
      %50 = tpu.matmul %47, %49, %cst_50 {dimension_numbers = #tpu.dot_dimension_numbers<[1], [0], [0], [1], [0, 0, 1, 1], [], []>} : vector<8x3xbf16>, vector<3x32xbf16>, vector<8x32xf32> -> vector<8x32xf32>
      %51 = arith.addf %43, %50 : vector<8x32xf32>
      %c0_i32_51 = arith.constant 0 : i32
      %52 = arith.addi %c0_i32_51, %2 : i32
      %c0_52 = arith.constant 0 : index
      %c0_53 = arith.constant 0 : index
      %53 = arith.index_cast %52 : i32 to index
      %c3_54 = arith.constant 3 : index
      %c0_55 = arith.constant 0 : index
      %54 = vector.load %arg1[%c0_52, %c0_53, %53, %c3_54, %c0_55] : memref<1x4x11x11x3xbf16, #tpu.memory_space<vmem>>, vector<1x1x1x8x3xbf16>
      %55 = vector.shape_cast %54 : vector<1x1x1x8x3xbf16> to vector<8x3xbf16>
      %c6 = arith.constant 6 : index
      %c0_56 = arith.constant 0 : index
      %c0_57 = arith.constant 0 : index
      %56 = vector.load %arg2[%c6, %c0_56, %c0_57] : memref<49x3x32xbf16, #tpu.memory_space<vmem>>, vector<1x3x32xbf16>
      %57 = vector.shape_cast %56 : vector<1x3x32xbf16> to vector<3x32xbf16>
      %cst_58 = arith.constant dense<0.000000e+00> : vector<8x32xf32>
      %58 = tpu.matmul %55, %57, %cst_58 {dimension_numbers = #tpu.dot_dimension_numbers<[1], [0], [0], [1], [0, 0, 1, 1], [], []>} : vector<8x3xbf16>, vector<3x32xbf16>, vector<8x32xf32> -> vector<8x32xf32>
      %59 = arith.addf %51, %58 : vector<8x32xf32>
      %c0_i32_59 = arith.constant 0 : i32
      %60 = arith.addi %c0_i32_59, %2 : i32
      %c0_60 = arith.constant 0 : index
      %c2_61 = arith.constant 2 : index
      %61 = arith.index_cast %60 : i32 to index
      %c0_62 = arith.constant 0 : index
      %c0_63 = arith.constant 0 : index
      %62 = vector.load %arg1[%c0_60, %c2_61, %61, %c0_62, %c0_63] : memref<1x4x11x11x3xbf16, #tpu.memory_space<vmem>>, vector<1x1x1x8x3xbf16>
      %63 = vector.shape_cast %62 : vector<1x1x1x8x3xbf16> to vector<8x3xbf16>
      %c7 = arith.constant 7 : index
      %c0_64 = arith.constant 0 : index
      %c0_65 = arith.constant 0 : index
      %64 = vector.load %arg2[%c7, %c0_64, %c0_65] : memref<49x3x32xbf16, #tpu.memory_space<vmem>>, vector<1x3x32xbf16>
      %65 = vector.shape_cast %64 : vector<1x3x32xbf16> to vector<3x32xbf16>
      %cst_66 = arith.constant dense<0.000000e+00> : vector<8x32xf32>
      %66 = tpu.matmul %63, %65, %cst_66 {dimension_numbers = #tpu.dot_dimension_numbers<[1], [0], [0], [1], [0, 0, 1, 1], [], []>} : vector<8x3xbf16>, vector<3x32xbf16>, vector<8x32xf32> -> vector<8x32xf32>
      %67 = arith.addf %59, %66 : vector<8x32xf32>
      %c0_i32_67 = arith.constant 0 : i32
      %68 = arith.addi %c0_i32_67, %2 : i32
      %c0_68 = arith.constant 0 : index
      %c3_69 = arith.constant 3 : index
      %69 = arith.index_cast %68 : i32 to index
      %c0_70 = arith.constant 0 : index
      %c0_71 = arith.constant 0 : index
      %70 = vector.load %arg1[%c0_68, %c3_69, %69, %c0_70, %c0_71] : memref<1x4x11x11x3xbf16, #tpu.memory_space<vmem>>, vector<1x1x1x8x3xbf16>
      %71 = vector.shape_cast %70 : vector<1x1x1x8x3xbf16> to vector<8x3xbf16>
      %c8 = arith.constant 8 : index
      %c0_72 = arith.constant 0 : index
      %c0_73 = arith.constant 0 : index
      %72 = vector.load %arg2[%c8, %c0_72, %c0_73] : memref<49x3x32xbf16, #tpu.memory_space<vmem>>, vector<1x3x32xbf16>
      %73 = vector.shape_cast %72 : vector<1x3x32xbf16> to vector<3x32xbf16>
      %cst_74 = arith.constant dense<0.000000e+00> : vector<8x32xf32>
      %74 = tpu.matmul %71, %73, %cst_74 {dimension_numbers = #tpu.dot_dimension_numbers<[1], [0], [0], [1], [0, 0, 1, 1], [], []>} : vector<8x3xbf16>, vector<3x32xbf16>, vector<8x32xf32> -> vector<8x32xf32>
      %75 = arith.addf %67, %74 : vector<8x32xf32>
      %c0_i32_75 = arith.constant 0 : i32
      %76 = arith.addi %c0_i32_75, %2 : i32
      %c0_76 = arith.constant 0 : index
      %c2_77 = arith.constant 2 : index
      %77 = arith.index_cast %76 : i32 to index
      %c1_78 = arith.constant 1 : index
      %c0_79 = arith.constant 0 : index
      %78 = vector.load %arg1[%c0_76, %c2_77, %77, %c1_78, %c0_79] : memref<1x4x11x11x3xbf16, #tpu.memory_space<vmem>>, vector<1x1x1x8x3xbf16>
      %79 = vector.shape_cast %78 : vector<1x1x1x8x3xbf16> to vector<8x3xbf16>
      %c9 = arith.constant 9 : index
      %c0_80 = arith.constant 0 : index
      %c0_81 = arith.constant 0 : index
      %80 = vector.load %arg2[%c9, %c0_80, %c0_81] : memref<49x3x32xbf16, #tpu.memory_space<vmem>>, vector<1x3x32xbf16>
      %81 = vector.shape_cast %80 : vector<1x3x32xbf16> to vector<3x32xbf16>
      %cst_82 = arith.constant dense<0.000000e+00> : vector<8x32xf32>
      %82 = tpu.matmul %79, %81, %cst_82 {dimension_numbers = #tpu.dot_dimension_numbers<[1], [0], [0], [1], [0, 0, 1, 1], [], []>} : vector<8x3xbf16>, vector<3x32xbf16>, vector<8x32xf32> -> vector<8x32xf32>
      %83 = arith.addf %75, %82 : vector<8x32xf32>
      %c0_i32_83 = arith.constant 0 : i32
      %84 = arith.addi %c0_i32_83, %2 : i32
      %c0_84 = arith.constant 0 : index
      %c3_85 = arith.constant 3 : index
      %85 = arith.index_cast %84 : i32 to index
      %c1_86 = arith.constant 1 : index
      %c0_87 = arith.constant 0 : index
      %86 = vector.load %arg1[%c0_84, %c3_85, %85, %c1_86, %c0_87] : memref<1x4x11x11x3xbf16, #tpu.memory_space<vmem>>, vector<1x1x1x8x3xbf16>
      %87 = vector.shape_cast %86 : vector<1x1x1x8x3xbf16> to vector<8x3xbf16>
      %c10 = arith.constant 10 : index
      %c0_88 = arith.constant 0 : index
      %c0_89 = arith.constant 0 : index
      %88 = vector.load %arg2[%c10, %c0_88, %c0_89] : memref<49x3x32xbf16, #tpu.memory_space<vmem>>, vector<1x3x32xbf16>
      %89 = vector.shape_cast %88 : vector<1x3x32xbf16> to vector<3x32xbf16>
      %cst_90 = arith.constant dense<0.000000e+00> : vector<8x32xf32>
      %90 = tpu.matmul %87, %89, %cst_90 {dimension_numbers = #tpu.dot_dimension_numbers<[1], [0], [0], [1], [0, 0, 1, 1], [], []>} : vector<8x3xbf16>, vector<3x32xbf16>, vector<8x32xf32> -> vector<8x32xf32>
      %91 = arith.addf %83, %90 : vector<8x32xf32>
      %c0_i32_91 = arith.constant 0 : i32
      %92 = arith.addi %c0_i32_91, %2 : i32
      %c0_92 = arith.constant 0 : index
      %c2_93 = arith.constant 2 : index
      %93 = arith.index_cast %92 : i32 to index
      %c2_94 = arith.constant 2 : index
      %c0_95 = arith.constant 0 : index
      %94 = vector.load %arg1[%c0_92, %c2_93, %93, %c2_94, %c0_95] : memref<1x4x11x11x3xbf16, #tpu.memory_space<vmem>>, vector<1x1x1x8x3xbf16>
      %95 = vector.shape_cast %94 : vector<1x1x1x8x3xbf16> to vector<8x3xbf16>
      %c11 = arith.constant 11 : index
      %c0_96 = arith.constant 0 : index
      %c0_97 = arith.constant 0 : index
      %96 = vector.load %arg2[%c11, %c0_96, %c0_97] : memref<49x3x32xbf16, #tpu.memory_space<vmem>>, vector<1x3x32xbf16>
      %97 = vector.shape_cast %96 : vector<1x3x32xbf16> to vector<3x32xbf16>
      %cst_98 = arith.constant dense<0.000000e+00> : vector<8x32xf32>
      %98 = tpu.matmul %95, %97, %cst_98 {dimension_numbers = #tpu.dot_dimension_numbers<[1], [0], [0], [1], [0, 0, 1, 1], [], []>} : vector<8x3xbf16>, vector<3x32xbf16>, vector<8x32xf32> -> vector<8x32xf32>
      %99 = arith.addf %91, %98 : vector<8x32xf32>
      %c0_i32_99 = arith.constant 0 : i32
      %100 = arith.addi %c0_i32_99, %2 : i32
      %c0_100 = arith.constant 0 : index
      %c3_101 = arith.constant 3 : index
      %101 = arith.index_cast %100 : i32 to index
      %c2_102 = arith.constant 2 : index
      %c0_103 = arith.constant 0 : index
      %102 = vector.load %arg1[%c0_100, %c3_101, %101, %c2_102, %c0_103] : memref<1x4x11x11x3xbf16, #tpu.memory_space<vmem>>, vector<1x1x1x8x3xbf16>
      %103 = vector.shape_cast %102 : vector<1x1x1x8x3xbf16> to vector<8x3xbf16>
      %c12 = arith.constant 12 : index
      %c0_104 = arith.constant 0 : index
      %c0_105 = arith.constant 0 : index
      %104 = vector.load %arg2[%c12, %c0_104, %c0_105] : memref<49x3x32xbf16, #tpu.memory_space<vmem>>, vector<1x3x32xbf16>
      %105 = vector.shape_cast %104 : vector<1x3x32xbf16> to vector<3x32xbf16>
      %cst_106 = arith.constant dense<0.000000e+00> : vector<8x32xf32>
      %106 = tpu.matmul %103, %105, %cst_106 {dimension_numbers = #tpu.dot_dimension_numbers<[1], [0], [0], [1], [0, 0, 1, 1], [], []>} : vector<8x3xbf16>, vector<3x32xbf16>, vector<8x32xf32> -> vector<8x32xf32>
      %107 = arith.addf %99, %106 : vector<8x32xf32>
      %c0_i32_107 = arith.constant 0 : i32
      %108 = arith.addi %c0_i32_107, %2 : i32
      %c0_108 = arith.constant 0 : index
      %c2_109 = arith.constant 2 : index
      %109 = arith.index_cast %108 : i32 to index
      %c3_110 = arith.constant 3 : index
      %c0_111 = arith.constant 0 : index
      %110 = vector.load %arg1[%c0_108, %c2_109, %109, %c3_110, %c0_111] : memref<1x4x11x11x3xbf16, #tpu.memory_space<vmem>>, vector<1x1x1x8x3xbf16>
      %111 = vector.shape_cast %110 : vector<1x1x1x8x3xbf16> to vector<8x3xbf16>
      %c13 = arith.constant 13 : index
      %c0_112 = arith.constant 0 : index
      %c0_113 = arith.constant 0 : index
      %112 = vector.load %arg2[%c13, %c0_112, %c0_113] : memref<49x3x32xbf16, #tpu.memory_space<vmem>>, vector<1x3x32xbf16>
      %113 = vector.shape_cast %112 : vector<1x3x32xbf16> to vector<3x32xbf16>
      %cst_114 = arith.constant dense<0.000000e+00> : vector<8x32xf32>
      %114 = tpu.matmul %111, %113, %cst_114 {dimension_numbers = #tpu.dot_dimension_numbers<[1], [0], [0], [1], [0, 0, 1, 1], [], []>} : vector<8x3xbf16>, vector<3x32xbf16>, vector<8x32xf32> -> vector<8x32xf32>
      %115 = arith.addf %107, %114 : vector<8x32xf32>
      %c1_i32_115 = arith.constant 1 : i32
      %116 = arith.addi %c1_i32_115, %2 : i32
      %c0_116 = arith.constant 0 : index
      %c0_117 = arith.constant 0 : index
      %117 = arith.index_cast %116 : i32 to index
      %c0_118 = arith.constant 0 : index
      %c0_119 = arith.constant 0 : index
      %118 = vector.load %arg1[%c0_116, %c0_117, %117, %c0_118, %c0_119] : memref<1x4x11x11x3xbf16, #tpu.memory_space<vmem>>, vector<1x1x1x8x3xbf16>
      %119 = vector.shape_cast %118 : vector<1x1x1x8x3xbf16> to vector<8x3xbf16>
      %c14 = arith.constant 14 : index
      %c0_120 = arith.constant 0 : index
      %c0_121 = arith.constant 0 : index
      %120 = vector.load %arg2[%c14, %c0_120, %c0_121] : memref<49x3x32xbf16, #tpu.memory_space<vmem>>, vector<1x3x32xbf16>
      %121 = vector.shape_cast %120 : vector<1x3x32xbf16> to vector<3x32xbf16>
      %cst_122 = arith.constant dense<0.000000e+00> : vector<8x32xf32>
      %122 = tpu.matmul %119, %121, %cst_122 {dimension_numbers = #tpu.dot_dimension_numbers<[1], [0], [0], [1], [0, 0, 1, 1], [], []>} : vector<8x3xbf16>, vector<3x32xbf16>, vector<8x32xf32> -> vector<8x32xf32>
      %123 = arith.addf %115, %122 : vector<8x32xf32>
      %c1_i32_123 = arith.constant 1 : i32
      %124 = arith.addi %c1_i32_123, %2 : i32
      %c0_124 = arith.constant 0 : index
      %c1_125 = arith.constant 1 : index
      %125 = arith.index_cast %124 : i32 to index
      %c0_126 = arith.constant 0 : index
      %c0_127 = arith.constant 0 : index
      %126 = vector.load %arg1[%c0_124, %c1_125, %125, %c0_126, %c0_127] : memref<1x4x11x11x3xbf16, #tpu.memory_space<vmem>>, vector<1x1x1x8x3xbf16>
      %127 = vector.shape_cast %126 : vector<1x1x1x8x3xbf16> to vector<8x3xbf16>
      %c15 = arith.constant 15 : index
      %c0_128 = arith.constant 0 : index
      %c0_129 = arith.constant 0 : index
      %128 = vector.load %arg2[%c15, %c0_128, %c0_129] : memref<49x3x32xbf16, #tpu.memory_space<vmem>>, vector<1x3x32xbf16>
      %129 = vector.shape_cast %128 : vector<1x3x32xbf16> to vector<3x32xbf16>
      %cst_130 = arith.constant dense<0.000000e+00> : vector<8x32xf32>
      %130 = tpu.matmul %127, %129, %cst_130 {dimension_numbers = #tpu.dot_dimension_numbers<[1], [0], [0], [1], [0, 0, 1, 1], [], []>} : vector<8x3xbf16>, vector<3x32xbf16>, vector<8x32xf32> -> vector<8x32xf32>
      %131 = arith.addf %123, %130 : vector<8x32xf32>
      %c1_i32_131 = arith.constant 1 : i32
      %132 = arith.addi %c1_i32_131, %2 : i32
      %c0_132 = arith.constant 0 : index
      %c0_133 = arith.constant 0 : index
      %133 = arith.index_cast %132 : i32 to index
      %c1_134 = arith.constant 1 : index
      %c0_135 = arith.constant 0 : index
      %134 = vector.load %arg1[%c0_132, %c0_133, %133, %c1_134, %c0_135] : memref<1x4x11x11x3xbf16, #tpu.memory_space<vmem>>, vector<1x1x1x8x3xbf16>
      %135 = vector.shape_cast %134 : vector<1x1x1x8x3xbf16> to vector<8x3xbf16>
      %c16 = arith.constant 16 : index
      %c0_136 = arith.constant 0 : index
      %c0_137 = arith.constant 0 : index
      %136 = vector.load %arg2[%c16, %c0_136, %c0_137] : memref<49x3x32xbf16, #tpu.memory_space<vmem>>, vector<1x3x32xbf16>
      %137 = vector.shape_cast %136 : vector<1x3x32xbf16> to vector<3x32xbf16>
      %cst_138 = arith.constant dense<0.000000e+00> : vector<8x32xf32>
      %138 = tpu.matmul %135, %137, %cst_138 {dimension_numbers = #tpu.dot_dimension_numbers<[1], [0], [0], [1], [0, 0, 1, 1], [], []>} : vector<8x3xbf16>, vector<3x32xbf16>, vector<8x32xf32> -> vector<8x32xf32>
      %139 = arith.addf %131, %138 : vector<8x32xf32>
      %c1_i32_139 = arith.constant 1 : i32
      %140 = arith.addi %c1_i32_139, %2 : i32
      %c0_140 = arith.constant 0 : index
      %c1_141 = arith.constant 1 : index
      %141 = arith.index_cast %140 : i32 to index
      %c1_142 = arith.constant 1 : index
      %c0_143 = arith.constant 0 : index
      %142 = vector.load %arg1[%c0_140, %c1_141, %141, %c1_142, %c0_143] : memref<1x4x11x11x3xbf16, #tpu.memory_space<vmem>>, vector<1x1x1x8x3xbf16>
      %143 = vector.shape_cast %142 : vector<1x1x1x8x3xbf16> to vector<8x3xbf16>
      %c17 = arith.constant 17 : index
      %c0_144 = arith.constant 0 : index
      %c0_145 = arith.constant 0 : index
      %144 = vector.load %arg2[%c17, %c0_144, %c0_145] : memref<49x3x32xbf16, #tpu.memory_space<vmem>>, vector<1x3x32xbf16>
      %145 = vector.shape_cast %144 : vector<1x3x32xbf16> to vector<3x32xbf16>
      %cst_146 = arith.constant dense<0.000000e+00> : vector<8x32xf32>
      %146 = tpu.matmul %143, %145, %cst_146 {dimension_numbers = #tpu.dot_dimension_numbers<[1], [0], [0], [1], [0, 0, 1, 1], [], []>} : vector<8x3xbf16>, vector<3x32xbf16>, vector<8x32xf32> -> vector<8x32xf32>
      %147 = arith.addf %139, %146 : vector<8x32xf32>
      %c1_i32_147 = arith.constant 1 : i32
      %148 = arith.addi %c1_i32_147, %2 : i32
      %c0_148 = arith.constant 0 : index
      %c0_149 = arith.constant 0 : index
      %149 = arith.index_cast %148 : i32 to index
      %c2_150 = arith.constant 2 : index
      %c0_151 = arith.constant 0 : index
      %150 = vector.load %arg1[%c0_148, %c0_149, %149, %c2_150, %c0_151] : memref<1x4x11x11x3xbf16, #tpu.memory_space<vmem>>, vector<1x1x1x8x3xbf16>
      %151 = vector.shape_cast %150 : vector<1x1x1x8x3xbf16> to vector<8x3xbf16>
      %c18 = arith.constant 18 : index
      %c0_152 = arith.constant 0 : index
      %c0_153 = arith.constant 0 : index
      %152 = vector.load %arg2[%c18, %c0_152, %c0_153] : memref<49x3x32xbf16, #tpu.memory_space<vmem>>, vector<1x3x32xbf16>
      %153 = vector.shape_cast %152 : vector<1x3x32xbf16> to vector<3x32xbf16>
      %cst_154 = arith.constant dense<0.000000e+00> : vector<8x32xf32>
      %154 = tpu.matmul %151, %153, %cst_154 {dimension_numbers = #tpu.dot_dimension_numbers<[1], [0], [0], [1], [0, 0, 1, 1], [], []>} : vector<8x3xbf16>, vector<3x32xbf16>, vector<8x32xf32> -> vector<8x32xf32>
      %155 = arith.addf %147, %154 : vector<8x32xf32>
      %c1_i32_155 = arith.constant 1 : i32
      %156 = arith.addi %c1_i32_155, %2 : i32
      %c0_156 = arith.constant 0 : index
      %c1_157 = arith.constant 1 : index
      %157 = arith.index_cast %156 : i32 to index
      %c2_158 = arith.constant 2 : index
      %c0_159 = arith.constant 0 : index
      %158 = vector.load %arg1[%c0_156, %c1_157, %157, %c2_158, %c0_159] : memref<1x4x11x11x3xbf16, #tpu.memory_space<vmem>>, vector<1x1x1x8x3xbf16>
      %159 = vector.shape_cast %158 : vector<1x1x1x8x3xbf16> to vector<8x3xbf16>
      %c19 = arith.constant 19 : index
      %c0_160 = arith.constant 0 : index
      %c0_161 = arith.constant 0 : index
      %160 = vector.load %arg2[%c19, %c0_160, %c0_161] : memref<49x3x32xbf16, #tpu.memory_space<vmem>>, vector<1x3x32xbf16>
      %161 = vector.shape_cast %160 : vector<1x3x32xbf16> to vector<3x32xbf16>
      %cst_162 = arith.constant dense<0.000000e+00> : vector<8x32xf32>
      %162 = tpu.matmul %159, %161, %cst_162 {dimension_numbers = #tpu.dot_dimension_numbers<[1], [0], [0], [1], [0, 0, 1, 1], [], []>} : vector<8x3xbf16>, vector<3x32xbf16>, vector<8x32xf32> -> vector<8x32xf32>
      %163 = arith.addf %155, %162 : vector<8x32xf32>
      %c1_i32_163 = arith.constant 1 : i32
      %164 = arith.addi %c1_i32_163, %2 : i32
      %c0_164 = arith.constant 0 : index
      %c0_165 = arith.constant 0 : index
      %165 = arith.index_cast %164 : i32 to index
      %c3_166 = arith.constant 3 : index
      %c0_167 = arith.constant 0 : index
      %166 = vector.load %arg1[%c0_164, %c0_165, %165, %c3_166, %c0_167] : memref<1x4x11x11x3xbf16, #tpu.memory_space<vmem>>, vector<1x1x1x8x3xbf16>
      %167 = vector.shape_cast %166 : vector<1x1x1x8x3xbf16> to vector<8x3xbf16>
      %c20 = arith.constant 20 : index
      %c0_168 = arith.constant 0 : index
      %c0_169 = arith.constant 0 : index
      %168 = vector.load %arg2[%c20, %c0_168, %c0_169] : memref<49x3x32xbf16, #tpu.memory_space<vmem>>, vector<1x3x32xbf16>
      %169 = vector.shape_cast %168 : vector<1x3x32xbf16> to vector<3x32xbf16>
      %cst_170 = arith.constant dense<0.000000e+00> : vector<8x32xf32>
      %170 = tpu.matmul %167, %169, %cst_170 {dimension_numbers = #tpu.dot_dimension_numbers<[1], [0], [0], [1], [0, 0, 1, 1], [], []>} : vector<8x3xbf16>, vector<3x32xbf16>, vector<8x32xf32> -> vector<8x32xf32>
      %171 = arith.addf %163, %170 : vector<8x32xf32>
      %c1_i32_171 = arith.constant 1 : i32
      %172 = arith.addi %c1_i32_171, %2 : i32
      %c0_172 = arith.constant 0 : index
      %c2_173 = arith.constant 2 : index
      %173 = arith.index_cast %172 : i32 to index
      %c0_174 = arith.constant 0 : index
      %c0_175 = arith.constant 0 : index
      %174 = vector.load %arg1[%c0_172, %c2_173, %173, %c0_174, %c0_175] : memref<1x4x11x11x3xbf16, #tpu.memory_space<vmem>>, vector<1x1x1x8x3xbf16>
      %175 = vector.shape_cast %174 : vector<1x1x1x8x3xbf16> to vector<8x3xbf16>
      %c21 = arith.constant 21 : index
      %c0_176 = arith.constant 0 : index
      %c0_177 = arith.constant 0 : index
      %176 = vector.load %arg2[%c21, %c0_176, %c0_177] : memref<49x3x32xbf16, #tpu.memory_space<vmem>>, vector<1x3x32xbf16>
      %177 = vector.shape_cast %176 : vector<1x3x32xbf16> to vector<3x32xbf16>
      %cst_178 = arith.constant dense<0.000000e+00> : vector<8x32xf32>
      %178 = tpu.matmul %175, %177, %cst_178 {dimension_numbers = #tpu.dot_dimension_numbers<[1], [0], [0], [1], [0, 0, 1, 1], [], []>} : vector<8x3xbf16>, vector<3x32xbf16>, vector<8x32xf32> -> vector<8x32xf32>
      %179 = arith.addf %171, %178 : vector<8x32xf32>
      %c1_i32_179 = arith.constant 1 : i32
      %180 = arith.addi %c1_i32_179, %2 : i32
      %c0_180 = arith.constant 0 : index
      %c3_181 = arith.constant 3 : index
      %181 = arith.index_cast %180 : i32 to index
      %c0_182 = arith.constant 0 : index
      %c0_183 = arith.constant 0 : index
      %182 = vector.load %arg1[%c0_180, %c3_181, %181, %c0_182, %c0_183] : memref<1x4x11x11x3xbf16, #tpu.memory_space<vmem>>, vector<1x1x1x8x3xbf16>
      %183 = vector.shape_cast %182 : vector<1x1x1x8x3xbf16> to vector<8x3xbf16>
      %c22 = arith.constant 22 : index
      %c0_184 = arith.constant 0 : index
      %c0_185 = arith.constant 0 : index
      %184 = vector.load %arg2[%c22, %c0_184, %c0_185] : memref<49x3x32xbf16, #tpu.memory_space<vmem>>, vector<1x3x32xbf16>
      %185 = vector.shape_cast %184 : vector<1x3x32xbf16> to vector<3x32xbf16>
      %cst_186 = arith.constant dense<0.000000e+00> : vector<8x32xf32>
      %186 = tpu.matmul %183, %185, %cst_186 {dimension_numbers = #tpu.dot_dimension_numbers<[1], [0], [0], [1], [0, 0, 1, 1], [], []>} : vector<8x3xbf16>, vector<3x32xbf16>, vector<8x32xf32> -> vector<8x32xf32>
      %187 = arith.addf %179, %186 : vector<8x32xf32>
      %c1_i32_187 = arith.constant 1 : i32
      %188 = arith.addi %c1_i32_187, %2 : i32
      %c0_188 = arith.constant 0 : index
      %c2_189 = arith.constant 2 : index
      %189 = arith.index_cast %188 : i32 to index
      %c1_190 = arith.constant 1 : index
      %c0_191 = arith.constant 0 : index
      %190 = vector.load %arg1[%c0_188, %c2_189, %189, %c1_190, %c0_191] : memref<1x4x11x11x3xbf16, #tpu.memory_space<vmem>>, vector<1x1x1x8x3xbf16>
      %191 = vector.shape_cast %190 : vector<1x1x1x8x3xbf16> to vector<8x3xbf16>
      %c23 = arith.constant 23 : index
      %c0_192 = arith.constant 0 : index
      %c0_193 = arith.constant 0 : index
      %192 = vector.load %arg2[%c23, %c0_192, %c0_193] : memref<49x3x32xbf16, #tpu.memory_space<vmem>>, vector<1x3x32xbf16>
      %193 = vector.shape_cast %192 : vector<1x3x32xbf16> to vector<3x32xbf16>
      %cst_194 = arith.constant dense<0.000000e+00> : vector<8x32xf32>
      %194 = tpu.matmul %191, %193, %cst_194 {dimension_numbers = #tpu.dot_dimension_numbers<[1], [0], [0], [1], [0, 0, 1, 1], [], []>} : vector<8x3xbf16>, vector<3x32xbf16>, vector<8x32xf32> -> vector<8x32xf32>
      %195 = arith.addf %187, %194 : vector<8x32xf32>
      %c1_i32_195 = arith.constant 1 : i32
      %196 = arith.addi %c1_i32_195, %2 : i32
      %c0_196 = arith.constant 0 : index
      %c3_197 = arith.constant 3 : index
      %197 = arith.index_cast %196 : i32 to index
      %c1_198 = arith.constant 1 : index
      %c0_199 = arith.constant 0 : index
      %198 = vector.load %arg1[%c0_196, %c3_197, %197, %c1_198, %c0_199] : memref<1x4x11x11x3xbf16, #tpu.memory_space<vmem>>, vector<1x1x1x8x3xbf16>
      %199 = vector.shape_cast %198 : vector<1x1x1x8x3xbf16> to vector<8x3xbf16>
      %c24 = arith.constant 24 : index
      %c0_200 = arith.constant 0 : index
      %c0_201 = arith.constant 0 : index
      %200 = vector.load %arg2[%c24, %c0_200, %c0_201] : memref<49x3x32xbf16, #tpu.memory_space<vmem>>, vector<1x3x32xbf16>
      %201 = vector.shape_cast %200 : vector<1x3x32xbf16> to vector<3x32xbf16>
      %cst_202 = arith.constant dense<0.000000e+00> : vector<8x32xf32>
      %202 = tpu.matmul %199, %201, %cst_202 {dimension_numbers = #tpu.dot_dimension_numbers<[1], [0], [0], [1], [0, 0, 1, 1], [], []>} : vector<8x3xbf16>, vector<3x32xbf16>, vector<8x32xf32> -> vector<8x32xf32>
      %203 = arith.addf %195, %202 : vector<8x32xf32>
      %c1_i32_203 = arith.constant 1 : i32
      %204 = arith.addi %c1_i32_203, %2 : i32
      %c0_204 = arith.constant 0 : index
      %c2_205 = arith.constant 2 : index
      %205 = arith.index_cast %204 : i32 to index
      %c2_206 = arith.constant 2 : index
      %c0_207 = arith.constant 0 : index
      %206 = vector.load %arg1[%c0_204, %c2_205, %205, %c2_206, %c0_207] : memref<1x4x11x11x3xbf16, #tpu.memory_space<vmem>>, vector<1x1x1x8x3xbf16>
      %207 = vector.shape_cast %206 : vector<1x1x1x8x3xbf16> to vector<8x3xbf16>
      %c25 = arith.constant 25 : index
      %c0_208 = arith.constant 0 : index
      %c0_209 = arith.constant 0 : index
      %208 = vector.load %arg2[%c25, %c0_208, %c0_209] : memref<49x3x32xbf16, #tpu.memory_space<vmem>>, vector<1x3x32xbf16>
      %209 = vector.shape_cast %208 : vector<1x3x32xbf16> to vector<3x32xbf16>
      %cst_210 = arith.constant dense<0.000000e+00> : vector<8x32xf32>
      %210 = tpu.matmul %207, %209, %cst_210 {dimension_numbers = #tpu.dot_dimension_numbers<[1], [0], [0], [1], [0, 0, 1, 1], [], []>} : vector<8x3xbf16>, vector<3x32xbf16>, vector<8x32xf32> -> vector<8x32xf32>
      %211 = arith.addf %203, %210 : vector<8x32xf32>
      %c1_i32_211 = arith.constant 1 : i32
      %212 = arith.addi %c1_i32_211, %2 : i32
      %c0_212 = arith.constant 0 : index
      %c3_213 = arith.constant 3 : index
      %213 = arith.index_cast %212 : i32 to index
      %c2_214 = arith.constant 2 : index
      %c0_215 = arith.constant 0 : index
      %214 = vector.load %arg1[%c0_212, %c3_213, %213, %c2_214, %c0_215] : memref<1x4x11x11x3xbf16, #tpu.memory_space<vmem>>, vector<1x1x1x8x3xbf16>
      %215 = vector.shape_cast %214 : vector<1x1x1x8x3xbf16> to vector<8x3xbf16>
      %c26 = arith.constant 26 : index
      %c0_216 = arith.constant 0 : index
      %c0_217 = arith.constant 0 : index
      %216 = vector.load %arg2[%c26, %c0_216, %c0_217] : memref<49x3x32xbf16, #tpu.memory_space<vmem>>, vector<1x3x32xbf16>
      %217 = vector.shape_cast %216 : vector<1x3x32xbf16> to vector<3x32xbf16>
      %cst_218 = arith.constant dense<0.000000e+00> : vector<8x32xf32>
      %218 = tpu.matmul %215, %217, %cst_218 {dimension_numbers = #tpu.dot_dimension_numbers<[1], [0], [0], [1], [0, 0, 1, 1], [], []>} : vector<8x3xbf16>, vector<3x32xbf16>, vector<8x32xf32> -> vector<8x32xf32>
      %219 = arith.addf %211, %218 : vector<8x32xf32>
      %c1_i32_219 = arith.constant 1 : i32
      %220 = arith.addi %c1_i32_219, %2 : i32
      %c0_220 = arith.constant 0 : index
      %c2_221 = arith.constant 2 : index
      %221 = arith.index_cast %220 : i32 to index
      %c3_222 = arith.constant 3 : index
      %c0_223 = arith.constant 0 : index
      %222 = vector.load %arg1[%c0_220, %c2_221, %221, %c3_222, %c0_223] : memref<1x4x11x11x3xbf16, #tpu.memory_space<vmem>>, vector<1x1x1x8x3xbf16>
      %223 = vector.shape_cast %222 : vector<1x1x1x8x3xbf16> to vector<8x3xbf16>
      %c27 = arith.constant 27 : index
      %c0_224 = arith.constant 0 : index
      %c0_225 = arith.constant 0 : index
      %224 = vector.load %arg2[%c27, %c0_224, %c0_225] : memref<49x3x32xbf16, #tpu.memory_space<vmem>>, vector<1x3x32xbf16>
      %225 = vector.shape_cast %224 : vector<1x3x32xbf16> to vector<3x32xbf16>
      %cst_226 = arith.constant dense<0.000000e+00> : vector<8x32xf32>
      %226 = tpu.matmul %223, %225, %cst_226 {dimension_numbers = #tpu.dot_dimension_numbers<[1], [0], [0], [1], [0, 0, 1, 1], [], []>} : vector<8x3xbf16>, vector<3x32xbf16>, vector<8x32xf32> -> vector<8x32xf32>
      %227 = arith.addf %219, %226 : vector<8x32xf32>
      %c2_i32 = arith.constant 2 : i32
      %228 = arith.addi %c2_i32, %2 : i32
      %c0_227 = arith.constant 0 : index
      %c0_228 = arith.constant 0 : index
      %229 = arith.index_cast %228 : i32 to index
      %c0_229 = arith.constant 0 : index
      %c0_230 = arith.constant 0 : index
      %230 = vector.load %arg1[%c0_227, %c0_228, %229, %c0_229, %c0_230] : memref<1x4x11x11x3xbf16, #tpu.memory_space<vmem>>, vector<1x1x1x8x3xbf16>
      %231 = vector.shape_cast %230 : vector<1x1x1x8x3xbf16> to vector<8x3xbf16>
      %c28 = arith.constant 28 : index
      %c0_231 = arith.constant 0 : index
      %c0_232 = arith.constant 0 : index
      %232 = vector.load %arg2[%c28, %c0_231, %c0_232] : memref<49x3x32xbf16, #tpu.memory_space<vmem>>, vector<1x3x32xbf16>
      %233 = vector.shape_cast %232 : vector<1x3x32xbf16> to vector<3x32xbf16>
      %cst_233 = arith.constant dense<0.000000e+00> : vector<8x32xf32>
      %234 = tpu.matmul %231, %233, %cst_233 {dimension_numbers = #tpu.dot_dimension_numbers<[1], [0], [0], [1], [0, 0, 1, 1], [], []>} : vector<8x3xbf16>, vector<3x32xbf16>, vector<8x32xf32> -> vector<8x32xf32>
      %235 = arith.addf %227, %234 : vector<8x32xf32>
      %c2_i32_234 = arith.constant 2 : i32
      %236 = arith.addi %c2_i32_234, %2 : i32
      %c0_235 = arith.constant 0 : index
      %c1_236 = arith.constant 1 : index
      %237 = arith.index_cast %236 : i32 to index
      %c0_237 = arith.constant 0 : index
      %c0_238 = arith.constant 0 : index
      %238 = vector.load %arg1[%c0_235, %c1_236, %237, %c0_237, %c0_238] : memref<1x4x11x11x3xbf16, #tpu.memory_space<vmem>>, vector<1x1x1x8x3xbf16>
      %239 = vector.shape_cast %238 : vector<1x1x1x8x3xbf16> to vector<8x3xbf16>
      %c29 = arith.constant 29 : index
      %c0_239 = arith.constant 0 : index
      %c0_240 = arith.constant 0 : index
      %240 = vector.load %arg2[%c29, %c0_239, %c0_240] : memref<49x3x32xbf16, #tpu.memory_space<vmem>>, vector<1x3x32xbf16>
      %241 = vector.shape_cast %240 : vector<1x3x32xbf16> to vector<3x32xbf16>
      %cst_241 = arith.constant dense<0.000000e+00> : vector<8x32xf32>
      %242 = tpu.matmul %239, %241, %cst_241 {dimension_numbers = #tpu.dot_dimension_numbers<[1], [0], [0], [1], [0, 0, 1, 1], [], []>} : vector<8x3xbf16>, vector<3x32xbf16>, vector<8x32xf32> -> vector<8x32xf32>
      %243 = arith.addf %235, %242 : vector<8x32xf32>
      %c2_i32_242 = arith.constant 2 : i32
      %244 = arith.addi %c2_i32_242, %2 : i32
      %c0_243 = arith.constant 0 : index
      %c0_244 = arith.constant 0 : index
      %245 = arith.index_cast %244 : i32 to index
      %c1_245 = arith.constant 1 : index
      %c0_246 = arith.constant 0 : index
      %246 = vector.load %arg1[%c0_243, %c0_244, %245, %c1_245, %c0_246] : memref<1x4x11x11x3xbf16, #tpu.memory_space<vmem>>, vector<1x1x1x8x3xbf16>
      %247 = vector.shape_cast %246 : vector<1x1x1x8x3xbf16> to vector<8x3xbf16>
      %c30 = arith.constant 30 : index
      %c0_247 = arith.constant 0 : index
      %c0_248 = arith.constant 0 : index
      %248 = vector.load %arg2[%c30, %c0_247, %c0_248] : memref<49x3x32xbf16, #tpu.memory_space<vmem>>, vector<1x3x32xbf16>
      %249 = vector.shape_cast %248 : vector<1x3x32xbf16> to vector<3x32xbf16>
      %cst_249 = arith.constant dense<0.000000e+00> : vector<8x32xf32>
      %250 = tpu.matmul %247, %249, %cst_249 {dimension_numbers = #tpu.dot_dimension_numbers<[1], [0], [0], [1], [0, 0, 1, 1], [], []>} : vector<8x3xbf16>, vector<3x32xbf16>, vector<8x32xf32> -> vector<8x32xf32>
      %251 = arith.addf %243, %250 : vector<8x32xf32>
      %c2_i32_250 = arith.constant 2 : i32
      %252 = arith.addi %c2_i32_250, %2 : i32
      %c0_251 = arith.constant 0 : index
      %c1_252 = arith.constant 1 : index
      %253 = arith.index_cast %252 : i32 to index
      %c1_253 = arith.constant 1 : index
      %c0_254 = arith.constant 0 : index
      %254 = vector.load %arg1[%c0_251, %c1_252, %253, %c1_253, %c0_254] : memref<1x4x11x11x3xbf16, #tpu.memory_space<vmem>>, vector<1x1x1x8x3xbf16>
      %255 = vector.shape_cast %254 : vector<1x1x1x8x3xbf16> to vector<8x3xbf16>
      %c31 = arith.constant 31 : index
      %c0_255 = arith.constant 0 : index
      %c0_256 = arith.constant 0 : index
      %256 = vector.load %arg2[%c31, %c0_255, %c0_256] : memref<49x3x32xbf16, #tpu.memory_space<vmem>>, vector<1x3x32xbf16>
      %257 = vector.shape_cast %256 : vector<1x3x32xbf16> to vector<3x32xbf16>
      %cst_257 = arith.constant dense<0.000000e+00> : vector<8x32xf32>
      %258 = tpu.matmul %255, %257, %cst_257 {dimension_numbers = #tpu.dot_dimension_numbers<[1], [0], [0], [1], [0, 0, 1, 1], [], []>} : vector<8x3xbf16>, vector<3x32xbf16>, vector<8x32xf32> -> vector<8x32xf32>
      %259 = arith.addf %251, %258 : vector<8x32xf32>
      %c2_i32_258 = arith.constant 2 : i32
      %260 = arith.addi %c2_i32_258, %2 : i32
      %c0_259 = arith.constant 0 : index
      %c0_260 = arith.constant 0 : index
      %261 = arith.index_cast %260 : i32 to index
      %c2_261 = arith.constant 2 : index
      %c0_262 = arith.constant 0 : index
      %262 = vector.load %arg1[%c0_259, %c0_260, %261, %c2_261, %c0_262] : memref<1x4x11x11x3xbf16, #tpu.memory_space<vmem>>, vector<1x1x1x8x3xbf16>
      %263 = vector.shape_cast %262 : vector<1x1x1x8x3xbf16> to vector<8x3xbf16>
      %c32 = arith.constant 32 : index
      %c0_263 = arith.constant 0 : index
      %c0_264 = arith.constant 0 : index
      %264 = vector.load %arg2[%c32, %c0_263, %c0_264] : memref<49x3x32xbf16, #tpu.memory_space<vmem>>, vector<1x3x32xbf16>
      %265 = vector.shape_cast %264 : vector<1x3x32xbf16> to vector<3x32xbf16>
      %cst_265 = arith.constant dense<0.000000e+00> : vector<8x32xf32>
      %266 = tpu.matmul %263, %265, %cst_265 {dimension_numbers = #tpu.dot_dimension_numbers<[1], [0], [0], [1], [0, 0, 1, 1], [], []>} : vector<8x3xbf16>, vector<3x32xbf16>, vector<8x32xf32> -> vector<8x32xf32>
      %267 = arith.addf %259, %266 : vector<8x32xf32>
      %c2_i32_266 = arith.constant 2 : i32
      %268 = arith.addi %c2_i32_266, %2 : i32
      %c0_267 = arith.constant 0 : index
      %c1_268 = arith.constant 1 : index
      %269 = arith.index_cast %268 : i32 to index
      %c2_269 = arith.constant 2 : index
      %c0_270 = arith.constant 0 : index
      %270 = vector.load %arg1[%c0_267, %c1_268, %269, %c2_269, %c0_270] : memref<1x4x11x11x3xbf16, #tpu.memory_space<vmem>>, vector<1x1x1x8x3xbf16>
      %271 = vector.shape_cast %270 : vector<1x1x1x8x3xbf16> to vector<8x3xbf16>
      %c33 = arith.constant 33 : index
      %c0_271 = arith.constant 0 : index
      %c0_272 = arith.constant 0 : index
      %272 = vector.load %arg2[%c33, %c0_271, %c0_272] : memref<49x3x32xbf16, #tpu.memory_space<vmem>>, vector<1x3x32xbf16>
      %273 = vector.shape_cast %272 : vector<1x3x32xbf16> to vector<3x32xbf16>
      %cst_273 = arith.constant dense<0.000000e+00> : vector<8x32xf32>
      %274 = tpu.matmul %271, %273, %cst_273 {dimension_numbers = #tpu.dot_dimension_numbers<[1], [0], [0], [1], [0, 0, 1, 1], [], []>} : vector<8x3xbf16>, vector<3x32xbf16>, vector<8x32xf32> -> vector<8x32xf32>
      %275 = arith.addf %267, %274 : vector<8x32xf32>
      %c2_i32_274 = arith.constant 2 : i32
      %276 = arith.addi %c2_i32_274, %2 : i32
      %c0_275 = arith.constant 0 : index
      %c0_276 = arith.constant 0 : index
      %277 = arith.index_cast %276 : i32 to index
      %c3_277 = arith.constant 3 : index
      %c0_278 = arith.constant 0 : index
      %278 = vector.load %arg1[%c0_275, %c0_276, %277, %c3_277, %c0_278] : memref<1x4x11x11x3xbf16, #tpu.memory_space<vmem>>, vector<1x1x1x8x3xbf16>
      %279 = vector.shape_cast %278 : vector<1x1x1x8x3xbf16> to vector<8x3xbf16>
      %c34 = arith.constant 34 : index
      %c0_279 = arith.constant 0 : index
      %c0_280 = arith.constant 0 : index
      %280 = vector.load %arg2[%c34, %c0_279, %c0_280] : memref<49x3x32xbf16, #tpu.memory_space<vmem>>, vector<1x3x32xbf16>
      %281 = vector.shape_cast %280 : vector<1x3x32xbf16> to vector<3x32xbf16>
      %cst_281 = arith.constant dense<0.000000e+00> : vector<8x32xf32>
      %282 = tpu.matmul %279, %281, %cst_281 {dimension_numbers = #tpu.dot_dimension_numbers<[1], [0], [0], [1], [0, 0, 1, 1], [], []>} : vector<8x3xbf16>, vector<3x32xbf16>, vector<8x32xf32> -> vector<8x32xf32>
      %283 = arith.addf %275, %282 : vector<8x32xf32>
      %c2_i32_282 = arith.constant 2 : i32
      %284 = arith.addi %c2_i32_282, %2 : i32
      %c0_283 = arith.constant 0 : index
      %c2_284 = arith.constant 2 : index
      %285 = arith.index_cast %284 : i32 to index
      %c0_285 = arith.constant 0 : index
      %c0_286 = arith.constant 0 : index
      %286 = vector.load %arg1[%c0_283, %c2_284, %285, %c0_285, %c0_286] : memref<1x4x11x11x3xbf16, #tpu.memory_space<vmem>>, vector<1x1x1x8x3xbf16>
      %287 = vector.shape_cast %286 : vector<1x1x1x8x3xbf16> to vector<8x3xbf16>
      %c35 = arith.constant 35 : index
      %c0_287 = arith.constant 0 : index
      %c0_288 = arith.constant 0 : index
      %288 = vector.load %arg2[%c35, %c0_287, %c0_288] : memref<49x3x32xbf16, #tpu.memory_space<vmem>>, vector<1x3x32xbf16>
      %289 = vector.shape_cast %288 : vector<1x3x32xbf16> to vector<3x32xbf16>
      %cst_289 = arith.constant dense<0.000000e+00> : vector<8x32xf32>
      %290 = tpu.matmul %287, %289, %cst_289 {dimension_numbers = #tpu.dot_dimension_numbers<[1], [0], [0], [1], [0, 0, 1, 1], [], []>} : vector<8x3xbf16>, vector<3x32xbf16>, vector<8x32xf32> -> vector<8x32xf32>
      %291 = arith.addf %283, %290 : vector<8x32xf32>
      %c2_i32_290 = arith.constant 2 : i32
      %292 = arith.addi %c2_i32_290, %2 : i32
      %c0_291 = arith.constant 0 : index
      %c3_292 = arith.constant 3 : index
      %293 = arith.index_cast %292 : i32 to index
      %c0_293 = arith.constant 0 : index
      %c0_294 = arith.constant 0 : index
      %294 = vector.load %arg1[%c0_291, %c3_292, %293, %c0_293, %c0_294] : memref<1x4x11x11x3xbf16, #tpu.memory_space<vmem>>, vector<1x1x1x8x3xbf16>
      %295 = vector.shape_cast %294 : vector<1x1x1x8x3xbf16> to vector<8x3xbf16>
      %c36 = arith.constant 36 : index
      %c0_295 = arith.constant 0 : index
      %c0_296 = arith.constant 0 : index
      %296 = vector.load %arg2[%c36, %c0_295, %c0_296] : memref<49x3x32xbf16, #tpu.memory_space<vmem>>, vector<1x3x32xbf16>
      %297 = vector.shape_cast %296 : vector<1x3x32xbf16> to vector<3x32xbf16>
      %cst_297 = arith.constant dense<0.000000e+00> : vector<8x32xf32>
      %298 = tpu.matmul %295, %297, %cst_297 {dimension_numbers = #tpu.dot_dimension_numbers<[1], [0], [0], [1], [0, 0, 1, 1], [], []>} : vector<8x3xbf16>, vector<3x32xbf16>, vector<8x32xf32> -> vector<8x32xf32>
      %299 = arith.addf %291, %298 : vector<8x32xf32>
      %c2_i32_298 = arith.constant 2 : i32
      %300 = arith.addi %c2_i32_298, %2 : i32
      %c0_299 = arith.constant 0 : index
      %c2_300 = arith.constant 2 : index
      %301 = arith.index_cast %300 : i32 to index
      %c1_301 = arith.constant 1 : index
      %c0_302 = arith.constant 0 : index
      %302 = vector.load %arg1[%c0_299, %c2_300, %301, %c1_301, %c0_302] : memref<1x4x11x11x3xbf16, #tpu.memory_space<vmem>>, vector<1x1x1x8x3xbf16>
      %303 = vector.shape_cast %302 : vector<1x1x1x8x3xbf16> to vector<8x3xbf16>
      %c37 = arith.constant 37 : index
      %c0_303 = arith.constant 0 : index
      %c0_304 = arith.constant 0 : index
      %304 = vector.load %arg2[%c37, %c0_303, %c0_304] : memref<49x3x32xbf16, #tpu.memory_space<vmem>>, vector<1x3x32xbf16>
      %305 = vector.shape_cast %304 : vector<1x3x32xbf16> to vector<3x32xbf16>
      %cst_305 = arith.constant dense<0.000000e+00> : vector<8x32xf32>
      %306 = tpu.matmul %303, %305, %cst_305 {dimension_numbers = #tpu.dot_dimension_numbers<[1], [0], [0], [1], [0, 0, 1, 1], [], []>} : vector<8x3xbf16>, vector<3x32xbf16>, vector<8x32xf32> -> vector<8x32xf32>
      %307 = arith.addf %299, %306 : vector<8x32xf32>
      %c2_i32_306 = arith.constant 2 : i32
      %308 = arith.addi %c2_i32_306, %2 : i32
      %c0_307 = arith.constant 0 : index
      %c3_308 = arith.constant 3 : index
      %309 = arith.index_cast %308 : i32 to index
      %c1_309 = arith.constant 1 : index
      %c0_310 = arith.constant 0 : index
      %310 = vector.load %arg1[%c0_307, %c3_308, %309, %c1_309, %c0_310] : memref<1x4x11x11x3xbf16, #tpu.memory_space<vmem>>, vector<1x1x1x8x3xbf16>
      %311 = vector.shape_cast %310 : vector<1x1x1x8x3xbf16> to vector<8x3xbf16>
      %c38 = arith.constant 38 : index
      %c0_311 = arith.constant 0 : index
      %c0_312 = arith.constant 0 : index
      %312 = vector.load %arg2[%c38, %c0_311, %c0_312] : memref<49x3x32xbf16, #tpu.memory_space<vmem>>, vector<1x3x32xbf16>
      %313 = vector.shape_cast %312 : vector<1x3x32xbf16> to vector<3x32xbf16>
      %cst_313 = arith.constant dense<0.000000e+00> : vector<8x32xf32>
      %314 = tpu.matmul %311, %313, %cst_313 {dimension_numbers = #tpu.dot_dimension_numbers<[1], [0], [0], [1], [0, 0, 1, 1], [], []>} : vector<8x3xbf16>, vector<3x32xbf16>, vector<8x32xf32> -> vector<8x32xf32>
      %315 = arith.addf %307, %314 : vector<8x32xf32>
      %c2_i32_314 = arith.constant 2 : i32
      %316 = arith.addi %c2_i32_314, %2 : i32
      %c0_315 = arith.constant 0 : index
      %c2_316 = arith.constant 2 : index
      %317 = arith.index_cast %316 : i32 to index
      %c2_317 = arith.constant 2 : index
      %c0_318 = arith.constant 0 : index
      %318 = vector.load %arg1[%c0_315, %c2_316, %317, %c2_317, %c0_318] : memref<1x4x11x11x3xbf16, #tpu.memory_space<vmem>>, vector<1x1x1x8x3xbf16>
      %319 = vector.shape_cast %318 : vector<1x1x1x8x3xbf16> to vector<8x3xbf16>
      %c39 = arith.constant 39 : index
      %c0_319 = arith.constant 0 : index
      %c0_320 = arith.constant 0 : index
      %320 = vector.load %arg2[%c39, %c0_319, %c0_320] : memref<49x3x32xbf16, #tpu.memory_space<vmem>>, vector<1x3x32xbf16>
      %321 = vector.shape_cast %320 : vector<1x3x32xbf16> to vector<3x32xbf16>
      %cst_321 = arith.constant dense<0.000000e+00> : vector<8x32xf32>
      %322 = tpu.matmul %319, %321, %cst_321 {dimension_numbers = #tpu.dot_dimension_numbers<[1], [0], [0], [1], [0, 0, 1, 1], [], []>} : vector<8x3xbf16>, vector<3x32xbf16>, vector<8x32xf32> -> vector<8x32xf32>
      %323 = arith.addf %315, %322 : vector<8x32xf32>
      %c2_i32_322 = arith.constant 2 : i32
      %324 = arith.addi %c2_i32_322, %2 : i32
      %c0_323 = arith.constant 0 : index
      %c3_324 = arith.constant 3 : index
      %325 = arith.index_cast %324 : i32 to index
      %c2_325 = arith.constant 2 : index
      %c0_326 = arith.constant 0 : index
      %326 = vector.load %arg1[%c0_323, %c3_324, %325, %c2_325, %c0_326] : memref<1x4x11x11x3xbf16, #tpu.memory_space<vmem>>, vector<1x1x1x8x3xbf16>
      %327 = vector.shape_cast %326 : vector<1x1x1x8x3xbf16> to vector<8x3xbf16>
      %c40 = arith.constant 40 : index
      %c0_327 = arith.constant 0 : index
      %c0_328 = arith.constant 0 : index
      %328 = vector.load %arg2[%c40, %c0_327, %c0_328] : memref<49x3x32xbf16, #tpu.memory_space<vmem>>, vector<1x3x32xbf16>
      %329 = vector.shape_cast %328 : vector<1x3x32xbf16> to vector<3x32xbf16>
      %cst_329 = arith.constant dense<0.000000e+00> : vector<8x32xf32>
      %330 = tpu.matmul %327, %329, %cst_329 {dimension_numbers = #tpu.dot_dimension_numbers<[1], [0], [0], [1], [0, 0, 1, 1], [], []>} : vector<8x3xbf16>, vector<3x32xbf16>, vector<8x32xf32> -> vector<8x32xf32>
      %331 = arith.addf %323, %330 : vector<8x32xf32>
      %c2_i32_330 = arith.constant 2 : i32
      %332 = arith.addi %c2_i32_330, %2 : i32
      %c0_331 = arith.constant 0 : index
      %c2_332 = arith.constant 2 : index
      %333 = arith.index_cast %332 : i32 to index
      %c3_333 = arith.constant 3 : index
      %c0_334 = arith.constant 0 : index
      %334 = vector.load %arg1[%c0_331, %c2_332, %333, %c3_333, %c0_334] : memref<1x4x11x11x3xbf16, #tpu.memory_space<vmem>>, vector<1x1x1x8x3xbf16>
      %335 = vector.shape_cast %334 : vector<1x1x1x8x3xbf16> to vector<8x3xbf16>
      %c41 = arith.constant 41 : index
      %c0_335 = arith.constant 0 : index
      %c0_336 = arith.constant 0 : index
      %336 = vector.load %arg2[%c41, %c0_335, %c0_336] : memref<49x3x32xbf16, #tpu.memory_space<vmem>>, vector<1x3x32xbf16>
      %337 = vector.shape_cast %336 : vector<1x3x32xbf16> to vector<3x32xbf16>
      %cst_337 = arith.constant dense<0.000000e+00> : vector<8x32xf32>
      %338 = tpu.matmul %335, %337, %cst_337 {dimension_numbers = #tpu.dot_dimension_numbers<[1], [0], [0], [1], [0, 0, 1, 1], [], []>} : vector<8x3xbf16>, vector<3x32xbf16>, vector<8x32xf32> -> vector<8x32xf32>
      %339 = arith.addf %331, %338 : vector<8x32xf32>
      %c3_i32 = arith.constant 3 : i32
      %340 = arith.addi %c3_i32, %2 : i32
      %c0_338 = arith.constant 0 : index
      %c0_339 = arith.constant 0 : index
      %341 = arith.index_cast %340 : i32 to index
      %c0_340 = arith.constant 0 : index
      %c0_341 = arith.constant 0 : index
      %342 = vector.load %arg1[%c0_338, %c0_339, %341, %c0_340, %c0_341] : memref<1x4x11x11x3xbf16, #tpu.memory_space<vmem>>, vector<1x1x1x8x3xbf16>
      %343 = vector.shape_cast %342 : vector<1x1x1x8x3xbf16> to vector<8x3xbf16>
      %c42 = arith.constant 42 : index
      %c0_342 = arith.constant 0 : index
      %c0_343 = arith.constant 0 : index
      %344 = vector.load %arg2[%c42, %c0_342, %c0_343] : memref<49x3x32xbf16, #tpu.memory_space<vmem>>, vector<1x3x32xbf16>
      %345 = vector.shape_cast %344 : vector<1x3x32xbf16> to vector<3x32xbf16>
      %cst_344 = arith.constant dense<0.000000e+00> : vector<8x32xf32>
      %346 = tpu.matmul %343, %345, %cst_344 {dimension_numbers = #tpu.dot_dimension_numbers<[1], [0], [0], [1], [0, 0, 1, 1], [], []>} : vector<8x3xbf16>, vector<3x32xbf16>, vector<8x32xf32> -> vector<8x32xf32>
      %347 = arith.addf %339, %346 : vector<8x32xf32>
      %c3_i32_345 = arith.constant 3 : i32
      %348 = arith.addi %c3_i32_345, %2 : i32
      %c0_346 = arith.constant 0 : index
      %c1_347 = arith.constant 1 : index
      %349 = arith.index_cast %348 : i32 to index
      %c0_348 = arith.constant 0 : index
      %c0_349 = arith.constant 0 : index
      %350 = vector.load %arg1[%c0_346, %c1_347, %349, %c0_348, %c0_349] : memref<1x4x11x11x3xbf16, #tpu.memory_space<vmem>>, vector<1x1x1x8x3xbf16>
      %351 = vector.shape_cast %350 : vector<1x1x1x8x3xbf16> to vector<8x3xbf16>
      %c43 = arith.constant 43 : index
      %c0_350 = arith.constant 0 : index
      %c0_351 = arith.constant 0 : index
      %352 = vector.load %arg2[%c43, %c0_350, %c0_351] : memref<49x3x32xbf16, #tpu.memory_space<vmem>>, vector<1x3x32xbf16>
      %353 = vector.shape_cast %352 : vector<1x3x32xbf16> to vector<3x32xbf16>
      %cst_352 = arith.constant dense<0.000000e+00> : vector<8x32xf32>
      %354 = tpu.matmul %351, %353, %cst_352 {dimension_numbers = #tpu.dot_dimension_numbers<[1], [0], [0], [1], [0, 0, 1, 1], [], []>} : vector<8x3xbf16>, vector<3x32xbf16>, vector<8x32xf32> -> vector<8x32xf32>
      %355 = arith.addf %347, %354 : vector<8x32xf32>
      %c3_i32_353 = arith.constant 3 : i32
      %356 = arith.addi %c3_i32_353, %2 : i32
      %c0_354 = arith.constant 0 : index
      %c0_355 = arith.constant 0 : index
      %357 = arith.index_cast %356 : i32 to index
      %c1_356 = arith.constant 1 : index
      %c0_357 = arith.constant 0 : index
      %358 = vector.load %arg1[%c0_354, %c0_355, %357, %c1_356, %c0_357] : memref<1x4x11x11x3xbf16, #tpu.memory_space<vmem>>, vector<1x1x1x8x3xbf16>
      %359 = vector.shape_cast %358 : vector<1x1x1x8x3xbf16> to vector<8x3xbf16>
      %c44 = arith.constant 44 : index
      %c0_358 = arith.constant 0 : index
      %c0_359 = arith.constant 0 : index
      %360 = vector.load %arg2[%c44, %c0_358, %c0_359] : memref<49x3x32xbf16, #tpu.memory_space<vmem>>, vector<1x3x32xbf16>
      %361 = vector.shape_cast %360 : vector<1x3x32xbf16> to vector<3x32xbf16>
      %cst_360 = arith.constant dense<0.000000e+00> : vector<8x32xf32>
      %362 = tpu.matmul %359, %361, %cst_360 {dimension_numbers = #tpu.dot_dimension_numbers<[1], [0], [0], [1], [0, 0, 1, 1], [], []>} : vector<8x3xbf16>, vector<3x32xbf16>, vector<8x32xf32> -> vector<8x32xf32>
      %363 = arith.addf %355, %362 : vector<8x32xf32>
      %c3_i32_361 = arith.constant 3 : i32
      %364 = arith.addi %c3_i32_361, %2 : i32
      %c0_362 = arith.constant 0 : index
      %c1_363 = arith.constant 1 : index
      %365 = arith.index_cast %364 : i32 to index
      %c1_364 = arith.constant 1 : index
      %c0_365 = arith.constant 0 : index
      %366 = vector.load %arg1[%c0_362, %c1_363, %365, %c1_364, %c0_365] : memref<1x4x11x11x3xbf16, #tpu.memory_space<vmem>>, vector<1x1x1x8x3xbf16>
      %367 = vector.shape_cast %366 : vector<1x1x1x8x3xbf16> to vector<8x3xbf16>
      %c45 = arith.constant 45 : index
      %c0_366 = arith.constant 0 : index
      %c0_367 = arith.constant 0 : index
      %368 = vector.load %arg2[%c45, %c0_366, %c0_367] : memref<49x3x32xbf16, #tpu.memory_space<vmem>>, vector<1x3x32xbf16>
      %369 = vector.shape_cast %368 : vector<1x3x32xbf16> to vector<3x32xbf16>
      %cst_368 = arith.constant dense<0.000000e+00> : vector<8x32xf32>
      %370 = tpu.matmul %367, %369, %cst_368 {dimension_numbers = #tpu.dot_dimension_numbers<[1], [0], [0], [1], [0, 0, 1, 1], [], []>} : vector<8x3xbf16>, vector<3x32xbf16>, vector<8x32xf32> -> vector<8x32xf32>
      %371 = arith.addf %363, %370 : vector<8x32xf32>
      %c3_i32_369 = arith.constant 3 : i32
      %372 = arith.addi %c3_i32_369, %2 : i32
      %c0_370 = arith.constant 0 : index
      %c0_371 = arith.constant 0 : index
      %373 = arith.index_cast %372 : i32 to index
      %c2_372 = arith.constant 2 : index
      %c0_373 = arith.constant 0 : index
      %374 = vector.load %arg1[%c0_370, %c0_371, %373, %c2_372, %c0_373] : memref<1x4x11x11x3xbf16, #tpu.memory_space<vmem>>, vector<1x1x1x8x3xbf16>
      %375 = vector.shape_cast %374 : vector<1x1x1x8x3xbf16> to vector<8x3xbf16>
      %c46 = arith.constant 46 : index
      %c0_374 = arith.constant 0 : index
      %c0_375 = arith.constant 0 : index
      %376 = vector.load %arg2[%c46, %c0_374, %c0_375] : memref<49x3x32xbf16, #tpu.memory_space<vmem>>, vector<1x3x32xbf16>
      %377 = vector.shape_cast %376 : vector<1x3x32xbf16> to vector<3x32xbf16>
      %cst_376 = arith.constant dense<0.000000e+00> : vector<8x32xf32>
      %378 = tpu.matmul %375, %377, %cst_376 {dimension_numbers = #tpu.dot_dimension_numbers<[1], [0], [0], [1], [0, 0, 1, 1], [], []>} : vector<8x3xbf16>, vector<3x32xbf16>, vector<8x32xf32> -> vector<8x32xf32>
      %379 = arith.addf %371, %378 : vector<8x32xf32>
      %c3_i32_377 = arith.constant 3 : i32
      %380 = arith.addi %c3_i32_377, %2 : i32
      %c0_378 = arith.constant 0 : index
      %c1_379 = arith.constant 1 : index
      %381 = arith.index_cast %380 : i32 to index
      %c2_380 = arith.constant 2 : index
      %c0_381 = arith.constant 0 : index
      %382 = vector.load %arg1[%c0_378, %c1_379, %381, %c2_380, %c0_381] : memref<1x4x11x11x3xbf16, #tpu.memory_space<vmem>>, vector<1x1x1x8x3xbf16>
      %383 = vector.shape_cast %382 : vector<1x1x1x8x3xbf16> to vector<8x3xbf16>
      %c47 = arith.constant 47 : index
      %c0_382 = arith.constant 0 : index
      %c0_383 = arith.constant 0 : index
      %384 = vector.load %arg2[%c47, %c0_382, %c0_383] : memref<49x3x32xbf16, #tpu.memory_space<vmem>>, vector<1x3x32xbf16>
      %385 = vector.shape_cast %384 : vector<1x3x32xbf16> to vector<3x32xbf16>
      %cst_384 = arith.constant dense<0.000000e+00> : vector<8x32xf32>
      %386 = tpu.matmul %383, %385, %cst_384 {dimension_numbers = #tpu.dot_dimension_numbers<[1], [0], [0], [1], [0, 0, 1, 1], [], []>} : vector<8x3xbf16>, vector<3x32xbf16>, vector<8x32xf32> -> vector<8x32xf32>
      %387 = arith.addf %379, %386 : vector<8x32xf32>
      %c3_i32_385 = arith.constant 3 : i32
      %388 = arith.addi %c3_i32_385, %2 : i32
      %c0_386 = arith.constant 0 : index
      %c0_387 = arith.constant 0 : index
      %389 = arith.index_cast %388 : i32 to index
      %c3_388 = arith.constant 3 : index
      %c0_389 = arith.constant 0 : index
      %390 = vector.load %arg1[%c0_386, %c0_387, %389, %c3_388, %c0_389] : memref<1x4x11x11x3xbf16, #tpu.memory_space<vmem>>, vector<1x1x1x8x3xbf16>
      %391 = vector.shape_cast %390 : vector<1x1x1x8x3xbf16> to vector<8x3xbf16>
      %c48 = arith.constant 48 : index
      %c0_390 = arith.constant 0 : index
      %c0_391 = arith.constant 0 : index
      %392 = vector.load %arg2[%c48, %c0_390, %c0_391] : memref<49x3x32xbf16, #tpu.memory_space<vmem>>, vector<1x3x32xbf16>
      %393 = vector.shape_cast %392 : vector<1x3x32xbf16> to vector<3x32xbf16>
      %cst_392 = arith.constant dense<0.000000e+00> : vector<8x32xf32>
      %394 = tpu.matmul %391, %393, %cst_392 {dimension_numbers = #tpu.dot_dimension_numbers<[1], [0], [0], [1], [0, 0, 1, 1], [], []>} : vector<8x3xbf16>, vector<3x32xbf16>, vector<8x32xf32> -> vector<8x32xf32>
      %395 = arith.addf %387, %394 : vector<8x32xf32>
      %c0_393 = arith.constant 0 : index
      %c0_394 = arith.constant 0 : index
      %396 = vector.load %arg3[%c0_393, %c0_394] : memref<1x32xf32, #tpu.memory_space<vmem>>, vector<1x32xf32>
      %397 = vector.broadcast %396 : vector<1x32xf32> to vector<8x32xf32>
      %398 = arith.mulf %395, %397 : vector<8x32xf32>
      %c0_395 = arith.constant 0 : index
      %c0_396 = arith.constant 0 : index
      %399 = vector.load %arg4[%c0_395, %c0_396] : memref<1x32xf32, #tpu.memory_space<vmem>>, vector<1x32xf32>
      %400 = vector.broadcast %399 : vector<1x32xf32> to vector<8x32xf32>
      %401 = arith.addf %398, %400 : vector<8x32xf32>
      %cst_397 = arith.constant 0.000000e+00 : f32
      %402 = vector.broadcast %cst_397 : f32 to vector<8x32xf32>
      %403 = arith.maximumf %401, %402 : vector<8x32xf32>
      %404 = arith.truncf %403 : vector<8x32xf32> to vector<8x32xbf16>
      %c0_398 = arith.constant 0 : index
      %405 = arith.index_cast %2 : i32 to index
      %c0_399 = arith.constant 0 : index
      %c0_400 = arith.constant 0 : index
      %406 = vector.load %arg5[%c0_398, %405, %c0_399, %c0_400] : memref<1x8x8x32xbf16, #tpu.memory_space<vmem>>, vector<1x1x8x32xbf16>
      %407 = vector.shape_cast %406 : vector<1x1x8x32xbf16> to vector<8x32xbf16>
      %408 = vector.shape_cast %404 : vector<8x32xbf16> to vector<1x1x8x32xbf16>
      tpu.vector_store %arg5[%c0_398, %405, %c0_399, %c0_400], %408 {strides = array<i32>} : memref<1x8x8x32xbf16, #tpu.memory_space<vmem>>, vector<1x1x8x32xbf16>,
    }
    %c8_i32_0 = arith.constant 8 : i32
    return
  }
  func.func @transform_0(%arg0: i32) -> (i32, i32, i32, i32, i32) {
    %c0_i32 = arith.constant 0 : i32
    %c0_i32_0 = arith.constant 0 : i32
    %c0_i32_1 = arith.constant 0 : i32
    %c0_i32_2 = arith.constant 0 : i32
    %c0_i32_3 = arith.constant 0 : i32
    return %arg0, %c0_i32, %c0_i32_0, %c0_i32_1, %c0_i32_2 : i32, i32, i32, i32, i32
  }
  func.func @transform_1(%arg0: i32) -> (i32, i32, i32) {
    %c0_i32 = arith.constant 0 : i32
    %c0_i32_0 = arith.constant 0 : i32
    %c0_i32_1 = arith.constant 0 : i32
    %c0_i32_2 = arith.constant 0 : i32
    return %c0_i32, %c0_i32_0, %c0_i32_1 : i32, i32, i32
  }
  func.func @transform_2(%arg0: i32) -> (i32, i32) {
    %c0_i32 = arith.constant 0 : i32
    %c0_i32_0 = arith.constant 0 : i32
    %c0_i32_1 = arith.constant 0 : i32
    return %c0_i32, %c0_i32_0 : i32, i32
  }
  func.func @transform_3(%arg0: i32) -> (i32, i32) {
    %c0_i32 = arith.constant 0 : i32
    %c0_i32_0 = arith.constant 0 : i32
    %c0_i32_1 = arith.constant 0 : i32
    return %c0_i32, %c0_i32_0 : i32, i32
  }
  func.func @transform_4(%arg0: i32) -> (i32, i32, i32, i32) {
    %c0_i32 = arith.constant 0 : i32
    %c0_i32_0 = arith.constant 0 : i32
    %c0_i32_1 = arith.constant 0 : i32
    %c0_i32_2 = arith.constant 0 : i32
    return %arg0, %c0_i32, %c0_i32_0, %c0_i32_1 : i32, i32, i32, i32
  }
}

module attributes {stable_mosaic.version = 11 : i64} {
  func.func @kernel(%arg0: i32, %arg1: memref<1x4x5x5x32xbf16, #tpu.memory_space<vmem>>, %arg2: memref<9x32x32xbf16, #tpu.memory_space<vmem>>, %arg3: memref<1x32x32xbf16, #tpu.memory_space<vmem>>, %arg4: memref<1x32xf32, #tpu.memory_space<vmem>>, %arg5: memref<1x32xf32, #tpu.memory_space<vmem>>, %arg6: memref<1x32xf32, #tpu.memory_space<vmem>>, %arg7: memref<1x32xf32, #tpu.memory_space<vmem>>, %arg8: memref<1x4x4x32xbf16, #tpu.memory_space<vmem>>, %arg9: memref<1x4x4x32xbf16, #tpu.memory_space<vmem>>) attributes {dimension_semantics = [#tpu.dimension_semantics<parallel>], iteration_bounds = array<i64: 2>, scalar_prefetch = 0 : i64, scratch_operands = 0 : i64, tpu.core_type = #tpu.core_type<tc>, window_params = [{transform_indices = @transform_0, window_bounds = array<i64: 1, 4, 5, 5, 32>}, {pipeline_mode = #tpu.pipeline_mode<synchronous>, transform_indices = @transform_1, window_bounds = array<i64: 9, 32, 32>}, {pipeline_mode = #tpu.pipeline_mode<synchronous>, transform_indices = @transform_2, window_bounds = array<i64: 1, 32, 32>}, {pipeline_mode = #tpu.pipeline_mode<synchronous>, transform_indices = @transform_3, window_bounds = array<i64: 1, 32>}, {pipeline_mode = #tpu.pipeline_mode<synchronous>, transform_indices = @transform_4, window_bounds = array<i64: 1, 32>}, {pipeline_mode = #tpu.pipeline_mode<synchronous>, transform_indices = @transform_5, window_bounds = array<i64: 1, 32>}, {pipeline_mode = #tpu.pipeline_mode<synchronous>, transform_indices = @transform_6, window_bounds = array<i64: 1, 32>}, {transform_indices = @transform_7, window_bounds = array<i64: 1, 4, 4, 32>}, {transform_indices = @transform_8, window_bounds = array<i64: 1, 4, 4, 32>}]} {
    %c0_i32 = arith.constant 0 : i32
    %c4_i32 = arith.constant 4 : i32
    %0 = arith.addi %c0_i32, %c4_i32 : i32
    %c1_i32 = arith.constant 1 : i32
    scf.for %arg10 = %c0_i32 to %0 step %c1_i32  : i32 {
      %c1_i32_1 = arith.constant 1 : i32
      %1 = arith.muli %arg10, %c1_i32_1 : i32
      %c0_i32_2 = arith.constant 0 : i32
      %2 = arith.addi %c0_i32_2, %1 : i32
      %cst = arith.constant 0.000000e+00 : f32
      %3 = vector.broadcast %cst : f32 to vector<4x32xf32>
      %c0_i32_3 = arith.constant 0 : i32
      %4 = arith.addi %c0_i32_3, %2 : i32
      %c0 = arith.constant 0 : index
      %c0_4 = arith.constant 0 : index
      %5 = arith.index_cast %4 : i32 to index
      %c0_5 = arith.constant 0 : index
      %c0_6 = arith.constant 0 : index
      %6 = vector.load %arg1[%c0, %c0_4, %5, %c0_5, %c0_6] : memref<1x4x5x5x32xbf16, #tpu.memory_space<vmem>>, vector<1x1x1x4x32xbf16>
      %7 = vector.shape_cast %6 : vector<1x1x1x4x32xbf16> to vector<4x32xbf16>
      %c0_7 = arith.constant 0 : index
      %c0_8 = arith.constant 0 : index
      %c0_9 = arith.constant 0 : index
      %8 = vector.load %arg2[%c0_7, %c0_8, %c0_9] : memref<9x32x32xbf16, #tpu.memory_space<vmem>>, vector<1x32x32xbf16>
      %9 = vector.shape_cast %8 : vector<1x32x32xbf16> to vector<32x32xbf16>
      %cst_10 = arith.constant dense<0.000000e+00> : vector<4x32xf32>
      %10 = tpu.matmul %7, %9, %cst_10 {dimension_numbers = #tpu.dot_dimension_numbers<[1], [0], [0], [1], [0, 0, 1, 1], [], []>} : vector<4x32xbf16>, vector<32x32xbf16>, vector<4x32xf32> -> vector<4x32xf32>
      %11 = arith.addf %3, %10 : vector<4x32xf32>
      %c0_i32_11 = arith.constant 0 : i32
      %12 = arith.addi %c0_i32_11, %2 : i32
      %c0_12 = arith.constant 0 : index
      %c1 = arith.constant 1 : index
      %13 = arith.index_cast %12 : i32 to index
      %c0_13 = arith.constant 0 : index
      %c0_14 = arith.constant 0 : index
      %14 = vector.load %arg1[%c0_12, %c1, %13, %c0_13, %c0_14] : memref<1x4x5x5x32xbf16, #tpu.memory_space<vmem>>, vector<1x1x1x4x32xbf16>
      %15 = vector.shape_cast %14 : vector<1x1x1x4x32xbf16> to vector<4x32xbf16>
      %c1_15 = arith.constant 1 : index
      %c0_16 = arith.constant 0 : index
      %c0_17 = arith.constant 0 : index
      %16 = vector.load %arg2[%c1_15, %c0_16, %c0_17] : memref<9x32x32xbf16, #tpu.memory_space<vmem>>, vector<1x32x32xbf16>
      %17 = vector.shape_cast %16 : vector<1x32x32xbf16> to vector<32x32xbf16>
      %cst_18 = arith.constant dense<0.000000e+00> : vector<4x32xf32>
      %18 = tpu.matmul %15, %17, %cst_18 {dimension_numbers = #tpu.dot_dimension_numbers<[1], [0], [0], [1], [0, 0, 1, 1], [], []>} : vector<4x32xbf16>, vector<32x32xbf16>, vector<4x32xf32> -> vector<4x32xf32>
      %19 = arith.addf %11, %18 : vector<4x32xf32>
      %c0_i32_19 = arith.constant 0 : i32
      %20 = arith.addi %c0_i32_19, %2 : i32
      %c0_20 = arith.constant 0 : index
      %c0_21 = arith.constant 0 : index
      %21 = arith.index_cast %20 : i32 to index
      %c1_22 = arith.constant 1 : index
      %c0_23 = arith.constant 0 : index
      %22 = vector.load %arg1[%c0_20, %c0_21, %21, %c1_22, %c0_23] : memref<1x4x5x5x32xbf16, #tpu.memory_space<vmem>>, vector<1x1x1x4x32xbf16>
      %23 = vector.shape_cast %22 : vector<1x1x1x4x32xbf16> to vector<4x32xbf16>
      %c2 = arith.constant 2 : index
      %c0_24 = arith.constant 0 : index
      %c0_25 = arith.constant 0 : index
      %24 = vector.load %arg2[%c2, %c0_24, %c0_25] : memref<9x32x32xbf16, #tpu.memory_space<vmem>>, vector<1x32x32xbf16>
      %25 = vector.shape_cast %24 : vector<1x32x32xbf16> to vector<32x32xbf16>
      %cst_26 = arith.constant dense<0.000000e+00> : vector<4x32xf32>
      %26 = tpu.matmul %23, %25, %cst_26 {dimension_numbers = #tpu.dot_dimension_numbers<[1], [0], [0], [1], [0, 0, 1, 1], [], []>} : vector<4x32xbf16>, vector<32x32xbf16>, vector<4x32xf32> -> vector<4x32xf32>
      %27 = arith.addf %19, %26 : vector<4x32xf32>
      %c0_i32_27 = arith.constant 0 : i32
      %28 = arith.addi %c0_i32_27, %2 : i32
      %c0_28 = arith.constant 0 : index
      %c2_29 = arith.constant 2 : index
      %29 = arith.index_cast %28 : i32 to index
      %c0_30 = arith.constant 0 : index
      %c0_31 = arith.constant 0 : index
      %30 = vector.load %arg1[%c0_28, %c2_29, %29, %c0_30, %c0_31] : memref<1x4x5x5x32xbf16, #tpu.memory_space<vmem>>, vector<1x1x1x4x32xbf16>
      %31 = vector.shape_cast %30 : vector<1x1x1x4x32xbf16> to vector<4x32xbf16>
      %c3 = arith.constant 3 : index
      %c0_32 = arith.constant 0 : index
      %c0_33 = arith.constant 0 : index
      %32 = vector.load %arg2[%c3, %c0_32, %c0_33] : memref<9x32x32xbf16, #tpu.memory_space<vmem>>, vector<1x32x32xbf16>
      %33 = vector.shape_cast %32 : vector<1x32x32xbf16> to vector<32x32xbf16>
      %cst_34 = arith.constant dense<0.000000e+00> : vector<4x32xf32>
      %34 = tpu.matmul %31, %33, %cst_34 {dimension_numbers = #tpu.dot_dimension_numbers<[1], [0], [0], [1], [0, 0, 1, 1], [], []>} : vector<4x32xbf16>, vector<32x32xbf16>, vector<4x32xf32> -> vector<4x32xf32>
      %35 = arith.addf %27, %34 : vector<4x32xf32>
      %c0_i32_35 = arith.constant 0 : i32
      %36 = arith.addi %c0_i32_35, %2 : i32
      %c0_36 = arith.constant 0 : index
      %c3_37 = arith.constant 3 : index
      %37 = arith.index_cast %36 : i32 to index
      %c0_38 = arith.constant 0 : index
      %c0_39 = arith.constant 0 : index
      %38 = vector.load %arg1[%c0_36, %c3_37, %37, %c0_38, %c0_39] : memref<1x4x5x5x32xbf16, #tpu.memory_space<vmem>>, vector<1x1x1x4x32xbf16>
      %39 = vector.shape_cast %38 : vector<1x1x1x4x32xbf16> to vector<4x32xbf16>
      %c4 = arith.constant 4 : index
      %c0_40 = arith.constant 0 : index
      %c0_41 = arith.constant 0 : index
      %40 = vector.load %arg2[%c4, %c0_40, %c0_41] : memref<9x32x32xbf16, #tpu.memory_space<vmem>>, vector<1x32x32xbf16>
      %41 = vector.shape_cast %40 : vector<1x32x32xbf16> to vector<32x32xbf16>
      %cst_42 = arith.constant dense<0.000000e+00> : vector<4x32xf32>
      %42 = tpu.matmul %39, %41, %cst_42 {dimension_numbers = #tpu.dot_dimension_numbers<[1], [0], [0], [1], [0, 0, 1, 1], [], []>} : vector<4x32xbf16>, vector<32x32xbf16>, vector<4x32xf32> -> vector<4x32xf32>
      %43 = arith.addf %35, %42 : vector<4x32xf32>
      %c0_43 = arith.constant 0 : index
      %c0_44 = arith.constant 0 : index
      %c0_45 = arith.constant 0 : index
      %44 = vector.load %arg3[%c0_43, %c0_44, %c0_45] : memref<1x32x32xbf16, #tpu.memory_space<vmem>>, vector<1x32x32xbf16>
      %45 = vector.shape_cast %44 : vector<1x32x32xbf16> to vector<32x32xbf16>
      %cst_46 = arith.constant dense<0.000000e+00> : vector<4x32xf32>
      %46 = tpu.matmul %39, %45, %cst_46 {dimension_numbers = #tpu.dot_dimension_numbers<[1], [0], [0], [1], [0, 0, 1, 1], [], []>} : vector<4x32xbf16>, vector<32x32xbf16>, vector<4x32xf32> -> vector<4x32xf32>
      %c0_i32_47 = arith.constant 0 : i32
      %47 = arith.addi %c0_i32_47, %2 : i32
      %c0_48 = arith.constant 0 : index
      %c2_49 = arith.constant 2 : index
      %48 = arith.index_cast %47 : i32 to index
      %c1_50 = arith.constant 1 : index
      %c0_51 = arith.constant 0 : index
      %49 = vector.load %arg1[%c0_48, %c2_49, %48, %c1_50, %c0_51] : memref<1x4x5x5x32xbf16, #tpu.memory_space<vmem>>, vector<1x1x1x4x32xbf16>
      %50 = vector.shape_cast %49 : vector<1x1x1x4x32xbf16> to vector<4x32xbf16>
      %c5 = arith.constant 5 : index
      %c0_52 = arith.constant 0 : index
      %c0_53 = arith.constant 0 : index
      %51 = vector.load %arg2[%c5, %c0_52, %c0_53] : memref<9x32x32xbf16, #tpu.memory_space<vmem>>, vector<1x32x32xbf16>
      %52 = vector.shape_cast %51 : vector<1x32x32xbf16> to vector<32x32xbf16>
      %cst_54 = arith.constant dense<0.000000e+00> : vector<4x32xf32>
      %53 = tpu.matmul %50, %52, %cst_54 {dimension_numbers = #tpu.dot_dimension_numbers<[1], [0], [0], [1], [0, 0, 1, 1], [], []>} : vector<4x32xbf16>, vector<32x32xbf16>, vector<4x32xf32> -> vector<4x32xf32>
      %54 = arith.addf %43, %53 : vector<4x32xf32>
      %c1_i32_55 = arith.constant 1 : i32
      %55 = arith.addi %c1_i32_55, %2 : i32
      %c0_56 = arith.constant 0 : index
      %c0_57 = arith.constant 0 : index
      %56 = arith.index_cast %55 : i32 to index
      %c0_58 = arith.constant 0 : index
      %c0_59 = arith.constant 0 : index
      %57 = vector.load %arg1[%c0_56, %c0_57, %56, %c0_58, %c0_59] : memref<1x4x5x5x32xbf16, #tpu.memory_space<vmem>>, vector<1x1x1x4x32xbf16>
      %58 = vector.shape_cast %57 : vector<1x1x1x4x32xbf16> to vector<4x32xbf16>
      %c6 = arith.constant 6 : index
      %c0_60 = arith.constant 0 : index
      %c0_61 = arith.constant 0 : index
      %59 = vector.load %arg2[%c6, %c0_60, %c0_61] : memref<9x32x32xbf16, #tpu.memory_space<vmem>>, vector<1x32x32xbf16>
      %60 = vector.shape_cast %59 : vector<1x32x32xbf16> to vector<32x32xbf16>
      %cst_62 = arith.constant dense<0.000000e+00> : vector<4x32xf32>
      %61 = tpu.matmul %58, %60, %cst_62 {dimension_numbers = #tpu.dot_dimension_numbers<[1], [0], [0], [1], [0, 0, 1, 1], [], []>} : vector<4x32xbf16>, vector<32x32xbf16>, vector<4x32xf32> -> vector<4x32xf32>
      %62 = arith.addf %54, %61 : vector<4x32xf32>
      %c1_i32_63 = arith.constant 1 : i32
      %63 = arith.addi %c1_i32_63, %2 : i32
      %c0_64 = arith.constant 0 : index
      %c1_65 = arith.constant 1 : index
      %64 = arith.index_cast %63 : i32 to index
      %c0_66 = arith.constant 0 : index
      %c0_67 = arith.constant 0 : index
      %65 = vector.load %arg1[%c0_64, %c1_65, %64, %c0_66, %c0_67] : memref<1x4x5x5x32xbf16, #tpu.memory_space<vmem>>, vector<1x1x1x4x32xbf16>
      %66 = vector.shape_cast %65 : vector<1x1x1x4x32xbf16> to vector<4x32xbf16>
      %c7 = arith.constant 7 : index
      %c0_68 = arith.constant 0 : index
      %c0_69 = arith.constant 0 : index
      %67 = vector.load %arg2[%c7, %c0_68, %c0_69] : memref<9x32x32xbf16, #tpu.memory_space<vmem>>, vector<1x32x32xbf16>
      %68 = vector.shape_cast %67 : vector<1x32x32xbf16> to vector<32x32xbf16>
      %cst_70 = arith.constant dense<0.000000e+00> : vector<4x32xf32>
      %69 = tpu.matmul %66, %68, %cst_70 {dimension_numbers = #tpu.dot_dimension_numbers<[1], [0], [0], [1], [0, 0, 1, 1], [], []>} : vector<4x32xbf16>, vector<32x32xbf16>, vector<4x32xf32> -> vector<4x32xf32>
      %70 = arith.addf %62, %69 : vector<4x32xf32>
      %c1_i32_71 = arith.constant 1 : i32
      %71 = arith.addi %c1_i32_71, %2 : i32
      %c0_72 = arith.constant 0 : index
      %c0_73 = arith.constant 0 : index
      %72 = arith.index_cast %71 : i32 to index
      %c1_74 = arith.constant 1 : index
      %c0_75 = arith.constant 0 : index
      %73 = vector.load %arg1[%c0_72, %c0_73, %72, %c1_74, %c0_75] : memref<1x4x5x5x32xbf16, #tpu.memory_space<vmem>>, vector<1x1x1x4x32xbf16>
      %74 = vector.shape_cast %73 : vector<1x1x1x4x32xbf16> to vector<4x32xbf16>
      %c8 = arith.constant 8 : index
      %c0_76 = arith.constant 0 : index
      %c0_77 = arith.constant 0 : index
      %75 = vector.load %arg2[%c8, %c0_76, %c0_77] : memref<9x32x32xbf16, #tpu.memory_space<vmem>>, vector<1x32x32xbf16>
      %76 = vector.shape_cast %75 : vector<1x32x32xbf16> to vector<32x32xbf16>
      %cst_78 = arith.constant dense<0.000000e+00> : vector<4x32xf32>
      %77 = tpu.matmul %74, %76, %cst_78 {dimension_numbers = #tpu.dot_dimension_numbers<[1], [0], [0], [1], [0, 0, 1, 1], [], []>} : vector<4x32xbf16>, vector<32x32xbf16>, vector<4x32xf32> -> vector<4x32xf32>
      %78 = arith.addf %70, %77 : vector<4x32xf32>
      %c0_79 = arith.constant 0 : index
      %c0_80 = arith.constant 0 : index
      %79 = vector.load %arg4[%c0_79, %c0_80] : memref<1x32xf32, #tpu.memory_space<vmem>>, vector<1x32xf32>
      %80 = vector.broadcast %79 : vector<1x32xf32> to vector<4x32xf32>
      %81 = arith.mulf %78, %80 : vector<4x32xf32>
      %c0_81 = arith.constant 0 : index
      %c0_82 = arith.constant 0 : index
      %82 = vector.load %arg5[%c0_81, %c0_82] : memref<1x32xf32, #tpu.memory_space<vmem>>, vector<1x32xf32>
      %83 = vector.broadcast %82 : vector<1x32xf32> to vector<4x32xf32>
      %84 = arith.addf %81, %83 : vector<4x32xf32>
      %cst_83 = arith.constant 0.000000e+00 : f32
      %85 = vector.broadcast %cst_83 : f32 to vector<4x32xf32>
      %86 = arith.maximumf %84, %85 : vector<4x32xf32>
      %87 = arith.truncf %86 : vector<4x32xf32> to vector<4x32xbf16>
      %c0_84 = arith.constant 0 : index
      %88 = arith.index_cast %2 : i32 to index
      %c0_85 = arith.constant 0 : index
      %c0_86 = arith.constant 0 : index
      %89 = vector.load %arg8[%c0_84, %88, %c0_85, %c0_86] : memref<1x4x4x32xbf16, #tpu.memory_space<vmem>>, vector<1x1x4x32xbf16>
      %90 = vector.shape_cast %89 : vector<1x1x4x32xbf16> to vector<4x32xbf16>
      %91 = vector.shape_cast %87 : vector<4x32xbf16> to vector<1x1x4x32xbf16>
      tpu.vector_store %arg8[%c0_84, %88, %c0_85, %c0_86], %91 {strides = array<i32>} : memref<1x4x4x32xbf16, #tpu.memory_space<vmem>>, vector<1x1x4x32xbf16>,
      %c0_87 = arith.constant 0 : index
      %c0_88 = arith.constant 0 : index
      %92 = vector.load %arg6[%c0_87, %c0_88] : memref<1x32xf32, #tpu.memory_space<vmem>>, vector<1x32xf32>
      %93 = vector.broadcast %92 : vector<1x32xf32> to vector<4x32xf32>
      %94 = arith.mulf %46, %93 : vector<4x32xf32>
      %c0_89 = arith.constant 0 : index
      %c0_90 = arith.constant 0 : index
      %95 = vector.load %arg7[%c0_89, %c0_90] : memref<1x32xf32, #tpu.memory_space<vmem>>, vector<1x32xf32>
      %96 = vector.broadcast %95 : vector<1x32xf32> to vector<4x32xf32>
      %97 = arith.addf %94, %96 : vector<4x32xf32>
      %98 = arith.truncf %97 : vector<4x32xf32> to vector<4x32xbf16>
      %c0_91 = arith.constant 0 : index
      %99 = arith.index_cast %2 : i32 to index
      %c0_92 = arith.constant 0 : index
      %c0_93 = arith.constant 0 : index
      %100 = vector.load %arg9[%c0_91, %99, %c0_92, %c0_93] : memref<1x4x4x32xbf16, #tpu.memory_space<vmem>>, vector<1x1x4x32xbf16>
      %101 = vector.shape_cast %100 : vector<1x1x4x32xbf16> to vector<4x32xbf16>
      %102 = vector.shape_cast %98 : vector<4x32xbf16> to vector<1x1x4x32xbf16>
      tpu.vector_store %arg9[%c0_91, %99, %c0_92, %c0_93], %102 {strides = array<i32>} : memref<1x4x4x32xbf16, #tpu.memory_space<vmem>>, vector<1x1x4x32xbf16>,
    }
    %c4_i32_0 = arith.constant 4 : i32
    return
  }
  func.func @transform_0(%arg0: i32) -> (i32, i32, i32, i32, i32) {
    %c0_i32 = arith.constant 0 : i32
    %c0_i32_0 = arith.constant 0 : i32
    %c0_i32_1 = arith.constant 0 : i32
    %c0_i32_2 = arith.constant 0 : i32
    %c0_i32_3 = arith.constant 0 : i32
    return %arg0, %c0_i32, %c0_i32_0, %c0_i32_1, %c0_i32_2 : i32, i32, i32, i32, i32
  }
  func.func @transform_1(%arg0: i32) -> (i32, i32, i32) {
    %c0_i32 = arith.constant 0 : i32
    %c0_i32_0 = arith.constant 0 : i32
    %c0_i32_1 = arith.constant 0 : i32
    %c0_i32_2 = arith.constant 0 : i32
    return %c0_i32, %c0_i32_0, %c0_i32_1 : i32, i32, i32
  }
  func.func @transform_2(%arg0: i32) -> (i32, i32, i32) {
    %c0_i32 = arith.constant 0 : i32
    %c0_i32_0 = arith.constant 0 : i32
    %c0_i32_1 = arith.constant 0 : i32
    %c0_i32_2 = arith.constant 0 : i32
    return %c0_i32, %c0_i32_0, %c0_i32_1 : i32, i32, i32
  }
  func.func @transform_3(%arg0: i32) -> (i32, i32) {
    %c0_i32 = arith.constant 0 : i32
    %c0_i32_0 = arith.constant 0 : i32
    %c0_i32_1 = arith.constant 0 : i32
    return %c0_i32, %c0_i32_0 : i32, i32
  }
  func.func @transform_4(%arg0: i32) -> (i32, i32) {
    %c0_i32 = arith.constant 0 : i32
    %c0_i32_0 = arith.constant 0 : i32
    %c0_i32_1 = arith.constant 0 : i32
    return %c0_i32, %c0_i32_0 : i32, i32
  }
  func.func @transform_5(%arg0: i32) -> (i32, i32) {
    %c0_i32 = arith.constant 0 : i32
    %c0_i32_0 = arith.constant 0 : i32
    %c0_i32_1 = arith.constant 0 : i32
    return %c0_i32, %c0_i32_0 : i32, i32
  }
  func.func @transform_6(%arg0: i32) -> (i32, i32) {
    %c0_i32 = arith.constant 0 : i32
    %c0_i32_0 = arith.constant 0 : i32
    %c0_i32_1 = arith.constant 0 : i32
    return %c0_i32, %c0_i32_0 : i32, i32
  }
  func.func @transform_7(%arg0: i32) -> (i32, i32, i32, i32) {
    %c0_i32 = arith.constant 0 : i32
    %c0_i32_0 = arith.constant 0 : i32
    %c0_i32_1 = arith.constant 0 : i32
    %c0_i32_2 = arith.constant 0 : i32
    return %arg0, %c0_i32, %c0_i32_0, %c0_i32_1 : i32, i32, i32, i32
  }
  func.func @transform_8(%arg0: i32) -> (i32, i32, i32, i32) {
    %c0_i32 = arith.constant 0 : i32
    %c0_i32_0 = arith.constant 0 : i32
    %c0_i32_1 = arith.constant 0 : i32
    %c0_i32_2 = arith.constant 0 : i32
    return %arg0, %c0_i32, %c0_i32_0, %c0_i32_1 : i32, i32, i32, i32
  }
}

module attributes {stable_mosaic.version = 11 : i64} {
  func.func @kernel(%arg0: i32, %arg1: memref<1x1x6x6x32xbf16, #tpu.memory_space<vmem>>, %arg2: memref<9x32x32xbf16, #tpu.memory_space<vmem>>, %arg3: memref<1x32xf32, #tpu.memory_space<vmem>>, %arg4: memref<1x32xf32, #tpu.memory_space<vmem>>, %arg5: memref<1x4x4x32xbf16, #tpu.memory_space<vmem>>, %arg6: memref<1x4x4x32xbf16, #tpu.memory_space<vmem>>) attributes {dimension_semantics = [#tpu.dimension_semantics<parallel>], iteration_bounds = array<i64: 2>, scalar_prefetch = 0 : i64, scratch_operands = 0 : i64, tpu.core_type = #tpu.core_type<tc>, window_params = [{transform_indices = @transform_0, window_bounds = array<i64: 1, 1, 6, 6, 32>}, {pipeline_mode = #tpu.pipeline_mode<synchronous>, transform_indices = @transform_1, window_bounds = array<i64: 9, 32, 32>}, {pipeline_mode = #tpu.pipeline_mode<synchronous>, transform_indices = @transform_2, window_bounds = array<i64: 1, 32>}, {pipeline_mode = #tpu.pipeline_mode<synchronous>, transform_indices = @transform_3, window_bounds = array<i64: 1, 32>}, {transform_indices = @transform_4, window_bounds = array<i64: 1, 4, 4, 32>}, {transform_indices = @transform_5, window_bounds = array<i64: 1, 4, 4, 32>}]} {
    %c0_i32 = arith.constant 0 : i32
    %c4_i32 = arith.constant 4 : i32
    %0 = arith.addi %c0_i32, %c4_i32 : i32
    %c1_i32 = arith.constant 1 : i32
    scf.for %arg7 = %c0_i32 to %0 step %c1_i32  : i32 {
      %c1_i32_1 = arith.constant 1 : i32
      %1 = arith.muli %arg7, %c1_i32_1 : i32
      %c0_i32_2 = arith.constant 0 : i32
      %2 = arith.addi %c0_i32_2, %1 : i32
      %cst = arith.constant 0.000000e+00 : f32
      %3 = vector.broadcast %cst : f32 to vector<4x32xf32>
      %c0_i32_3 = arith.constant 0 : i32
      %4 = arith.addi %c0_i32_3, %2 : i32
      %c0 = arith.constant 0 : index
      %c0_4 = arith.constant 0 : index
      %5 = arith.index_cast %4 : i32 to index
      %c0_5 = arith.constant 0 : index
      %c0_6 = arith.constant 0 : index
      %6 = vector.load %arg1[%c0, %c0_4, %5, %c0_5, %c0_6] : memref<1x1x6x6x32xbf16, #tpu.memory_space<vmem>>, vector<1x1x1x4x32xbf16>
      %7 = vector.shape_cast %6 : vector<1x1x1x4x32xbf16> to vector<4x32xbf16>
      %c0_7 = arith.constant 0 : index
      %c0_8 = arith.constant 0 : index
      %c0_9 = arith.constant 0 : index
      %8 = vector.load %arg2[%c0_7, %c0_8, %c0_9] : memref<9x32x32xbf16, #tpu.memory_space<vmem>>, vector<1x32x32xbf16>
      %9 = vector.shape_cast %8 : vector<1x32x32xbf16> to vector<32x32xbf16>
      %cst_10 = arith.constant dense<0.000000e+00> : vector<4x32xf32>
      %10 = tpu.matmul %7, %9, %cst_10 {dimension_numbers = #tpu.dot_dimension_numbers<[1], [0], [0], [1], [0, 0, 1, 1], [], []>} : vector<4x32xbf16>, vector<32x32xbf16>, vector<4x32xf32> -> vector<4x32xf32>
      %11 = arith.addf %3, %10 : vector<4x32xf32>
      %c0_i32_11 = arith.constant 0 : i32
      %12 = arith.addi %c0_i32_11, %2 : i32
      %c0_12 = arith.constant 0 : index
      %c0_13 = arith.constant 0 : index
      %13 = arith.index_cast %12 : i32 to index
      %c1 = arith.constant 1 : index
      %c0_14 = arith.constant 0 : index
      %14 = vector.load %arg1[%c0_12, %c0_13, %13, %c1, %c0_14] : memref<1x1x6x6x32xbf16, #tpu.memory_space<vmem>>, vector<1x1x1x4x32xbf16>
      %15 = vector.shape_cast %14 : vector<1x1x1x4x32xbf16> to vector<4x32xbf16>
      %c1_15 = arith.constant 1 : index
      %c0_16 = arith.constant 0 : index
      %c0_17 = arith.constant 0 : index
      %16 = vector.load %arg2[%c1_15, %c0_16, %c0_17] : memref<9x32x32xbf16, #tpu.memory_space<vmem>>, vector<1x32x32xbf16>
      %17 = vector.shape_cast %16 : vector<1x32x32xbf16> to vector<32x32xbf16>
      %cst_18 = arith.constant dense<0.000000e+00> : vector<4x32xf32>
      %18 = tpu.matmul %15, %17, %cst_18 {dimension_numbers = #tpu.dot_dimension_numbers<[1], [0], [0], [1], [0, 0, 1, 1], [], []>} : vector<4x32xbf16>, vector<32x32xbf16>, vector<4x32xf32> -> vector<4x32xf32>
      %19 = arith.addf %11, %18 : vector<4x32xf32>
      %c0_i32_19 = arith.constant 0 : i32
      %20 = arith.addi %c0_i32_19, %2 : i32
      %c0_20 = arith.constant 0 : index
      %c0_21 = arith.constant 0 : index
      %21 = arith.index_cast %20 : i32 to index
      %c2 = arith.constant 2 : index
      %c0_22 = arith.constant 0 : index
      %22 = vector.load %arg1[%c0_20, %c0_21, %21, %c2, %c0_22] : memref<1x1x6x6x32xbf16, #tpu.memory_space<vmem>>, vector<1x1x1x4x32xbf16>
      %23 = vector.shape_cast %22 : vector<1x1x1x4x32xbf16> to vector<4x32xbf16>
      %c2_23 = arith.constant 2 : index
      %c0_24 = arith.constant 0 : index
      %c0_25 = arith.constant 0 : index
      %24 = vector.load %arg2[%c2_23, %c0_24, %c0_25] : memref<9x32x32xbf16, #tpu.memory_space<vmem>>, vector<1x32x32xbf16>
      %25 = vector.shape_cast %24 : vector<1x32x32xbf16> to vector<32x32xbf16>
      %cst_26 = arith.constant dense<0.000000e+00> : vector<4x32xf32>
      %26 = tpu.matmul %23, %25, %cst_26 {dimension_numbers = #tpu.dot_dimension_numbers<[1], [0], [0], [1], [0, 0, 1, 1], [], []>} : vector<4x32xbf16>, vector<32x32xbf16>, vector<4x32xf32> -> vector<4x32xf32>
      %27 = arith.addf %19, %26 : vector<4x32xf32>
      %c1_i32_27 = arith.constant 1 : i32
      %28 = arith.addi %c1_i32_27, %2 : i32
      %c0_28 = arith.constant 0 : index
      %c0_29 = arith.constant 0 : index
      %29 = arith.index_cast %28 : i32 to index
      %c0_30 = arith.constant 0 : index
      %c0_31 = arith.constant 0 : index
      %30 = vector.load %arg1[%c0_28, %c0_29, %29, %c0_30, %c0_31] : memref<1x1x6x6x32xbf16, #tpu.memory_space<vmem>>, vector<1x1x1x4x32xbf16>
      %31 = vector.shape_cast %30 : vector<1x1x1x4x32xbf16> to vector<4x32xbf16>
      %c3 = arith.constant 3 : index
      %c0_32 = arith.constant 0 : index
      %c0_33 = arith.constant 0 : index
      %32 = vector.load %arg2[%c3, %c0_32, %c0_33] : memref<9x32x32xbf16, #tpu.memory_space<vmem>>, vector<1x32x32xbf16>
      %33 = vector.shape_cast %32 : vector<1x32x32xbf16> to vector<32x32xbf16>
      %cst_34 = arith.constant dense<0.000000e+00> : vector<4x32xf32>
      %34 = tpu.matmul %31, %33, %cst_34 {dimension_numbers = #tpu.dot_dimension_numbers<[1], [0], [0], [1], [0, 0, 1, 1], [], []>} : vector<4x32xbf16>, vector<32x32xbf16>, vector<4x32xf32> -> vector<4x32xf32>
      %35 = arith.addf %27, %34 : vector<4x32xf32>
      %c1_i32_35 = arith.constant 1 : i32
      %36 = arith.addi %c1_i32_35, %2 : i32
      %c0_36 = arith.constant 0 : index
      %c0_37 = arith.constant 0 : index
      %37 = arith.index_cast %36 : i32 to index
      %c1_38 = arith.constant 1 : index
      %c0_39 = arith.constant 0 : index
      %38 = vector.load %arg1[%c0_36, %c0_37, %37, %c1_38, %c0_39] : memref<1x1x6x6x32xbf16, #tpu.memory_space<vmem>>, vector<1x1x1x4x32xbf16>
      %39 = vector.shape_cast %38 : vector<1x1x1x4x32xbf16> to vector<4x32xbf16>
      %c4 = arith.constant 4 : index
      %c0_40 = arith.constant 0 : index
      %c0_41 = arith.constant 0 : index
      %40 = vector.load %arg2[%c4, %c0_40, %c0_41] : memref<9x32x32xbf16, #tpu.memory_space<vmem>>, vector<1x32x32xbf16>
      %41 = vector.shape_cast %40 : vector<1x32x32xbf16> to vector<32x32xbf16>
      %cst_42 = arith.constant dense<0.000000e+00> : vector<4x32xf32>
      %42 = tpu.matmul %39, %41, %cst_42 {dimension_numbers = #tpu.dot_dimension_numbers<[1], [0], [0], [1], [0, 0, 1, 1], [], []>} : vector<4x32xbf16>, vector<32x32xbf16>, vector<4x32xf32> -> vector<4x32xf32>
      %43 = arith.addf %35, %42 : vector<4x32xf32>
      %c1_i32_43 = arith.constant 1 : i32
      %44 = arith.addi %c1_i32_43, %2 : i32
      %c0_44 = arith.constant 0 : index
      %c0_45 = arith.constant 0 : index
      %45 = arith.index_cast %44 : i32 to index
      %c2_46 = arith.constant 2 : index
      %c0_47 = arith.constant 0 : index
      %46 = vector.load %arg1[%c0_44, %c0_45, %45, %c2_46, %c0_47] : memref<1x1x6x6x32xbf16, #tpu.memory_space<vmem>>, vector<1x1x1x4x32xbf16>
      %47 = vector.shape_cast %46 : vector<1x1x1x4x32xbf16> to vector<4x32xbf16>
      %c5 = arith.constant 5 : index
      %c0_48 = arith.constant 0 : index
      %c0_49 = arith.constant 0 : index
      %48 = vector.load %arg2[%c5, %c0_48, %c0_49] : memref<9x32x32xbf16, #tpu.memory_space<vmem>>, vector<1x32x32xbf16>
      %49 = vector.shape_cast %48 : vector<1x32x32xbf16> to vector<32x32xbf16>
      %cst_50 = arith.constant dense<0.000000e+00> : vector<4x32xf32>
      %50 = tpu.matmul %47, %49, %cst_50 {dimension_numbers = #tpu.dot_dimension_numbers<[1], [0], [0], [1], [0, 0, 1, 1], [], []>} : vector<4x32xbf16>, vector<32x32xbf16>, vector<4x32xf32> -> vector<4x32xf32>
      %51 = arith.addf %43, %50 : vector<4x32xf32>
      %c2_i32 = arith.constant 2 : i32
      %52 = arith.addi %c2_i32, %2 : i32
      %c0_51 = arith.constant 0 : index
      %c0_52 = arith.constant 0 : index
      %53 = arith.index_cast %52 : i32 to index
      %c0_53 = arith.constant 0 : index
      %c0_54 = arith.constant 0 : index
      %54 = vector.load %arg1[%c0_51, %c0_52, %53, %c0_53, %c0_54] : memref<1x1x6x6x32xbf16, #tpu.memory_space<vmem>>, vector<1x1x1x4x32xbf16>
      %55 = vector.shape_cast %54 : vector<1x1x1x4x32xbf16> to vector<4x32xbf16>
      %c6 = arith.constant 6 : index
      %c0_55 = arith.constant 0 : index
      %c0_56 = arith.constant 0 : index
      %56 = vector.load %arg2[%c6, %c0_55, %c0_56] : memref<9x32x32xbf16, #tpu.memory_space<vmem>>, vector<1x32x32xbf16>
      %57 = vector.shape_cast %56 : vector<1x32x32xbf16> to vector<32x32xbf16>
      %cst_57 = arith.constant dense<0.000000e+00> : vector<4x32xf32>
      %58 = tpu.matmul %55, %57, %cst_57 {dimension_numbers = #tpu.dot_dimension_numbers<[1], [0], [0], [1], [0, 0, 1, 1], [], []>} : vector<4x32xbf16>, vector<32x32xbf16>, vector<4x32xf32> -> vector<4x32xf32>
      %59 = arith.addf %51, %58 : vector<4x32xf32>
      %c2_i32_58 = arith.constant 2 : i32
      %60 = arith.addi %c2_i32_58, %2 : i32
      %c0_59 = arith.constant 0 : index
      %c0_60 = arith.constant 0 : index
      %61 = arith.index_cast %60 : i32 to index
      %c1_61 = arith.constant 1 : index
      %c0_62 = arith.constant 0 : index
      %62 = vector.load %arg1[%c0_59, %c0_60, %61, %c1_61, %c0_62] : memref<1x1x6x6x32xbf16, #tpu.memory_space<vmem>>, vector<1x1x1x4x32xbf16>
      %63 = vector.shape_cast %62 : vector<1x1x1x4x32xbf16> to vector<4x32xbf16>
      %c7 = arith.constant 7 : index
      %c0_63 = arith.constant 0 : index
      %c0_64 = arith.constant 0 : index
      %64 = vector.load %arg2[%c7, %c0_63, %c0_64] : memref<9x32x32xbf16, #tpu.memory_space<vmem>>, vector<1x32x32xbf16>
      %65 = vector.shape_cast %64 : vector<1x32x32xbf16> to vector<32x32xbf16>
      %cst_65 = arith.constant dense<0.000000e+00> : vector<4x32xf32>
      %66 = tpu.matmul %63, %65, %cst_65 {dimension_numbers = #tpu.dot_dimension_numbers<[1], [0], [0], [1], [0, 0, 1, 1], [], []>} : vector<4x32xbf16>, vector<32x32xbf16>, vector<4x32xf32> -> vector<4x32xf32>
      %67 = arith.addf %59, %66 : vector<4x32xf32>
      %c2_i32_66 = arith.constant 2 : i32
      %68 = arith.addi %c2_i32_66, %2 : i32
      %c0_67 = arith.constant 0 : index
      %c0_68 = arith.constant 0 : index
      %69 = arith.index_cast %68 : i32 to index
      %c2_69 = arith.constant 2 : index
      %c0_70 = arith.constant 0 : index
      %70 = vector.load %arg1[%c0_67, %c0_68, %69, %c2_69, %c0_70] : memref<1x1x6x6x32xbf16, #tpu.memory_space<vmem>>, vector<1x1x1x4x32xbf16>
      %71 = vector.shape_cast %70 : vector<1x1x1x4x32xbf16> to vector<4x32xbf16>
      %c8 = arith.constant 8 : index
      %c0_71 = arith.constant 0 : index
      %c0_72 = arith.constant 0 : index
      %72 = vector.load %arg2[%c8, %c0_71, %c0_72] : memref<9x32x32xbf16, #tpu.memory_space<vmem>>, vector<1x32x32xbf16>
      %73 = vector.shape_cast %72 : vector<1x32x32xbf16> to vector<32x32xbf16>
      %cst_73 = arith.constant dense<0.000000e+00> : vector<4x32xf32>
      %74 = tpu.matmul %71, %73, %cst_73 {dimension_numbers = #tpu.dot_dimension_numbers<[1], [0], [0], [1], [0, 0, 1, 1], [], []>} : vector<4x32xbf16>, vector<32x32xbf16>, vector<4x32xf32> -> vector<4x32xf32>
      %75 = arith.addf %67, %74 : vector<4x32xf32>
      %c0_74 = arith.constant 0 : index
      %c0_75 = arith.constant 0 : index
      %76 = vector.load %arg3[%c0_74, %c0_75] : memref<1x32xf32, #tpu.memory_space<vmem>>, vector<1x32xf32>
      %77 = vector.broadcast %76 : vector<1x32xf32> to vector<4x32xf32>
      %78 = arith.mulf %75, %77 : vector<4x32xf32>
      %c0_76 = arith.constant 0 : index
      %c0_77 = arith.constant 0 : index
      %79 = vector.load %arg4[%c0_76, %c0_77] : memref<1x32xf32, #tpu.memory_space<vmem>>, vector<1x32xf32>
      %80 = vector.broadcast %79 : vector<1x32xf32> to vector<4x32xf32>
      %81 = arith.addf %78, %80 : vector<4x32xf32>
      %cst_78 = arith.constant 0.000000e+00 : f32
      %82 = vector.broadcast %cst_78 : f32 to vector<4x32xf32>
      %83 = arith.maximumf %81, %82 : vector<4x32xf32>
      %c0_79 = arith.constant 0 : index
      %84 = arith.index_cast %2 : i32 to index
      %c0_80 = arith.constant 0 : index
      %c0_81 = arith.constant 0 : index
      %85 = vector.load %arg5[%c0_79, %84, %c0_80, %c0_81] : memref<1x4x4x32xbf16, #tpu.memory_space<vmem>>, vector<1x1x4x32xbf16>
      %86 = vector.shape_cast %85 : vector<1x1x4x32xbf16> to vector<4x32xbf16>
      %87 = arith.extf %86 : vector<4x32xbf16> to vector<4x32xf32>
      %88 = arith.addf %83, %87 : vector<4x32xf32>
      %89 = arith.truncf %88 : vector<4x32xf32> to vector<4x32xbf16>
      %c0_82 = arith.constant 0 : index
      %90 = arith.index_cast %2 : i32 to index
      %c0_83 = arith.constant 0 : index
      %c0_84 = arith.constant 0 : index
      %91 = vector.load %arg6[%c0_82, %90, %c0_83, %c0_84] : memref<1x4x4x32xbf16, #tpu.memory_space<vmem>>, vector<1x1x4x32xbf16>
      %92 = vector.shape_cast %91 : vector<1x1x4x32xbf16> to vector<4x32xbf16>
      %93 = vector.shape_cast %89 : vector<4x32xbf16> to vector<1x1x4x32xbf16>
      tpu.vector_store %arg6[%c0_82, %90, %c0_83, %c0_84], %93 {strides = array<i32>} : memref<1x4x4x32xbf16, #tpu.memory_space<vmem>>, vector<1x1x4x32xbf16>,
    }
    %c4_i32_0 = arith.constant 4 : i32
    return
  }
  func.func @transform_0(%arg0: i32) -> (i32, i32, i32, i32, i32) {
    %c0_i32 = arith.constant 0 : i32
    %c0_i32_0 = arith.constant 0 : i32
    %c0_i32_1 = arith.constant 0 : i32
    %c0_i32_2 = arith.constant 0 : i32
    %c0_i32_3 = arith.constant 0 : i32
    return %arg0, %c0_i32, %c0_i32_0, %c0_i32_1, %c0_i32_2 : i32, i32, i32, i32, i32
  }
  func.func @transform_1(%arg0: i32) -> (i32, i32, i32) {
    %c0_i32 = arith.constant 0 : i32
    %c0_i32_0 = arith.constant 0 : i32
    %c0_i32_1 = arith.constant 0 : i32
    %c0_i32_2 = arith.constant 0 : i32
    return %c0_i32, %c0_i32_0, %c0_i32_1 : i32, i32, i32
  }
  func.func @transform_2(%arg0: i32) -> (i32, i32) {
    %c0_i32 = arith.constant 0 : i32
    %c0_i32_0 = arith.constant 0 : i32
    %c0_i32_1 = arith.constant 0 : i32
    return %c0_i32, %c0_i32_0 : i32, i32
  }
  func.func @transform_3(%arg0: i32) -> (i32, i32) {
    %c0_i32 = arith.constant 0 : i32
    %c0_i32_0 = arith.constant 0 : i32
    %c0_i32_1 = arith.constant 0 : i32
    return %c0_i32, %c0_i32_0 : i32, i32
  }
  func.func @transform_4(%arg0: i32) -> (i32, i32, i32, i32) {
    %c0_i32 = arith.constant 0 : i32
    %c0_i32_0 = arith.constant 0 : i32
    %c0_i32_1 = arith.constant 0 : i32
    %c0_i32_2 = arith.constant 0 : i32
    return %arg0, %c0_i32, %c0_i32_0, %c0_i32_1 : i32, i32, i32, i32
  }
  func.func @transform_5(%arg0: i32) -> (i32, i32, i32, i32) {
    %c0_i32 = arith.constant 0 : i32
    %c0_i32_0 = arith.constant 0 : i32
    %c0_i32_1 = arith.constant 0 : i32
    %c0_i32_2 = arith.constant 0 : i32
    return %arg0, %c0_i32, %c0_i32_0, %c0_i32_1 : i32, i32, i32, i32
  }
}

module attributes {stable_mosaic.version = 11 : i64} {
  func.func @kernel(%arg0: i32, %arg1: memref<1x4x3x3x32xbf16, #tpu.memory_space<vmem>>, %arg2: memref<9x32x64xbf16, #tpu.memory_space<vmem>>, %arg3: memref<1x32x64xbf16, #tpu.memory_space<vmem>>, %arg4: memref<1x64xf32, #tpu.memory_space<vmem>>, %arg5: memref<1x64xf32, #tpu.memory_space<vmem>>, %arg6: memref<1x64xf32, #tpu.memory_space<vmem>>, %arg7: memref<1x64xf32, #tpu.memory_space<vmem>>, %arg8: memref<1x2x2x64xbf16, #tpu.memory_space<vmem>>, %arg9: memref<1x2x2x64xbf16, #tpu.memory_space<vmem>>) attributes {dimension_semantics = [#tpu.dimension_semantics<parallel>], iteration_bounds = array<i64: 2>, scalar_prefetch = 0 : i64, scratch_operands = 0 : i64, tpu.core_type = #tpu.core_type<tc>, window_params = [{transform_indices = @transform_0, window_bounds = array<i64: 1, 4, 3, 3, 32>}, {pipeline_mode = #tpu.pipeline_mode<synchronous>, transform_indices = @transform_1, window_bounds = array<i64: 9, 32, 64>}, {pipeline_mode = #tpu.pipeline_mode<synchronous>, transform_indices = @transform_2, window_bounds = array<i64: 1, 32, 64>}, {pipeline_mode = #tpu.pipeline_mode<synchronous>, transform_indices = @transform_3, window_bounds = array<i64: 1, 64>}, {pipeline_mode = #tpu.pipeline_mode<synchronous>, transform_indices = @transform_4, window_bounds = array<i64: 1, 64>}, {pipeline_mode = #tpu.pipeline_mode<synchronous>, transform_indices = @transform_5, window_bounds = array<i64: 1, 64>}, {pipeline_mode = #tpu.pipeline_mode<synchronous>, transform_indices = @transform_6, window_bounds = array<i64: 1, 64>}, {transform_indices = @transform_7, window_bounds = array<i64: 1, 2, 2, 64>}, {transform_indices = @transform_8, window_bounds = array<i64: 1, 2, 2, 64>}]} {
    %c0_i32 = arith.constant 0 : i32
    %c2_i32 = arith.constant 2 : i32
    %0 = arith.addi %c0_i32, %c2_i32 : i32
    %c1_i32 = arith.constant 1 : i32
    scf.for %arg10 = %c0_i32 to %0 step %c1_i32  : i32 {
      %c1_i32_1 = arith.constant 1 : i32
      %1 = arith.muli %arg10, %c1_i32_1 : i32
      %c0_i32_2 = arith.constant 0 : i32
      %2 = arith.addi %c0_i32_2, %1 : i32
      %cst = arith.constant 0.000000e+00 : f32
      %3 = vector.broadcast %cst : f32 to vector<2x64xf32>
      %c0_i32_3 = arith.constant 0 : i32
      %4 = arith.addi %c0_i32_3, %2 : i32
      %c0 = arith.constant 0 : index
      %c0_4 = arith.constant 0 : index
      %5 = arith.index_cast %4 : i32 to index
      %c0_5 = arith.constant 0 : index
      %c0_6 = arith.constant 0 : index
      %6 = vector.load %arg1[%c0, %c0_4, %5, %c0_5, %c0_6] : memref<1x4x3x3x32xbf16, #tpu.memory_space<vmem>>, vector<1x1x1x2x32xbf16>
      %7 = vector.shape_cast %6 : vector<1x1x1x2x32xbf16> to vector<2x32xbf16>
      %c0_7 = arith.constant 0 : index
      %c0_8 = arith.constant 0 : index
      %c0_9 = arith.constant 0 : index
      %8 = vector.load %arg2[%c0_7, %c0_8, %c0_9] : memref<9x32x64xbf16, #tpu.memory_space<vmem>>, vector<1x32x64xbf16>
      %9 = vector.shape_cast %8 : vector<1x32x64xbf16> to vector<32x64xbf16>
      %cst_10 = arith.constant dense<0.000000e+00> : vector<2x64xf32>
      %10 = tpu.matmul %7, %9, %cst_10 {dimension_numbers = #tpu.dot_dimension_numbers<[1], [0], [0], [1], [0, 0, 1, 1], [], []>} : vector<2x32xbf16>, vector<32x64xbf16>, vector<2x64xf32> -> vector<2x64xf32>
      %11 = arith.addf %3, %10 : vector<2x64xf32>
      %c0_i32_11 = arith.constant 0 : i32
      %12 = arith.addi %c0_i32_11, %2 : i32
      %c0_12 = arith.constant 0 : index
      %c1 = arith.constant 1 : index
      %13 = arith.index_cast %12 : i32 to index
      %c0_13 = arith.constant 0 : index
      %c0_14 = arith.constant 0 : index
      %14 = vector.load %arg1[%c0_12, %c1, %13, %c0_13, %c0_14] : memref<1x4x3x3x32xbf16, #tpu.memory_space<vmem>>, vector<1x1x1x2x32xbf16>
      %15 = vector.shape_cast %14 : vector<1x1x1x2x32xbf16> to vector<2x32xbf16>
      %c1_15 = arith.constant 1 : index
      %c0_16 = arith.constant 0 : index
      %c0_17 = arith.constant 0 : index
      %16 = vector.load %arg2[%c1_15, %c0_16, %c0_17] : memref<9x32x64xbf16, #tpu.memory_space<vmem>>, vector<1x32x64xbf16>
      %17 = vector.shape_cast %16 : vector<1x32x64xbf16> to vector<32x64xbf16>
      %cst_18 = arith.constant dense<0.000000e+00> : vector<2x64xf32>
      %18 = tpu.matmul %15, %17, %cst_18 {dimension_numbers = #tpu.dot_dimension_numbers<[1], [0], [0], [1], [0, 0, 1, 1], [], []>} : vector<2x32xbf16>, vector<32x64xbf16>, vector<2x64xf32> -> vector<2x64xf32>
      %19 = arith.addf %11, %18 : vector<2x64xf32>
      %c0_i32_19 = arith.constant 0 : i32
      %20 = arith.addi %c0_i32_19, %2 : i32
      %c0_20 = arith.constant 0 : index
      %c0_21 = arith.constant 0 : index
      %21 = arith.index_cast %20 : i32 to index
      %c1_22 = arith.constant 1 : index
      %c0_23 = arith.constant 0 : index
      %22 = vector.load %arg1[%c0_20, %c0_21, %21, %c1_22, %c0_23] : memref<1x4x3x3x32xbf16, #tpu.memory_space<vmem>>, vector<1x1x1x2x32xbf16>
      %23 = vector.shape_cast %22 : vector<1x1x1x2x32xbf16> to vector<2x32xbf16>
      %c2 = arith.constant 2 : index
      %c0_24 = arith.constant 0 : index
      %c0_25 = arith.constant 0 : index
      %24 = vector.load %arg2[%c2, %c0_24, %c0_25] : memref<9x32x64xbf16, #tpu.memory_space<vmem>>, vector<1x32x64xbf16>
      %25 = vector.shape_cast %24 : vector<1x32x64xbf16> to vector<32x64xbf16>
      %cst_26 = arith.constant dense<0.000000e+00> : vector<2x64xf32>
      %26 = tpu.matmul %23, %25, %cst_26 {dimension_numbers = #tpu.dot_dimension_numbers<[1], [0], [0], [1], [0, 0, 1, 1], [], []>} : vector<2x32xbf16>, vector<32x64xbf16>, vector<2x64xf32> -> vector<2x64xf32>
      %27 = arith.addf %19, %26 : vector<2x64xf32>
      %c0_i32_27 = arith.constant 0 : i32
      %28 = arith.addi %c0_i32_27, %2 : i32
      %c0_28 = arith.constant 0 : index
      %c2_29 = arith.constant 2 : index
      %29 = arith.index_cast %28 : i32 to index
      %c0_30 = arith.constant 0 : index
      %c0_31 = arith.constant 0 : index
      %30 = vector.load %arg1[%c0_28, %c2_29, %29, %c0_30, %c0_31] : memref<1x4x3x3x32xbf16, #tpu.memory_space<vmem>>, vector<1x1x1x2x32xbf16>
      %31 = vector.shape_cast %30 : vector<1x1x1x2x32xbf16> to vector<2x32xbf16>
      %c3 = arith.constant 3 : index
      %c0_32 = arith.constant 0 : index
      %c0_33 = arith.constant 0 : index
      %32 = vector.load %arg2[%c3, %c0_32, %c0_33] : memref<9x32x64xbf16, #tpu.memory_space<vmem>>, vector<1x32x64xbf16>
      %33 = vector.shape_cast %32 : vector<1x32x64xbf16> to vector<32x64xbf16>
      %cst_34 = arith.constant dense<0.000000e+00> : vector<2x64xf32>
      %34 = tpu.matmul %31, %33, %cst_34 {dimension_numbers = #tpu.dot_dimension_numbers<[1], [0], [0], [1], [0, 0, 1, 1], [], []>} : vector<2x32xbf16>, vector<32x64xbf16>, vector<2x64xf32> -> vector<2x64xf32>
      %35 = arith.addf %27, %34 : vector<2x64xf32>
      %c0_i32_35 = arith.constant 0 : i32
      %36 = arith.addi %c0_i32_35, %2 : i32
      %c0_36 = arith.constant 0 : index
      %c3_37 = arith.constant 3 : index
      %37 = arith.index_cast %36 : i32 to index
      %c0_38 = arith.constant 0 : index
      %c0_39 = arith.constant 0 : index
      %38 = vector.load %arg1[%c0_36, %c3_37, %37, %c0_38, %c0_39] : memref<1x4x3x3x32xbf16, #tpu.memory_space<vmem>>, vector<1x1x1x2x32xbf16>
      %39 = vector.shape_cast %38 : vector<1x1x1x2x32xbf16> to vector<2x32xbf16>
      %c4 = arith.constant 4 : index
      %c0_40 = arith.constant 0 : index
      %c0_41 = arith.constant 0 : index
      %40 = vector.load %arg2[%c4, %c0_40, %c0_41] : memref<9x32x64xbf16, #tpu.memory_space<vmem>>, vector<1x32x64xbf16>
      %41 = vector.shape_cast %40 : vector<1x32x64xbf16> to vector<32x64xbf16>
      %cst_42 = arith.constant dense<0.000000e+00> : vector<2x64xf32>
      %42 = tpu.matmul %39, %41, %cst_42 {dimension_numbers = #tpu.dot_dimension_numbers<[1], [0], [0], [1], [0, 0, 1, 1], [], []>} : vector<2x32xbf16>, vector<32x64xbf16>, vector<2x64xf32> -> vector<2x64xf32>
      %43 = arith.addf %35, %42 : vector<2x64xf32>
      %c0_43 = arith.constant 0 : index
      %c0_44 = arith.constant 0 : index
      %c0_45 = arith.constant 0 : index
      %44 = vector.load %arg3[%c0_43, %c0_44, %c0_45] : memref<1x32x64xbf16, #tpu.memory_space<vmem>>, vector<1x32x64xbf16>
      %45 = vector.shape_cast %44 : vector<1x32x64xbf16> to vector<32x64xbf16>
      %cst_46 = arith.constant dense<0.000000e+00> : vector<2x64xf32>
      %46 = tpu.matmul %39, %45, %cst_46 {dimension_numbers = #tpu.dot_dimension_numbers<[1], [0], [0], [1], [0, 0, 1, 1], [], []>} : vector<2x32xbf16>, vector<32x64xbf16>, vector<2x64xf32> -> vector<2x64xf32>
      %c0_i32_47 = arith.constant 0 : i32
      %47 = arith.addi %c0_i32_47, %2 : i32
      %c0_48 = arith.constant 0 : index
      %c2_49 = arith.constant 2 : index
      %48 = arith.index_cast %47 : i32 to index
      %c1_50 = arith.constant 1 : index
      %c0_51 = arith.constant 0 : index
      %49 = vector.load %arg1[%c0_48, %c2_49, %48, %c1_50, %c0_51] : memref<1x4x3x3x32xbf16, #tpu.memory_space<vmem>>, vector<1x1x1x2x32xbf16>
      %50 = vector.shape_cast %49 : vector<1x1x1x2x32xbf16> to vector<2x32xbf16>
      %c5 = arith.constant 5 : index
      %c0_52 = arith.constant 0 : index
      %c0_53 = arith.constant 0 : index
      %51 = vector.load %arg2[%c5, %c0_52, %c0_53] : memref<9x32x64xbf16, #tpu.memory_space<vmem>>, vector<1x32x64xbf16>
      %52 = vector.shape_cast %51 : vector<1x32x64xbf16> to vector<32x64xbf16>
      %cst_54 = arith.constant dense<0.000000e+00> : vector<2x64xf32>
      %53 = tpu.matmul %50, %52, %cst_54 {dimension_numbers = #tpu.dot_dimension_numbers<[1], [0], [0], [1], [0, 0, 1, 1], [], []>} : vector<2x32xbf16>, vector<32x64xbf16>, vector<2x64xf32> -> vector<2x64xf32>
      %54 = arith.addf %43, %53 : vector<2x64xf32>
      %c1_i32_55 = arith.constant 1 : i32
      %55 = arith.addi %c1_i32_55, %2 : i32
      %c0_56 = arith.constant 0 : index
      %c0_57 = arith.constant 0 : index
      %56 = arith.index_cast %55 : i32 to index
      %c0_58 = arith.constant 0 : index
      %c0_59 = arith.constant 0 : index
      %57 = vector.load %arg1[%c0_56, %c0_57, %56, %c0_58, %c0_59] : memref<1x4x3x3x32xbf16, #tpu.memory_space<vmem>>, vector<1x1x1x2x32xbf16>
      %58 = vector.shape_cast %57 : vector<1x1x1x2x32xbf16> to vector<2x32xbf16>
      %c6 = arith.constant 6 : index
      %c0_60 = arith.constant 0 : index
      %c0_61 = arith.constant 0 : index
      %59 = vector.load %arg2[%c6, %c0_60, %c0_61] : memref<9x32x64xbf16, #tpu.memory_space<vmem>>, vector<1x32x64xbf16>
      %60 = vector.shape_cast %59 : vector<1x32x64xbf16> to vector<32x64xbf16>
      %cst_62 = arith.constant dense<0.000000e+00> : vector<2x64xf32>
      %61 = tpu.matmul %58, %60, %cst_62 {dimension_numbers = #tpu.dot_dimension_numbers<[1], [0], [0], [1], [0, 0, 1, 1], [], []>} : vector<2x32xbf16>, vector<32x64xbf16>, vector<2x64xf32> -> vector<2x64xf32>
      %62 = arith.addf %54, %61 : vector<2x64xf32>
      %c1_i32_63 = arith.constant 1 : i32
      %63 = arith.addi %c1_i32_63, %2 : i32
      %c0_64 = arith.constant 0 : index
      %c1_65 = arith.constant 1 : index
      %64 = arith.index_cast %63 : i32 to index
      %c0_66 = arith.constant 0 : index
      %c0_67 = arith.constant 0 : index
      %65 = vector.load %arg1[%c0_64, %c1_65, %64, %c0_66, %c0_67] : memref<1x4x3x3x32xbf16, #tpu.memory_space<vmem>>, vector<1x1x1x2x32xbf16>
      %66 = vector.shape_cast %65 : vector<1x1x1x2x32xbf16> to vector<2x32xbf16>
      %c7 = arith.constant 7 : index
      %c0_68 = arith.constant 0 : index
      %c0_69 = arith.constant 0 : index
      %67 = vector.load %arg2[%c7, %c0_68, %c0_69] : memref<9x32x64xbf16, #tpu.memory_space<vmem>>, vector<1x32x64xbf16>
      %68 = vector.shape_cast %67 : vector<1x32x64xbf16> to vector<32x64xbf16>
      %cst_70 = arith.constant dense<0.000000e+00> : vector<2x64xf32>
      %69 = tpu.matmul %66, %68, %cst_70 {dimension_numbers = #tpu.dot_dimension_numbers<[1], [0], [0], [1], [0, 0, 1, 1], [], []>} : vector<2x32xbf16>, vector<32x64xbf16>, vector<2x64xf32> -> vector<2x64xf32>
      %70 = arith.addf %62, %69 : vector<2x64xf32>
      %c1_i32_71 = arith.constant 1 : i32
      %71 = arith.addi %c1_i32_71, %2 : i32
      %c0_72 = arith.constant 0 : index
      %c0_73 = arith.constant 0 : index
      %72 = arith.index_cast %71 : i32 to index
      %c1_74 = arith.constant 1 : index
      %c0_75 = arith.constant 0 : index
      %73 = vector.load %arg1[%c0_72, %c0_73, %72, %c1_74, %c0_75] : memref<1x4x3x3x32xbf16, #tpu.memory_space<vmem>>, vector<1x1x1x2x32xbf16>
      %74 = vector.shape_cast %73 : vector<1x1x1x2x32xbf16> to vector<2x32xbf16>
      %c8 = arith.constant 8 : index
      %c0_76 = arith.constant 0 : index
      %c0_77 = arith.constant 0 : index
      %75 = vector.load %arg2[%c8, %c0_76, %c0_77] : memref<9x32x64xbf16, #tpu.memory_space<vmem>>, vector<1x32x64xbf16>
      %76 = vector.shape_cast %75 : vector<1x32x64xbf16> to vector<32x64xbf16>
      %cst_78 = arith.constant dense<0.000000e+00> : vector<2x64xf32>
      %77 = tpu.matmul %74, %76, %cst_78 {dimension_numbers = #tpu.dot_dimension_numbers<[1], [0], [0], [1], [0, 0, 1, 1], [], []>} : vector<2x32xbf16>, vector<32x64xbf16>, vector<2x64xf32> -> vector<2x64xf32>
      %78 = arith.addf %70, %77 : vector<2x64xf32>
      %c0_79 = arith.constant 0 : index
      %c0_80 = arith.constant 0 : index
      %79 = vector.load %arg4[%c0_79, %c0_80] : memref<1x64xf32, #tpu.memory_space<vmem>>, vector<1x64xf32>
      %80 = vector.broadcast %79 : vector<1x64xf32> to vector<2x64xf32>
      %81 = arith.mulf %78, %80 : vector<2x64xf32>
      %c0_81 = arith.constant 0 : index
      %c0_82 = arith.constant 0 : index
      %82 = vector.load %arg5[%c0_81, %c0_82] : memref<1x64xf32, #tpu.memory_space<vmem>>, vector<1x64xf32>
      %83 = vector.broadcast %82 : vector<1x64xf32> to vector<2x64xf32>
      %84 = arith.addf %81, %83 : vector<2x64xf32>
      %cst_83 = arith.constant 0.000000e+00 : f32
      %85 = vector.broadcast %cst_83 : f32 to vector<2x64xf32>
      %86 = arith.maximumf %84, %85 : vector<2x64xf32>
      %87 = arith.truncf %86 : vector<2x64xf32> to vector<2x64xbf16>
      %c0_84 = arith.constant 0 : index
      %88 = arith.index_cast %2 : i32 to index
      %c0_85 = arith.constant 0 : index
      %c0_86 = arith.constant 0 : index
      %89 = vector.load %arg8[%c0_84, %88, %c0_85, %c0_86] : memref<1x2x2x64xbf16, #tpu.memory_space<vmem>>, vector<1x1x2x64xbf16>
      %90 = vector.shape_cast %89 : vector<1x1x2x64xbf16> to vector<2x64xbf16>
      %91 = vector.shape_cast %87 : vector<2x64xbf16> to vector<1x1x2x64xbf16>
      tpu.vector_store %arg8[%c0_84, %88, %c0_85, %c0_86], %91 {strides = array<i32>} : memref<1x2x2x64xbf16, #tpu.memory_space<vmem>>, vector<1x1x2x64xbf16>,
      %c0_87 = arith.constant 0 : index
      %c0_88 = arith.constant 0 : index
      %92 = vector.load %arg6[%c0_87, %c0_88] : memref<1x64xf32, #tpu.memory_space<vmem>>, vector<1x64xf32>
      %93 = vector.broadcast %92 : vector<1x64xf32> to vector<2x64xf32>
      %94 = arith.mulf %46, %93 : vector<2x64xf32>
      %c0_89 = arith.constant 0 : index
      %c0_90 = arith.constant 0 : index
      %95 = vector.load %arg7[%c0_89, %c0_90] : memref<1x64xf32, #tpu.memory_space<vmem>>, vector<1x64xf32>
      %96 = vector.broadcast %95 : vector<1x64xf32> to vector<2x64xf32>
      %97 = arith.addf %94, %96 : vector<2x64xf32>
      %98 = arith.truncf %97 : vector<2x64xf32> to vector<2x64xbf16>
      %c0_91 = arith.constant 0 : index
      %99 = arith.index_cast %2 : i32 to index
      %c0_92 = arith.constant 0 : index
      %c0_93 = arith.constant 0 : index
      %100 = vector.load %arg9[%c0_91, %99, %c0_92, %c0_93] : memref<1x2x2x64xbf16, #tpu.memory_space<vmem>>, vector<1x1x2x64xbf16>
      %101 = vector.shape_cast %100 : vector<1x1x2x64xbf16> to vector<2x64xbf16>
      %102 = vector.shape_cast %98 : vector<2x64xbf16> to vector<1x1x2x64xbf16>
      tpu.vector_store %arg9[%c0_91, %99, %c0_92, %c0_93], %102 {strides = array<i32>} : memref<1x2x2x64xbf16, #tpu.memory_space<vmem>>, vector<1x1x2x64xbf16>,
    }
    %c2_i32_0 = arith.constant 2 : i32
    return
  }
  func.func @transform_0(%arg0: i32) -> (i32, i32, i32, i32, i32) {
    %c0_i32 = arith.constant 0 : i32
    %c0_i32_0 = arith.constant 0 : i32
    %c0_i32_1 = arith.constant 0 : i32
    %c0_i32_2 = arith.constant 0 : i32
    %c0_i32_3 = arith.constant 0 : i32
    return %arg0, %c0_i32, %c0_i32_0, %c0_i32_1, %c0_i32_2 : i32, i32, i32, i32, i32
  }
  func.func @transform_1(%arg0: i32) -> (i32, i32, i32) {
    %c0_i32 = arith.constant 0 : i32
    %c0_i32_0 = arith.constant 0 : i32
    %c0_i32_1 = arith.constant 0 : i32
    %c0_i32_2 = arith.constant 0 : i32
    return %c0_i32, %c0_i32_0, %c0_i32_1 : i32, i32, i32
  }
  func.func @transform_2(%arg0: i32) -> (i32, i32, i32) {
    %c0_i32 = arith.constant 0 : i32
    %c0_i32_0 = arith.constant 0 : i32
    %c0_i32_1 = arith.constant 0 : i32
    %c0_i32_2 = arith.constant 0 : i32
    return %c0_i32, %c0_i32_0, %c0_i32_1 : i32, i32, i32
  }
  func.func @transform_3(%arg0: i32) -> (i32, i32) {
    %c0_i32 = arith.constant 0 : i32
    %c0_i32_0 = arith.constant 0 : i32
    %c0_i32_1 = arith.constant 0 : i32
    return %c0_i32, %c0_i32_0 : i32, i32
  }
  func.func @transform_4(%arg0: i32) -> (i32, i32) {
    %c0_i32 = arith.constant 0 : i32
    %c0_i32_0 = arith.constant 0 : i32
    %c0_i32_1 = arith.constant 0 : i32
    return %c0_i32, %c0_i32_0 : i32, i32
  }
  func.func @transform_5(%arg0: i32) -> (i32, i32) {
    %c0_i32 = arith.constant 0 : i32
    %c0_i32_0 = arith.constant 0 : i32
    %c0_i32_1 = arith.constant 0 : i32
    return %c0_i32, %c0_i32_0 : i32, i32
  }
  func.func @transform_6(%arg0: i32) -> (i32, i32) {
    %c0_i32 = arith.constant 0 : i32
    %c0_i32_0 = arith.constant 0 : i32
    %c0_i32_1 = arith.constant 0 : i32
    return %c0_i32, %c0_i32_0 : i32, i32
  }
  func.func @transform_7(%arg0: i32) -> (i32, i32, i32, i32) {
    %c0_i32 = arith.constant 0 : i32
    %c0_i32_0 = arith.constant 0 : i32
    %c0_i32_1 = arith.constant 0 : i32
    %c0_i32_2 = arith.constant 0 : i32
    return %arg0, %c0_i32, %c0_i32_0, %c0_i32_1 : i32, i32, i32, i32
  }
  func.func @transform_8(%arg0: i32) -> (i32, i32, i32, i32) {
    %c0_i32 = arith.constant 0 : i32
    %c0_i32_0 = arith.constant 0 : i32
    %c0_i32_1 = arith.constant 0 : i32
    %c0_i32_2 = arith.constant 0 : i32
    return %arg0, %c0_i32, %c0_i32_0, %c0_i32_1 : i32, i32, i32, i32
  }
}

module attributes {stable_mosaic.version = 11 : i64} {
  func.func @kernel(%arg0: i32, %arg1: memref<1x1x4x4x64xbf16, #tpu.memory_space<vmem>>, %arg2: memref<9x64x64xbf16, #tpu.memory_space<vmem>>, %arg3: memref<1x64xf32, #tpu.memory_space<vmem>>, %arg4: memref<1x64xf32, #tpu.memory_space<vmem>>, %arg5: memref<1x2x2x64xbf16, #tpu.memory_space<vmem>>, %arg6: memref<1x2x2x64xbf16, #tpu.memory_space<vmem>>) attributes {dimension_semantics = [#tpu.dimension_semantics<parallel>], iteration_bounds = array<i64: 2>, scalar_prefetch = 0 : i64, scratch_operands = 0 : i64, tpu.core_type = #tpu.core_type<tc>, window_params = [{transform_indices = @transform_0, window_bounds = array<i64: 1, 1, 4, 4, 64>}, {pipeline_mode = #tpu.pipeline_mode<synchronous>, transform_indices = @transform_1, window_bounds = array<i64: 9, 64, 64>}, {pipeline_mode = #tpu.pipeline_mode<synchronous>, transform_indices = @transform_2, window_bounds = array<i64: 1, 64>}, {pipeline_mode = #tpu.pipeline_mode<synchronous>, transform_indices = @transform_3, window_bounds = array<i64: 1, 64>}, {transform_indices = @transform_4, window_bounds = array<i64: 1, 2, 2, 64>}, {transform_indices = @transform_5, window_bounds = array<i64: 1, 2, 2, 64>}]} {
    %c0_i32 = arith.constant 0 : i32
    %c2_i32 = arith.constant 2 : i32
    %0 = arith.addi %c0_i32, %c2_i32 : i32
    %c1_i32 = arith.constant 1 : i32
    scf.for %arg7 = %c0_i32 to %0 step %c1_i32  : i32 {
      %c1_i32_1 = arith.constant 1 : i32
      %1 = arith.muli %arg7, %c1_i32_1 : i32
      %c0_i32_2 = arith.constant 0 : i32
      %2 = arith.addi %c0_i32_2, %1 : i32
      %cst = arith.constant 0.000000e+00 : f32
      %3 = vector.broadcast %cst : f32 to vector<2x64xf32>
      %c0_i32_3 = arith.constant 0 : i32
      %4 = arith.addi %c0_i32_3, %2 : i32
      %c0 = arith.constant 0 : index
      %c0_4 = arith.constant 0 : index
      %5 = arith.index_cast %4 : i32 to index
      %c0_5 = arith.constant 0 : index
      %c0_6 = arith.constant 0 : index
      %6 = vector.load %arg1[%c0, %c0_4, %5, %c0_5, %c0_6] : memref<1x1x4x4x64xbf16, #tpu.memory_space<vmem>>, vector<1x1x1x2x64xbf16>
      %7 = vector.shape_cast %6 : vector<1x1x1x2x64xbf16> to vector<2x64xbf16>
      %c0_7 = arith.constant 0 : index
      %c0_8 = arith.constant 0 : index
      %c0_9 = arith.constant 0 : index
      %8 = vector.load %arg2[%c0_7, %c0_8, %c0_9] : memref<9x64x64xbf16, #tpu.memory_space<vmem>>, vector<1x64x64xbf16>
      %9 = vector.shape_cast %8 : vector<1x64x64xbf16> to vector<64x64xbf16>
      %cst_10 = arith.constant dense<0.000000e+00> : vector<2x64xf32>
      %10 = tpu.matmul %7, %9, %cst_10 {dimension_numbers = #tpu.dot_dimension_numbers<[1], [0], [0], [1], [0, 0, 1, 1], [], []>} : vector<2x64xbf16>, vector<64x64xbf16>, vector<2x64xf32> -> vector<2x64xf32>
      %11 = arith.addf %3, %10 : vector<2x64xf32>
      %c0_i32_11 = arith.constant 0 : i32
      %12 = arith.addi %c0_i32_11, %2 : i32
      %c0_12 = arith.constant 0 : index
      %c0_13 = arith.constant 0 : index
      %13 = arith.index_cast %12 : i32 to index
      %c1 = arith.constant 1 : index
      %c0_14 = arith.constant 0 : index
      %14 = vector.load %arg1[%c0_12, %c0_13, %13, %c1, %c0_14] : memref<1x1x4x4x64xbf16, #tpu.memory_space<vmem>>, vector<1x1x1x2x64xbf16>
      %15 = vector.shape_cast %14 : vector<1x1x1x2x64xbf16> to vector<2x64xbf16>
      %c1_15 = arith.constant 1 : index
      %c0_16 = arith.constant 0 : index
      %c0_17 = arith.constant 0 : index
      %16 = vector.load %arg2[%c1_15, %c0_16, %c0_17] : memref<9x64x64xbf16, #tpu.memory_space<vmem>>, vector<1x64x64xbf16>
      %17 = vector.shape_cast %16 : vector<1x64x64xbf16> to vector<64x64xbf16>
      %cst_18 = arith.constant dense<0.000000e+00> : vector<2x64xf32>
      %18 = tpu.matmul %15, %17, %cst_18 {dimension_numbers = #tpu.dot_dimension_numbers<[1], [0], [0], [1], [0, 0, 1, 1], [], []>} : vector<2x64xbf16>, vector<64x64xbf16>, vector<2x64xf32> -> vector<2x64xf32>
      %19 = arith.addf %11, %18 : vector<2x64xf32>
      %c0_i32_19 = arith.constant 0 : i32
      %20 = arith.addi %c0_i32_19, %2 : i32
      %c0_20 = arith.constant 0 : index
      %c0_21 = arith.constant 0 : index
      %21 = arith.index_cast %20 : i32 to index
      %c2 = arith.constant 2 : index
      %c0_22 = arith.constant 0 : index
      %22 = vector.load %arg1[%c0_20, %c0_21, %21, %c2, %c0_22] : memref<1x1x4x4x64xbf16, #tpu.memory_space<vmem>>, vector<1x1x1x2x64xbf16>
      %23 = vector.shape_cast %22 : vector<1x1x1x2x64xbf16> to vector<2x64xbf16>
      %c2_23 = arith.constant 2 : index
      %c0_24 = arith.constant 0 : index
      %c0_25 = arith.constant 0 : index
      %24 = vector.load %arg2[%c2_23, %c0_24, %c0_25] : memref<9x64x64xbf16, #tpu.memory_space<vmem>>, vector<1x64x64xbf16>
      %25 = vector.shape_cast %24 : vector<1x64x64xbf16> to vector<64x64xbf16>
      %cst_26 = arith.constant dense<0.000000e+00> : vector<2x64xf32>
      %26 = tpu.matmul %23, %25, %cst_26 {dimension_numbers = #tpu.dot_dimension_numbers<[1], [0], [0], [1], [0, 0, 1, 1], [], []>} : vector<2x64xbf16>, vector<64x64xbf16>, vector<2x64xf32> -> vector<2x64xf32>
      %27 = arith.addf %19, %26 : vector<2x64xf32>
      %c1_i32_27 = arith.constant 1 : i32
      %28 = arith.addi %c1_i32_27, %2 : i32
      %c0_28 = arith.constant 0 : index
      %c0_29 = arith.constant 0 : index
      %29 = arith.index_cast %28 : i32 to index
      %c0_30 = arith.constant 0 : index
      %c0_31 = arith.constant 0 : index
      %30 = vector.load %arg1[%c0_28, %c0_29, %29, %c0_30, %c0_31] : memref<1x1x4x4x64xbf16, #tpu.memory_space<vmem>>, vector<1x1x1x2x64xbf16>
      %31 = vector.shape_cast %30 : vector<1x1x1x2x64xbf16> to vector<2x64xbf16>
      %c3 = arith.constant 3 : index
      %c0_32 = arith.constant 0 : index
      %c0_33 = arith.constant 0 : index
      %32 = vector.load %arg2[%c3, %c0_32, %c0_33] : memref<9x64x64xbf16, #tpu.memory_space<vmem>>, vector<1x64x64xbf16>
      %33 = vector.shape_cast %32 : vector<1x64x64xbf16> to vector<64x64xbf16>
      %cst_34 = arith.constant dense<0.000000e+00> : vector<2x64xf32>
      %34 = tpu.matmul %31, %33, %cst_34 {dimension_numbers = #tpu.dot_dimension_numbers<[1], [0], [0], [1], [0, 0, 1, 1], [], []>} : vector<2x64xbf16>, vector<64x64xbf16>, vector<2x64xf32> -> vector<2x64xf32>
      %35 = arith.addf %27, %34 : vector<2x64xf32>
      %c1_i32_35 = arith.constant 1 : i32
      %36 = arith.addi %c1_i32_35, %2 : i32
      %c0_36 = arith.constant 0 : index
      %c0_37 = arith.constant 0 : index
      %37 = arith.index_cast %36 : i32 to index
      %c1_38 = arith.constant 1 : index
      %c0_39 = arith.constant 0 : index
      %38 = vector.load %arg1[%c0_36, %c0_37, %37, %c1_38, %c0_39] : memref<1x1x4x4x64xbf16, #tpu.memory_space<vmem>>, vector<1x1x1x2x64xbf16>
      %39 = vector.shape_cast %38 : vector<1x1x1x2x64xbf16> to vector<2x64xbf16>
      %c4 = arith.constant 4 : index
      %c0_40 = arith.constant 0 : index
      %c0_41 = arith.constant 0 : index
      %40 = vector.load %arg2[%c4, %c0_40, %c0_41] : memref<9x64x64xbf16, #tpu.memory_space<vmem>>, vector<1x64x64xbf16>
      %41 = vector.shape_cast %40 : vector<1x64x64xbf16> to vector<64x64xbf16>
      %cst_42 = arith.constant dense<0.000000e+00> : vector<2x64xf32>
      %42 = tpu.matmul %39, %41, %cst_42 {dimension_numbers = #tpu.dot_dimension_numbers<[1], [0], [0], [1], [0, 0, 1, 1], [], []>} : vector<2x64xbf16>, vector<64x64xbf16>, vector<2x64xf32> -> vector<2x64xf32>
      %43 = arith.addf %35, %42 : vector<2x64xf32>
      %c1_i32_43 = arith.constant 1 : i32
      %44 = arith.addi %c1_i32_43, %2 : i32
      %c0_44 = arith.constant 0 : index
      %c0_45 = arith.constant 0 : index
      %45 = arith.index_cast %44 : i32 to index
      %c2_46 = arith.constant 2 : index
      %c0_47 = arith.constant 0 : index
      %46 = vector.load %arg1[%c0_44, %c0_45, %45, %c2_46, %c0_47] : memref<1x1x4x4x64xbf16, #tpu.memory_space<vmem>>, vector<1x1x1x2x64xbf16>
      %47 = vector.shape_cast %46 : vector<1x1x1x2x64xbf16> to vector<2x64xbf16>
      %c5 = arith.constant 5 : index
      %c0_48 = arith.constant 0 : index
      %c0_49 = arith.constant 0 : index
      %48 = vector.load %arg2[%c5, %c0_48, %c0_49] : memref<9x64x64xbf16, #tpu.memory_space<vmem>>, vector<1x64x64xbf16>
      %49 = vector.shape_cast %48 : vector<1x64x64xbf16> to vector<64x64xbf16>
      %cst_50 = arith.constant dense<0.000000e+00> : vector<2x64xf32>
      %50 = tpu.matmul %47, %49, %cst_50 {dimension_numbers = #tpu.dot_dimension_numbers<[1], [0], [0], [1], [0, 0, 1, 1], [], []>} : vector<2x64xbf16>, vector<64x64xbf16>, vector<2x64xf32> -> vector<2x64xf32>
      %51 = arith.addf %43, %50 : vector<2x64xf32>
      %c2_i32_51 = arith.constant 2 : i32
      %52 = arith.addi %c2_i32_51, %2 : i32
      %c0_52 = arith.constant 0 : index
      %c0_53 = arith.constant 0 : index
      %53 = arith.index_cast %52 : i32 to index
      %c0_54 = arith.constant 0 : index
      %c0_55 = arith.constant 0 : index
      %54 = vector.load %arg1[%c0_52, %c0_53, %53, %c0_54, %c0_55] : memref<1x1x4x4x64xbf16, #tpu.memory_space<vmem>>, vector<1x1x1x2x64xbf16>
      %55 = vector.shape_cast %54 : vector<1x1x1x2x64xbf16> to vector<2x64xbf16>
      %c6 = arith.constant 6 : index
      %c0_56 = arith.constant 0 : index
      %c0_57 = arith.constant 0 : index
      %56 = vector.load %arg2[%c6, %c0_56, %c0_57] : memref<9x64x64xbf16, #tpu.memory_space<vmem>>, vector<1x64x64xbf16>
      %57 = vector.shape_cast %56 : vector<1x64x64xbf16> to vector<64x64xbf16>
      %cst_58 = arith.constant dense<0.000000e+00> : vector<2x64xf32>
      %58 = tpu.matmul %55, %57, %cst_58 {dimension_numbers = #tpu.dot_dimension_numbers<[1], [0], [0], [1], [0, 0, 1, 1], [], []>} : vector<2x64xbf16>, vector<64x64xbf16>, vector<2x64xf32> -> vector<2x64xf32>
      %59 = arith.addf %51, %58 : vector<2x64xf32>
      %c2_i32_59 = arith.constant 2 : i32
      %60 = arith.addi %c2_i32_59, %2 : i32
      %c0_60 = arith.constant 0 : index
      %c0_61 = arith.constant 0 : index
      %61 = arith.index_cast %60 : i32 to index
      %c1_62 = arith.constant 1 : index
      %c0_63 = arith.constant 0 : index
      %62 = vector.load %arg1[%c0_60, %c0_61, %61, %c1_62, %c0_63] : memref<1x1x4x4x64xbf16, #tpu.memory_space<vmem>>, vector<1x1x1x2x64xbf16>
      %63 = vector.shape_cast %62 : vector<1x1x1x2x64xbf16> to vector<2x64xbf16>
      %c7 = arith.constant 7 : index
      %c0_64 = arith.constant 0 : index
      %c0_65 = arith.constant 0 : index
      %64 = vector.load %arg2[%c7, %c0_64, %c0_65] : memref<9x64x64xbf16, #tpu.memory_space<vmem>>, vector<1x64x64xbf16>
      %65 = vector.shape_cast %64 : vector<1x64x64xbf16> to vector<64x64xbf16>
      %cst_66 = arith.constant dense<0.000000e+00> : vector<2x64xf32>
      %66 = tpu.matmul %63, %65, %cst_66 {dimension_numbers = #tpu.dot_dimension_numbers<[1], [0], [0], [1], [0, 0, 1, 1], [], []>} : vector<2x64xbf16>, vector<64x64xbf16>, vector<2x64xf32> -> vector<2x64xf32>
      %67 = arith.addf %59, %66 : vector<2x64xf32>
      %c2_i32_67 = arith.constant 2 : i32
      %68 = arith.addi %c2_i32_67, %2 : i32
      %c0_68 = arith.constant 0 : index
      %c0_69 = arith.constant 0 : index
      %69 = arith.index_cast %68 : i32 to index
      %c2_70 = arith.constant 2 : index
      %c0_71 = arith.constant 0 : index
      %70 = vector.load %arg1[%c0_68, %c0_69, %69, %c2_70, %c0_71] : memref<1x1x4x4x64xbf16, #tpu.memory_space<vmem>>, vector<1x1x1x2x64xbf16>
      %71 = vector.shape_cast %70 : vector<1x1x1x2x64xbf16> to vector<2x64xbf16>
      %c8 = arith.constant 8 : index
      %c0_72 = arith.constant 0 : index
      %c0_73 = arith.constant 0 : index
      %72 = vector.load %arg2[%c8, %c0_72, %c0_73] : memref<9x64x64xbf16, #tpu.memory_space<vmem>>, vector<1x64x64xbf16>
      %73 = vector.shape_cast %72 : vector<1x64x64xbf16> to vector<64x64xbf16>
      %cst_74 = arith.constant dense<0.000000e+00> : vector<2x64xf32>
      %74 = tpu.matmul %71, %73, %cst_74 {dimension_numbers = #tpu.dot_dimension_numbers<[1], [0], [0], [1], [0, 0, 1, 1], [], []>} : vector<2x64xbf16>, vector<64x64xbf16>, vector<2x64xf32> -> vector<2x64xf32>
      %75 = arith.addf %67, %74 : vector<2x64xf32>
      %c0_75 = arith.constant 0 : index
      %c0_76 = arith.constant 0 : index
      %76 = vector.load %arg3[%c0_75, %c0_76] : memref<1x64xf32, #tpu.memory_space<vmem>>, vector<1x64xf32>
      %77 = vector.broadcast %76 : vector<1x64xf32> to vector<2x64xf32>
      %78 = arith.mulf %75, %77 : vector<2x64xf32>
      %c0_77 = arith.constant 0 : index
      %c0_78 = arith.constant 0 : index
      %79 = vector.load %arg4[%c0_77, %c0_78] : memref<1x64xf32, #tpu.memory_space<vmem>>, vector<1x64xf32>
      %80 = vector.broadcast %79 : vector<1x64xf32> to vector<2x64xf32>
      %81 = arith.addf %78, %80 : vector<2x64xf32>
      %cst_79 = arith.constant 0.000000e+00 : f32
      %82 = vector.broadcast %cst_79 : f32 to vector<2x64xf32>
      %83 = arith.maximumf %81, %82 : vector<2x64xf32>
      %c0_80 = arith.constant 0 : index
      %84 = arith.index_cast %2 : i32 to index
      %c0_81 = arith.constant 0 : index
      %c0_82 = arith.constant 0 : index
      %85 = vector.load %arg5[%c0_80, %84, %c0_81, %c0_82] : memref<1x2x2x64xbf16, #tpu.memory_space<vmem>>, vector<1x1x2x64xbf16>
      %86 = vector.shape_cast %85 : vector<1x1x2x64xbf16> to vector<2x64xbf16>
      %87 = arith.extf %86 : vector<2x64xbf16> to vector<2x64xf32>
      %88 = arith.addf %83, %87 : vector<2x64xf32>
      %89 = arith.truncf %88 : vector<2x64xf32> to vector<2x64xbf16>
      %c0_83 = arith.constant 0 : index
      %90 = arith.index_cast %2 : i32 to index
      %c0_84 = arith.constant 0 : index
      %c0_85 = arith.constant 0 : index
      %91 = vector.load %arg6[%c0_83, %90, %c0_84, %c0_85] : memref<1x2x2x64xbf16, #tpu.memory_space<vmem>>, vector<1x1x2x64xbf16>
      %92 = vector.shape_cast %91 : vector<1x1x2x64xbf16> to vector<2x64xbf16>
      %93 = vector.shape_cast %89 : vector<2x64xbf16> to vector<1x1x2x64xbf16>
      tpu.vector_store %arg6[%c0_83, %90, %c0_84, %c0_85], %93 {strides = array<i32>} : memref<1x2x2x64xbf16, #tpu.memory_space<vmem>>, vector<1x1x2x64xbf16>,
    }
    %c2_i32_0 = arith.constant 2 : i32
    return
  }
  func.func @transform_0(%arg0: i32) -> (i32, i32, i32, i32, i32) {
    %c0_i32 = arith.constant 0 : i32
    %c0_i32_0 = arith.constant 0 : i32
    %c0_i32_1 = arith.constant 0 : i32
    %c0_i32_2 = arith.constant 0 : i32
    %c0_i32_3 = arith.constant 0 : i32
    return %arg0, %c0_i32, %c0_i32_0, %c0_i32_1, %c0_i32_2 : i32, i32, i32, i32, i32
  }
  func.func @transform_1(%arg0: i32) -> (i32, i32, i32) {
    %c0_i32 = arith.constant 0 : i32
    %c0_i32_0 = arith.constant 0 : i32
    %c0_i32_1 = arith.constant 0 : i32
    %c0_i32_2 = arith.constant 0 : i32
    return %c0_i32, %c0_i32_0, %c0_i32_1 : i32, i32, i32
  }
  func.func @transform_2(%arg0: i32) -> (i32, i32) {
    %c0_i32 = arith.constant 0 : i32
    %c0_i32_0 = arith.constant 0 : i32
    %c0_i32_1 = arith.constant 0 : i32
    return %c0_i32, %c0_i32_0 : i32, i32
  }
  func.func @transform_3(%arg0: i32) -> (i32, i32) {
    %c0_i32 = arith.constant 0 : i32
    %c0_i32_0 = arith.constant 0 : i32
    %c0_i32_1 = arith.constant 0 : i32
    return %c0_i32, %c0_i32_0 : i32, i32
  }
  func.func @transform_4(%arg0: i32) -> (i32, i32, i32, i32) {
    %c0_i32 = arith.constant 0 : i32
    %c0_i32_0 = arith.constant 0 : i32
    %c0_i32_1 = arith.constant 0 : i32
    %c0_i32_2 = arith.constant 0 : i32
    return %arg0, %c0_i32, %c0_i32_0, %c0_i32_1 : i32, i32, i32, i32
  }
  func.func @transform_5(%arg0: i32) -> (i32, i32, i32, i32) {
    %c0_i32 = arith.constant 0 : i32
    %c0_i32_0 = arith.constant 0 : i32
    %c0_i32_1 = arith.constant 0 : i32
    %c0_i32_2 = arith.constant 0 : i32
    return %arg0, %c0_i32, %c0_i32_0, %c0_i32_1 : i32, i32, i32, i32
  }
}

module attributes {stable_mosaic.version = 11 : i64} {
  func.func @kernel(%arg0: i32, %arg1: memref<1x4x2x2x64xbf16, #tpu.memory_space<vmem>>, %arg2: memref<9x64x128xbf16, #tpu.memory_space<vmem>>, %arg3: memref<1x64x128xbf16, #tpu.memory_space<vmem>>, %arg4: memref<1x128xf32, #tpu.memory_space<vmem>>, %arg5: memref<1x128xf32, #tpu.memory_space<vmem>>, %arg6: memref<1x128xf32, #tpu.memory_space<vmem>>, %arg7: memref<1x128xf32, #tpu.memory_space<vmem>>, %arg8: memref<1x1x1x128xbf16, #tpu.memory_space<vmem>>, %arg9: memref<1x1x1x128xbf16, #tpu.memory_space<vmem>>) attributes {dimension_semantics = [#tpu.dimension_semantics<parallel>], iteration_bounds = array<i64: 2>, scalar_prefetch = 0 : i64, scratch_operands = 0 : i64, tpu.core_type = #tpu.core_type<tc>, window_params = [{transform_indices = @transform_0, window_bounds = array<i64: 1, 4, 2, 2, 64>}, {pipeline_mode = #tpu.pipeline_mode<synchronous>, transform_indices = @transform_1, window_bounds = array<i64: 9, 64, 128>}, {pipeline_mode = #tpu.pipeline_mode<synchronous>, transform_indices = @transform_2, window_bounds = array<i64: 1, 64, 128>}, {pipeline_mode = #tpu.pipeline_mode<synchronous>, transform_indices = @transform_3, window_bounds = array<i64: 1, 128>}, {pipeline_mode = #tpu.pipeline_mode<synchronous>, transform_indices = @transform_4, window_bounds = array<i64: 1, 128>}, {pipeline_mode = #tpu.pipeline_mode<synchronous>, transform_indices = @transform_5, window_bounds = array<i64: 1, 128>}, {pipeline_mode = #tpu.pipeline_mode<synchronous>, transform_indices = @transform_6, window_bounds = array<i64: 1, 128>}, {transform_indices = @transform_7, window_bounds = array<i64: 1, 1, 1, 128>}, {transform_indices = @transform_8, window_bounds = array<i64: 1, 1, 1, 128>}]} {
    %c0_i32 = arith.constant 0 : i32
    %c1_i32 = arith.constant 1 : i32
    %0 = arith.muli %c0_i32, %c1_i32 : i32
    %c0_i32_0 = arith.constant 0 : i32
    %1 = arith.addi %c0_i32_0, %0 : i32
    %cst = arith.constant 0.000000e+00 : f32
    %2 = vector.broadcast %cst : f32 to vector<1x128xf32>
    %c0_i32_1 = arith.constant 0 : i32
    %3 = arith.addi %c0_i32_1, %1 : i32
    %c0 = arith.constant 0 : index
    %c0_2 = arith.constant 0 : index
    %4 = arith.index_cast %3 : i32 to index
    %c0_3 = arith.constant 0 : index
    %c0_4 = arith.constant 0 : index
    %5 = vector.load %arg1[%c0, %c0_2, %4, %c0_3, %c0_4] : memref<1x4x2x2x64xbf16, #tpu.memory_space<vmem>>, vector<1x1x1x1x64xbf16>
    %6 = vector.shape_cast %5 : vector<1x1x1x1x64xbf16> to vector<1x64xbf16>
    %c0_5 = arith.constant 0 : index
    %c0_6 = arith.constant 0 : index
    %c0_7 = arith.constant 0 : index
    %7 = vector.load %arg2[%c0_5, %c0_6, %c0_7] : memref<9x64x128xbf16, #tpu.memory_space<vmem>>, vector<1x64x128xbf16>
    %8 = vector.shape_cast %7 : vector<1x64x128xbf16> to vector<64x128xbf16>
    %cst_8 = arith.constant dense<0.000000e+00> : vector<1x128xf32>
    %9 = tpu.matmul %6, %8, %cst_8 {dimension_numbers = #tpu.dot_dimension_numbers<[1], [0], [0], [1], [0, 0, 1, 1], [], []>} : vector<1x64xbf16>, vector<64x128xbf16>, vector<1x128xf32> -> vector<1x128xf32>
    %10 = arith.addf %2, %9 : vector<1x128xf32>
    %c0_i32_9 = arith.constant 0 : i32
    %11 = arith.addi %c0_i32_9, %1 : i32
    %c0_10 = arith.constant 0 : index
    %c1 = arith.constant 1 : index
    %12 = arith.index_cast %11 : i32 to index
    %c0_11 = arith.constant 0 : index
    %c0_12 = arith.constant 0 : index
    %13 = vector.load %arg1[%c0_10, %c1, %12, %c0_11, %c0_12] : memref<1x4x2x2x64xbf16, #tpu.memory_space<vmem>>, vector<1x1x1x1x64xbf16>
    %14 = vector.shape_cast %13 : vector<1x1x1x1x64xbf16> to vector<1x64xbf16>
    %c1_13 = arith.constant 1 : index
    %c0_14 = arith.constant 0 : index
    %c0_15 = arith.constant 0 : index
    %15 = vector.load %arg2[%c1_13, %c0_14, %c0_15] : memref<9x64x128xbf16, #tpu.memory_space<vmem>>, vector<1x64x128xbf16>
    %16 = vector.shape_cast %15 : vector<1x64x128xbf16> to vector<64x128xbf16>
    %cst_16 = arith.constant dense<0.000000e+00> : vector<1x128xf32>
    %17 = tpu.matmul %14, %16, %cst_16 {dimension_numbers = #tpu.dot_dimension_numbers<[1], [0], [0], [1], [0, 0, 1, 1], [], []>} : vector<1x64xbf16>, vector<64x128xbf16>, vector<1x128xf32> -> vector<1x128xf32>
    %18 = arith.addf %10, %17 : vector<1x128xf32>
    %c0_i32_17 = arith.constant 0 : i32
    %19 = arith.addi %c0_i32_17, %1 : i32
    %c0_18 = arith.constant 0 : index
    %c0_19 = arith.constant 0 : index
    %20 = arith.index_cast %19 : i32 to index
    %c1_20 = arith.constant 1 : index
    %c0_21 = arith.constant 0 : index
    %21 = vector.load %arg1[%c0_18, %c0_19, %20, %c1_20, %c0_21] : memref<1x4x2x2x64xbf16, #tpu.memory_space<vmem>>, vector<1x1x1x1x64xbf16>
    %22 = vector.shape_cast %21 : vector<1x1x1x1x64xbf16> to vector<1x64xbf16>
    %c2 = arith.constant 2 : index
    %c0_22 = arith.constant 0 : index
    %c0_23 = arith.constant 0 : index
    %23 = vector.load %arg2[%c2, %c0_22, %c0_23] : memref<9x64x128xbf16, #tpu.memory_space<vmem>>, vector<1x64x128xbf16>
    %24 = vector.shape_cast %23 : vector<1x64x128xbf16> to vector<64x128xbf16>
    %cst_24 = arith.constant dense<0.000000e+00> : vector<1x128xf32>
    %25 = tpu.matmul %22, %24, %cst_24 {dimension_numbers = #tpu.dot_dimension_numbers<[1], [0], [0], [1], [0, 0, 1, 1], [], []>} : vector<1x64xbf16>, vector<64x128xbf16>, vector<1x128xf32> -> vector<1x128xf32>
    %26 = arith.addf %18, %25 : vector<1x128xf32>
    %c0_i32_25 = arith.constant 0 : i32
    %27 = arith.addi %c0_i32_25, %1 : i32
    %c0_26 = arith.constant 0 : index
    %c2_27 = arith.constant 2 : index
    %28 = arith.index_cast %27 : i32 to index
    %c0_28 = arith.constant 0 : index
    %c0_29 = arith.constant 0 : index
    %29 = vector.load %arg1[%c0_26, %c2_27, %28, %c0_28, %c0_29] : memref<1x4x2x2x64xbf16, #tpu.memory_space<vmem>>, vector<1x1x1x1x64xbf16>
    %30 = vector.shape_cast %29 : vector<1x1x1x1x64xbf16> to vector<1x64xbf16>
    %c3 = arith.constant 3 : index
    %c0_30 = arith.constant 0 : index
    %c0_31 = arith.constant 0 : index
    %31 = vector.load %arg2[%c3, %c0_30, %c0_31] : memref<9x64x128xbf16, #tpu.memory_space<vmem>>, vector<1x64x128xbf16>
    %32 = vector.shape_cast %31 : vector<1x64x128xbf16> to vector<64x128xbf16>
    %cst_32 = arith.constant dense<0.000000e+00> : vector<1x128xf32>
    %33 = tpu.matmul %30, %32, %cst_32 {dimension_numbers = #tpu.dot_dimension_numbers<[1], [0], [0], [1], [0, 0, 1, 1], [], []>} : vector<1x64xbf16>, vector<64x128xbf16>, vector<1x128xf32> -> vector<1x128xf32>
    %34 = arith.addf %26, %33 : vector<1x128xf32>
    %c0_i32_33 = arith.constant 0 : i32
    %35 = arith.addi %c0_i32_33, %1 : i32
    %c0_34 = arith.constant 0 : index
    %c3_35 = arith.constant 3 : index
    %36 = arith.index_cast %35 : i32 to index
    %c0_36 = arith.constant 0 : index
    %c0_37 = arith.constant 0 : index
    %37 = vector.load %arg1[%c0_34, %c3_35, %36, %c0_36, %c0_37] : memref<1x4x2x2x64xbf16, #tpu.memory_space<vmem>>, vector<1x1x1x1x64xbf16>
    %38 = vector.shape_cast %37 : vector<1x1x1x1x64xbf16> to vector<1x64xbf16>
    %c4 = arith.constant 4 : index
    %c0_38 = arith.constant 0 : index
    %c0_39 = arith.constant 0 : index
    %39 = vector.load %arg2[%c4, %c0_38, %c0_39] : memref<9x64x128xbf16, #tpu.memory_space<vmem>>, vector<1x64x128xbf16>
    %40 = vector.shape_cast %39 : vector<1x64x128xbf16> to vector<64x128xbf16>
    %cst_40 = arith.constant dense<0.000000e+00> : vector<1x128xf32>
    %41 = tpu.matmul %38, %40, %cst_40 {dimension_numbers = #tpu.dot_dimension_numbers<[1], [0], [0], [1], [0, 0, 1, 1], [], []>} : vector<1x64xbf16>, vector<64x128xbf16>, vector<1x128xf32> -> vector<1x128xf32>
    %42 = arith.addf %34, %41 : vector<1x128xf32>
    %c0_41 = arith.constant 0 : index
    %c0_42 = arith.constant 0 : index
    %c0_43 = arith.constant 0 : index
    %43 = vector.load %arg3[%c0_41, %c0_42, %c0_43] : memref<1x64x128xbf16, #tpu.memory_space<vmem>>, vector<1x64x128xbf16>
    %44 = vector.shape_cast %43 : vector<1x64x128xbf16> to vector<64x128xbf16>
    %cst_44 = arith.constant dense<0.000000e+00> : vector<1x128xf32>
    %45 = tpu.matmul %38, %44, %cst_44 {dimension_numbers = #tpu.dot_dimension_numbers<[1], [0], [0], [1], [0, 0, 1, 1], [], []>} : vector<1x64xbf16>, vector<64x128xbf16>, vector<1x128xf32> -> vector<1x128xf32>
    %c0_i32_45 = arith.constant 0 : i32
    %46 = arith.addi %c0_i32_45, %1 : i32
    %c0_46 = arith.constant 0 : index
    %c2_47 = arith.constant 2 : index
    %47 = arith.index_cast %46 : i32 to index
    %c1_48 = arith.constant 1 : index
    %c0_49 = arith.constant 0 : index
    %48 = vector.load %arg1[%c0_46, %c2_47, %47, %c1_48, %c0_49] : memref<1x4x2x2x64xbf16, #tpu.memory_space<vmem>>, vector<1x1x1x1x64xbf16>
    %49 = vector.shape_cast %48 : vector<1x1x1x1x64xbf16> to vector<1x64xbf16>
    %c5 = arith.constant 5 : index
    %c0_50 = arith.constant 0 : index
    %c0_51 = arith.constant 0 : index
    %50 = vector.load %arg2[%c5, %c0_50, %c0_51] : memref<9x64x128xbf16, #tpu.memory_space<vmem>>, vector<1x64x128xbf16>
    %51 = vector.shape_cast %50 : vector<1x64x128xbf16> to vector<64x128xbf16>
    %cst_52 = arith.constant dense<0.000000e+00> : vector<1x128xf32>
    %52 = tpu.matmul %49, %51, %cst_52 {dimension_numbers = #tpu.dot_dimension_numbers<[1], [0], [0], [1], [0, 0, 1, 1], [], []>} : vector<1x64xbf16>, vector<64x128xbf16>, vector<1x128xf32> -> vector<1x128xf32>
    %53 = arith.addf %42, %52 : vector<1x128xf32>
    %c1_i32_53 = arith.constant 1 : i32
    %54 = arith.addi %c1_i32_53, %1 : i32
    %c0_54 = arith.constant 0 : index
    %c0_55 = arith.constant 0 : index
    %55 = arith.index_cast %54 : i32 to index
    %c0_56 = arith.constant 0 : index
    %c0_57 = arith.constant 0 : index
    %56 = vector.load %arg1[%c0_54, %c0_55, %55, %c0_56, %c0_57] : memref<1x4x2x2x64xbf16, #tpu.memory_space<vmem>>, vector<1x1x1x1x64xbf16>
    %57 = vector.shape_cast %56 : vector<1x1x1x1x64xbf16> to vector<1x64xbf16>
    %c6 = arith.constant 6 : index
    %c0_58 = arith.constant 0 : index
    %c0_59 = arith.constant 0 : index
    %58 = vector.load %arg2[%c6, %c0_58, %c0_59] : memref<9x64x128xbf16, #tpu.memory_space<vmem>>, vector<1x64x128xbf16>
    %59 = vector.shape_cast %58 : vector<1x64x128xbf16> to vector<64x128xbf16>
    %cst_60 = arith.constant dense<0.000000e+00> : vector<1x128xf32>
    %60 = tpu.matmul %57, %59, %cst_60 {dimension_numbers = #tpu.dot_dimension_numbers<[1], [0], [0], [1], [0, 0, 1, 1], [], []>} : vector<1x64xbf16>, vector<64x128xbf16>, vector<1x128xf32> -> vector<1x128xf32>
    %61 = arith.addf %53, %60 : vector<1x128xf32>
    %c1_i32_61 = arith.constant 1 : i32
    %62 = arith.addi %c1_i32_61, %1 : i32
    %c0_62 = arith.constant 0 : index
    %c1_63 = arith.constant 1 : index
    %63 = arith.index_cast %62 : i32 to index
    %c0_64 = arith.constant 0 : index
    %c0_65 = arith.constant 0 : index
    %64 = vector.load %arg1[%c0_62, %c1_63, %63, %c0_64, %c0_65] : memref<1x4x2x2x64xbf16, #tpu.memory_space<vmem>>, vector<1x1x1x1x64xbf16>
    %65 = vector.shape_cast %64 : vector<1x1x1x1x64xbf16> to vector<1x64xbf16>
    %c7 = arith.constant 7 : index
    %c0_66 = arith.constant 0 : index
    %c0_67 = arith.constant 0 : index
    %66 = vector.load %arg2[%c7, %c0_66, %c0_67] : memref<9x64x128xbf16, #tpu.memory_space<vmem>>, vector<1x64x128xbf16>
    %67 = vector.shape_cast %66 : vector<1x64x128xbf16> to vector<64x128xbf16>
    %cst_68 = arith.constant dense<0.000000e+00> : vector<1x128xf32>
    %68 = tpu.matmul %65, %67, %cst_68 {dimension_numbers = #tpu.dot_dimension_numbers<[1], [0], [0], [1], [0, 0, 1, 1], [], []>} : vector<1x64xbf16>, vector<64x128xbf16>, vector<1x128xf32> -> vector<1x128xf32>
    %69 = arith.addf %61, %68 : vector<1x128xf32>
    %c1_i32_69 = arith.constant 1 : i32
    %70 = arith.addi %c1_i32_69, %1 : i32
    %c0_70 = arith.constant 0 : index
    %c0_71 = arith.constant 0 : index
    %71 = arith.index_cast %70 : i32 to index
    %c1_72 = arith.constant 1 : index
    %c0_73 = arith.constant 0 : index
    %72 = vector.load %arg1[%c0_70, %c0_71, %71, %c1_72, %c0_73] : memref<1x4x2x2x64xbf16, #tpu.memory_space<vmem>>, vector<1x1x1x1x64xbf16>
    %73 = vector.shape_cast %72 : vector<1x1x1x1x64xbf16> to vector<1x64xbf16>
    %c8 = arith.constant 8 : index
    %c0_74 = arith.constant 0 : index
    %c0_75 = arith.constant 0 : index
    %74 = vector.load %arg2[%c8, %c0_74, %c0_75] : memref<9x64x128xbf16, #tpu.memory_space<vmem>>, vector<1x64x128xbf16>
    %75 = vector.shape_cast %74 : vector<1x64x128xbf16> to vector<64x128xbf16>
    %cst_76 = arith.constant dense<0.000000e+00> : vector<1x128xf32>
    %76 = tpu.matmul %73, %75, %cst_76 {dimension_numbers = #tpu.dot_dimension_numbers<[1], [0], [0], [1], [0, 0, 1, 1], [], []>} : vector<1x64xbf16>, vector<64x128xbf16>, vector<1x128xf32> -> vector<1x128xf32>
    %77 = arith.addf %69, %76 : vector<1x128xf32>
    %c0_77 = arith.constant 0 : index
    %c0_78 = arith.constant 0 : index
    %78 = vector.load %arg4[%c0_77, %c0_78] : memref<1x128xf32, #tpu.memory_space<vmem>>, vector<1x128xf32>
    %79 = arith.mulf %77, %78 : vector<1x128xf32>
    %c0_79 = arith.constant 0 : index
    %c0_80 = arith.constant 0 : index
    %80 = vector.load %arg5[%c0_79, %c0_80] : memref<1x128xf32, #tpu.memory_space<vmem>>, vector<1x128xf32>
    %81 = arith.addf %79, %80 : vector<1x128xf32>
    %cst_81 = arith.constant 0.000000e+00 : f32
    %82 = vector.broadcast %cst_81 : f32 to vector<1x128xf32>
    %83 = arith.maximumf %81, %82 : vector<1x128xf32>
    %84 = arith.truncf %83 : vector<1x128xf32> to vector<1x128xbf16>
    %c0_82 = arith.constant 0 : index
    %85 = arith.index_cast %1 : i32 to index
    %c0_83 = arith.constant 0 : index
    %c0_84 = arith.constant 0 : index
    %86 = vector.load %arg8[%c0_82, %85, %c0_83, %c0_84] : memref<1x1x1x128xbf16, #tpu.memory_space<vmem>>, vector<1x1x1x128xbf16>
    %87 = vector.shape_cast %86 : vector<1x1x1x128xbf16> to vector<1x128xbf16>
    %88 = vector.shape_cast %84 : vector<1x128xbf16> to vector<1x1x1x128xbf16>
    tpu.vector_store %arg8[%c0_82, %85, %c0_83, %c0_84], %88 {strides = array<i32>} : memref<1x1x1x128xbf16, #tpu.memory_space<vmem>>, vector<1x1x1x128xbf16>,
    %c0_85 = arith.constant 0 : index
    %c0_86 = arith.constant 0 : index
    %89 = vector.load %arg6[%c0_85, %c0_86] : memref<1x128xf32, #tpu.memory_space<vmem>>, vector<1x128xf32>
    %90 = arith.mulf %45, %89 : vector<1x128xf32>
    %c0_87 = arith.constant 0 : index
    %c0_88 = arith.constant 0 : index
    %91 = vector.load %arg7[%c0_87, %c0_88] : memref<1x128xf32, #tpu.memory_space<vmem>>, vector<1x128xf32>
    %92 = arith.addf %90, %91 : vector<1x128xf32>
    %93 = arith.truncf %92 : vector<1x128xf32> to vector<1x128xbf16>
    %c0_89 = arith.constant 0 : index
    %94 = arith.index_cast %1 : i32 to index
    %c0_90 = arith.constant 0 : index
    %c0_91 = arith.constant 0 : index
    %95 = vector.load %arg9[%c0_89, %94, %c0_90, %c0_91] : memref<1x1x1x128xbf16, #tpu.memory_space<vmem>>, vector<1x1x1x128xbf16>
    %96 = vector.shape_cast %95 : vector<1x1x1x128xbf16> to vector<1x128xbf16>
    %97 = vector.shape_cast %93 : vector<1x128xbf16> to vector<1x1x1x128xbf16>
    tpu.vector_store %arg9[%c0_89, %94, %c0_90, %c0_91], %97 {strides = array<i32>} : memref<1x1x1x128xbf16, #tpu.memory_space<vmem>>, vector<1x1x1x128xbf16>,
    %c1_i32_92 = arith.constant 1 : i32
    return
  }
  func.func @transform_0(%arg0: i32) -> (i32, i32, i32, i32, i32) {
    %c0_i32 = arith.constant 0 : i32
    %c0_i32_0 = arith.constant 0 : i32
    %c0_i32_1 = arith.constant 0 : i32
    %c0_i32_2 = arith.constant 0 : i32
    %c0_i32_3 = arith.constant 0 : i32
    return %arg0, %c0_i32, %c0_i32_0, %c0_i32_1, %c0_i32_2 : i32, i32, i32, i32, i32
  }
  func.func @transform_1(%arg0: i32) -> (i32, i32, i32) {
    %c0_i32 = arith.constant 0 : i32
    %c0_i32_0 = arith.constant 0 : i32
    %c0_i32_1 = arith.constant 0 : i32
    %c0_i32_2 = arith.constant 0 : i32
    return %c0_i32, %c0_i32_0, %c0_i32_1 : i32, i32, i32
  }
  func.func @transform_2(%arg0: i32) -> (i32, i32, i32) {
    %c0_i32 = arith.constant 0 : i32
    %c0_i32_0 = arith.constant 0 : i32
    %c0_i32_1 = arith.constant 0 : i32
    %c0_i32_2 = arith.constant 0 : i32
    return %c0_i32, %c0_i32_0, %c0_i32_1 : i32, i32, i32
  }
  func.func @transform_3(%arg0: i32) -> (i32, i32) {
    %c0_i32 = arith.constant 0 : i32
    %c0_i32_0 = arith.constant 0 : i32
    %c0_i32_1 = arith.constant 0 : i32
    return %c0_i32, %c0_i32_0 : i32, i32
  }
  func.func @transform_4(%arg0: i32) -> (i32, i32) {
    %c0_i32 = arith.constant 0 : i32
    %c0_i32_0 = arith.constant 0 : i32
    %c0_i32_1 = arith.constant 0 : i32
    return %c0_i32, %c0_i32_0 : i32, i32
  }
  func.func @transform_5(%arg0: i32) -> (i32, i32) {
    %c0_i32 = arith.constant 0 : i32
    %c0_i32_0 = arith.constant 0 : i32
    %c0_i32_1 = arith.constant 0 : i32
    return %c0_i32, %c0_i32_0 : i32, i32
  }
  func.func @transform_6(%arg0: i32) -> (i32, i32) {
    %c0_i32 = arith.constant 0 : i32
    %c0_i32_0 = arith.constant 0 : i32
    %c0_i32_1 = arith.constant 0 : i32
    return %c0_i32, %c0_i32_0 : i32, i32
  }
  func.func @transform_7(%arg0: i32) -> (i32, i32, i32, i32) {
    %c0_i32 = arith.constant 0 : i32
    %c0_i32_0 = arith.constant 0 : i32
    %c0_i32_1 = arith.constant 0 : i32
    %c0_i32_2 = arith.constant 0 : i32
    return %arg0, %c0_i32, %c0_i32_0, %c0_i32_1 : i32, i32, i32, i32
  }
  func.func @transform_8(%arg0: i32) -> (i32, i32, i32, i32) {
    %c0_i32 = arith.constant 0 : i32
    %c0_i32_0 = arith.constant 0 : i32
    %c0_i32_1 = arith.constant 0 : i32
    %c0_i32_2 = arith.constant 0 : i32
    return %arg0, %c0_i32, %c0_i32_0, %c0_i32_1 : i32, i32, i32, i32
  }
}

module attributes {stable_mosaic.version = 11 : i64} {
  func.func @kernel(%arg0: i32, %arg1: memref<1x1x3x3x128xbf16, #tpu.memory_space<vmem>>, %arg2: memref<9x128x128xbf16, #tpu.memory_space<vmem>>, %arg3: memref<1x128xf32, #tpu.memory_space<vmem>>, %arg4: memref<1x128xf32, #tpu.memory_space<vmem>>, %arg5: memref<1x1x1x128xbf16, #tpu.memory_space<vmem>>, %arg6: memref<1x1x1x128xbf16, #tpu.memory_space<vmem>>) attributes {dimension_semantics = [#tpu.dimension_semantics<parallel>], iteration_bounds = array<i64: 2>, scalar_prefetch = 0 : i64, scratch_operands = 0 : i64, tpu.core_type = #tpu.core_type<tc>, window_params = [{transform_indices = @transform_0, window_bounds = array<i64: 1, 1, 3, 3, 128>}, {pipeline_mode = #tpu.pipeline_mode<synchronous>, transform_indices = @transform_1, window_bounds = array<i64: 9, 128, 128>}, {pipeline_mode = #tpu.pipeline_mode<synchronous>, transform_indices = @transform_2, window_bounds = array<i64: 1, 128>}, {pipeline_mode = #tpu.pipeline_mode<synchronous>, transform_indices = @transform_3, window_bounds = array<i64: 1, 128>}, {transform_indices = @transform_4, window_bounds = array<i64: 1, 1, 1, 128>}, {transform_indices = @transform_5, window_bounds = array<i64: 1, 1, 1, 128>}]} {
    %c0_i32 = arith.constant 0 : i32
    %c1_i32 = arith.constant 1 : i32
    %0 = arith.muli %c0_i32, %c1_i32 : i32
    %c0_i32_0 = arith.constant 0 : i32
    %1 = arith.addi %c0_i32_0, %0 : i32
    %cst = arith.constant 0.000000e+00 : f32
    %2 = vector.broadcast %cst : f32 to vector<1x128xf32>
    %c0_i32_1 = arith.constant 0 : i32
    %3 = arith.addi %c0_i32_1, %1 : i32
    %c0 = arith.constant 0 : index
    %c0_2 = arith.constant 0 : index
    %4 = arith.index_cast %3 : i32 to index
    %c0_3 = arith.constant 0 : index
    %c0_4 = arith.constant 0 : index
    %5 = vector.load %arg1[%c0, %c0_2, %4, %c0_3, %c0_4] : memref<1x1x3x3x128xbf16, #tpu.memory_space<vmem>>, vector<1x1x1x1x128xbf16>
    %6 = vector.shape_cast %5 : vector<1x1x1x1x128xbf16> to vector<1x128xbf16>
    %c0_5 = arith.constant 0 : index
    %c0_6 = arith.constant 0 : index
    %c0_7 = arith.constant 0 : index
    %7 = vector.load %arg2[%c0_5, %c0_6, %c0_7] : memref<9x128x128xbf16, #tpu.memory_space<vmem>>, vector<1x128x128xbf16>
    %8 = vector.shape_cast %7 : vector<1x128x128xbf16> to vector<128x128xbf16>
    %cst_8 = arith.constant dense<0.000000e+00> : vector<1x128xf32>
    %9 = tpu.matmul %6, %8, %cst_8 {dimension_numbers = #tpu.dot_dimension_numbers<[1], [0], [0], [1], [0, 0, 1, 1], [], []>} : vector<1x128xbf16>, vector<128x128xbf16>, vector<1x128xf32> -> vector<1x128xf32>
    %10 = arith.addf %2, %9 : vector<1x128xf32>
    %c0_i32_9 = arith.constant 0 : i32
    %11 = arith.addi %c0_i32_9, %1 : i32
    %c0_10 = arith.constant 0 : index
    %c0_11 = arith.constant 0 : index
    %12 = arith.index_cast %11 : i32 to index
    %c1 = arith.constant 1 : index
    %c0_12 = arith.constant 0 : index
    %13 = vector.load %arg1[%c0_10, %c0_11, %12, %c1, %c0_12] : memref<1x1x3x3x128xbf16, #tpu.memory_space<vmem>>, vector<1x1x1x1x128xbf16>
    %14 = vector.shape_cast %13 : vector<1x1x1x1x128xbf16> to vector<1x128xbf16>
    %c1_13 = arith.constant 1 : index
    %c0_14 = arith.constant 0 : index
    %c0_15 = arith.constant 0 : index
    %15 = vector.load %arg2[%c1_13, %c0_14, %c0_15] : memref<9x128x128xbf16, #tpu.memory_space<vmem>>, vector<1x128x128xbf16>
    %16 = vector.shape_cast %15 : vector<1x128x128xbf16> to vector<128x128xbf16>
    %cst_16 = arith.constant dense<0.000000e+00> : vector<1x128xf32>
    %17 = tpu.matmul %14, %16, %cst_16 {dimension_numbers = #tpu.dot_dimension_numbers<[1], [0], [0], [1], [0, 0, 1, 1], [], []>} : vector<1x128xbf16>, vector<128x128xbf16>, vector<1x128xf32> -> vector<1x128xf32>
    %18 = arith.addf %10, %17 : vector<1x128xf32>
    %c0_i32_17 = arith.constant 0 : i32
    %19 = arith.addi %c0_i32_17, %1 : i32
    %c0_18 = arith.constant 0 : index
    %c0_19 = arith.constant 0 : index
    %20 = arith.index_cast %19 : i32 to index
    %c2 = arith.constant 2 : index
    %c0_20 = arith.constant 0 : index
    %21 = vector.load %arg1[%c0_18, %c0_19, %20, %c2, %c0_20] : memref<1x1x3x3x128xbf16, #tpu.memory_space<vmem>>, vector<1x1x1x1x128xbf16>
    %22 = vector.shape_cast %21 : vector<1x1x1x1x128xbf16> to vector<1x128xbf16>
    %c2_21 = arith.constant 2 : index
    %c0_22 = arith.constant 0 : index
    %c0_23 = arith.constant 0 : index
    %23 = vector.load %arg2[%c2_21, %c0_22, %c0_23] : memref<9x128x128xbf16, #tpu.memory_space<vmem>>, vector<1x128x128xbf16>
    %24 = vector.shape_cast %23 : vector<1x128x128xbf16> to vector<128x128xbf16>
    %cst_24 = arith.constant dense<0.000000e+00> : vector<1x128xf32>
    %25 = tpu.matmul %22, %24, %cst_24 {dimension_numbers = #tpu.dot_dimension_numbers<[1], [0], [0], [1], [0, 0, 1, 1], [], []>} : vector<1x128xbf16>, vector<128x128xbf16>, vector<1x128xf32> -> vector<1x128xf32>
    %26 = arith.addf %18, %25 : vector<1x128xf32>
    %c1_i32_25 = arith.constant 1 : i32
    %27 = arith.addi %c1_i32_25, %1 : i32
    %c0_26 = arith.constant 0 : index
    %c0_27 = arith.constant 0 : index
    %28 = arith.index_cast %27 : i32 to index
    %c0_28 = arith.constant 0 : index
    %c0_29 = arith.constant 0 : index
    %29 = vector.load %arg1[%c0_26, %c0_27, %28, %c0_28, %c0_29] : memref<1x1x3x3x128xbf16, #tpu.memory_space<vmem>>, vector<1x1x1x1x128xbf16>
    %30 = vector.shape_cast %29 : vector<1x1x1x1x128xbf16> to vector<1x128xbf16>
    %c3 = arith.constant 3 : index
    %c0_30 = arith.constant 0 : index
    %c0_31 = arith.constant 0 : index
    %31 = vector.load %arg2[%c3, %c0_30, %c0_31] : memref<9x128x128xbf16, #tpu.memory_space<vmem>>, vector<1x128x128xbf16>
    %32 = vector.shape_cast %31 : vector<1x128x128xbf16> to vector<128x128xbf16>
    %cst_32 = arith.constant dense<0.000000e+00> : vector<1x128xf32>
    %33 = tpu.matmul %30, %32, %cst_32 {dimension_numbers = #tpu.dot_dimension_numbers<[1], [0], [0], [1], [0, 0, 1, 1], [], []>} : vector<1x128xbf16>, vector<128x128xbf16>, vector<1x128xf32> -> vector<1x128xf32>
    %34 = arith.addf %26, %33 : vector<1x128xf32>
    %c1_i32_33 = arith.constant 1 : i32
    %35 = arith.addi %c1_i32_33, %1 : i32
    %c0_34 = arith.constant 0 : index
    %c0_35 = arith.constant 0 : index
    %36 = arith.index_cast %35 : i32 to index
    %c1_36 = arith.constant 1 : index
    %c0_37 = arith.constant 0 : index
    %37 = vector.load %arg1[%c0_34, %c0_35, %36, %c1_36, %c0_37] : memref<1x1x3x3x128xbf16, #tpu.memory_space<vmem>>, vector<1x1x1x1x128xbf16>
    %38 = vector.shape_cast %37 : vector<1x1x1x1x128xbf16> to vector<1x128xbf16>
    %c4 = arith.constant 4 : index
    %c0_38 = arith.constant 0 : index
    %c0_39 = arith.constant 0 : index
    %39 = vector.load %arg2[%c4, %c0_38, %c0_39] : memref<9x128x128xbf16, #tpu.memory_space<vmem>>, vector<1x128x128xbf16>
    %40 = vector.shape_cast %39 : vector<1x128x128xbf16> to vector<128x128xbf16>
    %cst_40 = arith.constant dense<0.000000e+00> : vector<1x128xf32>
    %41 = tpu.matmul %38, %40, %cst_40 {dimension_numbers = #tpu.dot_dimension_numbers<[1], [0], [0], [1], [0, 0, 1, 1], [], []>} : vector<1x128xbf16>, vector<128x128xbf16>, vector<1x128xf32> -> vector<1x128xf32>
    %42 = arith.addf %34, %41 : vector<1x128xf32>
    %c1_i32_41 = arith.constant 1 : i32
    %43 = arith.addi %c1_i32_41, %1 : i32
    %c0_42 = arith.constant 0 : index
    %c0_43 = arith.constant 0 : index
    %44 = arith.index_cast %43 : i32 to index
    %c2_44 = arith.constant 2 : index
    %c0_45 = arith.constant 0 : index
    %45 = vector.load %arg1[%c0_42, %c0_43, %44, %c2_44, %c0_45] : memref<1x1x3x3x128xbf16, #tpu.memory_space<vmem>>, vector<1x1x1x1x128xbf16>
    %46 = vector.shape_cast %45 : vector<1x1x1x1x128xbf16> to vector<1x128xbf16>
    %c5 = arith.constant 5 : index
    %c0_46 = arith.constant 0 : index
    %c0_47 = arith.constant 0 : index
    %47 = vector.load %arg2[%c5, %c0_46, %c0_47] : memref<9x128x128xbf16, #tpu.memory_space<vmem>>, vector<1x128x128xbf16>
    %48 = vector.shape_cast %47 : vector<1x128x128xbf16> to vector<128x128xbf16>
    %cst_48 = arith.constant dense<0.000000e+00> : vector<1x128xf32>
    %49 = tpu.matmul %46, %48, %cst_48 {dimension_numbers = #tpu.dot_dimension_numbers<[1], [0], [0], [1], [0, 0, 1, 1], [], []>} : vector<1x128xbf16>, vector<128x128xbf16>, vector<1x128xf32> -> vector<1x128xf32>
    %50 = arith.addf %42, %49 : vector<1x128xf32>
    %c2_i32 = arith.constant 2 : i32
    %51 = arith.addi %c2_i32, %1 : i32
    %c0_49 = arith.constant 0 : index
    %c0_50 = arith.constant 0 : index
    %52 = arith.index_cast %51 : i32 to index
    %c0_51 = arith.constant 0 : index
    %c0_52 = arith.constant 0 : index
    %53 = vector.load %arg1[%c0_49, %c0_50, %52, %c0_51, %c0_52] : memref<1x1x3x3x128xbf16, #tpu.memory_space<vmem>>, vector<1x1x1x1x128xbf16>
    %54 = vector.shape_cast %53 : vector<1x1x1x1x128xbf16> to vector<1x128xbf16>
    %c6 = arith.constant 6 : index
    %c0_53 = arith.constant 0 : index
    %c0_54 = arith.constant 0 : index
    %55 = vector.load %arg2[%c6, %c0_53, %c0_54] : memref<9x128x128xbf16, #tpu.memory_space<vmem>>, vector<1x128x128xbf16>
    %56 = vector.shape_cast %55 : vector<1x128x128xbf16> to vector<128x128xbf16>
    %cst_55 = arith.constant dense<0.000000e+00> : vector<1x128xf32>
    %57 = tpu.matmul %54, %56, %cst_55 {dimension_numbers = #tpu.dot_dimension_numbers<[1], [0], [0], [1], [0, 0, 1, 1], [], []>} : vector<1x128xbf16>, vector<128x128xbf16>, vector<1x128xf32> -> vector<1x128xf32>
    %58 = arith.addf %50, %57 : vector<1x128xf32>
    %c2_i32_56 = arith.constant 2 : i32
    %59 = arith.addi %c2_i32_56, %1 : i32
    %c0_57 = arith.constant 0 : index
    %c0_58 = arith.constant 0 : index
    %60 = arith.index_cast %59 : i32 to index
    %c1_59 = arith.constant 1 : index
    %c0_60 = arith.constant 0 : index
    %61 = vector.load %arg1[%c0_57, %c0_58, %60, %c1_59, %c0_60] : memref<1x1x3x3x128xbf16, #tpu.memory_space<vmem>>, vector<1x1x1x1x128xbf16>
    %62 = vector.shape_cast %61 : vector<1x1x1x1x128xbf16> to vector<1x128xbf16>
    %c7 = arith.constant 7 : index
    %c0_61 = arith.constant 0 : index
    %c0_62 = arith.constant 0 : index
    %63 = vector.load %arg2[%c7, %c0_61, %c0_62] : memref<9x128x128xbf16, #tpu.memory_space<vmem>>, vector<1x128x128xbf16>
    %64 = vector.shape_cast %63 : vector<1x128x128xbf16> to vector<128x128xbf16>
    %cst_63 = arith.constant dense<0.000000e+00> : vector<1x128xf32>
    %65 = tpu.matmul %62, %64, %cst_63 {dimension_numbers = #tpu.dot_dimension_numbers<[1], [0], [0], [1], [0, 0, 1, 1], [], []>} : vector<1x128xbf16>, vector<128x128xbf16>, vector<1x128xf32> -> vector<1x128xf32>
    %66 = arith.addf %58, %65 : vector<1x128xf32>
    %c2_i32_64 = arith.constant 2 : i32
    %67 = arith.addi %c2_i32_64, %1 : i32
    %c0_65 = arith.constant 0 : index
    %c0_66 = arith.constant 0 : index
    %68 = arith.index_cast %67 : i32 to index
    %c2_67 = arith.constant 2 : index
    %c0_68 = arith.constant 0 : index
    %69 = vector.load %arg1[%c0_65, %c0_66, %68, %c2_67, %c0_68] : memref<1x1x3x3x128xbf16, #tpu.memory_space<vmem>>, vector<1x1x1x1x128xbf16>
    %70 = vector.shape_cast %69 : vector<1x1x1x1x128xbf16> to vector<1x128xbf16>
    %c8 = arith.constant 8 : index
    %c0_69 = arith.constant 0 : index
    %c0_70 = arith.constant 0 : index
    %71 = vector.load %arg2[%c8, %c0_69, %c0_70] : memref<9x128x128xbf16, #tpu.memory_space<vmem>>, vector<1x128x128xbf16>
    %72 = vector.shape_cast %71 : vector<1x128x128xbf16> to vector<128x128xbf16>
    %cst_71 = arith.constant dense<0.000000e+00> : vector<1x128xf32>
    %73 = tpu.matmul %70, %72, %cst_71 {dimension_numbers = #tpu.dot_dimension_numbers<[1], [0], [0], [1], [0, 0, 1, 1], [], []>} : vector<1x128xbf16>, vector<128x128xbf16>, vector<1x128xf32> -> vector<1x128xf32>
    %74 = arith.addf %66, %73 : vector<1x128xf32>
    %c0_72 = arith.constant 0 : index
    %c0_73 = arith.constant 0 : index
    %75 = vector.load %arg3[%c0_72, %c0_73] : memref<1x128xf32, #tpu.memory_space<vmem>>, vector<1x128xf32>
    %76 = arith.mulf %74, %75 : vector<1x128xf32>
    %c0_74 = arith.constant 0 : index
    %c0_75 = arith.constant 0 : index
    %77 = vector.load %arg4[%c0_74, %c0_75] : memref<1x128xf32, #tpu.memory_space<vmem>>, vector<1x128xf32>
    %78 = arith.addf %76, %77 : vector<1x128xf32>
    %cst_76 = arith.constant 0.000000e+00 : f32
    %79 = vector.broadcast %cst_76 : f32 to vector<1x128xf32>
    %80 = arith.maximumf %78, %79 : vector<1x128xf32>
    %c0_77 = arith.constant 0 : index
    %81 = arith.index_cast %1 : i32 to index
    %c0_78 = arith.constant 0 : index
    %c0_79 = arith.constant 0 : index
    %82 = vector.load %arg5[%c0_77, %81, %c0_78, %c0_79] : memref<1x1x1x128xbf16, #tpu.memory_space<vmem>>, vector<1x1x1x128xbf16>
    %83 = vector.shape_cast %82 : vector<1x1x1x128xbf16> to vector<1x128xbf16>
    %84 = arith.extf %83 : vector<1x128xbf16> to vector<1x128xf32>
    %85 = arith.addf %80, %84 : vector<1x128xf32>
    %86 = arith.truncf %85 : vector<1x128xf32> to vector<1x128xbf16>
    %c0_80 = arith.constant 0 : index
    %87 = arith.index_cast %1 : i32 to index
    %c0_81 = arith.constant 0 : index
    %c0_82 = arith.constant 0 : index
    %88 = vector.load %arg6[%c0_80, %87, %c0_81, %c0_82] : memref<1x1x1x128xbf16, #tpu.memory_space<vmem>>, vector<1x1x1x128xbf16>
    %89 = vector.shape_cast %88 : vector<1x1x1x128xbf16> to vector<1x128xbf16>
    %90 = vector.shape_cast %86 : vector<1x128xbf16> to vector<1x1x1x128xbf16>
    tpu.vector_store %arg6[%c0_80, %87, %c0_81, %c0_82], %90 {strides = array<i32>} : memref<1x1x1x128xbf16, #tpu.memory_space<vmem>>, vector<1x1x1x128xbf16>,
    %c1_i32_83 = arith.constant 1 : i32
    return
  }
  func.func @transform_0(%arg0: i32) -> (i32, i32, i32, i32, i32) {
    %c0_i32 = arith.constant 0 : i32
    %c0_i32_0 = arith.constant 0 : i32
    %c0_i32_1 = arith.constant 0 : i32
    %c0_i32_2 = arith.constant 0 : i32
    %c0_i32_3 = arith.constant 0 : i32
    return %arg0, %c0_i32, %c0_i32_0, %c0_i32_1, %c0_i32_2 : i32, i32, i32, i32, i32
  }
  func.func @transform_1(%arg0: i32) -> (i32, i32, i32) {
    %c0_i32 = arith.constant 0 : i32
    %c0_i32_0 = arith.constant 0 : i32
    %c0_i32_1 = arith.constant 0 : i32
    %c0_i32_2 = arith.constant 0 : i32
    return %c0_i32, %c0_i32_0, %c0_i32_1 : i32, i32, i32
  }
  func.func @transform_2(%arg0: i32) -> (i32, i32) {
    %c0_i32 = arith.constant 0 : i32
    %c0_i32_0 = arith.constant 0 : i32
    %c0_i32_1 = arith.constant 0 : i32
    return %c0_i32, %c0_i32_0 : i32, i32
  }
  func.func @transform_3(%arg0: i32) -> (i32, i32) {
    %c0_i32 = arith.constant 0 : i32
    %c0_i32_0 = arith.constant 0 : i32
    %c0_i32_1 = arith.constant 0 : i32
    return %c0_i32, %c0_i32_0 : i32, i32
  }
  func.func @transform_4(%arg0: i32) -> (i32, i32, i32, i32) {
    %c0_i32 = arith.constant 0 : i32
    %c0_i32_0 = arith.constant 0 : i32
    %c0_i32_1 = arith.constant 0 : i32
    %c0_i32_2 = arith.constant 0 : i32
    return %arg0, %c0_i32, %c0_i32_0, %c0_i32_1 : i32, i32, i32, i32
  }
  func.func @transform_5(%arg0: i32) -> (i32, i32, i32, i32) {
    %c0_i32 = arith.constant 0 : i32
    %c0_i32_0 = arith.constant 0 : i32
    %c0_i32_1 = arith.constant 0 : i32
    %c0_i32_2 = arith.constant 0 : i32
    return %arg0, %c0_i32, %c0_i32_0, %c0_i32_1 : i32, i32, i32, i32
  }
}

module attributes {stable_mosaic.version = 11 : i64} {
  func.func @_head_kernel(%arg0: i32, %arg1: memref<2x1x128xbf16, #tpu.memory_space<vmem>>, %arg2: memref<128x6xf32, #tpu.memory_space<vmem>>, %arg3: memref<1x6xf32, #tpu.memory_space<vmem>>, %arg4: memref<2x6xf32, #tpu.memory_space<vmem>>) attributes {dimension_semantics = [#tpu.dimension_semantics<parallel>], iteration_bounds = array<i64: 1>, scalar_prefetch = 0 : i64, scratch_operands = 0 : i64, tpu.core_type = #tpu.core_type<tc>, window_params = [{transform_indices = @transform_0, window_bounds = array<i64: 2, 1, 128>}, {pipeline_mode = #tpu.pipeline_mode<synchronous>, transform_indices = @transform_1, window_bounds = array<i64: 128, 6>}, {pipeline_mode = #tpu.pipeline_mode<synchronous>, transform_indices = @transform_2, window_bounds = array<i64: 1, 6>}, {transform_indices = @transform_3, window_bounds = array<i64: 2, 6>}]} {
    %c0 = arith.constant 0 : index
    %c0_0 = arith.constant 0 : index
    %c0_1 = arith.constant 0 : index
    %0 = vector.load %arg1[%c0, %c0_0, %c0_1] : memref<2x1x128xbf16, #tpu.memory_space<vmem>>, vector<2x1x128xbf16>
    %1 = arith.extf %0 : vector<2x1x128xbf16> to vector<2x1x128xf32>
    %cst = arith.constant dense<0.000000e+00> : vector<2x128xf32>
    %2 = vector.multi_reduction <add>, %1, %cst [1] : vector<2x1x128xf32> to vector<2x128xf32>
    %cst_2 = arith.constant 1.000000e+00 : f32
    %3 = vector.broadcast %cst_2 : f32 to vector<2x128xf32>
    %4 = arith.divf %2, %3 : vector<2x128xf32>
    %c0_3 = arith.constant 0 : index
    %c0_4 = arith.constant 0 : index
    %5 = vector.load %arg2[%c0_3, %c0_4] : memref<128x6xf32, #tpu.memory_space<vmem>>, vector<128x6xf32>
    %cst_5 = arith.constant dense<0.000000e+00> : vector<2x6xf32>
    %6 = tpu.matmul %4, %5, %cst_5 {dimension_numbers = #tpu.dot_dimension_numbers<[1], [0], [0], [1], [0, 0, 1, 1], [], []>} : vector<2x128xf32>, vector<128x6xf32>, vector<2x6xf32> -> vector<2x6xf32>
    %c0_6 = arith.constant 0 : index
    %c0_7 = arith.constant 0 : index
    %7 = vector.load %arg3[%c0_6, %c0_7] : memref<1x6xf32, #tpu.memory_space<vmem>>, vector<1x6xf32>
    %8 = vector.broadcast %7 : vector<1x6xf32> to vector<2x6xf32>
    %9 = arith.addf %6, %8 : vector<2x6xf32>
    %c0_8 = arith.constant 0 : index
    %c0_9 = arith.constant 0 : index
    %10 = vector.load %arg4[%c0_8, %c0_9] : memref<2x6xf32, #tpu.memory_space<vmem>>, vector<2x6xf32>
    tpu.vector_store %arg4[%c0_8, %c0_9], %9 {strides = array<i32>} : memref<2x6xf32, #tpu.memory_space<vmem>>, vector<2x6xf32>,
    return
  }
  func.func @transform_0(%arg0: i32) -> (i32, i32, i32) {
    %c0_i32 = arith.constant 0 : i32
    %c0_i32_0 = arith.constant 0 : i32
    %c0_i32_1 = arith.constant 0 : i32
    return %arg0, %c0_i32, %c0_i32_0 : i32, i32, i32
  }
  func.func @transform_1(%arg0: i32) -> (i32, i32) {
    %c0_i32 = arith.constant 0 : i32
    %c0_i32_0 = arith.constant 0 : i32
    %c0_i32_1 = arith.constant 0 : i32
    return %c0_i32, %c0_i32_0 : i32, i32
  }
  func.func @transform_2(%arg0: i32) -> (i32, i32) {
    %c0_i32 = arith.constant 0 : i32
    %c0_i32_0 = arith.constant 0 : i32
    %c0_i32_1 = arith.constant 0 : i32
    return %c0_i32, %c0_i32_0 : i32, i32
  }
  func.func @transform_3(%arg0: i32) -> (i32, i32) {
    %c0_i32 = arith.constant 0 : i32
    %c0_i32_0 = arith.constant 0 : i32
    return %arg0, %c0_i32 : i32, i32
  }
}

</mosaic_0001>

<bundles_post_ra>
// kernel: cnn_classifier_forward.9
= control target key start
LH: loop header
LB: loop body
LE: loop exit
PB: predicated region body
PF: predicated region fallthrough
CT: control target
= control target key end

     0   :  { %s1454_s27 = smov 0   ;;  %s1632_s0 = inlined_call_operand.vmem [shape: bf16[2,4,5,5,32], index: 0, kind: input, shape index: {}]   ;;  %s1633_s1 = inlined_call_operand.vmem [shape: bf16[9,32,32], index: 1, kind: input, shape index: {}]   ;;  %s1634_s2 = inlined_call_operand.vmem [shape: bf16[1,32,32], index: 2, kind: input, shape index: {}]   ;;  %s1635_s3 = inlined_call_operand.vmem [shape: f32[1,32], index: 3, kind: input, shape index: {}]   ;;  %s1636_s4 = inlined_call_operand.vmem [shape: f32[1,32], index: 4, kind: input, shape index: {}]   ;;  %s1637_s5 = inlined_call_operand.vmem [shape: f32[1,32], index: 5, kind: input, shape index: {}]   ;;  %s1638_s6 = inlined_call_operand.vmem [shape: f32[1,32], index: 6, kind: input, shape index: {}]   ;;  %s1639_s7 = inlined_call_operand.vmem [shape: bf16[2,4,4,32], index: 7, kind: output, shape index: {0}]   ;;  %s1640_s8 = inlined_call_operand.vmem [shape: bf16[2,4,4,32], index: 8, kind: output, shape index: {1}]  }
   0x1 LB: > { %s1141_s28 = sadd.s32 4294967295, %s1401_s27   ;;  %p1145_p0 = scmp.ge.s32.totalorder %s1401_s27, 1  ;;  %s1401_s27 = sphi %s1454_s27, %s19_s27  }
   0x2   : > { %p265_p1 = scmp.lt.s32.totalorder %s1401_s27, 3 }
   0x4   : > { %p266_p2 = pnand %p1145_p0, %p265_p1 }
   0x5   : > { %p304_p3 = scmp.lt.s32.totalorder (!%p266_p2), %s1141_s28, 1  ;;  %s1477_s18 = smov (!%p266_p2), 0  }
   0x6   : > { %269 = sbr.rel (%p266_p2) target bundleno = 262 (0x106), region = 48 }
   0xb   : > { %s1642_s28 = smov (!%p304_p3, %s1141_s28), 1 }
   0xc   : > { %s1349_s29 = smul.u32 80, %s1642_s28  ;;  %s1237_s30 = sshll.u32 %s1642_s28, 3 }
   0xd   : > { %s1465_s11 = scalar_lea.vmem %s1639_s7, %s1237_s30  ;;  %s1470_s14 = scalar_lea.vmem %s1640_s8, %s1237_s30 }
   0xe   : > { %s1475_s17 = scalar_lea.vmem %s1632_s0, %s1349_s29 }
   0xf LB: >> { %v1368_v0 = vld [vmem:[%s1633_s1 + $0x18] sm:$0xff]   ;;  %v1407_v1 = vmov 0.0   ;;  %v1369_v2 = vld [vmem:[%s1633_s1 + $0x8] sm:$0xff]   ;;  %v1370_v3 = vld [vmem:[%s1633_s1 + $0x10] sm:$0xff]   ;;  %vm1408_vm0 = vmmov 0   ;;  %s1151_s25 = sshll.u32 %s1405_s18, 2  ;;  %s1405_s18 = sphi %s1477_s18, %s325_s18  }
  0x10   : >> { %1269 = vmatprep.subr.bf16.mxu0 %v1407_v1  ;;  %1277 = vmatprep.subr.bf16.mxu1 %v1407_v1  ;;  %v1371_v4 = vld [vmem:[%s1633_s1] sm:$0xff]   ;;  %s1501_s29 = scalar_lea.vmem %s1475_s17, %s1151_s25  ;;  %vm354_vm1 = vcmask 261120   ;;  %v1372_v7 = vld [vmem:[%s1633_s1 + $0x28] sm:$0xff]   ;;  %v1373_v8 = vld [vmem:[%s1633_s1 + $0x38] sm:$0xff]   ;;  %s1231_s12 = sshll.u32 %s1405_s18, 1  ;;  %vm1005_vm2 = vcmask 254976  }
  0x11   : >> { %1270 = vmatpush3.bf16.msra.mxu0 %v1368_v0  ;;  %1273 = vmatprep.mubr.msk.bf16.mxu0 %vm1408_vm0, %v1407_v1  ;;  %v1153_v5 = vld [vmem:[%s1501_s29 + $0x14] sm:$0x3]  ;;  %v328_v6 = vld [vmem:[%s1501_s29] sm:$0x3]  ;;  %v1173_v15 = vld [vmem:[%s1501_s29 + $0x28] sm:$0x3]  ;;  %s1025_s13 = scalar_lea.vmem %s1470_s14, %s1231_s12  ;;  %s1004_s21 = scalar_lea.vmem %s1465_s11, %s1231_s12 }
  0x12   : >> { %1278 = vmatpush3.bf16.msra.mxu1 %v1369_v2  ;;  %1271 = vmatprep.subr.bf16.mxu0 %v1407_v1  ;;  %v1374_v9 = vld [vmem:[%s1633_s1 + $0x20] sm:$0xff]   ;;  %v1375_v11 = vld [vmem:[%s1633_s1 + $0x30] sm:$0xff]   ;;  %v1377_v16 = vld [vmem:[%s1633_s1 + $0x48] sm:$0xff]   ;;  %s325_s18 = sadd.s32 1, %s1405_s18  }
  0x13   : >> { %1279 = vmatprep.subr.bf16.mxu1 %v1407_v1  ;;  %1281 = vmatprep.mubr.msk.bf16.mxu1 %vm1408_vm0, %v1407_v1  ;;  %v1376_v10 = vld [vmem:[%s1501_s29] ss:$0 sps:$4 sm:$0x77]   ;;  %v1378_v18 = vld [vmem:[%s1634_s2 + $0x8] sm:$0xff]   ;;  %v1182_v22 = vld [vmem:[%s1501_s29 + $0x3c] sm:$0x3] }
  0x14   : >> { %v463_v12 = vshrl.u32 %v1376_v10, 16  ;;  %v465_v13 = vshll.u32 %v1376_v10, 16  ;;  %v1379_v19 = vld [vmem:[%s1633_s1 + $0x40] sm:$0xff]   ;;  %v1385_v20 = vld [vmem:[%s1501_s29 + $0x28] ss:$0 sps:$4 sm:$0x77]  }
  0x15   : >> { %1272 = vmatpush3.bf16.msra.mxu0 %v1370_v3  ;;  %v1380_v21 = vld [vmem:[%s1634_s2] sm:$0xff]   ;;  %v723_v23 = vshll.u32 %v1385_v20, 16  ;;  %v1381_v24 = vld [vmem:[%s1633_s1 + $0x58] sm:$0xff]   ;;  %v1382_v25 = vld [vmem:[%s1633_s1 + $0x68] sm:$0xff]   ;;  %v721_v26 = vshrl.u32 %v1385_v20, 16  ;;  %p322_p4 = scmp.ge.s32.totalorder %s325_s18, 4  }
  0x16   : >> { %1280 = vmatpush3.bf16.msra.mxu1 %v1371_v4  ;;  %1285 = vmatprep.subr.bf16.mxu0 %v1407_v1  ;;  %v467_v14 = vrot.slane %v465_v13, 1  ;;  %v1383_v28 = vld [vmem:[%s1633_s1 + $0x50] sm:$0xff]   ;;  %v1390_v29 = vld [vmem:[%s1501_s29 + $0x4] ss:$0 sps:$4 sm:$0x77]   ;;  %v1386_v32 = vld [vmem:[%s1633_s1 + $0x78] sm:$0xff]  }
  0x17   : >> { %1293 = vmatprep.subr.bf16.mxu1 %v1407_v1  ;;  %v725_v27 = vrot.slane %v723_v23, 1  ;;  %v1384_v30 = vld [vmem:[%s1633_s1 + $0x60] sm:$0xff]   ;;  %v925_v33 = vshll.u32 %v1390_v29, 16  ;;  %v1387_v35 = vld [vmem:[%s1633_s1 + $0x88] sm:$0xff]   ;;  %v1388_v36 = vld [vmem:[%s1633_s1 + $0x70] sm:$0xff]   ;;  %v923_v37 = vshrl.u32 %v1390_v29, 16 }
  0x18   : >> { %1274 = vmatmul.mubr.msk.bf16.vlgmr.msra.gmra.mxu0 %vm354_vm1, %v1153_v5  ;;  %v468_v17 = vor.u32 %v467_v14, %v463_v12  ;;  %v1203_v34 = vld [vmem:[%s1501_s29 + $0x4] sm:$0x3]  ;;  %v1212_v40 = vld [vmem:[%s1501_s29 + $0x18] sm:$0x3]  ;;  %v1232_v58 = vld [vmem:[%s1637_s5] ss:$0 sm:$0xff] }
  0x19   : >> { %1282 = vmatmul.mubr.msk.bf16.vlgmr.msra.gmra.mxu1 %vm354_vm1, %v328_v6  ;;  %1286 = vmatpush3.bf16.msra.mxu0 %v1372_v7  ;;  %v726_v31 = vor.u32 %v725_v27, %v721_v26  ;;  %v927_v38 = vrot.slane %v925_v33, 1  ;;  %v1389_v39 = vld [vmem:[%s1633_s1 + $0x80] sm:$0xff]  }
  0x1a   : >> { %1294 = vmatpush3.bf16.msra.mxu1 %v1373_v8  ;;  %1287 = vmatprep.subr.bf16.mxu0 %v1407_v1  ;;  %v1233_v62 = vld [vmem:[%s1638_s6] ss:$0 sm:$0xff] }
  0x1b   : >> { %1295 = vmatprep.subr.bf16.mxu1 %v1407_v1  ;;  %1289 = vmatprep.mubr.msk.bf16.mxu0 %vm1408_vm0, %v1407_v1  ;;  %v928_v41 = vor.u32 %v927_v38, %v923_v37 }
  0x1c   : >> { %1297 = vmatprep.mubr.msk.bf16.mxu1 %vm1408_vm0, %v1407_v1 }
  0x1d   : >> { %1288 = vmatpush3.bf16.msra.mxu0 %v1374_v9 }
  0x1e   : >> { %1296 = vmatpush3.bf16.msra.mxu1 %v1375_v11  ;;  %1301 = vmatprep.subr.bf16.mxu0 %v1407_v1 }
  0x1f   : >> { %1309 = vmatprep.subr.bf16.mxu1 %v1407_v1 }
  0x20   : >> { %1290 = vmatmul.mubr.msk.bf16.vlgmr.msra.gmra.mxu0 %vm354_vm1, %v468_v17 }
  0x21   : >> { %1298 = vmatmul.mubr.msk.bf16.vlgmr.msra.gmra.mxu1 %vm354_vm1, %v1173_v15  ;;  %1302 = vmatpush3.bf16.msra.mxu0 %v1377_v16 }
  0x22   : >> { %1310 = vmatpush3.bf16.msra.mxu1 %v1378_v18  ;;  %1303 = vmatprep.subr.bf16.mxu0 %v1407_v1 }
  0x23   : >> { %1311 = vmatprep.subr.bf16.mxu1 %v1407_v1  ;;  %1305 = vmatprep.mubr.msk.bf16.mxu0 %vm1408_vm0, %v1407_v1 }
  0x24   : >> { %1313 = vmatprep.mubr.msk.bf16.mxu1 %vm1408_vm0, %v1407_v1 }
  0x25   : >> { %1304 = vmatpush3.bf16.msra.mxu0 %v1379_v19 }
  0x26   : >> { %1312 = vmatpush3.bf16.msra.mxu1 %v1380_v21  ;;  %1317 = vmatprep.subr.bf16.mxu0 %v1407_v1 }
  0x27   : >> { %1325 = vmatprep.subr.bf16.mxu1 %v1407_v1 }
  0x28   : >> { %1306 = vmatmul.mubr.msk.bf16.vlgmr.msra.gmra.mxu0 %vm354_vm1, %v1182_v22 }
  0x29   : >> { %1314 = vmatmul.mubr.msk.bf16.vlgmr.msra.gmra.mxu1 %vm354_vm1, %v1182_v22  ;;  %1318 = vmatpush3.bf16.msra.mxu0 %v1381_v24  ;;  %v1229_v24 = vld [vmem:[%s1635_s3] ss:$0 sm:$0xff] }
  0x2a   : >> { %1326 = vmatpush3.bf16.msra.mxu1 %v1382_v25  ;;  %1319 = vmatprep.subr.bf16.mxu0 %v1407_v1 }
  0x2b   : >> { %1327 = vmatprep.subr.bf16.mxu1 %v1407_v1  ;;  %1321 = vmatprep.mubr.msk.bf16.mxu0 %vm1408_vm0, %v1407_v1 }
  0x2c   : >> { %1329 = vmatprep.mubr.msk.bf16.mxu1 %vm1408_vm0, %v1407_v1 }
  0x2d   : >> { %1320 = vmatpush3.bf16.msra.mxu0 %v1383_v28  ;;  %v1230_v28 = vld [vmem:[%s1636_s4] ss:$0 sm:$0xff] }
  0x2e   : >> { %1328 = vmatpush3.bf16.msra.mxu1 %v1384_v30  ;;  %1333 = vmatprep.subr.bf16.mxu0 %v1407_v1 }
  0x2f   : >> { %1341 = vmatprep.subr.bf16.mxu1 %v1407_v1 }
  0x30   : >> { %1322 = vmatmul.mubr.msk.bf16.vlgmr.msra.gmra.mxu0 %vm354_vm1, %v726_v31 }
  0x31   : >> { %1330 = vmatmul.mubr.msk.bf16.vlgmr.msra.gmra.mxu1 %vm354_vm1, %v1203_v34  ;;  %1334 = vmatpush3.bf16.msra.mxu0 %v1386_v32 }
  0x32   : >> { %1342 = vmatpush3.bf16.msra.mxu1 %v1387_v35  ;;  %1335 = vmatprep.subr.bf16.mxu0 %v1407_v1 }
  0x33   : >> { %1343 = vmatprep.subr.bf16.mxu1 %v1407_v1  ;;  %1337 = vmatprep.mubr.msk.bf16.mxu0 %vm1408_vm0, %v1407_v1 }
  0x34   : >> { %1345 = vmatprep.mubr.msk.bf16.mxu1 %vm1408_vm0, %v1407_v1 }
  0x35   : >> { %1336 = vmatpush3.bf16.msra.mxu0 %v1388_v36 }
  0x36   : >> { %1344 = vmatpush3.bf16.msra.mxu1 %v1389_v39 }
  0x38   : >> { %1338 = vmatmul.mubr.msk.bf16.vlgmr.msra.gmra.mxu0 %vm354_vm1, %v1212_v40 }
  0x39   : >> { %1346 = vmatmul.mubr.msk.bf16.vlgmr.msra.gmra.mxu1 %vm354_vm1, %v928_v41 }
  0xd8   : >> { %v392_v42 = vpop.f32.mrf.mxu0 }
  0xd9   : >> { %v447_v43 = vpop.f32.mrf.mxu1 }
  0xda   : >> { %v1275_v44 = vpop.f32.mrf.mxu0  ;;  %v448_v60 = vadd.f32 %v447_v43, %v392_v42 }
  0xdb   : >> { %v1283_v45 = vpop.f32.mrf.mxu1 }
  0xdc   : >> { %v395_v46 = vpop.f32.mrf.mxu0 }
  0xdd   : >> { %v450_v47 = vpop.f32.mrf.mxu1 }
  0xde   : >> { %v1276_v48 = vpop.f32.mrf.mxu0 }
  0xdf   : >> { %v1284_v49 = vpop.f32.mrf.mxu1 }
  0xe0   : >> { %v518_v50 = vpop.f32.mrf.mxu0 }
  0xe1   : >> { %v583_v51 = vpop.f32.mrf.mxu1  ;;  %v524_v1 = vadd.f32 %v518_v50, %v448_v60 }
  0xe2   : >> { %v1291_v52 = vpop.f32.mrf.mxu0 }
  0xe3   : >> { %v1299_v53 = vpop.f32.mrf.mxu1  ;;  %v589_v8 = vadd.f32 %v583_v51, %v524_v1 }
  0xe4   : >> { %v521_v54 = vpop.f32.mrf.mxu0 }
  0xe5   : >> { %v586_v55 = vpop.f32.mrf.mxu1 }
  0xe6   : >> { %v1292_v56 = vpop.f32.mrf.mxu0 }
  0xe7   : >> { %v1300_v57 = vpop.f32.mrf.mxu1 }
  0xe8   : >> { %v648_v59 = vpop.f32.mrf.mxu0 }
  0xe9   : >> { %v705_v61 = vpop.f32.mrf.mxu1  ;;  %v654_v11 = vadd.f32 %v648_v59, %v589_v8 }
  0xea   : >> { %v1014_v63 = vmul.f32 %v1232_v58, %v705_v61  ;;  %v1307_v0 = vpop.f32.mrf.mxu0 }
  0xeb   : >> { %v1315_v2 = vpop.f32.mrf.mxu1 }
  0xec   : >> { %v1022_v3 = vadd.f32 %v1233_v62, %v1014_v63  ;;  %v651_v4 = vpop.f32.mrf.mxu0 }
  0xed   : >> { %v708_v5 = vpop.f32.mrf.mxu1 }
  0xee   : >> { %v1023_v6 = vpack.c.bf16 %v1022_v3, %v1022_v3  ;;  %v1308_v7 = vpop.f32.mrf.mxu0 }
  0xef   : >> { %v1316_v9 = vpop.f32.mrf.mxu1 }
  0xf0   : >> { %1026 = vst.msk [vmem:[%s1025_s13] sm:$0x3] %vm1005_vm2, %v1023_v6  ;;  %v776_v10 = vpop.f32.mrf.mxu0 }
  0xf1   : >> { %v841_v12 = vpop.f32.mrf.mxu1  ;;  %v782_v14 = vadd.f32 %v776_v10, %v654_v11 }
  0xf2   : >> { %v1323_v13 = vpop.f32.mrf.mxu0 }
  0xf3   : >> { %v1331_v15 = vpop.f32.mrf.mxu1  ;;  %v847_v19 = vadd.f32 %v841_v12, %v782_v14 }
  0xf4   : >> { %v779_v16 = vpop.f32.mrf.mxu0 }
  0xf5   : >> { %v844_v17 = vpop.f32.mrf.mxu1 }
  0xf6   : >> { %v1324_v18 = vpop.f32.mrf.mxu0 }
  0xf7   : >> { %v1332_v20 = vpop.f32.mrf.mxu1 }
  0xf8   : >> { %v906_v21 = vpop.f32.mrf.mxu0 }
  0xf9   : >> { %v912_v22 = vadd.f32 %v906_v21, %v847_v19  ;;  %v978_v23 = vpop.f32.mrf.mxu1 }
  0xfa   : >> { %v1339_v25 = vpop.f32.mrf.mxu0 }
  0xfb   : >> { %v984_v26 = vadd.f32 %v978_v23, %v912_v22  ;;  %v1347_v27 = vpop.f32.mrf.mxu1 }
  0xfc   : >> { %v909_v29 = vpop.f32.mrf.mxu0 }
  0xfd   : >> { %v992_v30 = vmul.f32 %v1229_v24, %v984_v26  ;;  %v981_v31 = vpop.f32.mrf.mxu1 }
  0xfe   : >> { %v1340_v32 = vpop.f32.mrf.mxu0 }
  0xff   : >> { %v1000_v33 = vadd.f32 %v1230_v28, %v992_v30  ;;  %v1348_v34 = vpop.f32.mrf.mxu1 }
 0x101   : >> { %v1001_v35 = vmax.f32 %v1000_v33, 0.0  ;;  %324 = sbr.rel (!%p322_p4) target bundleno = 15 (0xf), region = 113 }
 0x103   : >> { %v1002_v36 = vpack.c.bf16 %v1001_v35, %v1001_v35 }
 0x105   : >> { %1006 = vst.msk [vmem:[%s1004_s21] sm:$0x3] %vm1005_vm2, %v1002_v36 }
 0x106 PF: > { %s19_s27 = sadd.s32 1, %s1401_s27  }
 0x107   : > { %p16_p5 = scmp.ge.s32.totalorder %s19_s27, 4  }
 0x109   :  { %18 = sbr.rel (!%p16_p5) target bundleno = 1 (0x1), region = 124 }

// kernel: cnn_classifier_forward.10
= control target key start
LH: loop header
LB: loop body
LE: loop exit
PB: predicated region body
PF: predicated region fallthrough
CT: control target
= control target key end

     0   :  { %s1251_s18 = smov 0   ;;  %s1406_s0 = inlined_call_operand.vmem [shape: bf16[2,1,6,6,32], index: 0, kind: input, shape index: {}]   ;;  %s1407_s1 = inlined_call_operand.vmem [shape: bf16[9,32,32], index: 1, kind: input, shape index: {}]   ;;  %s1408_s2 = inlined_call_operand.vmem [shape: f32[1,32], index: 2, kind: input, shape index: {}]   ;;  %s1409_s3 = inlined_call_operand.vmem [shape: f32[1,32], index: 3, kind: input, shape index: {}]   ;;  %s1410_s4 = inlined_call_operand.vmem [shape: bf16[2,4,4,32], index: 4, kind: input, shape index: {}]   ;;  %s1411_s5 = inlined_call_operand.vmem [shape: bf16[2,4,4,32], index: 5, kind: output, shape index: {}]  }
   0x1 LB: > { %s969_s19 = sadd.s32 4294967295, %s1213_s18   ;;  %p973_p0 = scmp.ge.s32.totalorder %s1213_s18, 1  ;;  %s1213_s18 = sphi %s1251_s18, %s15_s18  }
   0x2   : > { %p197_p1 = scmp.lt.s32.totalorder %s1213_s18, 3 }
   0x4   : > { %p198_p2 = pnand %p973_p0, %p197_p1 }
   0x5   : > { %p230_p3 = scmp.lt.s32.totalorder (!%p198_p2), %s969_s19, 1  ;;  %s1274_s6 = smov (!%p198_p2), 0  }
   0x6   : > { %201 = sbr.rel (%p198_p2) target bundleno = 262 (0x106), region = 40 }
   0xb   : > { %s1413_s19 = smov (!%p230_p3, %s969_s19), 1 }
   0xc   : > { %s1160_s20 = smul.u32 24, %s1413_s19  ;;  %s1059_s21 = sshll.u32 %s1413_s19, 3 }
   0xd   : > { %s1262_s24 = scalar_lea.vmem %s1410_s4, %s1059_s21  ;;  %s1267_s27 = scalar_lea.vmem %s1411_s5, %s1059_s21 }
   0xe   : > { %s1272_s30 = scalar_lea.vmem %s1406_s0, %s1160_s20 }
   0xf LB: >> { %v1179_v0 = vld [vmem:[%s1407_s1 + $0x18] sm:$0xff]   ;;  %v1219_v1 = vmov 0.0   ;;  %v1180_v2 = vld [vmem:[%s1407_s1 + $0x8] sm:$0xff]   ;;  %v1181_v3 = vld [vmem:[%s1407_s1 + $0x10] sm:$0xff]   ;;  %vm1220_vm0 = vmmov 0   ;;  %s979_s13 = sshll.u32 %s1217_s6, 2  ;;  %s1217_s6 = sphi %s1274_s6, %s251_s6  }
  0x10   : >> { %1088 = vmatprep.subr.bf16.mxu0 %v1219_v1  ;;  %1096 = vmatprep.subr.bf16.mxu1 %v1219_v1  ;;  %v1182_v4 = vld [vmem:[%s1407_s1] sm:$0xff]   ;;  %s1298_s16 = scalar_lea.vmem %s1272_s30, %s979_s13  ;;  %vm287_vm1 = vcmask 261120   ;;  %v1185_v9 = vld [vmem:[%s1407_s1 + $0x38] sm:$0xff]   ;;  %v1184_v11 = vld [vmem:[%s1407_s1 + $0x28] sm:$0xff]   ;;  %vm883_vm2 = vcmask 254976  }
  0x11   : >> { %1089 = vmatpush3.bf16.msra.mxu0 %v1179_v0  ;;  %1092 = vmatprep.mubr.msk.bf16.mxu0 %vm1220_vm0, %v1219_v1  ;;  %v1183_v5 = vld [vmem:[%s1298_s16] ss:$0 sps:$4 sm:$0x77]   ;;  %v1187_v14 = vld [vmem:[%s1407_s1 + $0x30] sm:$0xff]   ;;  %v1000_v17 = vld [vmem:[%s1298_s16 + $0x4] sm:$0x3] }
  0x12   : >> { %1097 = vmatpush3.bf16.msra.mxu1 %v1180_v2  ;;  %1090 = vmatprep.subr.bf16.mxu0 %v1219_v1  ;;  %v254_v6 = vld [vmem:[%s1298_s16] sm:$0x3]  ;;  %v269_v7 = vshrl.u32 %v1183_v5, 16  ;;  %v271_v8 = vshll.u32 %v1183_v5, 16  ;;  %v1190_v18 = vld [vmem:[%s1407_s1 + $0x58] sm:$0xff]   ;;  %v1189_v22 = vld [vmem:[%s1407_s1 + $0x48] sm:$0xff]  }
  0x13   : >> { %1098 = vmatprep.subr.bf16.mxu1 %v1219_v1  ;;  %1100 = vmatprep.mubr.msk.bf16.mxu1 %vm1220_vm0, %v1219_v1  ;;  %v1188_v13 = vld [vmem:[%s1298_s16] ss:$0 sps:$4 sm:$0x66]   ;;  %v1193_v16 = vld [vmem:[%s1298_s16 + $0x4] ss:$0 sps:$4 sm:$0x77]  }
  0x14   : >> { %v273_v10 = vrot.slane %v271_v8, 1  ;;  %v1186_v15 = vld [vmem:[%s1407_s1 + $0x20] sm:$0xff]   ;;  %v395_v19 = vrot.slane %v1188_v13, 1  ;;  %v529_v20 = vshll.u32 %v1193_v16, 16  ;;  %v1192_v23 = vld [vmem:[%s1407_s1 + $0x50] sm:$0xff]   ;;  %v527_v24 = vshrl.u32 %v1193_v16, 16 }
  0x15   : >> { %1091 = vmatpush3.bf16.msra.mxu0 %v1181_v3  ;;  %v1194_v21 = vld [vmem:[%s1298_s16 + $0x4] ss:$0 sps:$4 sm:$0x66]   ;;  %v1199_v27 = vld [vmem:[%s1298_s16 + $0x8] ss:$0 sps:$4 sm:$0x77]  }
  0x16   : >> { %1099 = vmatpush3.bf16.msra.mxu1 %v1182_v4  ;;  %1104 = vmatprep.subr.bf16.mxu0 %v1219_v1  ;;  %v274_v12 = vor.u32 %v273_v10, %v269_v7  ;;  %v531_v25 = vrot.slane %v529_v20, 1  ;;  %v1191_v26 = vld [vmem:[%s1407_s1 + $0x40] sm:$0xff]   ;;  %v598_v28 = vrot.slane %v1194_v21, 1  ;;  %v1196_v29 = vld [vmem:[%s1407_s1 + $0x78] sm:$0xff]   ;;  %v732_v30 = vshll.u32 %v1199_v27, 16  ;;  %v1195_v32 = vld [vmem:[%s1407_s1 + $0x68] sm:$0xff]  }
  0x17   : >> { %1112 = vmatprep.subr.bf16.mxu1 %v1219_v1  ;;  %v730_v33 = vshrl.u32 %v1199_v27, 16  ;;  %v1198_v35 = vld [vmem:[%s1407_s1 + $0x70] sm:$0xff]   ;;  %v1197_v36 = vld [vmem:[%s1407_s1 + $0x60] sm:$0xff]   ;;  %v1027_v38 = vld [vmem:[%s1298_s16 + $0x8] sm:$0x3] }
  0x18   : >> { %1093 = vmatmul.mubr.msk.bf16.vlgmr.msra.gmra.mxu0 %vm287_vm1, %v274_v12  ;;  %v532_v31 = vor.u32 %v531_v25, %v527_v24  ;;  %v734_v34 = vrot.slane %v732_v30, 1  ;;  %v1200_v39 = vld [vmem:[%s1407_s1 + $0x88] sm:$0xff]   ;;  %v1201_v41 = vld [vmem:[%s1407_s1 + $0x80] sm:$0xff]  }
  0x19   : >> { %1101 = vmatmul.mubr.msk.bf16.vlgmr.msra.gmra.mxu1 %vm287_vm1, %v254_v6  ;;  %1105 = vmatpush3.bf16.msra.mxu0 %v1184_v11  ;;  %v1202_v40 = vld [vmem:[%s1298_s16 + $0x8] ss:$0 sps:$4 sm:$0x66]   ;;  %s1055_s16 = sshll.u32 %s1217_s6, 1  ;;  %v1054_v21 = vld [vmem:[%s1409_s3] ss:$0 sm:$0xff] }
  0x1a   : >> { %1113 = vmatpush3.bf16.msra.mxu1 %v1185_v9  ;;  %1116 = vmatprep.mubr.msk.bf16.mxu1 %vm1220_vm0, %v1219_v1  ;;  %v735_v37 = vor.u32 %v734_v34, %v730_v33  ;;  %v801_v42 = vrot.slane %v1202_v40, 1  ;;  %s876_s29 = scalar_lea.vmem %s1262_s24, %s1055_s16  ;;  %s882_s11 = scalar_lea.vmem %s1267_s27, %s1055_s16 }
  0x1b   : >> { %1114 = vmatprep.subr.bf16.mxu1 %v1219_v1  ;;  %1108 = vmatprep.mubr.msk.bf16.mxu0 %vm1220_vm0, %v1219_v1  ;;  %s251_s6 = sadd.s32 1, %s1217_s6  }
  0x1c   : >> { %1106 = vmatprep.subr.bf16.mxu0 %v1219_v1  ;;  %p248_p4 = scmp.ge.s32.totalorder %s251_s6, 4  }
  0x1d   : >> { %1107 = vmatpush3.bf16.msra.mxu0 %v1186_v15 }
  0x1e   : >> { %1115 = vmatpush3.bf16.msra.mxu1 %v1187_v14  ;;  %1120 = vmatprep.subr.bf16.mxu0 %v1219_v1 }
  0x1f   : >> { %1128 = vmatprep.subr.bf16.mxu1 %v1219_v1 }
  0x20   : >> { %1109 = vmatmul.mubr.msk.bf16.vlgmr.msra.gmra.mxu0 %vm287_vm1, %v395_v19  ;;  %v1053_v19 = vld [vmem:[%s1408_s2] ss:$0 sm:$0xff] }
  0x21   : >> { %1117 = vmatmul.mubr.msk.bf16.vlgmr.msra.gmra.mxu1 %vm287_vm1, %v1000_v17  ;;  %1121 = vmatpush3.bf16.msra.mxu0 %v1189_v22  ;;  %v877_v22 = vld [vmem:[%s876_s29] sm:$0x3] }
  0x22   : >> { %1129 = vmatpush3.bf16.msra.mxu1 %v1190_v18  ;;  %1132 = vmatprep.mubr.msk.bf16.mxu1 %vm1220_vm0, %v1219_v1  ;;  %v878_v27 = vunpack.c.l.bf16 %v877_v22 }
  0x23   : >> { %1130 = vmatprep.subr.bf16.mxu1 %v1219_v1  ;;  %1124 = vmatprep.mubr.msk.bf16.mxu0 %vm1220_vm0, %v1219_v1 }
  0x24   : >> { %1122 = vmatprep.subr.bf16.mxu0 %v1219_v1 }
  0x25   : >> { %1123 = vmatpush3.bf16.msra.mxu0 %v1191_v26 }
  0x26   : >> { %1131 = vmatpush3.bf16.msra.mxu1 %v1192_v23  ;;  %1136 = vmatprep.subr.bf16.mxu0 %v1219_v1 }
  0x27   : >> { %1144 = vmatprep.subr.bf16.mxu1 %v1219_v1 }
  0x28   : >> { %1125 = vmatmul.mubr.msk.bf16.vlgmr.msra.gmra.mxu0 %vm287_vm1, %v532_v31 }
  0x29   : >> { %1133 = vmatmul.mubr.msk.bf16.vlgmr.msra.gmra.mxu1 %vm287_vm1, %v598_v28  ;;  %1137 = vmatpush3.bf16.msra.mxu0 %v1195_v32 }
  0x2a   : >> { %1145 = vmatpush3.bf16.msra.mxu1 %v1196_v29  ;;  %1148 = vmatprep.mubr.msk.bf16.mxu1 %vm1220_vm0, %v1219_v1 }
  0x2b   : >> { %1146 = vmatprep.subr.bf16.mxu1 %v1219_v1  ;;  %1140 = vmatprep.mubr.msk.bf16.mxu0 %vm1220_vm0, %v1219_v1 }
  0x2c   : >> { %1138 = vmatprep.subr.bf16.mxu0 %v1219_v1 }
  0x2d   : >> { %1139 = vmatpush3.bf16.msra.mxu0 %v1197_v36 }
  0x2e   : >> { %1147 = vmatpush3.bf16.msra.mxu1 %v1198_v35  ;;  %1152 = vmatprep.subr.bf16.mxu0 %v1219_v1 }
  0x30   : >> { %1141 = vmatmul.mubr.msk.bf16.vlgmr.msra.gmra.mxu0 %vm287_vm1, %v1027_v38 }
  0x31   : >> { %1149 = vmatmul.mubr.msk.bf16.vlgmr.msra.gmra.mxu1 %vm287_vm1, %v735_v37  ;;  %1153 = vmatpush3.bf16.msra.mxu0 %v1200_v39 }
  0x32   : >> { %1156 = vmatprep.mubr.msk.bf16.mxu0 %vm1220_vm0, %v1219_v1  ;;  %1154 = vmatprep.subr.bf16.mxu0 %v1219_v1 }
  0x35   : >> { %1155 = vmatpush3.bf16.msra.mxu0 %v1201_v41 }
  0x38   : >> { %1157 = vmatmul.mubr.msk.bf16.vlgmr.msra.gmra.mxu0 %vm287_vm1, %v801_v42 }
  0xd8   : >> { %v325_v44 = vpop.f32.mrf.mxu0 }
  0xd9   : >> { %v380_v43 = vpop.f32.mrf.mxu1 }
  0xda   : >> { %v1094_v46 = vpop.f32.mrf.mxu0  ;;  %v381_v58 = vadd.f32 %v380_v43, %v325_v44 }
  0xdb   : >> { %v1102_v45 = vpop.f32.mrf.mxu1 }
  0xdc   : >> { %v328_v48 = vpop.f32.mrf.mxu0 }
  0xdd   : >> { %v383_v47 = vpop.f32.mrf.mxu1 }
  0xde   : >> { %v1095_v50 = vpop.f32.mrf.mxu0 }
  0xdf   : >> { %v1103_v49 = vpop.f32.mrf.mxu1 }
  0xe0   : >> { %v445_v52 = vpop.f32.mrf.mxu0 }
  0xe1   : >> { %v510_v51 = vpop.f32.mrf.mxu1  ;;  %v451_v61 = vadd.f32 %v445_v52, %v381_v58 }
  0xe2   : >> { %v1110_v54 = vpop.f32.mrf.mxu0 }
  0xe3   : >> { %v1118_v53 = vpop.f32.mrf.mxu1  ;;  %v516_v2 = vadd.f32 %v510_v51, %v451_v61 }
  0xe4   : >> { %v448_v56 = vpop.f32.mrf.mxu0 }
  0xe5   : >> { %v513_v55 = vpop.f32.mrf.mxu1 }
  0xe6   : >> { %v1111_v59 = vpop.f32.mrf.mxu0 }
  0xe7   : >> { %v1119_v57 = vpop.f32.mrf.mxu1 }
  0xe8   : >> { %v582_v62 = vpop.f32.mrf.mxu0 }
  0xe9   : >> { %v648_v60 = vpop.f32.mrf.mxu1  ;;  %v588_v5 = vadd.f32 %v582_v62, %v516_v2 }
  0xea   : >> { %v1126_v0 = vpop.f32.mrf.mxu0 }
  0xeb   : >> { %v1134_v63 = vpop.f32.mrf.mxu1  ;;  %v654_v10 = vadd.f32 %v648_v60, %v588_v5 }
  0xec   : >> { %v585_v3 = vpop.f32.mrf.mxu0 }
  0xed   : >> { %v651_v1 = vpop.f32.mrf.mxu1 }
  0xee   : >> { %v1127_v6 = vpop.f32.mrf.mxu0 }
  0xef   : >> { %v1135_v4 = vpop.f32.mrf.mxu1 }
  0xf0   : >> { %v713_v8 = vpop.f32.mrf.mxu0 }
  0xf1   : >> { %v785_v7 = vpop.f32.mrf.mxu1  ;;  %v719_v13 = vadd.f32 %v713_v8, %v654_v10 }
  0xf2   : >> { %v1142_v11 = vpop.f32.mrf.mxu0 }
  0xf3   : >> { %v1150_v9 = vpop.f32.mrf.mxu1  ;;  %v791_v17 = vadd.f32 %v785_v7, %v719_v13 }
  0xf4   : >> { %v716_v14 = vpop.f32.mrf.mxu0 }
  0xf5   : >> { %v788_v12 = vpop.f32.mrf.mxu1 }
  0xf6   : >> { %v1143_v16 = vpop.f32.mrf.mxu0 }
  0xf7   : >> { %v1151_v15 = vpop.f32.mrf.mxu1 }
  0xf8   : >> { %v851_v18 = vpop.f32.mrf.mxu0 }
  0xf9   : >> { %v857_v20 = vadd.f32 %v851_v18, %v791_v17 }
  0xfa   : >> { %v1158_v23 = vpop.f32.mrf.mxu0 }
  0xfb   : >> { %v865_v24 = vmul.f32 %v1053_v19, %v857_v20 }
  0xfc   : >> { %v854_v25 = vpop.f32.mrf.mxu0 }
  0xfd   : >> { %v873_v26 = vadd.f32 %v1054_v21, %v865_v24 }
  0xfe   : >> { %v1159_v28 = vpop.f32.mrf.mxu0 }
  0xff   : >> { %v874_v29 = vmax.f32 %v873_v26, 0.0 }
 0x101   : >> { %v879_v30 = vadd.f32 %v878_v27, %v874_v29  ;;  %250 = sbr.rel (!%p248_p4) target bundleno = 15 (0xf), region = 93 }
 0x103   : >> { %v880_v31 = vpack.c.bf16 %v879_v30, %v879_v30 }
 0x105   : >> { %884 = vst.msk [vmem:[%s882_s11] sm:$0x3] %vm883_vm2, %v880_v31 }
 0x106 PF: > { %s15_s18 = sadd.s32 1, %s1213_s18  }
 0x107   : > { %p12_p5 = scmp.ge.s32.totalorder %s15_s18, 4  }
 0x109   :  { %14 = sbr.rel (!%p12_p5) target bundleno = 1 (0x1), region = 104 }

// kernel: cnn_classifier_forward.11
= control target key start
LH: loop header
LB: loop body
LE: loop exit
PB: predicated region body
PF: predicated region fallthrough
CT: control target
= control target key end

     0   :  { %s1448_s27 = smov 0   ;;  %s1623_s0 = inlined_call_operand.vmem [shape: bf16[2,4,3,3,32], index: 0, kind: input, shape index: {}]   ;;  %s1624_s1 = inlined_call_operand.vmem [shape: bf16[9,32,64], index: 1, kind: input, shape index: {}]   ;;  %s1625_s2 = inlined_call_operand.vmem [shape: bf16[1,32,64], index: 2, kind: input, shape index: {}]   ;;  %s1626_s3 = inlined_call_operand.vmem [shape: f32[1,64], index: 3, kind: input, shape index: {}]   ;;  %s1627_s4 = inlined_call_operand.vmem [shape: f32[1,64], index: 4, kind: input, shape index: {}]   ;;  %s1628_s5 = inlined_call_operand.vmem [shape: f32[1,64], index: 5, kind: input, shape index: {}]   ;;  %s1629_s6 = inlined_call_operand.vmem [shape: f32[1,64], index: 6, kind: input, shape index: {}]   ;;  %s1630_s7 = inlined_call_operand.vmem [shape: bf16[2,2,2,64], index: 7, kind: output, shape index: {0}]   ;;  %s1631_s8 = inlined_call_operand.vmem [shape: bf16[2,2,2,64], index: 8, kind: output, shape index: {1}]  }
   0x1 LB: > { %s1144_s28 = sadd.s32 4294967295, %s1395_s27   ;;  %p1148_p0 = scmp.ge.s32.totalorder %s1395_s27, 1  ;;  %s1395_s27 = sphi %s1448_s27, %s19_s27  }
   0x2   : > { %p265_p1 = scmp.lt.s32.totalorder %s1395_s27, 3 }
   0x4   : > { %p266_p2 = pnand %p1148_p0, %p265_p1 }
   0x5   : > { %p302_p3 = scmp.lt.s32.totalorder (!%p266_p2), %s1144_s28, 1  ;;  %s1471_s18 = smov (!%p266_p2), 0  }
   0x6   : > { %269 = sbr.rel (%p266_p2) target bundleno = 262 (0x106), region = 48 }
   0xb   : > { %s1633_s28 = smov (!%p302_p3, %s1144_s28), 1 }
   0xc   : > { %s1346_s29 = smul.u32 24, %s1633_s28  ;;  %s1150_s30 = sshll.u32 %s1633_s28, 1 }
   0xd   : > { %s1459_s11 = scalar_lea.vmem %s1630_s7, %s1150_s30  ;;  %s1464_s14 = scalar_lea.vmem %s1631_s8, %s1150_s30 }
   0xe   : > { %s1469_s17 = scalar_lea.vmem %s1623_s0, %s1346_s29 }
   0xf LB: >> { %v1365_v0 = vld [vmem:[%s1624_s1 + $0x18] sm:$0xff]   ;;  %v1401_v1 = vmov 0.0   ;;  %v1366_v2 = vld [vmem:[%s1624_s1 + $0x8] sm:$0xff]   ;;  %v1367_v3 = vld [vmem:[%s1624_s1 + $0x10] sm:$0xff]   ;;  %vm1402_vm0 = vmmov 0   ;;  %s1152_s25 = sshll.u32 %s1399_s18, 1  ;;  %s1034_s12 = scalar_lea.vmem %s1464_s14, %s1399_s18  ;;  %s1399_s18 = sphi %s1471_s18, %s321_s18  }
  0x10   : >> { %1266 = vmatprep.subr.bf16.mxu0 %v1401_v1  ;;  %1274 = vmatprep.subr.bf16.mxu1 %v1401_v1  ;;  %v1368_v4 = vld [vmem:[%s1624_s1] sm:$0xff]   ;;  %s1495_s29 = scalar_lea.vmem %s1469_s17, %s1152_s25  ;;  %vm350_vm1 = vcmask 261120   ;;  %v1369_v7 = vld [vmem:[%s1624_s1 + $0x28] sm:$0xff]   ;;  %v1370_v8 = vld [vmem:[%s1624_s1 + $0x38] sm:$0xff]   ;;  %vm1015_vm2 = vcmask 516096   ;;  %s1014_s20 = scalar_lea.vmem %s1459_s11, %s1399_s18 }
  0x11   : >> { %1267 = vmatpush3.bf16.msra.mxu0 %v1365_v0  ;;  %1270 = vmatprep.mubr.msk.bf16.mxu0 %vm1402_vm0, %v1401_v1  ;;  %v1154_v5 = vld [vmem:[%s1495_s29 + $0x6] sm:$0x1]  ;;  %v324_v6 = vld [vmem:[%s1495_s29] sm:$0x1]  ;;  %v1372_v11 = vld [vmem:[%s1624_s1 + $0x30] sm:$0xff]   ;;  %s321_s18 = sadd.s32 1, %s1399_s18  }
  0x12   : >> { %1275 = vmatpush3.bf16.msra.mxu1 %v1366_v2  ;;  %1268 = vmatprep.subr.bf16.mxu0 %v1401_v1  ;;  %v1169_v9 = vld.sshfl [vmem:[%s1495_s29] sm:$0x3 pattern:$0x76325410]  ;;  %v1174_v15 = vld [vmem:[%s1495_s29 + $0xc] sm:$0x1] }
  0x13   : >> { %1276 = vmatprep.subr.bf16.mxu1 %v1401_v1  ;;  %1278 = vmatprep.mubr.msk.bf16.mxu1 %vm1402_vm0, %v1401_v1  ;;  %v1371_v10 = vld [vmem:[%s1624_s1 + $0x20] sm:$0xff]   ;;  %v464_v12 = vshrl.u32 %v1169_v9, 16  ;;  %v466_v13 = vshll.u32 %v1169_v9, 16  ;;  %v1373_v17 = vld [vmem:[%s1624_s1 + $0x48] sm:$0xff]   ;;  %v1183_v22 = vld [vmem:[%s1495_s29 + $0x12] sm:$0x1] }
  0x14   : >> { %v1374_v18 = vld [vmem:[%s1625_s2 + $0x8] sm:$0xff]   ;;  %v1375_v19 = vld [vmem:[%s1624_s1 + $0x40] sm:$0xff]   ;;  %v1377_v24 = vld [vmem:[%s1624_s1 + $0x58] sm:$0xff]   ;;  %p318_p4 = scmp.ge.s32.totalorder %s321_s18, 2  }
  0x15   : >> { %1269 = vmatpush3.bf16.msra.mxu0 %v1367_v3  ;;  %v468_v14 = vrot.slane %v466_v13, 1  ;;  %v1199_v20 = vld.sshfl [vmem:[%s1495_s29 + $0xc] sm:$0x3 pattern:$0x76325410]  ;;  %v1376_v21 = vld [vmem:[%s1625_s2] sm:$0xff]  }
  0x16   : >> { %1277 = vmatpush3.bf16.msra.mxu1 %v1368_v4  ;;  %1282 = vmatprep.subr.bf16.mxu0 %v1401_v1  ;;  %v729_v23 = vshll.u32 %v1199_v20, 16  ;;  %v1378_v25 = vld [vmem:[%s1624_s1 + $0x68] sm:$0xff]   ;;  %v727_v26 = vshrl.u32 %v1199_v20, 16  ;;  %v1379_v28 = vld [vmem:[%s1624_s1 + $0x50] sm:$0xff]   ;;  %v1380_v29 = vld [vmem:[%s1624_s1 + $0x60] sm:$0xff]  }
  0x17   : >> { %1290 = vmatprep.subr.bf16.mxu1 %v1401_v1  ;;  %v469_v16 = vor.u32 %v468_v14, %v464_v12  ;;  %v1226_v30 = vld.sshfl [vmem:[%s1495_s29 + $0x2] sm:$0x3 pattern:$0x76325410]  ;;  %v1381_v32 = vld [vmem:[%s1624_s1 + $0x78] sm:$0xff]   ;;  %v1382_v35 = vld [vmem:[%s1624_s1 + $0x88] sm:$0xff]  }
  0x18   : >> { %1271 = vmatmul.mubr.msk.bf16.vlgmr.msra.gmra.mxu0 %vm350_vm1, %v1154_v5  ;;  %v731_v27 = vrot.slane %v729_v23, 1  ;;  %v936_v33 = vshll.u32 %v1226_v30, 16  ;;  %v1204_v34 = vld [vmem:[%s1495_s29 + $0x2] sm:$0x1]  ;;  %v1383_v36 = vld [vmem:[%s1624_s1 + $0x70] sm:$0xff]   ;;  %v934_v37 = vshrl.u32 %v1226_v30, 16 }
  0x19   : >> { %1279 = vmatmul.mubr.msk.bf16.vlgmr.msra.gmra.mxu1 %vm350_vm1, %v324_v6  ;;  %1283 = vmatpush3.bf16.msra.mxu0 %v1369_v7  ;;  %v1384_v39 = vld [vmem:[%s1624_s1 + $0x80] sm:$0xff]   ;;  %v1213_v40 = vld [vmem:[%s1495_s29 + $0x8] sm:$0x1] }
  0x1a   : >> { %1291 = vmatpush3.bf16.msra.mxu1 %v1370_v8  ;;  %1284 = vmatprep.subr.bf16.mxu0 %v1401_v1  ;;  %v732_v31 = vor.u32 %v731_v27, %v727_v26  ;;  %v938_v38 = vrot.slane %v936_v33, 1  ;;  %v1232_v58 = vld [vmem:[%s1628_s5] ss:$0 sm:$0xff] }
  0x1b   : >> { %1292 = vmatprep.subr.bf16.mxu1 %v1401_v1  ;;  %1286 = vmatprep.mubr.msk.bf16.mxu0 %vm1402_vm0, %v1401_v1  ;;  %v1233_v62 = vld [vmem:[%s1629_s6] ss:$0 sm:$0xff] }
  0x1c   : >> { %1294 = vmatprep.mubr.msk.bf16.mxu1 %vm1402_vm0, %v1401_v1  ;;  %v939_v41 = vor.u32 %v938_v38, %v934_v37 }
  0x1d   : >> { %1285 = vmatpush3.bf16.msra.mxu0 %v1371_v10 }
  0x1e   : >> { %1293 = vmatpush3.bf16.msra.mxu1 %v1372_v11  ;;  %1298 = vmatprep.subr.bf16.mxu0 %v1401_v1 }
  0x1f   : >> { %1306 = vmatprep.subr.bf16.mxu1 %v1401_v1 }
  0x20   : >> { %1287 = vmatmul.mubr.msk.bf16.vlgmr.msra.gmra.mxu0 %vm350_vm1, %v469_v16 }
  0x21   : >> { %1295 = vmatmul.mubr.msk.bf16.vlgmr.msra.gmra.mxu1 %vm350_vm1, %v1174_v15  ;;  %1299 = vmatpush3.bf16.msra.mxu0 %v1373_v17 }
  0x22   : >> { %1307 = vmatpush3.bf16.msra.mxu1 %v1374_v18  ;;  %1300 = vmatprep.subr.bf16.mxu0 %v1401_v1 }
  0x23   : >> { %1308 = vmatprep.subr.bf16.mxu1 %v1401_v1  ;;  %1302 = vmatprep.mubr.msk.bf16.mxu0 %vm1402_vm0, %v1401_v1 }
  0x24   : >> { %1310 = vmatprep.mubr.msk.bf16.mxu1 %vm1402_vm0, %v1401_v1 }
  0x25   : >> { %1301 = vmatpush3.bf16.msra.mxu0 %v1375_v19 }
  0x26   : >> { %1309 = vmatpush3.bf16.msra.mxu1 %v1376_v21  ;;  %1314 = vmatprep.subr.bf16.mxu0 %v1401_v1 }
  0x27   : >> { %1322 = vmatprep.subr.bf16.mxu1 %v1401_v1 }
  0x28   : >> { %1303 = vmatmul.mubr.msk.bf16.vlgmr.msra.gmra.mxu0 %vm350_vm1, %v1183_v22 }
  0x29   : >> { %1311 = vmatmul.mubr.msk.bf16.vlgmr.msra.gmra.mxu1 %vm350_vm1, %v1183_v22  ;;  %1315 = vmatpush3.bf16.msra.mxu0 %v1377_v24  ;;  %v1230_v24 = vld [vmem:[%s1626_s3] ss:$0 sm:$0xff] }
  0x2a   : >> { %1323 = vmatpush3.bf16.msra.mxu1 %v1378_v25  ;;  %1316 = vmatprep.subr.bf16.mxu0 %v1401_v1 }
  0x2b   : >> { %1324 = vmatprep.subr.bf16.mxu1 %v1401_v1  ;;  %1318 = vmatprep.mubr.msk.bf16.mxu0 %vm1402_vm0, %v1401_v1 }
  0x2c   : >> { %1326 = vmatprep.mubr.msk.bf16.mxu1 %vm1402_vm0, %v1401_v1 }
  0x2d   : >> { %1317 = vmatpush3.bf16.msra.mxu0 %v1379_v28  ;;  %v1231_v28 = vld [vmem:[%s1627_s4] ss:$0 sm:$0xff] }
  0x2e   : >> { %1325 = vmatpush3.bf16.msra.mxu1 %v1380_v29  ;;  %1330 = vmatprep.subr.bf16.mxu0 %v1401_v1 }
  0x2f   : >> { %1338 = vmatprep.subr.bf16.mxu1 %v1401_v1 }
  0x30   : >> { %1319 = vmatmul.mubr.msk.bf16.vlgmr.msra.gmra.mxu0 %vm350_vm1, %v732_v31 }
  0x31   : >> { %1327 = vmatmul.mubr.msk.bf16.vlgmr.msra.gmra.mxu1 %vm350_vm1, %v1204_v34  ;;  %1331 = vmatpush3.bf16.msra.mxu0 %v1381_v32 }
  0x32   : >> { %1339 = vmatpush3.bf16.msra.mxu1 %v1382_v35  ;;  %1332 = vmatprep.subr.bf16.mxu0 %v1401_v1 }
  0x33   : >> { %1340 = vmatprep.subr.bf16.mxu1 %v1401_v1  ;;  %1334 = vmatprep.mubr.msk.bf16.mxu0 %vm1402_vm0, %v1401_v1 }
  0x34   : >> { %1342 = vmatprep.mubr.msk.bf16.mxu1 %vm1402_vm0, %v1401_v1 }
  0x35   : >> { %1333 = vmatpush3.bf16.msra.mxu0 %v1383_v36 }
  0x36   : >> { %1341 = vmatpush3.bf16.msra.mxu1 %v1384_v39 }
  0x38   : >> { %1335 = vmatmul.mubr.msk.bf16.vlgmr.msra.gmra.mxu0 %vm350_vm1, %v1213_v40 }
  0x39   : >> { %1343 = vmatmul.mubr.msk.bf16.vlgmr.msra.gmra.mxu1 %vm350_vm1, %v939_v41 }
  0xd8   : >> { %v388_v42 = vpop.f32.mrf.mxu0 }
  0xd9   : >> { %v443_v43 = vpop.f32.mrf.mxu1 }
  0xda   : >> { %v1272_v44 = vpop.f32.mrf.mxu0  ;;  %v444_v60 = vadd.f32 %v443_v43, %v388_v42 }
  0xdb   : >> { %v1280_v45 = vpop.f32.mrf.mxu1 }
  0xdc   : >> { %v391_v46 = vpop.f32.mrf.mxu0 }
  0xdd   : >> { %v446_v47 = vpop.f32.mrf.mxu1 }
  0xde   : >> { %v1273_v48 = vpop.f32.mrf.mxu0 }
  0xdf   : >> { %v1281_v49 = vpop.f32.mrf.mxu1 }
  0xe0   : >> { %v519_v50 = vpop.f32.mrf.mxu0 }
  0xe1   : >> { %v584_v51 = vpop.f32.mrf.mxu1  ;;  %v525_v1 = vadd.f32 %v519_v50, %v444_v60 }
  0xe2   : >> { %v1288_v52 = vpop.f32.mrf.mxu0 }
  0xe3   : >> { %v1296_v53 = vpop.f32.mrf.mxu1  ;;  %v590_v8 = vadd.f32 %v584_v51, %v525_v1 }
  0xe4   : >> { %v522_v54 = vpop.f32.mrf.mxu0 }
  0xe5   : >> { %v587_v55 = vpop.f32.mrf.mxu1 }
  0xe6   : >> { %v1289_v56 = vpop.f32.mrf.mxu0 }
  0xe7   : >> { %v1297_v57 = vpop.f32.mrf.mxu1 }
  0xe8   : >> { %v649_v59 = vpop.f32.mrf.mxu0 }
  0xe9   : >> { %v706_v61 = vpop.f32.mrf.mxu1  ;;  %v655_v11 = vadd.f32 %v649_v59, %v590_v8 }
  0xea   : >> { %v1024_v63 = vmul.f32 %v1232_v58, %v706_v61  ;;  %v1304_v0 = vpop.f32.mrf.mxu0 }
  0xeb   : >> { %v1312_v2 = vpop.f32.mrf.mxu1 }
  0xec   : >> { %v1032_v3 = vadd.f32 %v1233_v62, %v1024_v63  ;;  %v652_v4 = vpop.f32.mrf.mxu0 }
  0xed   : >> { %v709_v5 = vpop.f32.mrf.mxu1 }
  0xee   : >> { %v1033_v6 = vpack.c.bf16 %v1032_v3, %v1032_v3  ;;  %v1305_v7 = vpop.f32.mrf.mxu0 }
  0xef   : >> { %v1313_v9 = vpop.f32.mrf.mxu1 }
  0xf0   : >> { %1035 = vst.msk [vmem:[%s1034_s12] sm:$0x1] %vm1015_vm2, %v1033_v6  ;;  %v782_v10 = vpop.f32.mrf.mxu0 }
  0xf1   : >> { %v847_v12 = vpop.f32.mrf.mxu1  ;;  %v788_v14 = vadd.f32 %v782_v10, %v655_v11 }
  0xf2   : >> { %v1320_v13 = vpop.f32.mrf.mxu0 }
  0xf3   : >> { %v1328_v15 = vpop.f32.mrf.mxu1  ;;  %v853_v19 = vadd.f32 %v847_v12, %v788_v14 }
  0xf4   : >> { %v785_v16 = vpop.f32.mrf.mxu0 }
  0xf5   : >> { %v850_v17 = vpop.f32.mrf.mxu1 }
  0xf6   : >> { %v1321_v18 = vpop.f32.mrf.mxu0 }
  0xf7   : >> { %v1329_v20 = vpop.f32.mrf.mxu1 }
  0xf8   : >> { %v912_v21 = vpop.f32.mrf.mxu0 }
  0xf9   : >> { %v918_v22 = vadd.f32 %v912_v21, %v853_v19  ;;  %v989_v23 = vpop.f32.mrf.mxu1 }
  0xfa   : >> { %v1336_v25 = vpop.f32.mrf.mxu0 }
  0xfb   : >> { %v995_v26 = vadd.f32 %v989_v23, %v918_v22  ;;  %v1344_v27 = vpop.f32.mrf.mxu1 }
  0xfc   : >> { %v915_v29 = vpop.f32.mrf.mxu0 }
  0xfd   : >> { %v1003_v30 = vmul.f32 %v1230_v24, %v995_v26  ;;  %v992_v31 = vpop.f32.mrf.mxu1 }
  0xfe   : >> { %v1337_v32 = vpop.f32.mrf.mxu0 }
  0xff   : >> { %v1011_v33 = vadd.f32 %v1231_v28, %v1003_v30  ;;  %v1345_v34 = vpop.f32.mrf.mxu1 }
 0x101   : >> { %v1012_v35 = vmax.f32 %v1011_v33, 0.0  ;;  %320 = sbr.rel (!%p318_p4) target bundleno = 15 (0xf), region = 113 }
 0x103   : >> { %v1013_v36 = vpack.c.bf16 %v1012_v35, %v1012_v35 }
 0x105   : >> { %1016 = vst.msk [vmem:[%s1014_s20] sm:$0x1] %vm1015_vm2, %v1013_v36 }
 0x106 PF: > { %s19_s27 = sadd.s32 1, %s1395_s27  }
 0x107   : > { %p16_p5 = scmp.ge.s32.totalorder %s19_s27, 4  }
 0x109   :  { %18 = sbr.rel (!%p16_p5) target bundleno = 1 (0x1), region = 124 }

// kernel: cnn_classifier_forward.8
= control target key start
LH: loop header
LB: loop body
LE: loop exit
PB: predicated region body
PF: predicated region fallthrough
CT: control target
= control target key end

     0   :  { %s3883_s15 = smov 0   ;;  %s4381_s0 = inlined_call_operand.vmem [shape: bf16[2,4,11,11,3], index: 0, kind: input, shape index: {}]   ;;  %s4382_s1 = inlined_call_operand.vmem [shape: bf16[49,3,32], index: 1, kind: input, shape index: {}]   ;;  %s4383_s2 = inlined_call_operand.vmem [shape: f32[1,32], index: 2, kind: input, shape index: {}]   ;;  %s4384_s3 = inlined_call_operand.vmem [shape: f32[1,32], index: 3, kind: input, shape index: {}]   ;;  %s4385_s4 = inlined_call_operand.vmem [shape: bf16[2,8,8,32], index: 4, kind: output, shape index: {}]  }
   0x1 LB: > { %s3152_s16 = sadd.s32 4294967295, %s3849_s15   ;;  %p3156_p0 = scmp.ge.s32.totalorder %s3849_s15, 1  ;;  %s3849_s15 = sphi %s3883_s15, %s14_s15  }
   0x2   : > { %p162_p1 = scmp.lt.s32.totalorder %s3849_s15, 3 }
   0x4   : > { %p163_p2 = pnand %p3156_p0, %p162_p1 }
   0x5   : > { %p188_p3 = scmp.lt.s32.totalorder (!%p163_p2), %s3152_s16, 1  ;;  %s3901_s25 = smov (!%p163_p2), 0  }
   0x6   : > { %166 = sbr.rel (%p163_p2) target bundleno = 419 (0x1a3), region = 36 }
   0xb   : > { %s4387_s16 = smov (!%p188_p3, %s3152_s16), 1 }
   0xc   : > { %s3784_s17 = smul.u32 352, %s4387_s16  ;;  %s3380_s18 = sshll.u32 %s4387_s16, 5 }
   0xd   : > { %s3894_s21 = scalar_lea.vmem %s4385_s4, %s3380_s18 }
   0xe   : > { %s3899_s24 = scalar_lea.vmem %s4381_s0, %s3784_s17 }
   0xf LB: >> { %v3165_v0 = vld [vmem:[%s4382_s1 + $0x2] sm:$0x3]  ;;  %vm220_vm0 = vcmask 1040384   ;;  %vm221_vm1 = vcmask 1041408   ;;  %v3855_v1 = vmov 0.0   ;;  %v3856_v2 = vmov 65535   ;;  %s3853_s25 = sphi %s3901_s25, %s204_s25  }
  0x10   : >> { %3490 = vmatprep.subr.bf16.mxu0 %v3855_v1  ;;  %v222_v3 = vsel %vm220_vm0, 4294967295, %v3856_v2  ;;  %3496 = vmatprep.subr.bf16.mxu1 %v3855_v1  ;;  %v209_v4 = vld [vmem:[%s4382_s1] sm:$0x3]  ;;  %vm3857_vm2 = vmmov 0   ;;  %s3381_s30 = sshll.u32 %s3853_s25, 3  ;;  %vm216_vm3 = vcmask 23552  }
  0x11   : >> { %v3914_v5 = vsel %vm221_vm1, %v222_v3, 0  ;;  %3492 = vmatprep.mubr.msk.bf16.mxu0 %vm3857_vm2, %v3855_v1  ;;  %3498 = vmatprep.mubr.msk.bf16.mxu1 %vm3857_vm2, %v3855_v1  ;;  %v3168_v6 = vld [vmem:[%s4382_s1 + $0x4] sm:$0x3]  ;;  %v3173_v7 = vld [vmem:[%s4382_s1 + $0x6] sm:$0x3]  ;;  %s3930_s9 = scalar_lea.vmem %s3899_s24, %s3381_s30  ;;  %s3377_s20 = sshll.u32 %s3853_s25, 2 }
  0x12   : >> { %v225_v8 = vand.u32 %v3165_v0, %v3914_v5  ;;  %v271_v9 = vand.u32 %v3914_v5, %v209_v4  ;;  %v3164_v10 = vld [vmem:[%s3930_s9 + $0x58] sm:$0xf]  ;;  %v208_v11 = vld [vmem:[%s3930_s9] sm:$0xf]  ;;  %v333_v13 = vand.u32 %v3168_v6, %v3914_v5  ;;  %v396_v14 = vand.u32 %v3173_v7, %v3914_v5  ;;  %v314_v15 = vld [vmem:[%s3930_s9 + $0x4] sm:$0x1]  ;;  %s3036_s22 = scalar_lea.vmem %s3894_s21, %s3377_s20 }
  0x13   : >> { %v313_v12 = vld [vmem:[%s3930_s9] sm:$0xf]  ;;  %v3171_v16 = vld [vmem:[%s3930_s9 + $0x58] sm:$0xf]  ;;  %v3172_v17 = vld [vmem:[%s3930_s9 + $0x5c] sm:$0x1] }
  0x14   : >> { %3491 = vmatpush3.bf16.msra.mxu0 %v225_v8  ;;  %3497 = vmatpush3.bf16.msra.mxu1 %v271_v9  ;;  %v3169_v18 = vcombine.low %v313_v12, %v314_v15  ;;  %v3174_v19 = vcombine.low %v3171_v16, %v3172_v17  ;;  %v3176_v26 = vld [vmem:[%s4382_s1 + $0x8] sm:$0x3]  ;;  %v3180_v27 = vld [vmem:[%s4382_s1 + $0xa] sm:$0x3]  ;;  %v439_v32 = vld [vmem:[%s3930_s9] sm:$0xe] }
  0x15   : >> { %3502 = vmatprep.subr.bf16.mxu0 %v3855_v1  ;;  %3508 = vmatprep.subr.bf16.mxu1 %v3855_v1  ;;  %v450_v30 = vand.u32 %v3176_v26, %v3914_v5  ;;  %v504_v31 = vand.u32 %v3180_v27, %v3914_v5  ;;  %v547_v33 = vld [vmem:[%s3930_s9 + $0x4] sm:$0x3]  ;;  %v3179_v34 = vld [vmem:[%s3930_s9 + $0x58] sm:$0xe]  ;;  %v3177_v35 = vcombine.low %v439_v32, %v314_v15  ;;  %v3183_v38 = vld [vmem:[%s4382_s1 + $0xc] sm:$0x3] }
  0x16   : >> { %v323_v20 = vshrl.u32 %v3169_v18, 16  ;;  %v325_v21 = vshll.u32 %v3169_v18, 16  ;;  %v386_v22 = vshrl.u32 %v3174_v19, 16  ;;  %v388_v23 = vshll.u32 %v3174_v19, 16  ;;  %v3189_v39 = vld [vmem:[%s4382_s1 + $0xe] sm:$0x3] }
  0x17   : >> { %3493 = vmatmul.mubr.msk.bf16.vlgmr.msra.gmra.mxu0 %vm216_vm3, %v3164_v10  ;;  %3499 = vmatmul.mubr.msk.bf16.vlgmr.msra.gmra.mxu1 %vm216_vm3, %v208_v11  ;;  %v3184_v36 = vcombine.low %v439_v32, %v547_v33  ;;  %v3181_v37 = vcombine.low %v3179_v34, %v3172_v17  ;;  %v445_v40 = vrot.slane %v3177_v35, 1  ;;  %v565_v44 = vand.u32 %v3183_v38, %v3914_v5  ;;  %v3196_v46 = vld [vmem:[%s3930_s9 + $0xb0] sm:$0xf]  ;;  %v3197_v47 = vld [vmem:[%s3930_s9 + $0xb4] sm:$0x1]  ;;  %s204_s25 = sadd.s32 1, %s3853_s25  }
  0x18   : >> { %3503 = vmatpush3.bf16.msra.mxu0 %v333_v13  ;;  %3509 = vmatpush3.bf16.msra.mxu1 %v396_v14  ;;  %v327_v24 = vrot.slane %v325_v21, 1  ;;  %v390_v25 = vrot.slane %v388_v23, 1  ;;  %v618_v45 = vand.u32 %v3189_v39, %v3914_v5  ;;  %v3199_v50 = vcombine.low %v3196_v46, %v3197_v47  ;;  %v3194_v51 = vld [vmem:[%s4382_s1 + $0x10] sm:$0x3]  ;;  %v3198_v52 = vld [vmem:[%s4382_s1 + $0x12] sm:$0x3] }
  0x19   : >> { %3504 = vmatprep.mubr.msk.bf16.mxu0 %vm3857_vm2, %v3855_v1  ;;  %3510 = vmatprep.mubr.msk.bf16.mxu1 %vm3857_vm2, %v3855_v1  ;;  %v499_v41 = vrot.slane %v3181_v37, 1  ;;  %v554_v42 = vshrl.u32 %v3184_v36, 16  ;;  %v557_v43 = vshll.u32 %v3184_v36, 16  ;;  %v3188_v55 = vld [vmem:[%s3930_s9 + $0xb0] sm:$0xf]  ;;  %v671_v56 = vand.u32 %v3194_v51, %v3914_v5  ;;  %p201_p4 = scmp.ge.s32.totalorder %s204_s25, 8  }
  0x1a   : >> { %3514 = vmatprep.subr.bf16.mxu0 %v3855_v1  ;;  %3520 = vmatprep.subr.bf16.mxu1 %v3855_v1  ;;  %v328_v28 = vor.u32 %v327_v24, %v323_v20  ;;  %v391_v29 = vor.u32 %v390_v25, %v386_v22  ;;  %v726_v54 = vshll.u32 %v3199_v50, 16  ;;  %v734_v57 = vand.u32 %v3198_v52, %v3914_v5  ;;  %v3201_v58 = vld [vmem:[%s3930_s9 + $0x108] sm:$0xf]  ;;  %v3202_v59 = vld [vmem:[%s3930_s9 + $0x10c] sm:$0x1] }
  0x1b   : >> { %v556_v48 = vrot.slane %v554_v42, 1  ;;  %v559_v49 = vrot.slane %v557_v43, 2  ;;  %v724_v60 = vshrl.u32 %v3199_v50, 16  ;;  %v3204_v62 = vcombine.low %v3201_v58, %v3202_v59  ;;  %v3203_v63 = vld [vmem:[%s4382_s1 + $0x14] sm:$0x3] }
  0x1c   : >> { %v728_v61 = vrot.slane %v726_v54, 1  ;;  %v3207_v0 = vld [vmem:[%s4382_s1 + $0x16] sm:$0x3]  ;;  %v3193_v4 = vld [vmem:[%s3930_s9 + $0x108] sm:$0xf]  ;;  %v797_v6 = vand.u32 %v3203_v63, %v3914_v5  ;;  %vm3037_vm4 = vcmask 257024  }
  0x1d   : >> { %v560_v53 = vor.u32 %v559_v49, %v556_v48  ;;  %v789_v3 = vshll.u32 %v3204_v62, 16  ;;  %v851_v7 = vand.u32 %v3207_v0, %v3914_v5  ;;  %v3206_v8 = vld [vmem:[%s3930_s9 + $0xb0] sm:$0xe]  ;;  %v3214_v9 = vld [vmem:[%s3930_s9 + $0xb4] sm:$0x3]  ;;  %v787_v10 = vshrl.u32 %v3204_v62, 16 }
  0x1e   : >> { %v729_v2 = vor.u32 %v728_v61, %v724_v60  ;;  %v3208_v12 = vcombine.low %v3206_v8, %v3197_v47  ;;  %v3216_v13 = vcombine.low %v3206_v8, %v3214_v9  ;;  %v3211_v14 = vld [vmem:[%s4382_s1 + $0x18] sm:$0x3]  ;;  %v3215_v15 = vld [vmem:[%s4382_s1 + $0x1a] sm:$0x3]  ;;  %v3210_v22 = vld [vmem:[%s3930_s9 + $0x108] sm:$0xe] }
  0x1f   : >> { %3505 = vmatmul.mubr.msk.bf16.vlgmr.msra.gmra.mxu0 %vm216_vm3, %v328_v28  ;;  %3511 = vmatmul.mubr.msk.bf16.vlgmr.msra.gmra.mxu1 %vm216_vm3, %v391_v29  ;;  %v791_v11 = vrot.slane %v789_v3, 1  ;;  %v905_v20 = vand.u32 %v3211_v14, %v3914_v5  ;;  %v966_v21 = vand.u32 %v3215_v15, %v3914_v5  ;;  %v3212_v23 = vcombine.low %v3210_v22, %v3202_v59  ;;  %v3220_v26 = vld [vmem:[%s4382_s1 + $0x1c] sm:$0x3]  ;;  %v3225_v27 = vld [vmem:[%s4382_s1 + $0x1e] sm:$0x3] }
  0x20   : >> { %3515 = vmatpush3.bf16.msra.mxu0 %v450_v30  ;;  %3521 = vmatpush3.bf16.msra.mxu1 %v504_v31  ;;  %v846_v17 = vrot.slane %v3208_v12, 1  ;;  %v955_v18 = vshrl.u32 %v3216_v13, 16  ;;  %v958_v19 = vshll.u32 %v3216_v13, 16  ;;  %v3227_v30 = vld [vmem:[%s3930_s9 + $0x8] sm:$0xf]  ;;  %v1020_v31 = vand.u32 %v3220_v26, %v3914_v5 }
  0x21   : >> { %3516 = vmatprep.mubr.msk.bf16.mxu0 %vm3857_vm2, %v3855_v1  ;;  %3522 = vmatprep.mubr.msk.bf16.mxu1 %vm3857_vm2, %v3855_v1  ;;  %v792_v16 = vor.u32 %v791_v11, %v787_v10  ;;  %v900_v28 = vrot.slane %v3212_v23, 1  ;;  %v1073_v32 = vand.u32 %v3225_v27, %v3914_v5  ;;  %v3228_v33 = vld [vmem:[%s3930_s9 + $0xc] sm:$0x1]  ;;  %v3232_v34 = vld [vmem:[%s3930_s9 + $0x60] sm:$0xf] }
  0x22   : >> { %3526 = vmatprep.subr.bf16.mxu0 %v3855_v1  ;;  %3532 = vmatprep.subr.bf16.mxu1 %v3855_v1  ;;  %v957_v24 = vrot.slane %v955_v18, 1  ;;  %v960_v25 = vrot.slane %v958_v19, 2  ;;  %v3233_v35 = vld [vmem:[%s3930_s9 + $0x64] sm:$0x1]  ;;  %v3230_v36 = vcombine.low %v3227_v30, %v3228_v33  ;;  %v3229_v38 = vld [vmem:[%s4382_s1 + $0x20] sm:$0x3] }
  0x23   : >> { %v3235_v37 = vcombine.low %v3232_v34, %v3233_v35  ;;  %v3234_v39 = vld [vmem:[%s4382_s1 + $0x22] sm:$0x3]  ;;  %v3219_v42 = vld [vmem:[%s3930_s9 + $0x8] sm:$0xf]  ;;  %v3238_v50 = vld [vmem:[%s4382_s1 + $0x24] sm:$0x3] }
  0x24   : >> { %v961_v29 = vor.u32 %v960_v25, %v957_v24  ;;  %v3224_v43 = vld [vmem:[%s3930_s9 + $0x60] sm:$0xf]  ;;  %v1126_v46 = vshrl.u32 %v3230_v36, 16  ;;  %v3242_v51 = vld [vmem:[%s4382_s1 + $0x26] sm:$0x3]  ;;  %v1253_v54 = vand.u32 %v3238_v50, %v3914_v5 }
  0x25   : >> { %v1189_v48 = vshrl.u32 %v3235_v37, 16  ;;  %v3241_v58 = vld [vmem:[%s3930_s9 + $0x60] sm:$0xe]  ;;  %v3246_v62 = vld [vmem:[%s4382_s1 + $0x28] sm:$0x3] }
  0x26   : >> { %v3243_v61 = vcombine.low %v3241_v58, %v3233_v35  ;;  %v3252_v63 = vld [vmem:[%s4382_s1 + $0x2a] sm:$0x3]  ;;  %v3259_v8 = vld [vmem:[%s3930_s9 + $0xb8] sm:$0xf]  ;;  %v3260_v9 = vld [vmem:[%s3930_s9 + $0xbc] sm:$0x1] }
  0x27   : >> { %3517 = vmatmul.mubr.msk.bf16.vlgmr.msra.gmra.mxu0 %vm216_vm3, %v445_v40  ;;  %3523 = vmatmul.mubr.msk.bf16.vlgmr.msra.gmra.mxu1 %vm216_vm3, %v499_v41  ;;  %v1128_v40 = vshll.u32 %v3230_v36, 16  ;;  %v1191_v41 = vshll.u32 %v3235_v37, 16  ;;  %v3262_v12 = vcombine.low %v3259_v8, %v3260_v9  ;;  %v3257_v13 = vld [vmem:[%s4382_s1 + $0x2c] sm:$0x3]  ;;  %v3261_v14 = vld [vmem:[%s4382_s1 + $0x2e] sm:$0x3] }
  0x28   : >> { %3527 = vmatpush3.bf16.msra.mxu0 %v565_v44  ;;  %3533 = vmatpush3.bf16.msra.mxu1 %v618_v45  ;;  %v1136_v44 = vand.u32 %v3229_v38, %v3914_v5  ;;  %v1199_v45 = vand.u32 %v3234_v39, %v3914_v5  ;;  %v1474_v18 = vand.u32 %v3257_v13, %v3914_v5  ;;  %v3266_v25 = vld [vmem:[%s4382_s1 + $0x30] sm:$0x3]  ;;  %v3270_v26 = vld [vmem:[%s4382_s1 + $0x32] sm:$0x3]  ;;  %v3274_v38 = vld [vmem:[%s4382_s1 + $0x34] sm:$0x3] }
  0x29   : >> { %3528 = vmatprep.mubr.msk.bf16.mxu0 %vm3857_vm2, %v3855_v1  ;;  %3534 = vmatprep.mubr.msk.bf16.mxu1 %vm3857_vm2, %v3855_v1  ;;  %v1130_v47 = vrot.slane %v1128_v40, 1  ;;  %v1193_v49 = vrot.slane %v1191_v41, 1  ;;  %v1537_v19 = vand.u32 %v3261_v14, %v3914_v5  ;;  %v1527_v22 = vshrl.u32 %v3262_v12, 16  ;;  %v3278_v39 = vld [vmem:[%s4382_s1 + $0x36] sm:$0x3] }
  0x2a   : >> { %3538 = vmatprep.subr.bf16.mxu0 %v3855_v1  ;;  %3544 = vmatprep.subr.bf16.mxu1 %v3855_v1  ;;  %v1600_v30 = vand.u32 %v3266_v25, %v3914_v5  ;;  %v3283_v50 = vld [vmem:[%s4382_s1 + $0x38] sm:$0x3]  ;;  %v3295_v58 = vld [vmem:[%s3930_s9 + $0x68] sm:$0xf]  ;;  %v3305_v13 = vld [vmem:[%s4382_s1 + $0x42] sm:$0x3] }
  0x2b   : >> { %v1131_v52 = vor.u32 %v1130_v47, %v1126_v46  ;;  %v3273_v46 = vld [vmem:[%s3930_s9 + $0x110] sm:$0xe]  ;;  %v3315_v25 = vld [vmem:[%s4382_s1 + $0x46] sm:$0x3] }
  0x2f   : >> { %3529 = vmatmul.mubr.msk.bf16.vlgmr.msra.gmra.mxu0 %vm216_vm3, %v560_v53  ;;  %3535 = vmatmul.mubr.msk.bf16.vlgmr.msra.gmra.mxu1 %vm216_vm3, %v3188_v55  ;;  %v1194_v53 = vor.u32 %v1193_v49, %v1189_v48  ;;  %v1307_v55 = vand.u32 %v3242_v51, %v3914_v5  ;;  %v3288_v51 = vld [vmem:[%s4382_s1 + $0x3a] sm:$0x3] }
  0x30   : >> { %3539 = vmatpush3.bf16.msra.mxu0 %v671_v56  ;;  %3545 = vmatpush3.bf16.msra.mxu1 %v734_v57  ;;  %v3237_v56 = vld [vmem:[%s3930_s9 + $0x8] sm:$0xe]  ;;  %v3245_v57 = vld [vmem:[%s3930_s9 + $0xc] sm:$0x3] }
  0x31   : >> { %3540 = vmatprep.mubr.msk.bf16.mxu0 %vm3857_vm2, %v3855_v1  ;;  %3546 = vmatprep.mubr.msk.bf16.mxu1 %vm3857_vm2, %v3855_v1  ;;  %v3239_v59 = vcombine.low %v3237_v56, %v3228_v33  ;;  %v3247_v60 = vcombine.low %v3237_v56, %v3245_v57  ;;  %v3277_v33 = vld [vmem:[%s3930_s9 + $0xbc] sm:$0x3]  ;;  %v1876_v56 = vand.u32 %v3288_v51, %v3914_v5  ;;  %v3291_v57 = vld [vmem:[%s3930_s9 + $0x14] sm:$0x1] }
  0x32   : >> { %3550 = vmatprep.subr.bf16.mxu0 %v3855_v1  ;;  %3556 = vmatprep.subr.bf16.mxu1 %v3855_v1 }
  0x33   : >> { %v1248_v0 = vrot.slane %v3239_v59, 1  ;;  %v1357_v3 = vshrl.u32 %v3247_v60, 16  ;;  %v3296_v59 = vld [vmem:[%s3930_s9 + $0x6c] sm:$0x1] }
  0x35   : >> { %v1359_v10 = vrot.slane %v1357_v3, 1  ;;  %v3282_v3 = vld [vmem:[%s3930_s9 + $0x10] sm:$0xf] }
  0x37   : >> { %3541 = vmatmul.mubr.msk.bf16.vlgmr.msra.gmra.mxu0 %vm216_vm3, %v3193_v4  ;;  %3547 = vmatmul.mubr.msk.bf16.vlgmr.msra.gmra.mxu1 %vm216_vm3, %v729_v2  ;;  %v1302_v2 = vrot.slane %v3243_v61, 1  ;;  %v1360_v4 = vshll.u32 %v3247_v60, 16  ;;  %v3298_v61 = vcombine.low %v3295_v58, %v3296_v59 }
  0x38   : >> { %3551 = vmatpush3.bf16.msra.mxu0 %v797_v6  ;;  %3557 = vmatpush3.bf16.msra.mxu1 %v851_v7  ;;  %v1368_v6 = vand.u32 %v3246_v62, %v3914_v5  ;;  %v1421_v7 = vand.u32 %v3252_v63, %v3914_v5  ;;  %v3292_v62 = vld [vmem:[%s4382_s1 + $0x3c] sm:$0x3]  ;;  %v3297_v63 = vld [vmem:[%s4382_s1 + $0x3e] sm:$0x3] }
  0x39   : >> { %3552 = vmatprep.mubr.msk.bf16.mxu0 %vm3857_vm2, %v3855_v1  ;;  %3558 = vmatprep.mubr.msk.bf16.mxu1 %vm3857_vm2, %v3855_v1  ;;  %v1362_v11 = vrot.slane %v1360_v4, 2  ;;  %v3287_v4 = vld [vmem:[%s3930_s9 + $0x68] sm:$0xf] }
  0x3a   : >> { %3562 = vmatprep.subr.bf16.mxu0 %v3855_v1  ;;  %3568 = vmatprep.subr.bf16.mxu1 %v3855_v1 }
  0x3b   : >> { %v1363_v15 = vor.u32 %v1362_v11, %v1359_v10  ;;  %v1992_v10 = vshrl.u32 %v3298_v61, 16 }
  0x3f   : >> { %3553 = vmatmul.mubr.msk.bf16.vlgmr.msra.gmra.mxu0 %vm216_vm3, %v792_v16  ;;  %3559 = vmatmul.mubr.msk.bf16.vlgmr.msra.gmra.mxu1 %vm216_vm3, %v846_v17  ;;  %v1529_v16 = vshll.u32 %v3262_v12, 16  ;;  %v3251_v17 = vld [vmem:[%s3930_s9 + $0xb8] sm:$0xf]  ;;  %v3301_v12 = vld [vmem:[%s4382_s1 + $0x40] sm:$0x3] }
  0x40   : >> { %3563 = vmatpush3.bf16.msra.mxu0 %v905_v20  ;;  %3569 = vmatpush3.bf16.msra.mxu1 %v966_v21  ;;  %v3264_v20 = vld [vmem:[%s3930_s9 + $0x110] sm:$0xf]  ;;  %v3265_v21 = vld [vmem:[%s3930_s9 + $0x114] sm:$0x1] }
  0x41   : >> { %3564 = vmatprep.mubr.msk.bf16.mxu0 %vm3857_vm2, %v3855_v1  ;;  %3570 = vmatprep.mubr.msk.bf16.mxu1 %vm3857_vm2, %v3855_v1  ;;  %v1531_v23 = vrot.slane %v1529_v16, 1  ;;  %v3267_v24 = vcombine.low %v3264_v20, %v3265_v21  ;;  %v3275_v47 = vcombine.low %v3273_v46, %v3265_v21  ;;  %v2056_v16 = vand.u32 %v3301_v12, %v3914_v5  ;;  %v3304_v20 = vld [vmem:[%s3930_s9 + $0x68] sm:$0xe]  ;;  %v3346_v12 = vld [vmem:[%s4382_s1 + $0x54] sm:$0x3] }
  0x42   : >> { %3574 = vmatprep.subr.bf16.mxu0 %v3855_v1  ;;  %3580 = vmatprep.subr.bf16.mxu1 %v3855_v1 }
  0x43   : >> { %v1532_v27 = vor.u32 %v1531_v23, %v1527_v22  ;;  %v1590_v34 = vshrl.u32 %v3267_v24, 16  ;;  %v3306_v23 = vcombine.low %v3304_v20, %v3296_v59  ;;  %v3358_v20 = vld [vmem:[%s3930_s9 + $0x70] sm:$0xf] }
  0x47   : >> { %3565 = vmatmul.mubr.msk.bf16.vlgmr.msra.gmra.mxu0 %vm216_vm3, %v900_v28  ;;  %3571 = vmatmul.mubr.msk.bf16.vlgmr.msra.gmra.mxu1 %vm216_vm3, %v961_v29  ;;  %v1592_v28 = vshll.u32 %v3267_v24, 16  ;;  %v3256_v29 = vld [vmem:[%s3930_s9 + $0x110] sm:$0xf]  ;;  %v3309_v24 = vld [vmem:[%s4382_s1 + $0x44] sm:$0x3] }
  0x48   : >> { %3575 = vmatpush3.bf16.msra.mxu0 %v1020_v31  ;;  %3581 = vmatpush3.bf16.msra.mxu1 %v1073_v32  ;;  %v1654_v31 = vand.u32 %v3270_v26, %v3914_v5  ;;  %v3269_v32 = vld [vmem:[%s3930_s9 + $0xb8] sm:$0xe] }
  0x49   : >> { %3576 = vmatprep.mubr.msk.bf16.mxu0 %vm3857_vm2, %v3855_v1  ;;  %3582 = vmatprep.mubr.msk.bf16.mxu1 %vm3857_vm2, %v3855_v1  ;;  %v1594_v35 = vrot.slane %v1592_v28, 1  ;;  %v3271_v36 = vcombine.low %v3269_v32, %v3260_v9  ;;  %v3279_v37 = vcombine.low %v3269_v32, %v3277_v33  ;;  %v3322_v32 = vld [vmem:[%s3930_s9 + $0xc0] sm:$0xf]  ;;  %v3323_v33 = vld [vmem:[%s3930_s9 + $0xc4] sm:$0x1] }
  0x4a   : >> { %3586 = vmatprep.subr.bf16.mxu0 %v3855_v1  ;;  %3592 = vmatprep.subr.bf16.mxu1 %v3855_v1 }
  0x4b   : >> { %v1595_v40 = vor.u32 %v1594_v35, %v1590_v34  ;;  %v1649_v41 = vrot.slane %v3271_v36, 1  ;;  %v3325_v36 = vcombine.low %v3322_v32, %v3323_v33 }
  0x4d   : >> { %v2330_v46 = vshrl.u32 %v3325_v36, 16 }
  0x4f   : >> { %3577 = vmatmul.mubr.msk.bf16.vlgmr.msra.gmra.mxu0 %vm216_vm3, %v3219_v42  ;;  %3583 = vmatmul.mubr.msk.bf16.vlgmr.msra.gmra.mxu1 %vm216_vm3, %v3224_v43  ;;  %v1758_v42 = vshrl.u32 %v3279_v37, 16  ;;  %v1761_v43 = vshll.u32 %v3279_v37, 16  ;;  %v3320_v37 = vld [vmem:[%s4382_s1 + $0x48] sm:$0x3] }
  0x50   : >> { %3587 = vmatpush3.bf16.msra.mxu0 %v1136_v44  ;;  %3593 = vmatpush3.bf16.msra.mxu1 %v1199_v45  ;;  %v1708_v44 = vand.u32 %v3274_v38, %v3914_v5  ;;  %v1769_v45 = vand.u32 %v3278_v39, %v3914_v5  ;;  %v3324_v38 = vld [vmem:[%s4382_s1 + $0x4a] sm:$0x3] }
  0x51   : >> { %3588 = vmatprep.mubr.msk.bf16.mxu0 %vm3857_vm2, %v3855_v1  ;;  %3594 = vmatprep.mubr.msk.bf16.mxu1 %vm3857_vm2, %v3855_v1  ;;  %v1760_v48 = vrot.slane %v1758_v42, 1  ;;  %v1763_v49 = vrot.slane %v1761_v43, 2  ;;  %v2277_v42 = vand.u32 %v3320_v37, %v3914_v5  ;;  %v2340_v43 = vand.u32 %v3324_v38, %v3914_v5  ;;  %v3368_v37 = vld [vmem:[%s4382_s1 + $0x5e] sm:$0x3] }
  0x52   : >> { %3598 = vmatprep.subr.bf16.mxu0 %v3855_v1  ;;  %3604 = vmatprep.subr.bf16.mxu1 %v3855_v1 }
  0x57   : >> { %3589 = vmatmul.mubr.msk.bf16.vlgmr.msra.gmra.mxu0 %vm216_vm3, %v1131_v52  ;;  %3595 = vmatmul.mubr.msk.bf16.vlgmr.msra.gmra.mxu1 %vm216_vm3, %v1194_v53  ;;  %v1703_v52 = vrot.slane %v3275_v47, 1  ;;  %v1764_v53 = vor.u32 %v1763_v49, %v1760_v48  ;;  %v3329_v49 = vld [vmem:[%s4382_s1 + $0x4c] sm:$0x3] }
  0x58   : >> { %3599 = vmatpush3.bf16.msra.mxu0 %v1253_v54  ;;  %3605 = vmatpush3.bf16.msra.mxu1 %v1307_v55  ;;  %v3290_v54 = vld [vmem:[%s3930_s9 + $0x10] sm:$0xf]  ;;  %v1823_v55 = vand.u32 %v3283_v50, %v3914_v5  ;;  %v3333_v50 = vld [vmem:[%s4382_s1 + $0x4e] sm:$0x3] }
  0x59   : >> { %3600 = vmatprep.mubr.msk.bf16.mxu0 %vm3857_vm2, %v3855_v1  ;;  %3606 = vmatprep.mubr.msk.bf16.mxu1 %vm3857_vm2, %v3855_v1  ;;  %v3293_v60 = vcombine.low %v3290_v54, %v3291_v57  ;;  %v2403_v54 = vand.u32 %v3329_v49, %v3914_v5 }
  0x5a   : >> { %3610 = vmatprep.subr.bf16.mxu0 %v3855_v1  ;;  %3616 = vmatprep.subr.bf16.mxu1 %v3855_v1 }
  0x5b   : >> { %v1929_v8 = vshrl.u32 %v3293_v60, 16 }
  0x5f   : >> { %3601 = vmatmul.mubr.msk.bf16.vlgmr.msra.gmra.mxu0 %vm216_vm3, %v1248_v0  ;;  %3607 = vmatmul.mubr.msk.bf16.vlgmr.msra.gmra.mxu1 %vm216_vm3, %v1302_v2  ;;  %v1931_v0 = vshll.u32 %v3293_v60, 16  ;;  %v1994_v2 = vshll.u32 %v3298_v61, 16 }
  0x60   : >> { %3611 = vmatpush3.bf16.msra.mxu0 %v1368_v6  ;;  %3617 = vmatpush3.bf16.msra.mxu1 %v1421_v7  ;;  %v1939_v6 = vand.u32 %v3292_v62, %v3914_v5  ;;  %v2002_v7 = vand.u32 %v3297_v63, %v3914_v5  ;;  %v3337_v62 = vld [vmem:[%s4382_s1 + $0x50] sm:$0x3]  ;;  %v3341_v63 = vld [vmem:[%s4382_s1 + $0x52] sm:$0x3] }
  0x61   : >> { %3612 = vmatprep.mubr.msk.bf16.mxu0 %vm3857_vm2, %v3855_v1  ;;  %3618 = vmatprep.mubr.msk.bf16.mxu1 %vm3857_vm2, %v3855_v1  ;;  %v1933_v9 = vrot.slane %v1931_v0, 1  ;;  %v1996_v11 = vrot.slane %v1994_v2, 1 }
  0x62   : >> { %3622 = vmatprep.subr.bf16.mxu0 %v3855_v1  ;;  %3628 = vmatprep.subr.bf16.mxu1 %v3855_v1 }
  0x63   : >> { %v1934_v14 = vor.u32 %v1933_v9, %v1929_v8  ;;  %v3336_v8 = vld [vmem:[%s3930_s9 + $0x118] sm:$0xe] }
  0x67   : >> { %3613 = vmatmul.mubr.msk.bf16.vlgmr.msra.gmra.mxu0 %vm216_vm3, %v1363_v15  ;;  %3619 = vmatmul.mubr.msk.bf16.vlgmr.msra.gmra.mxu1 %vm216_vm3, %v3251_v17  ;;  %v1997_v15 = vor.u32 %v1996_v11, %v1992_v10  ;;  %v2110_v17 = vand.u32 %v3305_v13, %v3914_v5  ;;  %v3351_v13 = vld [vmem:[%s4382_s1 + $0x56] sm:$0x3] }
  0x68   : >> { %3623 = vmatpush3.bf16.msra.mxu0 %v1474_v18  ;;  %3629 = vmatpush3.bf16.msra.mxu1 %v1537_v19  ;;  %v3300_v18 = vld [vmem:[%s3930_s9 + $0x10] sm:$0xe]  ;;  %v3308_v19 = vld [vmem:[%s3930_s9 + $0x14] sm:$0x3] }
  0x69   : >> { %3624 = vmatprep.mubr.msk.bf16.mxu0 %vm3857_vm2, %v3855_v1  ;;  %3630 = vmatprep.mubr.msk.bf16.mxu1 %vm3857_vm2, %v3855_v1  ;;  %v3302_v21 = vcombine.low %v3300_v18, %v3291_v57  ;;  %v3310_v22 = vcombine.low %v3300_v18, %v3308_v19  ;;  %v3340_v57 = vld [vmem:[%s3930_s9 + $0xc4] sm:$0x3]  ;;  %v2679_v18 = vand.u32 %v3351_v13, %v3914_v5  ;;  %v3354_v19 = vld [vmem:[%s3930_s9 + $0x1c] sm:$0x1] }
  0x6a   : >> { %3634 = vmatprep.subr.bf16.mxu0 %v3855_v1  ;;  %3640 = vmatprep.subr.bf16.mxu1 %v3855_v1 }
  0x6b   : >> { %v2051_v26 = vrot.slane %v3302_v21, 1  ;;  %v2160_v28 = vshrl.u32 %v3310_v22, 16  ;;  %v3359_v21 = vld [vmem:[%s3930_s9 + $0x74] sm:$0x1] }
  0x6d   : >> { %v2162_v34 = vrot.slane %v2160_v28, 1  ;;  %v3345_v28 = vld [vmem:[%s3930_s9 + $0x18] sm:$0xf] }
  0x6f   : >> { %3625 = vmatmul.mubr.msk.bf16.vlgmr.msra.gmra.mxu0 %vm216_vm3, %v3256_v29  ;;  %3631 = vmatmul.mubr.msk.bf16.vlgmr.msra.gmra.mxu1 %vm216_vm3, %v1532_v27  ;;  %v2105_v27 = vrot.slane %v3306_v23, 1  ;;  %v2163_v29 = vshll.u32 %v3310_v22, 16  ;;  %v3361_v23 = vcombine.low %v3358_v20, %v3359_v21 }
  0x70   : >> { %3635 = vmatpush3.bf16.msra.mxu0 %v1600_v30  ;;  %3641 = vmatpush3.bf16.msra.mxu1 %v1654_v31  ;;  %v2171_v30 = vand.u32 %v3309_v24, %v3914_v5  ;;  %v2224_v31 = vand.u32 %v3315_v25, %v3914_v5  ;;  %v3355_v24 = vld [vmem:[%s4382_s1 + $0x58] sm:$0x3]  ;;  %v3360_v25 = vld [vmem:[%s4382_s1 + $0x5a] sm:$0x3] }
  0x71   : >> { %3636 = vmatprep.mubr.msk.bf16.mxu0 %vm3857_vm2, %v3855_v1  ;;  %3642 = vmatprep.mubr.msk.bf16.mxu1 %vm3857_vm2, %v3855_v1  ;;  %v2165_v35 = vrot.slane %v2163_v29, 2  ;;  %v3350_v29 = vld [vmem:[%s3930_s9 + $0x70] sm:$0xf] }
  0x72   : >> { %3646 = vmatprep.subr.bf16.mxu0 %v3855_v1  ;;  %3652 = vmatprep.subr.bf16.mxu1 %v3855_v1 }
  0x73   : >> { %v2166_v39 = vor.u32 %v2165_v35, %v2162_v34  ;;  %v2795_v34 = vshrl.u32 %v3361_v23, 16 }
  0x77   : >> { %3637 = vmatmul.mubr.msk.bf16.vlgmr.msra.gmra.mxu0 %vm216_vm3, %v1595_v40  ;;  %3643 = vmatmul.mubr.msk.bf16.vlgmr.msra.gmra.mxu1 %vm216_vm3, %v1649_v41  ;;  %v2332_v40 = vshll.u32 %v3325_v36, 16  ;;  %v3314_v41 = vld [vmem:[%s3930_s9 + $0xc0] sm:$0xf]  ;;  %v3364_v36 = vld [vmem:[%s4382_s1 + $0x5c] sm:$0x3] }
  0x78   : >> { %3647 = vmatpush3.bf16.msra.mxu0 %v1708_v44  ;;  %3653 = vmatpush3.bf16.msra.mxu1 %v1769_v45  ;;  %v3327_v44 = vld [vmem:[%s3930_s9 + $0x118] sm:$0xf]  ;;  %v3328_v45 = vld [vmem:[%s3930_s9 + $0x11c] sm:$0x1] }
  0x79   : >> { %3648 = vmatprep.mubr.msk.bf16.mxu0 %vm3857_vm2, %v3855_v1  ;;  %3654 = vmatprep.mubr.msk.bf16.mxu1 %vm3857_vm2, %v3855_v1  ;;  %v2334_v47 = vrot.slane %v2332_v40, 1  ;;  %v3330_v48 = vcombine.low %v3327_v44, %v3328_v45  ;;  %v3338_v9 = vcombine.low %v3336_v8, %v3328_v45  ;;  %v2859_v40 = vand.u32 %v3364_v36, %v3914_v5  ;;  %v3367_v44 = vld [vmem:[%s3930_s9 + $0x70] sm:$0xe] }
  0x7a   : >> { %3658 = vmatprep.subr.bf16.mxu0 %v3855_v1  ;;  %3664 = vmatprep.subr.bf16.mxu1 %v3855_v1 }
  0x7b   : >> { %v2335_v51 = vor.u32 %v2334_v47, %v2330_v46  ;;  %v2393_v58 = vshrl.u32 %v3330_v48, 16  ;;  %v3369_v47 = vcombine.low %v3367_v44, %v3359_v21 }
  0x7f   : >> { %3649 = vmatmul.mubr.msk.bf16.vlgmr.msra.gmra.mxu0 %vm216_vm3, %v1703_v52  ;;  %3655 = vmatmul.mubr.msk.bf16.vlgmr.msra.gmra.mxu1 %vm216_vm3, %v1764_v53  ;;  %v2395_v52 = vshll.u32 %v3330_v48, 16  ;;  %v3319_v53 = vld [vmem:[%s3930_s9 + $0x118] sm:$0xf]  ;;  %v3372_v48 = vld [vmem:[%s4382_s1 + $0x60] sm:$0x3] }
  0x80   : >> { %3659 = vmatpush3.bf16.msra.mxu0 %v1823_v55  ;;  %3665 = vmatpush3.bf16.msra.mxu1 %v1876_v56  ;;  %v2457_v55 = vand.u32 %v3333_v50, %v3914_v5  ;;  %v3332_v56 = vld [vmem:[%s3930_s9 + $0xc0] sm:$0xe]  ;;  %v2908_v50 = vrot.slane %v3369_v47, 1 }
  0x81   : >> { %3660 = vmatprep.mubr.msk.bf16.mxu0 %vm3857_vm2, %v3855_v1  ;;  %3666 = vmatprep.mubr.msk.bf16.mxu1 %vm3857_vm2, %v3855_v1  ;;  %v2397_v59 = vrot.slane %v2395_v52, 1  ;;  %v3334_v60 = vcombine.low %v3332_v56, %v3323_v33  ;;  %v3342_v61 = vcombine.low %v3332_v56, %v3340_v57 }
  0x82   : >> { %3670 = vmatprep.subr.bf16.mxu0 %v3855_v1  ;;  %3676 = vmatprep.subr.bf16.mxu1 %v3855_v1 }
  0x83   : >> { %v2398_v0 = vor.u32 %v2397_v59, %v2393_v58  ;;  %v2452_v2 = vrot.slane %v3334_v60, 1 }
  0x87   : >> { %3661 = vmatmul.mubr.msk.bf16.vlgmr.msra.gmra.mxu0 %vm216_vm3, %v3282_v3  ;;  %3667 = vmatmul.mubr.msk.bf16.vlgmr.msra.gmra.mxu1 %vm216_vm3, %v3287_v4  ;;  %v2561_v3 = vshrl.u32 %v3342_v61, 16  ;;  %v2564_v4 = vshll.u32 %v3342_v61, 16 }
  0x88   : >> { %3671 = vmatpush3.bf16.msra.mxu0 %v1939_v6  ;;  %3677 = vmatpush3.bf16.msra.mxu1 %v2002_v7  ;;  %v2511_v6 = vand.u32 %v3337_v62, %v3914_v5  ;;  %v2572_v7 = vand.u32 %v3341_v63, %v3914_v5 }
  0x89   : >> { %3672 = vmatprep.mubr.msk.bf16.mxu0 %vm3857_vm2, %v3855_v1  ;;  %3678 = vmatprep.mubr.msk.bf16.mxu1 %vm3857_vm2, %v3855_v1  ;;  %v2563_v10 = vrot.slane %v2561_v3, 1  ;;  %v2566_v11 = vrot.slane %v2564_v4, 2 }
  0x8a   : >> { %3682 = vmatprep.subr.bf16.mxu0 %v3855_v1  ;;  %3688 = vmatprep.subr.bf16.mxu1 %v3855_v1 }
  0x8f   : >> { %3673 = vmatmul.mubr.msk.bf16.vlgmr.msra.gmra.mxu0 %vm216_vm3, %v1934_v14  ;;  %3679 = vmatmul.mubr.msk.bf16.vlgmr.msra.gmra.mxu1 %vm216_vm3, %v1997_v15  ;;  %v2506_v14 = vrot.slane %v3338_v9, 1  ;;  %v2567_v15 = vor.u32 %v2566_v11, %v2563_v10 }
  0x90   : >> { %3683 = vmatpush3.bf16.msra.mxu0 %v2056_v16  ;;  %3689 = vmatpush3.bf16.msra.mxu1 %v2110_v17  ;;  %v3353_v16 = vld [vmem:[%s3930_s9 + $0x18] sm:$0xf]  ;;  %v2626_v17 = vand.u32 %v3346_v12, %v3914_v5 }
  0x91   : >> { %3684 = vmatprep.mubr.msk.bf16.mxu0 %vm3857_vm2, %v3855_v1  ;;  %3690 = vmatprep.mubr.msk.bf16.mxu1 %vm3857_vm2, %v3855_v1  ;;  %v3356_v22 = vcombine.low %v3353_v16, %v3354_v19 }
  0x92   : >> { %3694 = vmatprep.subr.bf16.mxu0 %v3855_v1  ;;  %3700 = vmatprep.subr.bf16.mxu1 %v3855_v1 }
  0x93   : >> { %v2732_v32 = vshrl.u32 %v3356_v22, 16 }
  0x97   : >> { %3685 = vmatmul.mubr.msk.bf16.vlgmr.msra.gmra.mxu0 %vm216_vm3, %v2051_v26  ;;  %3691 = vmatmul.mubr.msk.bf16.vlgmr.msra.gmra.mxu1 %vm216_vm3, %v2105_v27  ;;  %v2734_v26 = vshll.u32 %v3356_v22, 16  ;;  %v2797_v27 = vshll.u32 %v3361_v23, 16 }
  0x98   : >> { %3695 = vmatpush3.bf16.msra.mxu0 %v2171_v30  ;;  %3701 = vmatpush3.bf16.msra.mxu1 %v2224_v31  ;;  %v2742_v30 = vand.u32 %v3355_v24, %v3914_v5  ;;  %v2805_v31 = vand.u32 %v3360_v25, %v3914_v5 }
  0x99   : >> { %3696 = vmatprep.mubr.msk.bf16.mxu0 %vm3857_vm2, %v3855_v1  ;;  %3702 = vmatprep.mubr.msk.bf16.mxu1 %vm3857_vm2, %v3855_v1  ;;  %v2736_v33 = vrot.slane %v2734_v26, 1  ;;  %v2799_v35 = vrot.slane %v2797_v27, 1 }
  0x9a   : >> { %3706 = vmatprep.subr.bf16.mxu0 %v3855_v1  ;;  %3712 = vmatprep.subr.bf16.mxu1 %v3855_v1 }
  0x9b   : >> { %v2737_v38 = vor.u32 %v2736_v33, %v2732_v32 }
  0x9f   : >> { %3697 = vmatmul.mubr.msk.bf16.vlgmr.msra.gmra.mxu0 %vm216_vm3, %v2166_v39  ;;  %3703 = vmatmul.mubr.msk.bf16.vlgmr.msra.gmra.mxu1 %vm216_vm3, %v3314_v41  ;;  %v2800_v39 = vor.u32 %v2799_v35, %v2795_v34  ;;  %v2913_v41 = vand.u32 %v3368_v37, %v3914_v5 }
  0xa0   : >> { %3707 = vmatpush3.bf16.msra.mxu0 %v2277_v42  ;;  %3713 = vmatpush3.bf16.msra.mxu1 %v2340_v43  ;;  %v3363_v42 = vld [vmem:[%s3930_s9 + $0x18] sm:$0xe]  ;;  %v3371_v43 = vld [vmem:[%s3930_s9 + $0x1c] sm:$0x3] }
  0xa1   : >> { %3708 = vmatprep.mubr.msk.bf16.mxu0 %vm3857_vm2, %v3855_v1  ;;  %3714 = vmatprep.mubr.msk.bf16.mxu1 %vm3857_vm2, %v3855_v1  ;;  %v3365_v45 = vcombine.low %v3363_v42, %v3354_v19  ;;  %v3373_v46 = vcombine.low %v3363_v42, %v3371_v43 }
  0xa2   : >> { %3718 = vmatprep.subr.bf16.mxu0 %v3855_v1  ;;  %3724 = vmatprep.subr.bf16.mxu1 %v3855_v1 }
  0xa3   : >> { %v2854_v49 = vrot.slane %v3365_v45, 1  ;;  %v2966_v52 = vshll.u32 %v3373_v46, 16 }
  0xa7   : >> { %3709 = vmatmul.mubr.msk.bf16.vlgmr.msra.gmra.mxu0 %vm216_vm3, %v3319_v53  ;;  %3715 = vmatmul.mubr.msk.bf16.vlgmr.msra.gmra.mxu1 %vm216_vm3, %v2335_v51  ;;  %v2963_v51 = vshrl.u32 %v3373_v46, 16  ;;  %v2974_v53 = vand.u32 %v3372_v48, %v3914_v5 }
  0xa8   : >> { %3719 = vmatpush3.bf16.msra.mxu0 %v2403_v54  ;;  %3725 = vmatpush3.bf16.msra.mxu1 %v2457_v55  ;;  %v2968_v55 = vrot.slane %v2966_v52, 2 }
  0xa9   : >> { %3720 = vmatprep.mubr.msk.bf16.mxu0 %vm3857_vm2, %v3855_v1  ;;  %3726 = vmatprep.mubr.msk.bf16.mxu1 %vm3857_vm2, %v3855_v1  ;;  %v2965_v54 = vrot.slane %v2963_v51, 1 }
  0xaa   : >> { %3730 = vmatprep.subr.bf16.mxu0 %v3855_v1  ;;  %3736 = vmatprep.subr.bf16.mxu1 %v3855_v1 }
  0xab   : >> { %v2969_v56 = vor.u32 %v2968_v55, %v2965_v54 }
  0xaf   : >> { %3721 = vmatmul.mubr.msk.bf16.vlgmr.msra.gmra.mxu0 %vm216_vm3, %v2398_v0  ;;  %3727 = vmatmul.mubr.msk.bf16.vlgmr.msra.gmra.mxu1 %vm216_vm3, %v2452_v2 }
  0xb0   : >> { %3731 = vmatpush3.bf16.msra.mxu0 %v2511_v6  ;;  %3737 = vmatpush3.bf16.msra.mxu1 %v2572_v7 }
  0xb1   : >> { %3732 = vmatprep.mubr.msk.bf16.mxu0 %vm3857_vm2, %v3855_v1  ;;  %3738 = vmatprep.mubr.msk.bf16.mxu1 %vm3857_vm2, %v3855_v1 }
  0xb2   : >> { %3742 = vmatprep.subr.bf16.mxu0 %v3855_v1  ;;  %3748 = vmatprep.subr.bf16.mxu1 %v3855_v1 }
  0xb7   : >> { %3733 = vmatmul.mubr.msk.bf16.vlgmr.msra.gmra.mxu0 %vm216_vm3, %v2506_v14  ;;  %3739 = vmatmul.mubr.msk.bf16.vlgmr.msra.gmra.mxu1 %vm216_vm3, %v2567_v15 }
  0xb8   : >> { %3743 = vmatpush3.bf16.msra.mxu0 %v2626_v17  ;;  %3749 = vmatpush3.bf16.msra.mxu1 %v2679_v18 }
  0xb9   : >> { %3744 = vmatprep.mubr.msk.bf16.mxu0 %vm3857_vm2, %v3855_v1  ;;  %3750 = vmatprep.mubr.msk.bf16.mxu1 %vm3857_vm2, %v3855_v1 }
  0xba   : >> { %3754 = vmatprep.subr.bf16.mxu0 %v3855_v1  ;;  %3760 = vmatprep.subr.bf16.mxu1 %v3855_v1 }
  0xbf   : >> { %3745 = vmatmul.mubr.msk.bf16.vlgmr.msra.gmra.mxu0 %vm216_vm3, %v3345_v28  ;;  %3751 = vmatmul.mubr.msk.bf16.vlgmr.msra.gmra.mxu1 %vm216_vm3, %v3350_v29 }
  0xc0   : >> { %3755 = vmatpush3.bf16.msra.mxu0 %v2742_v30  ;;  %3761 = vmatpush3.bf16.msra.mxu1 %v2805_v31 }
  0xc1   : >> { %3756 = vmatprep.mubr.msk.bf16.mxu0 %vm3857_vm2, %v3855_v1  ;;  %3762 = vmatprep.mubr.msk.bf16.mxu1 %vm3857_vm2, %v3855_v1 }
  0xc2   : >> { %3766 = vmatprep.subr.bf16.mxu0 %v3855_v1  ;;  %3772 = vmatprep.subr.bf16.mxu1 %v3855_v1 }
  0xc7   : >> { %3757 = vmatmul.mubr.msk.bf16.vlgmr.msra.gmra.mxu0 %vm216_vm3, %v2737_v38  ;;  %3763 = vmatmul.mubr.msk.bf16.vlgmr.msra.gmra.mxu1 %vm216_vm3, %v2800_v39 }
  0xc8   : >> { %3767 = vmatpush3.bf16.msra.mxu0 %v2859_v40  ;;  %3773 = vmatpush3.bf16.msra.mxu1 %v2913_v41 }
  0xc9   : >> { %3768 = vmatprep.mubr.msk.bf16.mxu0 %vm3857_vm2, %v3855_v1  ;;  %3774 = vmatprep.mubr.msk.bf16.mxu1 %vm3857_vm2, %v3855_v1 }
  0xca   : >> { %3778 = vmatprep.subr.bf16.mxu0 %v3855_v1 }
  0xcf   : >> { %3769 = vmatmul.mubr.msk.bf16.vlgmr.msra.gmra.mxu0 %vm216_vm3, %v2854_v49  ;;  %3775 = vmatmul.mubr.msk.bf16.vlgmr.msra.gmra.mxu1 %vm216_vm3, %v2908_v50 }
  0xd0   : >> { %3779 = vmatpush3.bf16.msra.mxu0 %v2974_v53  ;;  %3780 = vmatprep.mubr.msk.bf16.mxu0 %vm3857_vm2, %v3855_v1 }
  0xd7   : >> { %v261_v57 = vpop.f32.mrf.mxu0  ;;  %3781 = vmatmul.mubr.msk.bf16.vlgmr.msra.gmra.mxu0 %vm216_vm3, %v2969_v56  ;;  %v307_v58 = vpop.f32.mrf.mxu1 }
  0xd8   : >> { %v308_v59 = vadd.f32 %v307_v58, %v261_v57 }
  0xd9   : >> { %v3494_v60 = vpop.f32.mrf.mxu0  ;;  %v3500_v61 = vpop.f32.mrf.mxu1 }
  0xdb   : >> { %v264_v62 = vpop.f32.mrf.mxu0  ;;  %v310_v5 = vpop.f32.mrf.mxu1 }
  0xdd   : >> { %v3495_v63 = vpop.f32.mrf.mxu0  ;;  %v3501_v0 = vpop.f32.mrf.mxu1 }
  0xdf   : >> { %v369_v2 = vpop.f32.mrf.mxu0  ;;  %v432_v3 = vpop.f32.mrf.mxu1 }
  0xe0   : >> { %v375_v4 = vadd.f32 %v369_v2, %v308_v59 }
  0xe1   : >> { %v3506_v6 = vpop.f32.mrf.mxu0  ;;  %v3512_v7 = vpop.f32.mrf.mxu1 }
  0xe2   : >> { %v438_v8 = vadd.f32 %v432_v3, %v375_v4 }
  0xe3   : >> { %v372_v9 = vpop.f32.mrf.mxu0  ;;  %v435_v1 = vpop.f32.mrf.mxu1 }
  0xe5   : >> { %v3507_v10 = vpop.f32.mrf.mxu0  ;;  %v3513_v11 = vpop.f32.mrf.mxu1 }
  0xe7   : >> { %v486_v12 = vpop.f32.mrf.mxu0  ;;  %v540_v13 = vpop.f32.mrf.mxu1 }
  0xe8   : >> { %v492_v14 = vadd.f32 %v486_v12, %v438_v8 }
  0xe9   : >> { %v3518_v15 = vpop.f32.mrf.mxu0  ;;  %v3524_v16 = vpop.f32.mrf.mxu1 }
  0xea   : >> { %v546_v17 = vadd.f32 %v540_v13, %v492_v14 }
  0xeb   : >> { %v489_v18 = vpop.f32.mrf.mxu0  ;;  %v543_v19 = vpop.f32.mrf.mxu1 }
  0xed   : >> { %v3519_v20 = vpop.f32.mrf.mxu0  ;;  %v3525_v21 = vpop.f32.mrf.mxu1 }
  0xef   : >> { %v601_v22 = vpop.f32.mrf.mxu0  ;;  %v654_v23 = vpop.f32.mrf.mxu1 }
  0xf0   : >> { %v607_v24 = vadd.f32 %v601_v22, %v546_v17 }
  0xf1   : >> { %v3530_v25 = vpop.f32.mrf.mxu0  ;;  %v3536_v26 = vpop.f32.mrf.mxu1 }
  0xf2   : >> { %v660_v27 = vadd.f32 %v654_v23, %v607_v24 }
  0xf3   : >> { %v604_v28 = vpop.f32.mrf.mxu0  ;;  %v657_v29 = vpop.f32.mrf.mxu1 }
  0xf5   : >> { %v3531_v30 = vpop.f32.mrf.mxu0  ;;  %v3537_v31 = vpop.f32.mrf.mxu1 }
  0xf7   : >> { %v707_v32 = vpop.f32.mrf.mxu0  ;;  %v770_v33 = vpop.f32.mrf.mxu1 }
  0xf8   : >> { %v713_v34 = vadd.f32 %v707_v32, %v660_v27 }
  0xf9   : >> { %v3542_v35 = vpop.f32.mrf.mxu0  ;;  %v3548_v36 = vpop.f32.mrf.mxu1 }
  0xfa   : >> { %v776_v37 = vadd.f32 %v770_v33, %v713_v34 }
  0xfb   : >> { %v710_v38 = vpop.f32.mrf.mxu0  ;;  %v773_v39 = vpop.f32.mrf.mxu1 }
  0xfd   : >> { %v3543_v40 = vpop.f32.mrf.mxu0  ;;  %v3549_v41 = vpop.f32.mrf.mxu1 }
  0xff   : >> { %v833_v42 = vpop.f32.mrf.mxu0  ;;  %v887_v43 = vpop.f32.mrf.mxu1 }
 0x100   : >> { %v839_v44 = vadd.f32 %v833_v42, %v776_v37 }
 0x101   : >> { %v3554_v45 = vpop.f32.mrf.mxu0  ;;  %v3560_v46 = vpop.f32.mrf.mxu1 }
 0x102   : >> { %v893_v47 = vadd.f32 %v887_v43, %v839_v44 }
 0x103   : >> { %v836_v48 = vpop.f32.mrf.mxu0  ;;  %v890_v49 = vpop.f32.mrf.mxu1 }
 0x105   : >> { %v3555_v50 = vpop.f32.mrf.mxu0  ;;  %v3561_v51 = vpop.f32.mrf.mxu1 }
 0x107   : >> { %v941_v52 = vpop.f32.mrf.mxu0  ;;  %v1002_v53 = vpop.f32.mrf.mxu1 }
 0x108   : >> { %v947_v54 = vadd.f32 %v941_v52, %v893_v47 }
 0x109   : >> { %v3566_v55 = vpop.f32.mrf.mxu0  ;;  %v3572_v56 = vpop.f32.mrf.mxu1 }
 0x10a   : >> { %v1008_v57 = vadd.f32 %v1002_v53, %v947_v54 }
 0x10b   : >> { %v944_v58 = vpop.f32.mrf.mxu0  ;;  %v1005_v59 = vpop.f32.mrf.mxu1 }
 0x10d   : >> { %v3567_v60 = vpop.f32.mrf.mxu0  ;;  %v3573_v61 = vpop.f32.mrf.mxu1 }
 0x10f   : >> { %v1056_v62 = vpop.f32.mrf.mxu0  ;;  %v1109_v5 = vpop.f32.mrf.mxu1 }
 0x110   : >> { %v1062_v63 = vadd.f32 %v1056_v62, %v1008_v57 }
 0x111   : >> { %v3578_v0 = vpop.f32.mrf.mxu0  ;;  %v3584_v2 = vpop.f32.mrf.mxu1 }
 0x112   : >> { %v1115_v3 = vadd.f32 %v1109_v5, %v1062_v63 }
 0x113   : >> { %v1059_v4 = vpop.f32.mrf.mxu0  ;;  %v1112_v6 = vpop.f32.mrf.mxu1 }
 0x115   : >> { %v3579_v7 = vpop.f32.mrf.mxu0  ;;  %v3585_v8 = vpop.f32.mrf.mxu1 }
 0x117   : >> { %v1172_v9 = vpop.f32.mrf.mxu0  ;;  %v1235_v1 = vpop.f32.mrf.mxu1 }
 0x118   : >> { %v1178_v10 = vadd.f32 %v1172_v9, %v1115_v3 }
 0x119   : >> { %v3590_v11 = vpop.f32.mrf.mxu0  ;;  %v3596_v12 = vpop.f32.mrf.mxu1 }
 0x11a   : >> { %v1241_v13 = vadd.f32 %v1235_v1, %v1178_v10 }
 0x11b   : >> { %v1175_v14 = vpop.f32.mrf.mxu0  ;;  %v1238_v15 = vpop.f32.mrf.mxu1 }
 0x11d   : >> { %v3591_v16 = vpop.f32.mrf.mxu0  ;;  %v3597_v17 = vpop.f32.mrf.mxu1 }
 0x11f   : >> { %v1289_v18 = vpop.f32.mrf.mxu0  ;;  %v1343_v19 = vpop.f32.mrf.mxu1 }
 0x120   : >> { %v1295_v50 = vadd.f32 %v1289_v18, %v1241_v13 }
 0x121   : >> { %v3602_v20 = vpop.f32.mrf.mxu0  ;;  %v3608_v21 = vpop.f32.mrf.mxu1 }
 0x122   : >> { %v1349_v55 = vadd.f32 %v1343_v19, %v1295_v50 }
 0x123   : >> { %v1292_v22 = vpop.f32.mrf.mxu0  ;;  %v1346_v23 = vpop.f32.mrf.mxu1 }
 0x125   : >> { %v3603_v24 = vpop.f32.mrf.mxu0  ;;  %v3609_v25 = vpop.f32.mrf.mxu1 }
 0x127   : >> { %v1404_v26 = vpop.f32.mrf.mxu0  ;;  %v1457_v27 = vpop.f32.mrf.mxu1 }
 0x128   : >> { %v1410_v58 = vadd.f32 %v1404_v26, %v1349_v55 }
 0x129   : >> { %v3614_v28 = vpop.f32.mrf.mxu0  ;;  %v3620_v29 = vpop.f32.mrf.mxu1 }
 0x12a   : >> { %v1463_v5 = vadd.f32 %v1457_v27, %v1410_v58 }
 0x12b   : >> { %v1407_v30 = vpop.f32.mrf.mxu0  ;;  %v1460_v31 = vpop.f32.mrf.mxu1 }
 0x12d   : >> { %v3615_v32 = vpop.f32.mrf.mxu0  ;;  %v3621_v33 = vpop.f32.mrf.mxu1 }
 0x12f   : >> { %v1510_v34 = vpop.f32.mrf.mxu0  ;;  %v1573_v35 = vpop.f32.mrf.mxu1 }
 0x130   : >> { %v1516_v2 = vadd.f32 %v1510_v34, %v1463_v5 }
 0x131   : >> { %v3626_v36 = vpop.f32.mrf.mxu0  ;;  %v3632_v37 = vpop.f32.mrf.mxu1 }
 0x132   : >> { %v1579_v8 = vadd.f32 %v1573_v35, %v1516_v2 }
 0x133   : >> { %v1513_v38 = vpop.f32.mrf.mxu0  ;;  %v1576_v39 = vpop.f32.mrf.mxu1 }
 0x135   : >> { %v3627_v40 = vpop.f32.mrf.mxu0  ;;  %v3633_v41 = vpop.f32.mrf.mxu1 }
 0x137   : >> { %v1636_v42 = vpop.f32.mrf.mxu0  ;;  %v1690_v43 = vpop.f32.mrf.mxu1 }
 0x138   : >> { %v1642_v10 = vadd.f32 %v1636_v42, %v1579_v8 }
 0x139   : >> { %v3638_v44 = vpop.f32.mrf.mxu0  ;;  %v3644_v45 = vpop.f32.mrf.mxu1 }
 0x13a   : >> { %v1696_v15 = vadd.f32 %v1690_v43, %v1642_v10 }
 0x13b   : >> { %v1639_v46 = vpop.f32.mrf.mxu0  ;;  %v1693_v47 = vpop.f32.mrf.mxu1 }
 0x13d   : >> { %v3639_v48 = vpop.f32.mrf.mxu0  ;;  %v3645_v49 = vpop.f32.mrf.mxu1 }
 0x13f   : >> { %v1744_v51 = vpop.f32.mrf.mxu0  ;;  %v1805_v52 = vpop.f32.mrf.mxu1 }
 0x140   : >> { %v1750_v18 = vadd.f32 %v1744_v51, %v1696_v15 }
 0x141   : >> { %v3650_v53 = vpop.f32.mrf.mxu0  ;;  %v3656_v54 = vpop.f32.mrf.mxu1 }
 0x142   : >> { %v1811_v23 = vadd.f32 %v1805_v52, %v1750_v18 }
 0x143   : >> { %v1747_v56 = vpop.f32.mrf.mxu0  ;;  %v1808_v57 = vpop.f32.mrf.mxu1 }
 0x145   : >> { %v3651_v59 = vpop.f32.mrf.mxu0  ;;  %v3657_v60 = vpop.f32.mrf.mxu1 }
 0x147   : >> { %v1859_v61 = vpop.f32.mrf.mxu0  ;;  %v1912_v62 = vpop.f32.mrf.mxu1 }
 0x148   : >> { %v1865_v26 = vadd.f32 %v1859_v61, %v1811_v23 }
 0x149   : >> { %v3662_v63 = vpop.f32.mrf.mxu0  ;;  %v3668_v0 = vpop.f32.mrf.mxu1 }
 0x14a   : >> { %v1918_v31 = vadd.f32 %v1912_v62, %v1865_v26 }
 0x14b   : >> { %v1862_v3 = vpop.f32.mrf.mxu0  ;;  %v1915_v4 = vpop.f32.mrf.mxu1 }
 0x14d   : >> { %v3663_v6 = vpop.f32.mrf.mxu0  ;;  %v3669_v7 = vpop.f32.mrf.mxu1 }
 0x14f   : >> { %v1975_v9 = vpop.f32.mrf.mxu0  ;;  %v2038_v1 = vpop.f32.mrf.mxu1 }
 0x150   : >> { %v1981_v34 = vadd.f32 %v1975_v9, %v1918_v31 }
 0x151   : >> { %v3674_v11 = vpop.f32.mrf.mxu0  ;;  %v3680_v12 = vpop.f32.mrf.mxu1 }
 0x152   : >> { %v2044_v39 = vadd.f32 %v2038_v1, %v1981_v34 }
 0x153   : >> { %v1978_v13 = vpop.f32.mrf.mxu0  ;;  %v2041_v14 = vpop.f32.mrf.mxu1 }
 0x155   : >> { %v3675_v16 = vpop.f32.mrf.mxu0  ;;  %v3681_v17 = vpop.f32.mrf.mxu1 }
 0x157   : >> { %v2092_v19 = vpop.f32.mrf.mxu0  ;;  %v2146_v20 = vpop.f32.mrf.mxu1 }
 0x158   : >> { %v2098_v42 = vadd.f32 %v2092_v19, %v2044_v39 }
 0x159   : >> { %v3686_v21 = vpop.f32.mrf.mxu0  ;;  %v3692_v22 = vpop.f32.mrf.mxu1 }
 0x15a   : >> { %v2152_v47 = vadd.f32 %v2146_v20, %v2098_v42 }
 0x15b   : >> { %v2095_v24 = vpop.f32.mrf.mxu0  ;;  %v2149_v25 = vpop.f32.mrf.mxu1 }
 0x15d   : >> { %v3687_v27 = vpop.f32.mrf.mxu0  ;;  %v3693_v28 = vpop.f32.mrf.mxu1 }
 0x15f   : >> { %v2207_v29 = vpop.f32.mrf.mxu0  ;;  %v2260_v30 = vpop.f32.mrf.mxu1 }
 0x160   : >> { %v2213_v50 = vadd.f32 %v2207_v29, %v2152_v47 }
 0x161   : >> { %v3698_v32 = vpop.f32.mrf.mxu0  ;;  %v3704_v33 = vpop.f32.mrf.mxu1 }
 0x162   : >> { %v2266_v55 = vadd.f32 %v2260_v30, %v2213_v50 }
 0x163   : >> { %v2210_v35 = vpop.f32.mrf.mxu0  ;;  %v2263_v36 = vpop.f32.mrf.mxu1 }
 0x165   : >> { %v3699_v37 = vpop.f32.mrf.mxu0  ;;  %v3705_v38 = vpop.f32.mrf.mxu1 }
 0x167   : >> { %v2313_v40 = vpop.f32.mrf.mxu0  ;;  %v2376_v41 = vpop.f32.mrf.mxu1 }
 0x168   : >> { %v2319_v58 = vadd.f32 %v2313_v40, %v2266_v55 }
 0x169   : >> { %v3710_v43 = vpop.f32.mrf.mxu0  ;;  %v3716_v44 = vpop.f32.mrf.mxu1 }
 0x16a   : >> { %v2382_v5 = vadd.f32 %v2376_v41, %v2319_v58  ;;  %v3375_v41 = vld [vmem:[%s4383_s2] ss:$0 sm:$0xff] }
 0x16b   : >> { %v2316_v45 = vpop.f32.mrf.mxu0  ;;  %v2379_v46 = vpop.f32.mrf.mxu1  ;;  %v3376_v43 = vld [vmem:[%s4384_s3] ss:$0 sm:$0xff] }
 0x16d   : >> { %v3711_v48 = vpop.f32.mrf.mxu0  ;;  %v3717_v49 = vpop.f32.mrf.mxu1 }
 0x16f   : >> { %v2439_v51 = vpop.f32.mrf.mxu0  ;;  %v2493_v52 = vpop.f32.mrf.mxu1 }
 0x170   : >> { %v2445_v2 = vadd.f32 %v2439_v51, %v2382_v5 }
 0x171   : >> { %v3722_v53 = vpop.f32.mrf.mxu0  ;;  %v3728_v54 = vpop.f32.mrf.mxu1 }
 0x172   : >> { %v2499_v8 = vadd.f32 %v2493_v52, %v2445_v2 }
 0x173   : >> { %v2442_v56 = vpop.f32.mrf.mxu0  ;;  %v2496_v57 = vpop.f32.mrf.mxu1 }
 0x175   : >> { %v3723_v59 = vpop.f32.mrf.mxu0  ;;  %v3729_v60 = vpop.f32.mrf.mxu1 }
 0x177   : >> { %v2547_v61 = vpop.f32.mrf.mxu0  ;;  %v2608_v62 = vpop.f32.mrf.mxu1 }
 0x178   : >> { %v2553_v10 = vadd.f32 %v2547_v61, %v2499_v8 }
 0x179   : >> { %v3734_v63 = vpop.f32.mrf.mxu0  ;;  %v3740_v0 = vpop.f32.mrf.mxu1 }
 0x17a   : >> { %v2614_v15 = vadd.f32 %v2608_v62, %v2553_v10 }
 0x17b   : >> { %v2550_v3 = vpop.f32.mrf.mxu0  ;;  %v2611_v4 = vpop.f32.mrf.mxu1 }
 0x17d   : >> { %v3735_v6 = vpop.f32.mrf.mxu0  ;;  %v3741_v7 = vpop.f32.mrf.mxu1 }
 0x17f   : >> { %v2662_v9 = vpop.f32.mrf.mxu0  ;;  %v2715_v1 = vpop.f32.mrf.mxu1 }
 0x180   : >> { %v2668_v18 = vadd.f32 %v2662_v9, %v2614_v15 }
 0x181   : >> { %v3746_v11 = vpop.f32.mrf.mxu0  ;;  %v3752_v12 = vpop.f32.mrf.mxu1 }
 0x182   : >> { %v2721_v23 = vadd.f32 %v2715_v1, %v2668_v18 }
 0x183   : >> { %v2665_v13 = vpop.f32.mrf.mxu0  ;;  %v2718_v14 = vpop.f32.mrf.mxu1 }
 0x185   : >> { %v3747_v16 = vpop.f32.mrf.mxu0  ;;  %v3753_v17 = vpop.f32.mrf.mxu1 }
 0x187   : >> { %v2778_v19 = vpop.f32.mrf.mxu0  ;;  %v2841_v20 = vpop.f32.mrf.mxu1 }
 0x188   : >> { %v2784_v26 = vadd.f32 %v2778_v19, %v2721_v23 }
 0x189   : >> { %v3758_v21 = vpop.f32.mrf.mxu0  ;;  %v3764_v22 = vpop.f32.mrf.mxu1 }
 0x18a   : >> { %v2847_v31 = vadd.f32 %v2841_v20, %v2784_v26 }
 0x18b   : >> { %v2781_v24 = vpop.f32.mrf.mxu0  ;;  %v2844_v25 = vpop.f32.mrf.mxu1 }
 0x18d   : >> { %v3759_v27 = vpop.f32.mrf.mxu0  ;;  %v3765_v28 = vpop.f32.mrf.mxu1 }
 0x18f   : >> { %v2895_v29 = vpop.f32.mrf.mxu0  ;;  %v2949_v30 = vpop.f32.mrf.mxu1 }
 0x190   : >> { %v2901_v34 = vadd.f32 %v2895_v29, %v2847_v31 }
 0x191   : >> { %v3770_v32 = vpop.f32.mrf.mxu0  ;;  %v3776_v33 = vpop.f32.mrf.mxu1 }
 0x192   : >> { %v2955_v39 = vadd.f32 %v2949_v30, %v2901_v34 }
 0x193   : >> { %v2898_v35 = vpop.f32.mrf.mxu0  ;;  %v2952_v36 = vpop.f32.mrf.mxu1 }
 0x195   : >> { %v3771_v37 = vpop.f32.mrf.mxu0  ;;  %v3777_v38 = vpop.f32.mrf.mxu1 }
 0x197   : >> { %v3010_v40 = vpop.f32.mrf.mxu0 }
 0x198   : >> { %v3016_v42 = vadd.f32 %v3010_v40, %v2955_v39 }
 0x199   : >> { %v3782_v44 = vpop.f32.mrf.mxu0 }
 0x19a   : >> { %v3024_v45 = vmul.f32 %v3375_v41, %v3016_v42 }
 0x19b   : >> { %v3013_v46 = vpop.f32.mrf.mxu0 }
 0x19c   : >> { %v3032_v47 = vadd.f32 %v3376_v43, %v3024_v45 }
 0x19d   : >> { %v3783_v48 = vpop.f32.mrf.mxu0 }
 0x19e   : >> { %v3033_v49 = vmax.f32 %v3032_v47, 0.0  ;;  %203 = sbr.rel (!%p201_p4) target bundleno = 15 (0xf), region = 136 }
 0x1a0   : >> { %v3034_v50 = vpack.c.bf16 %v3033_v49, %v3033_v49 }
 0x1a2   : >> { %3038 = vst.msk [vmem:[%s3036_s22] sm:$0xf] %vm3037_vm4, %v3034_v50 }
 0x1a3 PF: > { %s14_s15 = sadd.s32 1, %s3849_s15  }
 0x1a4   : > { %p11_p5 = scmp.ge.s32.totalorder %s14_s15, 4  }
 0x1a6   :  { %13 = sbr.rel (!%p11_p5) target bundleno = 1 (0x1), region = 147 }

// kernel: cnn_classifier_forward.12
= control target key start
LH: loop header
LB: loop body
LE: loop exit
PB: predicated region body
PF: predicated region fallthrough
CT: control target
= control target key end

     0   :  { %s1525_s18 = smov 0   ;;  %s1753_s0 = inlined_call_operand.vmem [shape: bf16[2,1,4,4,64], index: 0, kind: input, shape index: {}]   ;;  %s1754_s1 = inlined_call_operand.vmem [shape: bf16[9,64,64], index: 1, kind: input, shape index: {}]   ;;  %s1755_s2 = inlined_call_operand.vmem [shape: f32[1,64], index: 2, kind: input, shape index: {}]   ;;  %s1756_s3 = inlined_call_operand.vmem [shape: f32[1,64], index: 3, kind: input, shape index: {}]   ;;  %s1757_s4 = inlined_call_operand.vmem [shape: bf16[2,2,2,64], index: 4, kind: input, shape index: {}]   ;;  %s1758_s5 = inlined_call_operand.vmem [shape: bf16[2,2,2,64], index: 5, kind: output, shape index: {}]  }
   0x1 LB: > { %s1132_s19 = sadd.s32 4294967295, %s1487_s18   ;;  %p1136_p0 = scmp.ge.s32.totalorder %s1487_s18, 1  ;;  %s1487_s18 = sphi %s1525_s18, %s15_s18  }
   0x2   : > { %p196_p1 = scmp.lt.s32.totalorder %s1487_s18, 3 }
   0x4   : > { %p197_p2 = pnand %p1136_p0, %p196_p1 }
   0x5   : > { %p227_p3 = scmp.lt.s32.totalorder (!%p197_p2), %s1132_s19, 1  ;;  %s1548_s6 = smov (!%p197_p2), 0  }
   0x6   : > { %200 = sbr.rel (%p197_p2) target bundleno = 302 (0x12e), region = 40 }
   0xb   : > { %s1760_s19 = smov (!%p227_p3, %s1132_s19), 1 }
   0xc   : > { %s1269_s20 = sshll.u32 %s1760_s19, 3  ;;  %s1139_s21 = sshll.u32 %s1760_s19, 1 }
   0xd   : > { %s1536_s24 = scalar_lea.vmem %s1753_s0, %s1269_s20  ;;  %s1541_s27 = scalar_lea.vmem %s1757_s4, %s1139_s21 }
   0xe   : > { %s1546_s30 = scalar_lea.vmem %s1758_s5, %s1139_s21 }
   0xf LB: >> { %v1441_v0 = vld [vmem:[%s1754_s1 + $0x38] sm:$0xff]   ;;  %v1493_v1 = vmov 0.0   ;;  %v1443_v3 = vld [vmem:[%s1754_s1 + $0x30] sm:$0xff]   ;;  %vm1494_vm0 = vmmov 0   ;;  %s1141_s13 = sshll.u32 %s1491_s6, 1  ;;  %v1445_v5 = vld [vmem:[%s1754_s1 + $0x28] sm:$0xff]   ;;  %s1049_s8 = scalar_lea.vmem %s1546_s30, %s1491_s6  ;;  %s1491_s6 = sphi %s1548_s6, %s246_s6  }
  0x10   : >> { %1315 = vmatprep.subr.bf16.mxu0 %v1493_v1  ;;  %1327 = vmatprep.subr.bf16.mxu1 %v1493_v1  ;;  %v1442_v2 = vld [vmem:[%s1754_s1 + $0x18] sm:$0xff]   ;;  %v1444_v4 = vld [vmem:[%s1754_s1 + $0x10] sm:$0xff]   ;;  %s1575_s16 = scalar_lea.vmem %s1536_s24, %s1141_s13  ;;  %v1446_v6 = vld [vmem:[%s1754_s1 + $0x8] sm:$0xff]   ;;  %vm307_vm1 = vcmask 523264   ;;  %vm1050_vm2 = vcmask 516096  }
  0x11   : >> { %1316 = vmatpush3.bf16.msra.mxu0 %v1441_v0  ;;  %1323 = vmatprep.mubr.msk.bf16.mxu0 %vm1494_vm0, %v1493_v1  ;;  %v1150_v7 = vld.sshfl [vmem:[%s1575_s16] sm:$0x3 pattern:$0x76325410]  ;;  %v1449_v15 = vld [vmem:[%s1754_s1 + $0x58] sm:$0xff]   ;;  %v1451_v17 = vld [vmem:[%s1754_s1 + $0x50] sm:$0xff]  }
  0x12   : >> { %1328 = vmatpush3.bf16.msra.mxu1 %v1442_v2  ;;  %1317 = vmatprep.subr.bf16.mxu0 %v1493_v1  ;;  %v277_v8 = vshrl.u32 %v1150_v7, 16  ;;  %v279_v9 = vshll.u32 %v1150_v7, 16  ;;  %v1447_v10 = vld [vmem:[%s1754_s1 + $0x20] sm:$0xff]   ;;  %v1450_v16 = vld [vmem:[%s1754_s1 + $0x78] sm:$0xff]   ;;  %v1452_v18 = vld [vmem:[%s1754_s1 + $0x70] sm:$0xff]  }
  0x13   : >> { %1329 = vmatprep.subr.bf16.mxu1 %v1493_v1  ;;  %1335 = vmatprep.mubr.msk.bf16.mxu1 %vm1494_vm0, %v1493_v1  ;;  %v1448_v11 = vld [vmem:[%s1754_s1] sm:$0xff]   ;;  %v1453_v19 = vld [vmem:[%s1754_s1 + $0x48] sm:$0xff]   ;;  %v1457_v25 = vld [vmem:[%s1754_s1 + $0x98] sm:$0xff]  }
  0x14   : >> { %v281_v12 = vrot.slane %v279_v9, 1  ;;  %v249_v14 = vld [vmem:[%s1575_s16] sm:$0x1]  ;;  %v1454_v20 = vld [vmem:[%s1754_s1 + $0x68] sm:$0xff]   ;;  %v1458_v26 = vld [vmem:[%s1754_s1 + $0xb8] sm:$0xff]  }
  0x15   : >> { %1318 = vmatpush3.bf16.msra.mxu0 %v1443_v3  ;;  %v1455_v21 = vld [vmem:[%s1754_s1 + $0x40] sm:$0xff]   ;;  %v1459_v29 = vld [vmem:[%s1754_s1 + $0x90] sm:$0xff]   ;;  %v1461_v32 = vld [vmem:[%s1754_s1 + $0x88] sm:$0xff]  }
  0x16   : >> { %1330 = vmatpush3.bf16.msra.mxu1 %v1444_v4  ;;  %1319 = vmatprep.subr.bf16.mxu0 %v1493_v1  ;;  %v282_v13 = vor.u32 %v281_v12, %v277_v8  ;;  %v1169_v22 = vld.sshfl [vmem:[%s1575_s16] sm:$0x2 pattern:$0x76325410]  ;;  %v1176_v27 = vld [vmem:[%s1575_s16 + $0x2] sm:$0x1] }
  0x17   : >> { %1331 = vmatprep.subr.bf16.mxu1 %v1493_v1  ;;  %v1456_v23 = vld [vmem:[%s1754_s1 + $0x60] sm:$0xff]   ;;  %v436_v24 = vrot.slane %v1169_v22, 1  ;;  %v1460_v30 = vld [vmem:[%s1754_s1 + $0xb0] sm:$0xff]   ;;  %v1462_v33 = vld [vmem:[%s1754_s1 + $0xa8] sm:$0xff]  }
  0x18   : >> { %v1199_v28 = vld.sshfl [vmem:[%s1575_s16 + $0x2] sm:$0x3 pattern:$0x76325410]  ;;  %v1465_v40 = vld [vmem:[%s1754_s1 + $0xd8] sm:$0xff]   ;;  %v1467_v43 = vld [vmem:[%s1754_s1 + $0xd0] sm:$0xff]  }
  0x19   : >> { %1320 = vmatpush3.bf16.msra.mxu0 %v1445_v5  ;;  %v607_v31 = vshll.u32 %v1199_v28, 16  ;;  %v605_v34 = vshrl.u32 %v1199_v28, 16  ;;  %v1463_v36 = vld [vmem:[%s1754_s1 + $0x80] sm:$0xff]   ;;  %v1466_v42 = vld [vmem:[%s1754_s1 + $0xf8] sm:$0xff]   ;;  %v1468_v44 = vld [vmem:[%s1754_s1 + $0xf0] sm:$0xff]  }
  0x1a   : >> { %1332 = vmatpush3.bf16.msra.mxu1 %v1446_v6  ;;  %1321 = vmatprep.subr.bf16.mxu0 %v1493_v1  ;;  %v1464_v37 = vld [vmem:[%s1754_s1 + $0xa0] sm:$0xff]   ;;  %v1469_v46 = vld [vmem:[%s1754_s1 + $0xc8] sm:$0xff]   ;;  %v1473_v54 = vld [vmem:[%s1754_s1 + $0x118] sm:$0xff]  }
  0x1b   : >> { %1333 = vmatprep.subr.bf16.mxu1 %v1493_v1  ;;  %v609_v35 = vrot.slane %v607_v31, 1  ;;  %v1214_v38 = vld.sshfl [vmem:[%s1575_s16 + $0x2] sm:$0x2 pattern:$0x76325410]  ;;  %v1470_v48 = vld [vmem:[%s1754_s1 + $0xe8] sm:$0xff]  }
  0x1c   : >> { %v697_v41 = vrot.slane %v1214_v38, 1  ;;  %v1244_v45 = vld.sshfl [vmem:[%s1575_s16 + $0x4] sm:$0x3 pattern:$0x76325410]  ;;  %v1474_v56 = vld [vmem:[%s1754_s1 + $0x110] sm:$0xff]  }
  0x1d   : >> { %1322 = vmatpush3.bf16.msra.mxu0 %v1447_v10  ;;  %v610_v39 = vor.u32 %v609_v35, %v605_v34  ;;  %v868_v47 = vshll.u32 %v1244_v45, 16  ;;  %v1471_v49 = vld [vmem:[%s1754_s1 + $0xc0] sm:$0xff]   ;;  %v866_v50 = vshrl.u32 %v1244_v45, 16  ;;  %v1475_v57 = vld [vmem:[%s1754_s1 + $0x108] sm:$0xff]  }
  0x1e   : >> { %1334 = vmatpush3.bf16.msra.mxu1 %v1448_v11  ;;  %1339 = vmatprep.subr.bf16.mxu0 %v1493_v1  ;;  %v1472_v52 = vld [vmem:[%s1754_s1 + $0xe0] sm:$0xff]  }
  0x1f   : >> { %1351 = vmatprep.subr.bf16.mxu1 %v1493_v1  ;;  %v870_v51 = vrot.slane %v868_v47, 1  ;;  %v1221_v53 = vld [vmem:[%s1575_s16 + $0x4] sm:$0x1] }
  0x20   : >> { %1324 = vmatmul.mubr.msk.bf16.vlgmr.msra.gmra.mxu0 %vm307_vm1, %v282_v13  ;;  %v1476_v58 = vld [vmem:[%s1754_s1 + $0x100] sm:$0xff]  }
  0x21   : >> { %1336 = vmatmul.mubr.msk.bf16.vlgmr.msra.gmra.mxu1 %vm307_vm1, %v249_v14  ;;  %1340 = vmatpush3.bf16.msra.mxu0 %v1449_v15  ;;  %v871_v55 = vor.u32 %v870_v51, %v866_v50  ;;  %v1259_v59 = vld.sshfl [vmem:[%s1575_s16 + $0x4] sm:$0x2 pattern:$0x76325410]  ;;  %s1044_s16 = scalar_lea.vmem %s1541_s27, %s1491_s6  ;;  %s246_s6 = sadd.s32 1, %s1491_s6  }
  0x22   : >> { %1352 = vmatpush3.bf16.msra.mxu1 %v1450_v16  ;;  %1341 = vmatprep.subr.bf16.mxu0 %v1493_v1  ;;  %v958_v60 = vrot.slane %v1259_v59, 1  ;;  %p243_p4 = scmp.ge.s32.totalorder %s246_s6, 2  }
  0x23   : >> { %1353 = vmatprep.subr.bf16.mxu1 %v1493_v1  ;;  %1347 = vmatprep.mubr.msk.bf16.mxu0 %vm1494_vm0, %v1493_v1 }
  0x24   : >> { %1359 = vmatprep.mubr.msk.bf16.mxu1 %vm1494_vm0, %v1493_v1 }
  0x25   : >> { %1342 = vmatpush3.bf16.msra.mxu0 %v1451_v17 }
  0x26   : >> { %1354 = vmatpush3.bf16.msra.mxu1 %v1452_v18  ;;  %1343 = vmatprep.subr.bf16.mxu0 %v1493_v1 }
  0x27   : >> { %1355 = vmatprep.subr.bf16.mxu1 %v1493_v1 }
  0x29   : >> { %1344 = vmatpush3.bf16.msra.mxu0 %v1453_v19 }
  0x2a   : >> { %1356 = vmatpush3.bf16.msra.mxu1 %v1454_v20  ;;  %1345 = vmatprep.subr.bf16.mxu0 %v1493_v1 }
  0x2b   : >> { %1357 = vmatprep.subr.bf16.mxu1 %v1493_v1 }
  0x2d   : >> { %1346 = vmatpush3.bf16.msra.mxu0 %v1455_v21 }
  0x2e   : >> { %1358 = vmatpush3.bf16.msra.mxu1 %v1456_v23  ;;  %1363 = vmatprep.subr.bf16.mxu0 %v1493_v1 }
  0x2f   : >> { %1375 = vmatprep.subr.bf16.mxu1 %v1493_v1 }
  0x30   : >> { %1348 = vmatmul.mubr.msk.bf16.vlgmr.msra.gmra.mxu0 %vm307_vm1, %v436_v24 }
  0x31   : >> { %1364 = vmatpush3.bf16.msra.mxu0 %v1457_v25  ;;  %1360 = vmatmul.mubr.msk.bf16.vlgmr.msra.gmra.mxu1 %vm307_vm1, %v1176_v27 }
  0x32   : >> { %1376 = vmatpush3.bf16.msra.mxu1 %v1458_v26  ;;  %1365 = vmatprep.subr.bf16.mxu0 %v1493_v1 }
  0x33   : >> { %1377 = vmatprep.subr.bf16.mxu1 %v1493_v1  ;;  %1371 = vmatprep.mubr.msk.bf16.mxu0 %vm1494_vm0, %v1493_v1 }
  0x34   : >> { %1383 = vmatprep.mubr.msk.bf16.mxu1 %vm1494_vm0, %v1493_v1 }
  0x35   : >> { %1366 = vmatpush3.bf16.msra.mxu0 %v1459_v29 }
  0x36   : >> { %1378 = vmatpush3.bf16.msra.mxu1 %v1460_v30  ;;  %1367 = vmatprep.subr.bf16.mxu0 %v1493_v1 }
  0x37   : >> { %1379 = vmatprep.subr.bf16.mxu1 %v1493_v1 }
  0x39   : >> { %1368 = vmatpush3.bf16.msra.mxu0 %v1461_v32 }
  0x3a   : >> { %1380 = vmatpush3.bf16.msra.mxu1 %v1462_v33  ;;  %1369 = vmatprep.subr.bf16.mxu0 %v1493_v1 }
  0x3b   : >> { %1381 = vmatprep.subr.bf16.mxu1 %v1493_v1 }
  0x3d   : >> { %1370 = vmatpush3.bf16.msra.mxu0 %v1463_v36 }
  0x3e   : >> { %1382 = vmatpush3.bf16.msra.mxu1 %v1464_v37  ;;  %1387 = vmatprep.subr.bf16.mxu0 %v1493_v1  ;;  %v1265_v37 = vld [vmem:[%s1755_s2] ss:$0 sm:$0xff] }
  0x3f   : >> { %1399 = vmatprep.subr.bf16.mxu1 %v1493_v1 }
  0x40   : >> { %1372 = vmatmul.mubr.msk.bf16.vlgmr.msra.gmra.mxu0 %vm307_vm1, %v610_v39  ;;  %v1266_v39 = vld [vmem:[%s1756_s3] ss:$0 sm:$0xff] }
  0x41   : >> { %1388 = vmatpush3.bf16.msra.mxu0 %v1465_v40  ;;  %1384 = vmatmul.mubr.msk.bf16.vlgmr.msra.gmra.mxu1 %vm307_vm1, %v697_v41  ;;  %v1045_v40 = vld [vmem:[%s1044_s16] sm:$0x1] }
  0x42   : >> { %1400 = vmatpush3.bf16.msra.mxu1 %v1466_v42  ;;  %1389 = vmatprep.subr.bf16.mxu0 %v1493_v1  ;;  %v1046_v45 = vunpack.c.l.bf16 %v1045_v40 }
  0x43   : >> { %1401 = vmatprep.subr.bf16.mxu1 %v1493_v1  ;;  %1395 = vmatprep.mubr.msk.bf16.mxu0 %vm1494_vm0, %v1493_v1 }
  0x44   : >> { %1407 = vmatprep.mubr.msk.bf16.mxu1 %vm1494_vm0, %v1493_v1 }
  0x45   : >> { %1390 = vmatpush3.bf16.msra.mxu0 %v1467_v43 }
  0x46   : >> { %1402 = vmatpush3.bf16.msra.mxu1 %v1468_v44  ;;  %1391 = vmatprep.subr.bf16.mxu0 %v1493_v1 }
  0x47   : >> { %1403 = vmatprep.subr.bf16.mxu1 %v1493_v1 }
  0x49   : >> { %1392 = vmatpush3.bf16.msra.mxu0 %v1469_v46 }
  0x4a   : >> { %1404 = vmatpush3.bf16.msra.mxu1 %v1470_v48  ;;  %1393 = vmatprep.subr.bf16.mxu0 %v1493_v1 }
  0x4b   : >> { %1405 = vmatprep.subr.bf16.mxu1 %v1493_v1 }
  0x4d   : >> { %1394 = vmatpush3.bf16.msra.mxu0 %v1471_v49 }
  0x4e   : >> { %1406 = vmatpush3.bf16.msra.mxu1 %v1472_v52  ;;  %1411 = vmatprep.subr.bf16.mxu0 %v1493_v1 }
  0x50   : >> { %1396 = vmatmul.mubr.msk.bf16.vlgmr.msra.gmra.mxu0 %vm307_vm1, %v1221_v53 }
  0x51   : >> { %1412 = vmatpush3.bf16.msra.mxu0 %v1473_v54  ;;  %1408 = vmatmul.mubr.msk.bf16.vlgmr.msra.gmra.mxu1 %vm307_vm1, %v871_v55 }
  0x52   : >> { %1413 = vmatprep.subr.bf16.mxu0 %v1493_v1  ;;  %1419 = vmatprep.mubr.msk.bf16.mxu0 %vm1494_vm0, %v1493_v1 }
  0x55   : >> { %1414 = vmatpush3.bf16.msra.mxu0 %v1474_v56 }
  0x56   : >> { %1415 = vmatprep.subr.bf16.mxu0 %v1493_v1 }
  0x59   : >> { %1416 = vmatpush3.bf16.msra.mxu0 %v1475_v57 }
  0x5a   : >> { %1417 = vmatprep.subr.bf16.mxu0 %v1493_v1 }
  0x5d   : >> { %1418 = vmatpush3.bf16.msra.mxu0 %v1476_v58 }
  0x60   : >> { %1420 = vmatmul.mubr.msk.bf16.vlgmr.msra.gmra.mxu0 %vm307_vm1, %v958_v60 }
  0xe0   : >> { %v345_v61 = vpop.f32.mrf.mxu0 }
  0xe1   : >> { %v412_v62 = vpop.f32.mrf.mxu1 }
  0xe2   : >> { %v1325_v63 = vpop.f32.mrf.mxu0  ;;  %v413_v21 = vadd.f32 %v412_v62, %v345_v61 }
  0xe3   : >> { %v1337_v0 = vpop.f32.mrf.mxu1 }
  0xe4   : >> { %v348_v2 = vpop.f32.mrf.mxu0 }
  0xe5   : >> { %v415_v3 = vpop.f32.mrf.mxu1 }
  0xe6   : >> { %v1326_v4 = vpop.f32.mrf.mxu0 }
  0xe7   : >> { %v1338_v5 = vpop.f32.mrf.mxu1 }
  0xf0   : >> { %v498_v6 = vpop.f32.mrf.mxu0 }
  0xf1   : >> { %v579_v7 = vpop.f32.mrf.mxu1  ;;  %v504_v22 = vadd.f32 %v498_v6, %v413_v21 }
  0xf2   : >> { %v1349_v8 = vpop.f32.mrf.mxu0 }
  0xf3   : >> { %v1361_v9 = vpop.f32.mrf.mxu1  ;;  %v585_v26 = vadd.f32 %v579_v7, %v504_v22 }
  0xf4   : >> { %v501_v10 = vpop.f32.mrf.mxu0 }
  0xf5   : >> { %v582_v11 = vpop.f32.mrf.mxu1 }
  0xf6   : >> { %v1350_v12 = vpop.f32.mrf.mxu0 }
  0xf7   : >> { %v1362_v1 = vpop.f32.mrf.mxu1 }
 0x100   : >> { %v672_v13 = vpop.f32.mrf.mxu0 }
 0x101   : >> { %v759_v14 = vpop.f32.mrf.mxu1  ;;  %v678_v29 = vadd.f32 %v672_v13, %v585_v26 }
 0x102   : >> { %v1373_v15 = vpop.f32.mrf.mxu0 }
 0x103   : >> { %v1385_v16 = vpop.f32.mrf.mxu1  ;;  %v765_v33 = vadd.f32 %v759_v14, %v678_v29 }
 0x104   : >> { %v675_v17 = vpop.f32.mrf.mxu0 }
 0x105   : >> { %v762_v18 = vpop.f32.mrf.mxu1 }
 0x106   : >> { %v1374_v19 = vpop.f32.mrf.mxu0 }
 0x107   : >> { %v1386_v20 = vpop.f32.mrf.mxu1 }
 0x110   : >> { %v840_v23 = vpop.f32.mrf.mxu0 }
 0x111   : >> { %v933_v24 = vpop.f32.mrf.mxu1  ;;  %v846_v34 = vadd.f32 %v840_v23, %v765_v33 }
 0x112   : >> { %v1397_v25 = vpop.f32.mrf.mxu0 }
 0x113   : >> { %v1409_v27 = vpop.f32.mrf.mxu1  ;;  %v939_v35 = vadd.f32 %v933_v24, %v846_v34 }
 0x114   : >> { %v843_v28 = vpop.f32.mrf.mxu0 }
 0x115   : >> { %v936_v30 = vpop.f32.mrf.mxu1 }
 0x116   : >> { %v1398_v31 = vpop.f32.mrf.mxu0 }
 0x117   : >> { %v1410_v32 = vpop.f32.mrf.mxu1 }
 0x120   : >> { %v1020_v36 = vpop.f32.mrf.mxu0 }
 0x121   : >> { %v1026_v38 = vadd.f32 %v1020_v36, %v939_v35 }
 0x122   : >> { %v1421_v41 = vpop.f32.mrf.mxu0 }
 0x123   : >> { %v1034_v42 = vmul.f32 %v1265_v37, %v1026_v38 }
 0x124   : >> { %v1023_v43 = vpop.f32.mrf.mxu0 }
 0x125   : >> { %v1042_v44 = vadd.f32 %v1266_v39, %v1034_v42 }
 0x126   : >> { %v1422_v46 = vpop.f32.mrf.mxu0 }
 0x127   : >> { %v1043_v47 = vmax.f32 %v1042_v44, 0.0 }
 0x129   : >> { %v1047_v48 = vadd.f32 %v1046_v45, %v1043_v47  ;;  %245 = sbr.rel (!%p243_p4) target bundleno = 15 (0xf), region = 93 }
 0x12b   : >> { %v1048_v49 = vpack.c.bf16 %v1047_v48, %v1047_v48 }
 0x12d   : >> { %1051 = vst.msk [vmem:[%s1049_s8] sm:$0x1] %vm1050_vm2, %v1048_v49 }
 0x12e PF: > { %s15_s18 = sadd.s32 1, %s1487_s18  }
 0x12f   : > { %p12_p5 = scmp.ge.s32.totalorder %s15_s18, 4  }
 0x131   :  { %14 = sbr.rel (!%p12_p5) target bundleno = 1 (0x1), region = 104 }

// kernel: cnn_classifier_forward.13
= control target key start
LH: loop header
LB: loop body
LE: loop exit
PB: predicated region body
PF: predicated region fallthrough
CT: control target
= control target key end

     0   :  { %s1633_s27 = smov 0   ;;  %s1884_s0 = inlined_call_operand.vmem [shape: bf16[2,4,2,2,64], index: 0, kind: input, shape index: {}]   ;;  %s1885_s1 = inlined_call_operand.vmem [shape: bf16[9,64,128], index: 1, kind: input, shape index: {}]   ;;  %s1886_s2 = inlined_call_operand.vmem [shape: bf16[1,64,128], index: 2, kind: input, shape index: {}]   ;;  %s1887_s3 = inlined_call_operand.vmem [shape: f32[1,128], index: 3, kind: input, shape index: {}]   ;;  %s1888_s4 = inlined_call_operand.vmem [shape: f32[1,128], index: 4, kind: input, shape index: {}]   ;;  %s1889_s5 = inlined_call_operand.vmem [shape: f32[1,128], index: 5, kind: input, shape index: {}]   ;;  %s1890_s6 = inlined_call_operand.vmem [shape: f32[1,128], index: 6, kind: input, shape index: {}]   ;;  %s1891_s7 = inlined_call_operand.vmem [shape: bf16[2,1,1,128], index: 7, kind: output, shape index: {0}]   ;;  %s1892_s8 = inlined_call_operand.vmem [shape: bf16[2,1,1,128], index: 8, kind: output, shape index: {1}]  }
   0x1 LB: > { %s1229_s28 = sadd.s32 4294967295, %s1583_s27   ;;  %p1233_p0 = scmp.ge.s32.totalorder %s1583_s27, 1  ;;  %s1583_s27 = sphi %s1633_s27, %s19_s27  }
   0x2   : > { %p264_p1 = scmp.lt.s32.totalorder %s1583_s27, 3 }
   0x4   : > { %p265_p2 = pnand %p1233_p0, %p264_p1 }
   0x5   : > { %p298_p3 = scmp.lt.s32.totalorder (!%p265_p2), %s1229_s28, 1 }
   0x6   : > { %268 = sbr.rel (%p265_p2) target bundleno = 299 (0x12b), region = 48 }
   0xb   : > { %v1537_v0 = vld [vmem:[%s1885_s1 + $0x38] sm:$0xff]   ;;  %v1585_v1 = vmov 0.0   ;;  %v1539_v3 = vld [vmem:[%s1885_s1 + $0x30] sm:$0xff]   ;;  %vm1586_vm0 = vmmov 0   ;;  %s1896_s28 = smov (!%p298_p3, %s1229_s28), 1  ;;  %v1541_v5 = vld [vmem:[%s1885_s1 + $0x28] sm:$0xff]   ;;  %v477_v7 = vlaneseq }
   0xc   : > { %1406 = vmatprep.subr.bf16.mxu0 %v1585_v1  ;;  %1418 = vmatprep.subr.bf16.mxu1 %v1585_v1  ;;  %v1538_v2 = vld [vmem:[%s1885_s1 + $0x18] sm:$0xff]   ;;  %v1540_v4 = vld [vmem:[%s1885_s1 + $0x10] sm:$0xff]   ;;  %s1234_s17 = sshll.u32 %s1896_s28, 3  ;;  %v1542_v6 = vld [vmem:[%s1885_s1 + $0x8] sm:$0xff]   ;;  %v1587_v8 = vmov 1966171168   ;;  %s307_s19 = scalar_lea.vmem %s1892_s8, %s1896_s28 }
   0xd   : > { %1407 = vmatpush3.bf16.msra.mxu0 %v1537_v0  ;;  %1414 = vmatprep.mubr.msk.bf16.mxu0 %vm1586_vm0, %v1585_v1  ;;  %s1675_s22 = scalar_lea.vmem %s1884_s0, %s1234_s17  ;;  %v475_v9 = vunpack.c.l.s4 %v1587_v8  ;;  %v1543_v10 = vld [vmem:[%s1885_s1 + $0x20] sm:$0xff]   ;;  %v478_v12 = vshrl.u32 %v477_v7, 7  ;;  %vm353_vm1 = vcmask 523264   ;;  %v1545_v16 = vld [vmem:[%s1885_s1 + $0x58] sm:$0xff]   ;;  %v1547_v19 = vld [vmem:[%s1885_s1 + $0x50] sm:$0xff]   ;;  %vm1143_vm2 = vcmask 1040384   ;;  %s304_s29 = scalar_lea.vmem %s1891_s7, %s1896_s28 }
   0xe   : > { %1419 = vmatpush3.bf16.msra.mxu1 %v1538_v2  ;;  %1408 = vmatprep.subr.bf16.mxu0 %v1585_v1  ;;  %v1544_v11 = vld [vmem:[%s1885_s1] sm:$0xff]   ;;  %v1546_v17 = vld [vmem:[%s1885_s1 + $0x78] sm:$0xff]   ;;  %v1548_v20 = vld [vmem:[%s1885_s1 + $0x70] sm:$0xff]   ;;  %vm1144_vm3 = vsmask.f32 256 }
   0xf   : > { %1420 = vmatprep.subr.bf16.mxu1 %v1585_v1  ;;  %1426 = vmatprep.mubr.msk.bf16.mxu1 %vm1586_vm0, %v1585_v1  ;;  %v1235_v13 = vld [vmem:[%s1675_s22 + $0x2] sm:$0x1]  ;;  %v309_v14 = vld [vmem:[%s1675_s22] sm:$0x1]  ;;  %v476_v15 = vunpack.c.0.s8 %v475_v9  ;;  %v1549_v22 = vld [vmem:[%s1885_s1 + $0x48] sm:$0xff]  }
  0x10   : > { %v1550_v23 = vld [vmem:[%s1885_s1 + $0x68] sm:$0xff]   ;;  %v1551_v25 = vld [vmem:[%s1885_s1 + $0x40] sm:$0xff]   ;;  %v1553_v29 = vld [vmem:[%s1885_s1 + $0x98] sm:$0xff]  }
  0x11   : > { %1409 = vmatpush3.bf16.msra.mxu0 %v1539_v3  ;;  %v1696_v18 = vsub.s32 %v476_v15, %v478_v12  ;;  %v1552_v26 = vld [vmem:[%s1885_s1 + $0x60] sm:$0xff]   ;;  %v1554_v30 = vld [vmem:[%s1886_s2 + $0x18] sm:$0xff]   ;;  %v1555_v31 = vld [vmem:[%s1885_s1 + $0x90] sm:$0xff]  }
  0x12   : > { %1421 = vmatpush3.bf16.msra.mxu1 %v1540_v4  ;;  %1410 = vmatprep.subr.bf16.mxu0 %v1585_v1  ;;  %v1267_v28 = vld [vmem:[%s1675_s22 + $0x4] sm:$0x1]  ;;  %v1556_v32 = vld [vmem:[%s1886_s2 + $0x10] sm:$0xff]   ;;  %v1557_v33 = vld [vmem:[%s1885_s1 + $0x88] sm:$0xff]  }
  0x13   : > { %1422 = vmatprep.subr.bf16.mxu1 %v1585_v1  ;;  %v480_v21 = vrot.slane %v309_v14, %v1696_v18  ;;  %v1558_v34 = vld [vmem:[%s1886_s2 + $0x8] sm:$0xff]   ;;  %v1559_v35 = vld [vmem:[%s1885_s1 + $0x80] sm:$0xff]   ;;  %v1561_v38 = vld [vmem:[%s1885_s1 + $0xb8] sm:$0xff]   ;;  %v805_v42 = vrot.slane %v1267_v28, %v1696_v18 }
  0x14   : > { %v1560_v36 = vld [vmem:[%s1886_s2] sm:$0xff]   ;;  %v1562_v39 = vld [vmem:[%s1885_s1 + $0xd8] sm:$0xff]   ;;  %v1563_v40 = vld [vmem:[%s1885_s1 + $0xb0] sm:$0xff]  }
  0x15   : > { %1411 = vmatpush3.bf16.msra.mxu0 %v1541_v5  ;;  %v487_v24 = vrot.slane %v480_v21, %v1696_v18  ;;  %v1281_v37 = vld [vmem:[%s1675_s22 + $0x6] sm:$0x1]  ;;  %v1564_v41 = vld [vmem:[%s1885_s1 + $0xd0] sm:$0xff]   ;;  %v1565_v43 = vld [vmem:[%s1885_s1 + $0xa8] sm:$0xff]   ;;  %v812_v45 = vrot.slane %v805_v42, %v1696_v18 }
  0x16   : > { %1423 = vmatpush3.bf16.msra.mxu1 %v1542_v6  ;;  %1412 = vmatprep.subr.bf16.mxu0 %v1585_v1  ;;  %v1566_v44 = vld [vmem:[%s1885_s1 + $0xc8] sm:$0xff]   ;;  %v1567_v46 = vld [vmem:[%s1885_s1 + $0xa0] sm:$0xff]   ;;  %v1569_v49 = vld [vmem:[%s1885_s1 + $0xf8] sm:$0xff]  }
  0x17   : > { %1424 = vmatprep.subr.bf16.mxu1 %v1585_v1  ;;  %v489_v27 = vshrl.u32 %v487_v24, 16  ;;  %v1568_v47 = vld [vmem:[%s1885_s1 + $0xc0] sm:$0xff]   ;;  %v814_v48 = vshrl.u32 %v812_v45, 16  ;;  %v1570_v51 = vld [vmem:[%s1885_s1 + $0x118] sm:$0xff]   ;;  %v1571_v52 = vld [vmem:[%s1885_s1 + $0xf0] sm:$0xff]  }
  0x18   : > { %v1313_v50 = vld [vmem:[%s1675_s22 + $0x1] sm:$0x1]  ;;  %v1572_v53 = vld [vmem:[%s1885_s1 + $0x110] sm:$0xff]   ;;  %v1573_v55 = vld [vmem:[%s1885_s1 + $0xe8] sm:$0xff]  }
  0x19   : > { %1413 = vmatpush3.bf16.msra.mxu0 %v1543_v10  ;;  %v1058_v54 = vrot.slane %v1313_v50, %v1696_v18  ;;  %v1574_v56 = vld [vmem:[%s1885_s1 + $0x108] sm:$0xff]   ;;  %v1575_v58 = vld [vmem:[%s1885_s1 + $0xe0] sm:$0xff]   ;;  %vm1863_vm4 = vmand %vm1143_vm2, %vm1144_vm3 }
  0x1a   : > { %1425 = vmatpush3.bf16.msra.mxu1 %v1544_v11  ;;  %1430 = vmatprep.subr.bf16.mxu0 %v1585_v1  ;;  %v1576_v59 = vld [vmem:[%s1885_s1 + $0x100] sm:$0xff]  }
  0x1b   : > { %1442 = vmatprep.subr.bf16.mxu1 %v1585_v1  ;;  %v1065_v57 = vrot.slane %v1058_v54, %v1696_v18  ;;  %v1327_v61 = vld [vmem:[%s1675_s22 + $0x3] sm:$0x1]  ;;  %v1154_v24 = vld [vmem:[%s307_s19] sm:$0x1] }
  0x1c   : > { %1415 = vmatmul.mubr.msk.bf16.vlgmr.msra.gmra.mxu0 %vm353_vm1, %v1235_v13 }
  0x1d   : > { %1427 = vmatmul.mubr.msk.bf16.vlgmr.msra.gmra.mxu1 %vm353_vm1, %v309_v14  ;;  %1431 = vmatpush3.bf16.msra.mxu0 %v1545_v16  ;;  %v1067_v60 = vshrl.u32 %v1065_v57, 16  ;;  %v1149_v14 = vld [vmem:[%s1889_s5] sm:$0x1] }
  0x1e   : > { %1443 = vmatpush3.bf16.msra.mxu1 %v1546_v17  ;;  %1432 = vmatprep.subr.bf16.mxu0 %v1585_v1  ;;  %v1151_v17 = vld [vmem:[%s1890_s6] sm:$0x1] }
  0x1f   : > { %1444 = vmatprep.subr.bf16.mxu1 %v1585_v1  ;;  %1438 = vmatprep.mubr.msk.bf16.mxu0 %vm1586_vm0, %v1585_v1 }
  0x20   : > { %1450 = vmatprep.mubr.msk.bf16.mxu1 %vm1586_vm0, %v1585_v1 }
  0x21   : > { %1433 = vmatpush3.bf16.msra.mxu0 %v1547_v19 }
  0x22   : > { %1445 = vmatpush3.bf16.msra.mxu1 %v1548_v20  ;;  %1434 = vmatprep.subr.bf16.mxu0 %v1585_v1 }
  0x23   : > { %1446 = vmatprep.subr.bf16.mxu1 %v1585_v1 }
  0x25   : > { %1435 = vmatpush3.bf16.msra.mxu0 %v1549_v22 }
  0x26   : > { %1447 = vmatpush3.bf16.msra.mxu1 %v1550_v23  ;;  %1436 = vmatprep.subr.bf16.mxu0 %v1585_v1 }
  0x27   : > { %1448 = vmatprep.subr.bf16.mxu1 %v1585_v1 }
  0x29   : > { %1437 = vmatpush3.bf16.msra.mxu0 %v1551_v25 }
  0x2a   : > { %1449 = vmatpush3.bf16.msra.mxu1 %v1552_v26  ;;  %1454 = vmatprep.subr.bf16.mxu0 %v1585_v1 }
  0x2b   : > { %1466 = vmatprep.subr.bf16.mxu1 %v1585_v1 }
  0x2c   : > { %1439 = vmatmul.mubr.msk.bf16.vlgmr.msra.gmra.mxu0 %vm353_vm1, %v489_v27 }
  0x2d   : > { %1451 = vmatmul.mubr.msk.bf16.vlgmr.msra.gmra.mxu1 %vm353_vm1, %v1267_v28  ;;  %1455 = vmatpush3.bf16.msra.mxu0 %v1553_v29 }
  0x2e   : > { %1467 = vmatpush3.bf16.msra.mxu1 %v1554_v30  ;;  %1456 = vmatprep.subr.bf16.mxu0 %v1585_v1 }
  0x2f   : > { %1468 = vmatprep.subr.bf16.mxu1 %v1585_v1  ;;  %1462 = vmatprep.mubr.msk.bf16.mxu0 %vm1586_vm0, %v1585_v1 }
  0x30   : > { %1474 = vmatprep.mubr.msk.bf16.mxu1 %vm1586_vm0, %v1585_v1 }
  0x31   : > { %1457 = vmatpush3.bf16.msra.mxu0 %v1555_v31 }
  0x32   : > { %1469 = vmatpush3.bf16.msra.mxu1 %v1556_v32  ;;  %1458 = vmatprep.subr.bf16.mxu0 %v1585_v1 }
  0x33   : > { %1470 = vmatprep.subr.bf16.mxu1 %v1585_v1 }
  0x35   : > { %1459 = vmatpush3.bf16.msra.mxu0 %v1557_v33 }
  0x36   : > { %1471 = vmatpush3.bf16.msra.mxu1 %v1558_v34  ;;  %1460 = vmatprep.subr.bf16.mxu0 %v1585_v1 }
  0x37   : > { %1472 = vmatprep.subr.bf16.mxu1 %v1585_v1 }
  0x39   : > { %1461 = vmatpush3.bf16.msra.mxu0 %v1559_v35 }
  0x3a   : > { %1473 = vmatpush3.bf16.msra.mxu1 %v1560_v36  ;;  %1478 = vmatprep.subr.bf16.mxu0 %v1585_v1 }
  0x3b   : > { %1490 = vmatprep.subr.bf16.mxu1 %v1585_v1 }
  0x3c   : > { %1463 = vmatmul.mubr.msk.bf16.vlgmr.msra.gmra.mxu0 %vm353_vm1, %v1281_v37 }
  0x3d   : > { %1475 = vmatmul.mubr.msk.bf16.vlgmr.msra.gmra.mxu1 %vm353_vm1, %v1281_v37  ;;  %1479 = vmatpush3.bf16.msra.mxu0 %v1561_v38 }
  0x3e   : > { %1491 = vmatpush3.bf16.msra.mxu1 %v1562_v39  ;;  %1480 = vmatprep.subr.bf16.mxu0 %v1585_v1 }
  0x3f   : > { %1492 = vmatprep.subr.bf16.mxu1 %v1585_v1  ;;  %1486 = vmatprep.mubr.msk.bf16.mxu0 %vm1586_vm0, %v1585_v1 }
  0x40   : > { %1498 = vmatprep.mubr.msk.bf16.mxu1 %vm1586_vm0, %v1585_v1 }
  0x41   : > { %1481 = vmatpush3.bf16.msra.mxu0 %v1563_v40 }
  0x42   : > { %1493 = vmatpush3.bf16.msra.mxu1 %v1564_v41  ;;  %1482 = vmatprep.subr.bf16.mxu0 %v1585_v1 }
  0x43   : > { %1494 = vmatprep.subr.bf16.mxu1 %v1585_v1 }
  0x45   : > { %1483 = vmatpush3.bf16.msra.mxu0 %v1565_v43 }
  0x46   : > { %1495 = vmatpush3.bf16.msra.mxu1 %v1566_v44  ;;  %1484 = vmatprep.subr.bf16.mxu0 %v1585_v1 }
  0x47   : > { %1496 = vmatprep.subr.bf16.mxu1 %v1585_v1 }
  0x49   : > { %1485 = vmatpush3.bf16.msra.mxu0 %v1567_v46 }
  0x4a   : > { %1497 = vmatpush3.bf16.msra.mxu1 %v1568_v47  ;;  %1502 = vmatprep.subr.bf16.mxu0 %v1585_v1  ;;  %v1137_v47 = vld [vmem:[%s1887_s3] sm:$0x1] }
  0x4b   : > { %1514 = vmatprep.subr.bf16.mxu1 %v1585_v1 }
  0x4c   : > { %1487 = vmatmul.mubr.msk.bf16.vlgmr.msra.gmra.mxu0 %vm353_vm1, %v814_v48 }
  0x4d   : > { %1499 = vmatmul.mubr.msk.bf16.vlgmr.msra.gmra.mxu1 %vm353_vm1, %v1313_v50  ;;  %1503 = vmatpush3.bf16.msra.mxu0 %v1569_v49 }
  0x4e   : > { %1515 = vmatpush3.bf16.msra.mxu1 %v1570_v51  ;;  %1504 = vmatprep.subr.bf16.mxu0 %v1585_v1  ;;  %v1139_v51 = vld [vmem:[%s1888_s4] sm:$0x1] }
  0x4f   : > { %1516 = vmatprep.subr.bf16.mxu1 %v1585_v1  ;;  %1510 = vmatprep.mubr.msk.bf16.mxu0 %vm1586_vm0, %v1585_v1 }
  0x50   : > { %1522 = vmatprep.mubr.msk.bf16.mxu1 %vm1586_vm0, %v1585_v1 }
  0x51   : > { %1505 = vmatpush3.bf16.msra.mxu0 %v1571_v52 }
  0x52   : > { %1517 = vmatpush3.bf16.msra.mxu1 %v1572_v53  ;;  %1506 = vmatprep.subr.bf16.mxu0 %v1585_v1 }
  0x53   : > { %1518 = vmatprep.subr.bf16.mxu1 %v1585_v1 }
  0x55   : > { %1507 = vmatpush3.bf16.msra.mxu0 %v1573_v55 }
  0x56   : > { %1519 = vmatpush3.bf16.msra.mxu1 %v1574_v56  ;;  %1508 = vmatprep.subr.bf16.mxu0 %v1585_v1 }
  0x57   : > { %1520 = vmatprep.subr.bf16.mxu1 %v1585_v1 }
  0x59   : > { %1509 = vmatpush3.bf16.msra.mxu0 %v1575_v58 }
  0x5a   : > { %1521 = vmatpush3.bf16.msra.mxu1 %v1576_v59  ;;  %v1146_v59 = vld [vmem:[%s304_s29] sm:$0x1] }
  0x5c   : > { %1511 = vmatmul.mubr.msk.bf16.vlgmr.msra.gmra.mxu0 %vm353_vm1, %v1327_v61 }
  0x5d   : > { %1523 = vmatmul.mubr.msk.bf16.vlgmr.msra.gmra.mxu1 %vm353_vm1, %v1067_v60 }
  0xdc   : > { %v391_v62 = vpop.f32.mrf.mxu0 }
  0xdd   : > { %v458_v63 = vpop.f32.mrf.mxu1 }
  0xde   : > { %v1416_v0 = vpop.f32.mrf.mxu0  ;;  %v459_v31 = vadd.f32 %v458_v63, %v391_v62 }
  0xdf   : > { %v1428_v2 = vpop.f32.mrf.mxu1 }
  0xe0   : > { %v394_v3 = vpop.f32.mrf.mxu0 }
  0xe1   : > { %v461_v4 = vpop.f32.mrf.mxu1 }
  0xe2   : > { %v1417_v5 = vpop.f32.mrf.mxu0 }
  0xe3   : > { %v1429_v6 = vpop.f32.mrf.mxu1 }
  0xec   : > { %v552_v7 = vpop.f32.mrf.mxu0 }
  0xed   : > { %v631_v8 = vpop.f32.mrf.mxu1  ;;  %v558_v34 = vadd.f32 %v552_v7, %v459_v31 }
  0xee   : > { %v1440_v1 = vpop.f32.mrf.mxu0 }
  0xef   : > { %v1452_v9 = vpop.f32.mrf.mxu1  ;;  %v637_v39 = vadd.f32 %v631_v8, %v558_v34 }
  0xf0   : > { %v555_v10 = vpop.f32.mrf.mxu0 }
  0xf1   : > { %v634_v11 = vpop.f32.mrf.mxu1 }
  0xf2   : > { %v1441_v12 = vpop.f32.mrf.mxu0 }
  0xf3   : > { %v1453_v13 = vpop.f32.mrf.mxu1 }
  0xfc   : > { %v710_v15 = vpop.f32.mrf.mxu0 }
  0xfd   : > { %v783_v16 = vpop.f32.mrf.mxu1  ;;  %v716_v41 = vadd.f32 %v710_v15, %v637_v39 }
  0xfe   : > { %v1150_v18 = vmul.f32 %v1149_v14, %v783_v16  ;;  %v1464_v19 = vpop.f32.mrf.mxu0 }
  0xff   : > { %v1476_v20 = vpop.f32.mrf.mxu1 }
 0x100   : > { %v1152_v21 = vadd.f32 %v1151_v17, %v1150_v18  ;;  %v713_v22 = vpop.f32.mrf.mxu0 }
 0x101   : > { %v786_v25 = vpop.f32.mrf.mxu1 }
 0x102   : > { %v1153_v26 = vpack.c.bf16 %v1152_v21, %v1152_v21  ;;  %v1465_v27 = vpop.f32.mrf.mxu0 }
 0x103   : > { %v1477_v28 = vpop.f32.mrf.mxu1 }
 0x104   : > { %v1155_v29 = vsel %vm1863_vm4, %v1153_v26, %v1154_v24 }
 0x105   : > { %1156 = vst [vmem:[%s307_s19] sm:$0x1] %v1155_v29 }
 0x10c   : > { %v877_v30 = vpop.f32.mrf.mxu0 }
 0x10d   : > { %v956_v32 = vpop.f32.mrf.mxu1  ;;  %v883_v42 = vadd.f32 %v877_v30, %v716_v41 }
 0x10e   : > { %v1488_v33 = vpop.f32.mrf.mxu0 }
 0x10f   : > { %v1500_v35 = vpop.f32.mrf.mxu1  ;;  %v962_v43 = vadd.f32 %v956_v32, %v883_v42 }
 0x110   : > { %v880_v36 = vpop.f32.mrf.mxu0 }
 0x111   : > { %v959_v37 = vpop.f32.mrf.mxu1 }
 0x112   : > { %v1489_v38 = vpop.f32.mrf.mxu0 }
 0x113   : > { %v1501_v40 = vpop.f32.mrf.mxu1 }
 0x11c   : > { %v1035_v44 = vpop.f32.mrf.mxu0 }
 0x11d   : > { %v1041_v45 = vadd.f32 %v1035_v44, %v962_v43  ;;  %v1130_v46 = vpop.f32.mrf.mxu1 }
 0x11e   : > { %v1512_v48 = vpop.f32.mrf.mxu0 }
 0x11f   : > { %v1136_v49 = vadd.f32 %v1130_v46, %v1041_v45  ;;  %v1524_v50 = vpop.f32.mrf.mxu1 }
 0x120   : > { %v1038_v52 = vpop.f32.mrf.mxu0 }
 0x121   : > { %v1138_v53 = vmul.f32 %v1137_v47, %v1136_v49  ;;  %v1133_v54 = vpop.f32.mrf.mxu1 }
 0x122   : > { %v1513_v55 = vpop.f32.mrf.mxu0 }
 0x123   : > { %v1140_v56 = vadd.f32 %v1139_v51, %v1138_v53  ;;  %v1525_v57 = vpop.f32.mrf.mxu1 }
 0x125   : > { %v1141_v58 = vmax.f32 %v1140_v56, 0.0 }
 0x127   : > { %v1142_v60 = vpack.c.bf16 %v1141_v58, %v1141_v58 }
 0x129   : > { %v1147_v61 = vsel %vm1863_vm4, %v1142_v60, %v1146_v59 }
 0x12a   : > { %1148 = vst [vmem:[%s304_s29] sm:$0x1] %v1147_v61 }
 0x12b PF: > { %s19_s27 = sadd.s32 1, %s1583_s27  }
 0x12c   : > { %p16_p4 = scmp.ge.s32.totalorder %s19_s27, 4  }
 0x12e   :  { %18 = sbr.rel (!%p16_p4) target bundleno = 1 (0x1), region = 103 }

// kernel: cnn_classifier_forward.15
= control target key start
LH: loop header
LB: loop body
LE: loop exit
PB: predicated region body
PF: predicated region fallthrough
CT: control target
= control target key end

     0   :  { %v221_v1 = vmov 0.0   ;;  %vm222_vm0 = vmmov 0   ;;  %s304_s0 = inlined_call_operand.vmem [shape: bf16[2,1,128], index: 0, kind: input, shape index: {}]   ;;  %s305_s1 = inlined_call_operand.vmem [shape: f32[128,6], index: 1, kind: input, shape index: {}]   ;;  %s306_s2 = inlined_call_operand.vmem [shape: f32[1,6], index: 2, kind: input, shape index: {}]   ;;  %s307_s3 = inlined_call_operand.hbm [shape: f32[2,6], index: 3, kind: output, shape index: {}]  }
   0x1   :  { %v36_v0 = vld [vmem:[%s305_s1 + $0x78] sm:$0xff]  ;;  %161 = vmatprep.subr.mxu0 %v221_v1  ;;  %v35_v2 = vld [vmem:[%s305_s1 + $0x70] sm:$0xff]  ;;  %193 = vmatprep.mubr.msk.f32.mxu0 %vm222_vm0, %v221_v1  ;;  %v34_v3 = vld [vmem:[%s305_s1 + $0x68] sm:$0xff] }
   0x2   :  { %162 = vmatpush3.msra.mxu0 %v36_v0  ;;  %v33_v4 = vld [vmem:[%s305_s1 + $0x60] sm:$0xff] }
   0x3   :  { %163 = vmatprep.subr.mxu0 %v221_v1 }
   0x4   :  { %164 = vmatpush3.msra.mxu0 %v35_v2 }
   0x5   :  { %165 = vmatprep.subr.mxu0 %v221_v1 }
   0x6   :  { %166 = vmatpush3.msra.mxu0 %v34_v3 }
   0x7   :  { %8 = vsyncpa [#allocation3], 0  ;;  %167 = vmatprep.subr.mxu0 %v221_v1  ;;  %v32_v5 = vld [vmem:[%s305_s1 + $0x58] sm:$0xff]  ;;  %v31_v6 = vld [vmem:[%s305_s1 + $0x50] sm:$0xff]  ;;  %v46_v9 = vlaneseq  ;;  %vm54_vm1 = vcmask 1041409   ;;  %s223_s22 = smov [#allocation2]  }
   0x8   :  { %168 = vmatpush3.msra.mxu0 %v33_v4  ;;  %v30_v7 = vld [vmem:[%s305_s1 + $0x48] sm:$0xff]  ;;  %v29_v8 = vld [vmem:[%s305_s1 + $0x40] sm:$0xff]  ;;  %v28_v10 = vld [vmem:[%s305_s1 + $0x38] sm:$0xff]  ;;  %s135_s23 = sshll.u32 %s223_s22, 4  ;;  %vm127_vm2 = vcmask 41984   ;;  %s136_s23 = int_to_ptr.vmem [resolvable:$true] %s135_s23 }
   0x9   :  { %169 = vmatprep.subr.mxu0 %v221_v1  ;;  %v27_v11 = vld [vmem:[%s305_s1 + $0x30] sm:$0xff]  ;;  %v47_v12 = vshrl.u32 %v46_v9, 7  ;;  %v26_v13 = vld [vmem:[%s305_s1 + $0x28] sm:$0xff]  ;;  %v15_v14 = vld [vmem:[%s304_s0] sm:$0x1]  ;;  %s199_s24 = scalar_lea.vmem %s136_s23, 32  ;;  %p204_p1 = scmp.lt.s32.totalorder %s136_s23, %s136_s23 }
   0xa   :  { %170 = vmatpush3.msra.mxu0 %v32_v5  ;;  %v16_v15 = vld [vmem:[%s304_s0 + $0x1] sm:$0x1]  ;;  %v17_v17 = vunpack.c.l.bf16 %v15_v14  ;;  %v24_v20 = vld [vmem:[%s305_s1 + $0x18] sm:$0xff]  ;;  %v23_v21 = vld [vmem:[%s305_s1 + $0x10] sm:$0xff]  ;;  %p200_p0 = scmp.ne.s32.totalorder %s136_s23, %s199_s24  ;;  %p205_p2 = scmp.lt.s32.totalorder %s199_s24, %s199_s24 }
   0xb   :  { %171 = vmatprep.subr.mxu0 %v221_v1  ;;  %v25_v16 = vld [vmem:[%s305_s1 + $0x20] sm:$0xff]  ;;  %v18_v18 = vunpack.c.l.bf16 %v16_v15  ;;  %v48_v19 = vsub.s32 0, %v47_v12  ;;  %v22_v24 = vld [vmem:[%s305_s1 + $0x8] sm:$0xff] }
   0xc   :  { %172 = vmatpush3.msra.mxu0 %v31_v6  ;;  %v21_v25 = vld [vmem:[%s305_s1] sm:$0xff]  ;;  %p206_p3 = por %p205_p2, %p204_p1 }
   0xd   :  { %173 = vmatprep.subr.mxu0 %v221_v1  ;;  %v49_v22 = vrot.slane %v17_v17, %v48_v19  ;;  %v53_v23 = vrot.slane %v18_v18, %v48_v19  ;;  %v143_v27 = vld [vmem:[%s306_s2] ss:$0 sm:$0xff] }
   0xe   :  { %174 = vmatpush3.msra.mxu0 %v30_v7  ;;  %p207_p4 = pnand %p206_p3, %p200_p0 }
   0xf   :  { %175 = vmatprep.subr.mxu0 %v221_v1  ;;  %v55_v26 = vsel %vm54_vm1, %v53_v23, %v49_v22 }
  0x10   :  { %176 = vmatpush3.msra.mxu0 %v29_v8 }
  0x11   :  { %177 = vmatprep.subr.mxu0 %v221_v1 }
  0x12   :  { %178 = vmatpush3.msra.mxu0 %v28_v10 }
  0x13   :  { %179 = vmatprep.subr.mxu0 %v221_v1 }
  0x14   :  { %180 = vmatpush3.msra.mxu0 %v27_v11 }
  0x15   :  { %181 = vmatprep.subr.mxu0 %v221_v1 }
  0x16   :  { %182 = vmatpush3.msra.mxu0 %v26_v13 }
  0x17   :  { %183 = vmatprep.subr.mxu0 %v221_v1 }
  0x18   :  { %184 = vmatpush3.msra.mxu0 %v25_v16 }
  0x19   :  { %185 = vmatprep.subr.mxu0 %v221_v1 }
  0x1a   :  { %186 = vmatpush3.msra.mxu0 %v24_v20 }
  0x1b   :  { %187 = vmatprep.subr.mxu0 %v221_v1 }
  0x1c   :  { %188 = vmatpush3.msra.mxu0 %v23_v21 }
  0x1d   :  { %189 = vmatprep.subr.mxu0 %v221_v1 }
  0x1e   :  { %190 = vmatpush3.msra.mxu0 %v22_v24 }
  0x1f   :  { %191 = vmatprep.subr.mxu0 %v221_v1 }
  0x20   :  { %192 = vmatpush3.msra.mxu0 %v21_v25 }
  0x21   :  { %194 = vmatmul.mubr.f32.vlgmr.msra.gmra.mxu0 %v55_v26 }
  0xe1   :  { %v123_v28 = vpop.f32.mrf.mxu0 }
  0xe2   :  { %v124_v29 = vadd.f32 %v143_v27, %v123_v28 }
  0xe3   :  { %v195_v30 = vpop.f32.mrf.mxu0 }
  0xe4   :  { %128 = vst.msk [vmem:[#allocation2] sm:$0x3] %vm127_vm2, %v124_v29 }
  0xe5   :  { %210 = shalt.err (!%p207_p4)
}
  0xe6   :  { %138 = dma.vmem_to_hbm [thread:$0]  %s136_s23, 32, %s307_s3, [#allocation3]  }
  0xe7   :  { %219 = dma.done.wait [#allocation3], 32  }
  0xe8   :  { %220 = vsyncadd [#allocation3], 4294967264 }
  0xe9   :  { %142 = vsyncpa [#allocation3], 1 }

// kernel: cnn_classifier_forward.14
= control target key start
LH: loop header
LB: loop body
LE: loop exit
PB: predicated region body
PF: predicated region fallthrough
CT: control target
= control target key end

     0   :  { %s1933_s18 = smov 0   ;;  %s2294_s0 = inlined_call_operand.vmem [shape: bf16[2,1,3,3,128], index: 0, kind: input, shape index: {}]   ;;  %s2295_s1 = inlined_call_operand.vmem [shape: bf16[9,128,128], index: 1, kind: input, shape index: {}]   ;;  %s2296_s2 = inlined_call_operand.vmem [shape: f32[1,128], index: 2, kind: input, shape index: {}]   ;;  %s2297_s3 = inlined_call_operand.vmem [shape: f32[1,128], index: 3, kind: input, shape index: {}]   ;;  %s2298_s4 = inlined_call_operand.vmem [shape: bf16[2,1,1,128], index: 4, kind: input, shape index: {}]   ;;  %s2299_s5 = inlined_call_operand.vmem [shape: bf16[2,1,1,128], index: 5, kind: output, shape index: {}]  }
   0x1 LB: > { %s1332_s19 = sadd.s32 4294967295, %s1898_s18   ;;  %p1336_p0 = scmp.ge.s32.totalorder %s1898_s18, 1  ;;  %s1898_s18 = sphi %s1933_s18, %s15_s18  }
   0x2   : > { %p195_p1 = scmp.lt.s32.totalorder %s1898_s18, 3 }
   0x4   : > { %p196_p2 = pnand %p1336_p0, %p195_p1 }
   0x5   : > { %p224_p3 = scmp.lt.s32.totalorder (!%p196_p2), %s1332_s19, 1 }
   0x6   : > { %199 = sbr.rel (%p196_p2) target bundleno = 379 (0x17b), region = 40 }
   0xb   : > { %v1820_v0 = vld [vmem:[%s2295_s1 + $0x78] sm:$0xff]   ;;  %v1900_v1 = vmov 0.0   ;;  %v1822_v3 = vld [vmem:[%s2295_s1 + $0x70] sm:$0xff]   ;;  %vm1901_vm0 = vmmov 0   ;;  %v1824_v5 = vld [vmem:[%s2295_s1 + $0x68] sm:$0xff]   ;;  %s2301_s19 = smov (!%p224_p3, %s1332_s19), 1  ;;  %v274_v9 = vlaneseq }
   0xc   : > { %1628 = vmatprep.subr.bf16.mxu0 %v1900_v1  ;;  %1648 = vmatprep.subr.bf16.mxu1 %v1900_v1  ;;  %v1821_v2 = vld [vmem:[%s2295_s1 + $0x38] sm:$0xff]   ;;  %v1823_v4 = vld [vmem:[%s2295_s1 + $0x30] sm:$0xff]   ;;  %v1825_v6 = vld [vmem:[%s2295_s1 + $0x28] sm:$0xff]   ;;  %s1808_s15 = smul.u32 6, %s2301_s19  ;;  %v1902_v12 = vmov 1983009808   ;;  %s231_s11 = scalar_lea.vmem %s2298_s4, %s2301_s19 }
   0xd   : > { %1629 = vmatpush3.bf16.msra.mxu0 %v1820_v0  ;;  %1644 = vmatprep.mubr.msk.bf16.mxu0 %vm1901_vm0, %v1900_v1  ;;  %v1826_v7 = vld [vmem:[%s2295_s1 + $0x60] sm:$0xff]   ;;  %v1828_v10 = vld [vmem:[%s2295_s1 + $0x58] sm:$0xff]   ;;  %v272_v13 = vunpack.c.l.s4 %v1902_v12  ;;  %v275_v14 = vshrl.u32 %v274_v9, 7  ;;  %v1830_v15 = vld [vmem:[%s2295_s1 + $0x50] sm:$0xff]   ;;  %s234_s20 = scalar_lea.vmem %s2299_s5, %s2301_s19  ;;  %vm1270_vm1 = vcmask 1040384  }
   0xe   : > { %1649 = vmatpush3.bf16.msra.mxu1 %v1821_v2  ;;  %1630 = vmatprep.subr.bf16.mxu0 %v1900_v1  ;;  %v1827_v8 = vld [vmem:[%s2295_s1 + $0x20] sm:$0xff]   ;;  %v1829_v11 = vld [vmem:[%s2295_s1 + $0x18] sm:$0xff]   ;;  %v1831_v16 = vld [vmem:[%s2295_s1 + $0x10] sm:$0xff]   ;;  %s2002_s24 = scalar_lea.vmem %s2294_s0, %s1808_s15  ;;  %vm1271_vm2 = vsmask.f32 256 }
   0xf   : > { %1650 = vmatprep.subr.bf16.mxu1 %v1900_v1  ;;  %1664 = vmatprep.mubr.msk.bf16.mxu1 %vm1901_vm0, %v1900_v1  ;;  %v273_v17 = vunpack.c.0.s8 %v272_v13  ;;  %v1832_v18 = vld [vmem:[%s2295_s1 + $0x48] sm:$0xff]   ;;  %v236_v20 = vld [vmem:[%s2002_s24] sm:$0x1]  ;;  %v1836_v26 = vld [vmem:[%s2295_s1 + $0xb8] sm:$0xff]  }
  0x10   : > { %v1833_v21 = vld [vmem:[%s2295_s1 + $0x8] sm:$0xff]   ;;  %v1834_v23 = vld [vmem:[%s2295_s1 + $0x40] sm:$0xff]   ;;  %v1837_v27 = vld [vmem:[%s2295_s1 + $0xf8] sm:$0xff]  }
  0x11   : > { %1631 = vmatpush3.bf16.msra.mxu0 %v1822_v3  ;;  %v2008_v19 = vsub.s32 %v273_v17, %v275_v14  ;;  %v1835_v24 = vld [vmem:[%s2295_s1] sm:$0xff]   ;;  %v1838_v28 = vld [vmem:[%s2295_s1 + $0xb0] sm:$0xff]   ;;  %v1840_v30 = vld [vmem:[%s2295_s1 + $0xa8] sm:$0xff]  }
  0x12   : > { %1651 = vmatpush3.bf16.msra.mxu1 %v1823_v4  ;;  %1632 = vmatprep.subr.bf16.mxu0 %v1900_v1  ;;  %v1839_v29 = vld [vmem:[%s2295_s1 + $0xf0] sm:$0xff]   ;;  %v1841_v31 = vld [vmem:[%s2295_s1 + $0xe8] sm:$0xff]   ;;  %v1842_v32 = vld [vmem:[%s2295_s1 + $0xa0] sm:$0xff]  }
  0x13   : > { %1652 = vmatprep.subr.bf16.mxu1 %v1900_v1  ;;  %v277_v22 = vrot.slane %v236_v20, %v2008_v19  ;;  %v1843_v33 = vld [vmem:[%s2295_s1 + $0xe0] sm:$0xff]   ;;  %v1844_v34 = vld [vmem:[%s2295_s1 + $0x98] sm:$0xff]   ;;  %v1846_v36 = vld [vmem:[%s2295_s1 + $0x90] sm:$0xff]  }
  0x14   : > { %v1845_v35 = vld [vmem:[%s2295_s1 + $0xd8] sm:$0xff]   ;;  %v1847_v37 = vld [vmem:[%s2295_s1 + $0xd0] sm:$0xff]   ;;  %v1848_v38 = vld [vmem:[%s2295_s1 + $0x88] sm:$0xff]  }
  0x15   : > { %1633 = vmatpush3.bf16.msra.mxu0 %v1824_v5  ;;  %v279_v25 = vshrl.u32 %v277_v22, 16  ;;  %v1849_v39 = vld [vmem:[%s2295_s1 + $0xc8] sm:$0xff]   ;;  %v1386_v40 = vld.sshfl [vmem:[%s2002_s24] sm:$0x2 pattern:$0x76325410]  ;;  %vm1272_vm3 = vmand %vm1270_vm1, %vm1271_vm2 }
  0x16   : > { %1653 = vmatpush3.bf16.msra.mxu1 %v1825_v6  ;;  %1634 = vmatprep.subr.bf16.mxu0 %v1900_v1  ;;  %v1850_v41 = vld [vmem:[%s2295_s1 + $0x80] sm:$0xff]   ;;  %v484_v43 = vrot.slane %v1386_v40, 1  ;;  %v1852_v44 = vld [vmem:[%s2295_s1 + $0x138] sm:$0xff]   ;;  %v1854_v47 = vld [vmem:[%s2295_s1 + $0x130] sm:$0xff]  }
  0x17   : > { %1654 = vmatprep.subr.bf16.mxu1 %v1900_v1  ;;  %v1851_v42 = vld [vmem:[%s2295_s1 + $0xc0] sm:$0xff]   ;;  %v1853_v46 = vld [vmem:[%s2295_s1 + $0x178] sm:$0xff]   ;;  %v1855_v49 = vld [vmem:[%s2295_s1 + $0x170] sm:$0xff]  }
  0x18   : > { %v1395_v45 = vld [vmem:[%s2002_s24 + $0x2] sm:$0x1]  ;;  %v2107_v48 = vld [vmem:[%s2002_s24 + $0x4] sm:$0x1]  ;;  %v1856_v51 = vld [vmem:[%s2295_s1 + $0x128] sm:$0xff]  }
  0x19   : > { %1635 = vmatpush3.bf16.msra.mxu0 %v1826_v7  ;;  %v1050_v50 = vrot.slane %v2107_v48, %v2008_v19  ;;  %v1857_v52 = vld [vmem:[%s2295_s1 + $0x168] sm:$0xff]   ;;  %v1858_v53 = vld [vmem:[%s2295_s1 + $0x120] sm:$0xff]   ;;  %v1860_v55 = vld [vmem:[%s2295_s1 + $0x118] sm:$0xff]   ;;  %v707_v61 = vrot.slane %v1395_v45, %v2008_v19 }
  0x1a   : > { %1655 = vmatpush3.bf16.msra.mxu1 %v1827_v8  ;;  %1636 = vmatprep.subr.bf16.mxu0 %v1900_v1  ;;  %v1859_v54 = vld [vmem:[%s2295_s1 + $0x160] sm:$0xff]   ;;  %v1861_v56 = vld [vmem:[%s2295_s1 + $0x158] sm:$0xff]   ;;  %v1862_v57 = vld [vmem:[%s2295_s1 + $0x110] sm:$0xff]  }
  0x1b   : > { %1656 = vmatprep.subr.bf16.mxu1 %v1900_v1  ;;  %v1863_v58 = vld [vmem:[%s2295_s1 + $0x150] sm:$0xff]   ;;  %v1864_v59 = vld [vmem:[%s2295_s1 + $0x108] sm:$0xff]   ;;  %v1866_v62 = vld [vmem:[%s2295_s1 + $0x100] sm:$0xff]   ;;  %v709_v2 = vshrl.u32 %v707_v61, 16 }
  0x1c   : > { %v1865_v60 = vld [vmem:[%s2295_s1 + $0x148] sm:$0xff]   ;;  %v1867_v63 = vld [vmem:[%s2295_s1 + $0x140] sm:$0xff]   ;;  %v1868_v3 = vld [vmem:[%s2295_s1 + $0x1b8] sm:$0xff]  }
  0x1d   : > { %1637 = vmatpush3.bf16.msra.mxu0 %v1828_v10  ;;  %v1461_v0 = vld.sshfl [vmem:[%s2002_s24 + $0x2] sm:$0x2 pattern:$0x76325410]  ;;  %v1869_v5 = vld [vmem:[%s2295_s1 + $0x1f8] sm:$0xff]   ;;  %v1870_v6 = vld [vmem:[%s2295_s1 + $0x1b0] sm:$0xff]  }
  0x1e   : > { %1657 = vmatpush3.bf16.msra.mxu1 %v1829_v11  ;;  %1638 = vmatprep.subr.bf16.mxu0 %v1900_v1  ;;  %v827_v4 = vrot.slane %v1461_v0, 1  ;;  %v1871_v7 = vld [vmem:[%s2295_s1 + $0x1f0] sm:$0xff]   ;;  %v1872_v8 = vld [vmem:[%s2295_s1 + $0x1a8] sm:$0xff]   ;;  %v1874_v10 = vld [vmem:[%s2295_s1 + $0x1a0] sm:$0xff]  }
  0x1f   : > { %1658 = vmatprep.subr.bf16.mxu1 %v1900_v1  ;;  %v1873_v9 = vld [vmem:[%s2295_s1 + $0x1e8] sm:$0xff]   ;;  %v1875_v11 = vld [vmem:[%s2295_s1 + $0x1e0] sm:$0xff]   ;;  %v1876_v12 = vld [vmem:[%s2295_s1 + $0x198] sm:$0xff]  }
  0x20   : > { %v1877_v13 = vld [vmem:[%s2295_s1 + $0x1d8] sm:$0xff]   ;;  %v1878_v14 = vld [vmem:[%s2295_s1 + $0x190] sm:$0xff]   ;;  %v1881_v17 = vld [vmem:[%s2295_s1 + $0x1c8] sm:$0xff]  }
  0x21   : > { %1639 = vmatpush3.bf16.msra.mxu0 %v1830_v15  ;;  %v1879_v15 = vld [vmem:[%s2295_s1 + $0x1d0] sm:$0xff]   ;;  %v1884_v22 = vld [vmem:[%s2295_s1 + $0x238] sm:$0xff]   ;;  %v1886_v19 = vld [vmem:[%s2295_s1 + $0x228] sm:$0xff]  }
  0x22   : > { %1659 = vmatpush3.bf16.msra.mxu1 %v1831_v16  ;;  %1640 = vmatprep.subr.bf16.mxu0 %v1900_v1  ;;  %v1880_v16 = vld [vmem:[%s2295_s1 + $0x188] sm:$0xff]  }
  0x23   : > { %1660 = vmatprep.subr.bf16.mxu1 %v1900_v1 }
  0x25   : > { %1641 = vmatpush3.bf16.msra.mxu0 %v1832_v18  ;;  %v1882_v18 = vld [vmem:[%s2295_s1 + $0x180] sm:$0xff]  }
  0x26   : > { %1661 = vmatpush3.bf16.msra.mxu1 %v1833_v21  ;;  %1642 = vmatprep.subr.bf16.mxu0 %v1900_v1  ;;  %v1052_v21 = vshrl.u32 %v1050_v50, 16 }
  0x27   : > { %1662 = vmatprep.subr.bf16.mxu1 %v1900_v1 }
  0x29   : > { %1643 = vmatpush3.bf16.msra.mxu0 %v1834_v23  ;;  %v1885_v23 = vld [vmem:[%s2295_s1 + $0x230] sm:$0xff]  }
  0x2a   : > { %1663 = vmatpush3.bf16.msra.mxu1 %v1835_v24  ;;  %1668 = vmatprep.subr.bf16.mxu0 %v1900_v1  ;;  %v1887_v24 = vld [vmem:[%s2295_s1 + $0x220] sm:$0xff]  }
  0x2b   : > { %1688 = vmatprep.subr.bf16.mxu1 %v1900_v1 }
  0x2c   : > { %1645 = vmatmul.mubr.bf16.vlgmr.msra.gmra.mxu0 %v279_v25  ;;  %v1888_v25 = vld [vmem:[%s2295_s1 + $0x218] sm:$0xff]  }
  0x2d   : > { %1665 = vmatmul.mubr.bf16.vlgmr.msra.gmra.mxu1 %v236_v20  ;;  %1669 = vmatpush3.bf16.msra.mxu0 %v1836_v26  ;;  %v1883_v20 = vld [vmem:[%s2295_s1 + $0x1c0] sm:$0xff]   ;;  %v1889_v26 = vld [vmem:[%s2295_s1 + $0x210] sm:$0xff]  }
  0x2e   : > { %1689 = vmatpush3.bf16.msra.mxu1 %v1837_v27  ;;  %1670 = vmatprep.subr.bf16.mxu0 %v1900_v1  ;;  %v1890_v27 = vld [vmem:[%s2295_s1 + $0x208] sm:$0xff]  }
  0x2f   : > { %1690 = vmatprep.subr.bf16.mxu1 %v1900_v1  ;;  %1684 = vmatprep.mubr.msk.bf16.mxu0 %vm1901_vm0, %v1900_v1 }
  0x30   : > { %1704 = vmatprep.mubr.msk.bf16.mxu1 %vm1901_vm0, %v1900_v1 }
  0x31   : > { %1671 = vmatpush3.bf16.msra.mxu0 %v1838_v28  ;;  %v1891_v28 = vld [vmem:[%s2295_s1 + $0x200] sm:$0xff]  }
  0x32   : > { %1691 = vmatpush3.bf16.msra.mxu1 %v1839_v29  ;;  %1672 = vmatprep.subr.bf16.mxu0 %v1900_v1  ;;  %v1536_v29 = vld.sshfl [vmem:[%s2002_s24 + $0x4] sm:$0x2 pattern:$0x76325410] }
  0x33   : > { %1692 = vmatprep.subr.bf16.mxu1 %v1900_v1 }
  0x35   : > { %1673 = vmatpush3.bf16.msra.mxu0 %v1840_v30  ;;  %v1170_v30 = vrot.slane %v1536_v29, 1 }
  0x36   : > { %1693 = vmatpush3.bf16.msra.mxu1 %v1841_v31  ;;  %1674 = vmatprep.subr.bf16.mxu0 %v1900_v1 }
  0x37   : > { %1694 = vmatprep.subr.bf16.mxu1 %v1900_v1 }
  0x39   : > { %1675 = vmatpush3.bf16.msra.mxu0 %v1842_v32 }
  0x3a   : > { %1695 = vmatpush3.bf16.msra.mxu1 %v1843_v33  ;;  %1676 = vmatprep.subr.bf16.mxu0 %v1900_v1 }
  0x3b   : > { %1696 = vmatprep.subr.bf16.mxu1 %v1900_v1 }
  0x3d   : > { %1677 = vmatpush3.bf16.msra.mxu0 %v1844_v34 }
  0x3e   : > { %1697 = vmatpush3.bf16.msra.mxu1 %v1845_v35  ;;  %1678 = vmatprep.subr.bf16.mxu0 %v1900_v1 }
  0x3f   : > { %1698 = vmatprep.subr.bf16.mxu1 %v1900_v1 }
  0x41   : > { %1679 = vmatpush3.bf16.msra.mxu0 %v1846_v36 }
  0x42   : > { %1699 = vmatpush3.bf16.msra.mxu1 %v1847_v37  ;;  %1680 = vmatprep.subr.bf16.mxu0 %v1900_v1 }
  0x43   : > { %1700 = vmatprep.subr.bf16.mxu1 %v1900_v1 }
  0x45   : > { %1681 = vmatpush3.bf16.msra.mxu0 %v1848_v38 }
  0x46   : > { %1701 = vmatpush3.bf16.msra.mxu1 %v1849_v39  ;;  %1682 = vmatprep.subr.bf16.mxu0 %v1900_v1 }
  0x47   : > { %1702 = vmatprep.subr.bf16.mxu1 %v1900_v1 }
  0x49   : > { %1683 = vmatpush3.bf16.msra.mxu0 %v1850_v41 }
  0x4a   : > { %1703 = vmatpush3.bf16.msra.mxu1 %v1851_v42  ;;  %1708 = vmatprep.subr.bf16.mxu0 %v1900_v1 }
  0x4b   : > { %1728 = vmatprep.subr.bf16.mxu1 %v1900_v1 }
  0x4c   : > { %1685 = vmatmul.mubr.bf16.vlgmr.msra.gmra.mxu0 %v484_v43 }
  0x4d   : > { %1709 = vmatpush3.bf16.msra.mxu0 %v1852_v44  ;;  %1705 = vmatmul.mubr.bf16.vlgmr.msra.gmra.mxu1 %v1395_v45 }
  0x4e   : > { %1729 = vmatpush3.bf16.msra.mxu1 %v1853_v46  ;;  %1710 = vmatprep.subr.bf16.mxu0 %v1900_v1 }
  0x4f   : > { %1730 = vmatprep.subr.bf16.mxu1 %v1900_v1  ;;  %1724 = vmatprep.mubr.msk.bf16.mxu0 %vm1901_vm0, %v1900_v1 }
  0x50   : > { %1744 = vmatprep.mubr.msk.bf16.mxu1 %vm1901_vm0, %v1900_v1 }
  0x51   : > { %1711 = vmatpush3.bf16.msra.mxu0 %v1854_v47 }
  0x52   : > { %1731 = vmatpush3.bf16.msra.mxu1 %v1855_v49  ;;  %1712 = vmatprep.subr.bf16.mxu0 %v1900_v1 }
  0x53   : > { %1732 = vmatprep.subr.bf16.mxu1 %v1900_v1 }
  0x55   : > { %1713 = vmatpush3.bf16.msra.mxu0 %v1856_v51 }
  0x56   : > { %1733 = vmatpush3.bf16.msra.mxu1 %v1857_v52  ;;  %1714 = vmatprep.subr.bf16.mxu0 %v1900_v1 }
  0x57   : > { %1734 = vmatprep.subr.bf16.mxu1 %v1900_v1 }
  0x59   : > { %1715 = vmatpush3.bf16.msra.mxu0 %v1858_v53 }
  0x5a   : > { %1735 = vmatpush3.bf16.msra.mxu1 %v1859_v54  ;;  %1716 = vmatprep.subr.bf16.mxu0 %v1900_v1 }
  0x5b   : > { %1736 = vmatprep.subr.bf16.mxu1 %v1900_v1 }
  0x5d   : > { %1717 = vmatpush3.bf16.msra.mxu0 %v1860_v55 }
  0x5e   : > { %1737 = vmatpush3.bf16.msra.mxu1 %v1861_v56  ;;  %1718 = vmatprep.subr.bf16.mxu0 %v1900_v1 }
  0x5f   : > { %1738 = vmatprep.subr.bf16.mxu1 %v1900_v1 }
  0x61   : > { %1719 = vmatpush3.bf16.msra.mxu0 %v1862_v57 }
  0x62   : > { %1739 = vmatpush3.bf16.msra.mxu1 %v1863_v58  ;;  %1720 = vmatprep.subr.bf16.mxu0 %v1900_v1 }
  0x63   : > { %1740 = vmatprep.subr.bf16.mxu1 %v1900_v1 }
  0x65   : > { %1721 = vmatpush3.bf16.msra.mxu0 %v1864_v59 }
  0x66   : > { %1741 = vmatpush3.bf16.msra.mxu1 %v1865_v60  ;;  %1722 = vmatprep.subr.bf16.mxu0 %v1900_v1 }
  0x67   : > { %1742 = vmatprep.subr.bf16.mxu1 %v1900_v1 }
  0x69   : > { %1723 = vmatpush3.bf16.msra.mxu0 %v1866_v62 }
  0x6a   : > { %1743 = vmatpush3.bf16.msra.mxu1 %v1867_v63  ;;  %1748 = vmatprep.subr.bf16.mxu0 %v1900_v1 }
  0x6b   : > { %1768 = vmatprep.subr.bf16.mxu1 %v1900_v1 }
  0x6c   : > { %1725 = vmatmul.mubr.bf16.vlgmr.msra.gmra.mxu0 %v709_v2 }
  0x6d   : > { %1749 = vmatpush3.bf16.msra.mxu0 %v1868_v3  ;;  %1745 = vmatmul.mubr.bf16.vlgmr.msra.gmra.mxu1 %v827_v4 }
  0x6e   : > { %1769 = vmatpush3.bf16.msra.mxu1 %v1869_v5  ;;  %1750 = vmatprep.subr.bf16.mxu0 %v1900_v1 }
  0x6f   : > { %1770 = vmatprep.subr.bf16.mxu1 %v1900_v1  ;;  %1764 = vmatprep.mubr.msk.bf16.mxu0 %vm1901_vm0, %v1900_v1 }
  0x70   : > { %1784 = vmatprep.mubr.msk.bf16.mxu1 %vm1901_vm0, %v1900_v1 }
  0x71   : > { %1751 = vmatpush3.bf16.msra.mxu0 %v1870_v6 }
  0x72   : > { %1771 = vmatpush3.bf16.msra.mxu1 %v1871_v7  ;;  %1752 = vmatprep.subr.bf16.mxu0 %v1900_v1  ;;  %v1261_v7 = vld [vmem:[%s2296_s2] sm:$0x1] }
  0x73   : > { %1772 = vmatprep.subr.bf16.mxu1 %v1900_v1 }
  0x75   : > { %1753 = vmatpush3.bf16.msra.mxu0 %v1872_v8 }
  0x76   : > { %1773 = vmatpush3.bf16.msra.mxu1 %v1873_v9  ;;  %1754 = vmatprep.subr.bf16.mxu0 %v1900_v1  ;;  %v1263_v9 = vld [vmem:[%s2297_s3] sm:$0x1] }
  0x77   : > { %1774 = vmatprep.subr.bf16.mxu1 %v1900_v1 }
  0x79   : > { %1755 = vmatpush3.bf16.msra.mxu0 %v1874_v10  ;;  %v1266_v10 = vld [vmem:[%s231_s11] sm:$0x1] }
  0x7a   : > { %1775 = vmatpush3.bf16.msra.mxu1 %v1875_v11  ;;  %1756 = vmatprep.subr.bf16.mxu0 %v1900_v1 }
  0x7b   : > { %1776 = vmatprep.subr.bf16.mxu1 %v1900_v1 }
  0x7d   : > { %1757 = vmatpush3.bf16.msra.mxu0 %v1876_v12 }
  0x7e   : > { %1777 = vmatpush3.bf16.msra.mxu1 %v1877_v13  ;;  %1758 = vmatprep.subr.bf16.mxu0 %v1900_v1 }
  0x7f   : > { %1778 = vmatprep.subr.bf16.mxu1 %v1900_v1 }
  0x81   : > { %1759 = vmatpush3.bf16.msra.mxu0 %v1878_v14 }
  0x82   : > { %1779 = vmatpush3.bf16.msra.mxu1 %v1879_v15  ;;  %1760 = vmatprep.subr.bf16.mxu0 %v1900_v1  ;;  %v1267_v15 = vunpack.c.l.bf16 %v1266_v10 }
  0x83   : > { %1780 = vmatprep.subr.bf16.mxu1 %v1900_v1 }
  0x85   : > { %1761 = vmatpush3.bf16.msra.mxu0 %v1880_v16 }
  0x86   : > { %1781 = vmatpush3.bf16.msra.mxu1 %v1881_v17  ;;  %1762 = vmatprep.subr.bf16.mxu0 %v1900_v1 }
  0x87   : > { %1782 = vmatprep.subr.bf16.mxu1 %v1900_v1 }
  0x89   : > { %1763 = vmatpush3.bf16.msra.mxu0 %v1882_v18 }
  0x8a   : > { %1783 = vmatpush3.bf16.msra.mxu1 %v1883_v20  ;;  %1788 = vmatprep.subr.bf16.mxu0 %v1900_v1  ;;  %v1273_v20 = vld [vmem:[%s234_s20] sm:$0x1] }
  0x8c   : > { %1765 = vmatmul.mubr.bf16.vlgmr.msra.gmra.mxu0 %v2107_v48 }
  0x8d   : > { %1789 = vmatpush3.bf16.msra.mxu0 %v1884_v22  ;;  %1785 = vmatmul.mubr.bf16.vlgmr.msra.gmra.mxu1 %v1052_v21 }
  0x8e   : > { %1790 = vmatprep.subr.bf16.mxu0 %v1900_v1  ;;  %1804 = vmatprep.mubr.msk.bf16.mxu0 %vm1901_vm0, %v1900_v1 }
  0x91   : > { %1791 = vmatpush3.bf16.msra.mxu0 %v1885_v23 }
  0x92   : > { %1792 = vmatprep.subr.bf16.mxu0 %v1900_v1 }
  0x95   : > { %1793 = vmatpush3.bf16.msra.mxu0 %v1886_v19 }
  0x96   : > { %1794 = vmatprep.subr.bf16.mxu0 %v1900_v1 }
  0x99   : > { %1795 = vmatpush3.bf16.msra.mxu0 %v1887_v24 }
  0x9a   : > { %1796 = vmatprep.subr.bf16.mxu0 %v1900_v1 }
  0x9d   : > { %1797 = vmatpush3.bf16.msra.mxu0 %v1888_v25 }
  0x9e   : > { %1798 = vmatprep.subr.bf16.mxu0 %v1900_v1 }
  0xa1   : > { %1799 = vmatpush3.bf16.msra.mxu0 %v1889_v26 }
  0xa2   : > { %1800 = vmatprep.subr.bf16.mxu0 %v1900_v1 }
  0xa5   : > { %1801 = vmatpush3.bf16.msra.mxu0 %v1890_v27 }
  0xa6   : > { %1802 = vmatprep.subr.bf16.mxu0 %v1900_v1 }
  0xa9   : > { %1803 = vmatpush3.bf16.msra.mxu0 %v1891_v28 }
  0xac   : > { %1805 = vmatmul.mubr.bf16.vlgmr.msra.gmra.mxu0 %v1170_v30 }
  0xec   : > { %v364_v31 = vpop.f32.mrf.mxu0 }
  0xed   : > { %v452_v32 = vpop.f32.mrf.mxu1 }
  0xee   : > { %v453_v33 = vadd.f32 %v452_v32, %v364_v31  ;;  %v1646_v34 = vpop.f32.mrf.mxu0 }
  0xef   : > { %v1666_v35 = vpop.f32.mrf.mxu1 }
  0xf0   : > { %v367_v36 = vpop.f32.mrf.mxu0 }
  0xf1   : > { %v455_v37 = vpop.f32.mrf.mxu1 }
  0xf2   : > { %v1647_v38 = vpop.f32.mrf.mxu0 }
  0xf3   : > { %v1667_v39 = vpop.f32.mrf.mxu1 }
 0x10c   : > { %v568_v40 = vpop.f32.mrf.mxu0 }
 0x10d   : > { %v574_v41 = vadd.f32 %v568_v40, %v453_v33  ;;  %v676_v42 = vpop.f32.mrf.mxu1 }
 0x10e   : > { %v1686_v43 = vpop.f32.mrf.mxu0 }
 0x10f   : > { %v682_v44 = vadd.f32 %v676_v42, %v574_v41  ;;  %v1706_v45 = vpop.f32.mrf.mxu1 }
 0x110   : > { %v571_v46 = vpop.f32.mrf.mxu0 }
 0x111   : > { %v679_v1 = vpop.f32.mrf.mxu1 }
 0x112   : > { %v1687_v47 = vpop.f32.mrf.mxu0 }
 0x113   : > { %v1707_v48 = vpop.f32.mrf.mxu1 }
 0x12c   : > { %v794_v49 = vpop.f32.mrf.mxu0 }
 0x12d   : > { %v911_v50 = vpop.f32.mrf.mxu1  ;;  %v800_v2 = vadd.f32 %v794_v49, %v682_v44 }
 0x12e   : > { %v1726_v51 = vpop.f32.mrf.mxu0 }
 0x12f   : > { %v1746_v52 = vpop.f32.mrf.mxu1  ;;  %v917_v3 = vadd.f32 %v911_v50, %v800_v2 }
 0x130   : > { %v797_v53 = vpop.f32.mrf.mxu0 }
 0x131   : > { %v914_v54 = vpop.f32.mrf.mxu1 }
 0x132   : > { %v1727_v55 = vpop.f32.mrf.mxu0 }
 0x133   : > { %v1747_v56 = vpop.f32.mrf.mxu1 }
 0x14c   : > { %v1019_v57 = vpop.f32.mrf.mxu0 }
 0x14d   : > { %v1137_v58 = vpop.f32.mrf.mxu1  ;;  %v1025_v4 = vadd.f32 %v1019_v57, %v917_v3 }
 0x14e   : > { %v1766_v59 = vpop.f32.mrf.mxu0 }
 0x14f   : > { %v1786_v60 = vpop.f32.mrf.mxu1  ;;  %v1143_v5 = vadd.f32 %v1137_v58, %v1025_v4 }
 0x150   : > { %v1022_v61 = vpop.f32.mrf.mxu0 }
 0x151   : > { %v1140_v62 = vpop.f32.mrf.mxu1 }
 0x152   : > { %v1767_v63 = vpop.f32.mrf.mxu0 }
 0x153   : > { %v1787_v0 = vpop.f32.mrf.mxu1 }
 0x16c   : > { %v1254_v6 = vpop.f32.mrf.mxu0 }
 0x16d   : > { %v1260_v8 = vadd.f32 %v1254_v6, %v1143_v5 }
 0x16e   : > { %v1806_v11 = vpop.f32.mrf.mxu0 }
 0x16f   : > { %v1262_v12 = vmul.f32 %v1261_v7, %v1260_v8 }
 0x170   : > { %v1257_v13 = vpop.f32.mrf.mxu0 }
 0x171   : > { %v1264_v14 = vadd.f32 %v1263_v9, %v1262_v12 }
 0x172   : > { %v1807_v16 = vpop.f32.mrf.mxu0 }
 0x173   : > { %v1265_v17 = vmax.f32 %v1264_v14, 0.0 }
 0x175   : > { %v1268_v18 = vadd.f32 %v1267_v15, %v1265_v17 }
 0x177   : > { %v1269_v21 = vpack.c.bf16 %v1268_v18, %v1268_v18 }
 0x179   : > { %v1274_v22 = vsel %vm1272_vm3, %v1269_v21, %v1273_v20 }
 0x17a   : > { %1275 = vst [vmem:[%s234_s20] sm:$0x1] %v1274_v22 }
 0x17b PF: > { %s15_s18 = sadd.s32 1, %s1898_s18  }
 0x17c   : > { %p12_p4 = scmp.ge.s32.totalorder %s15_s18, 4  }
 0x17e   :  { %14 = sbr.rel (!%p12_p4) target bundleno = 1 (0x1), region = 83 }

</bundles_post_ra>
